<compile_context>
chip_gen: v7x
topology: tpu7x:2x2x1
jax: 0.10.0
libtpu: 0.0.40
codegen_flags: <defaults>
</compile_context>

<pallas_src>
import functools

import jax
import jax.numpy as jnp
from jax.experimental import pallas as pl
from jax.experimental.pallas import tpu as pltpu

NUM_CLASSES = 10
NUM_ROUTING_ITERATIONS = 3
_VMEM_LIMIT = 32 * 1024 * 1024
_EPS = 1e-9  # guards sqrt(0) in squash (same hazard exists in the torch ref)


def _round_up(x, m):
    return (x + m - 1) // m * m


# ----------------------------------------------------------------------------
# Pallas kernel 1: tiled matmul with fused bias + activation (conv-as-matmul).
# Output block is resident across the K axis and used directly as the f32
# accumulator; bias + activation applied in-place on the last K step.
# ----------------------------------------------------------------------------
def _mm_kernel(a_ref, b_ref, bias_ref, o_ref, *, activation):
    k = pl.program_id(1)

    @pl.when(k == 0)
    def _():
        o_ref[...] = jnp.zeros_like(o_ref)

    o_ref[...] += jnp.dot(a_ref[...], b_ref[...],
                          preferred_element_type=jnp.float32)

    @pl.when(k == pl.num_programs(1) - 1)
    def _():
        r = o_ref[...] + bias_ref[...]
        if activation == "relu":
            r = jnp.maximum(r, 0.0)
        elif activation == "sigmoid":
            r = jax.nn.sigmoid(r)
        o_ref[...] = r


def matmul_bias_act(a, w, bias, activation=None, tm_max=256, tk_max=2304):
    """act(a @ w + bias) in f32 with bf16 MXU operands.

    a: (M, K), w: (K, N), bias: (N,) -> (M, N) float32.
    """
    M, K = a.shape
    N = w.shape[1]
    Np = _round_up(N, 128)

    # M tiling: pad to a multiple of 16 (bf16 sublane) and take the largest
    # 16-multiple divisor of Mp as the tile -> no padding beyond 16.
    Mp = _round_up(M, 16)
    tm = 16
    for cand in range(16, min(tm_max, Mp) + 1, 16):
        if Mp % cand == 0:
            tm = cand
    nm = Mp // tm

    # K tiling: no padding when K fits in one block; otherwise prefer a tile
    # that divides K exactly (e.g. 2304 for K = 20736 = 9 * 2304).
    if K <= tk_max:
        tk, Kp = K, K
    else:
        tk = 0
        for cand in range(128, tk_max + 1, 128):
            if K % cand == 0:
                tk = cand
        if tk == 0:
            tk = tk_max
        Kp = _round_up(K, tk)
    nk = Kp // tk

    a_p = a.astype(jnp.bfloat16)
    if (Mp, Kp) != (M, K):
        a_p = jnp.pad(a_p, ((0, Mp - M), (0, Kp - K)))
    w_p = w.astype(jnp.bfloat16)
    if (Kp, Np) != (K, N):
        w_p = jnp.pad(w_p, ((0, Kp - K), (0, Np - N)))
    b_p = bias.astype(jnp.float32).reshape(1, N)
    if Np != N:
        b_p = jnp.pad(b_p, ((0, 0), (0, Np - N)))

    kernel = functools.partial(_mm_kernel, activation=activation)
    out = pl.pallas_call(
        kernel,
        out_shape=jax.ShapeDtypeStruct((Mp, Np), jnp.float32),
        grid_spec=pltpu.PrefetchScalarGridSpec(
            num_scalar_prefetch=0,
            grid=(nm, nk),
            in_specs=[
                pl.BlockSpec((tm, tk), lambda m, k: (m, k)),
                pl.BlockSpec((tk, Np), lambda m, k: (k, 0)),
                pl.BlockSpec((1, Np), lambda m, k: (0, 0)),
            ],
            out_specs=pl.BlockSpec((tm, Np), lambda m, k: (m, 0)),
        ),
        compiler_params=pltpu.CompilerParams(
            dimension_semantics=("parallel", "arbitrary"),
            vmem_limit_bytes=_VMEM_LIMIT),
    )(a_p, w_p, b_p)
    return out[:M, :N]


# ----------------------------------------------------------------------------
# Pallas kernel 2: primary-capsule squash (done ONCE, hoisted out of routing).
# ----------------------------------------------------------------------------
def _primary_squash_kernel(u_ref, o_ref):
    u = u_ref[...]                                        # (B, 8, 1152)
    sq = jnp.sum(u * u, axis=1, keepdims=True)            # (B, 1, 1152)
    scale = (sq / (1.0 + sq)) * jax.lax.rsqrt(sq + _EPS)
    o_ref[...] = u * scale


def primary_squash(u):
    """Squash (B, 8, 1152) primary-capsule outputs along the 8-dim."""
    return pl.pallas_call(
        _primary_squash_kernel,
        out_shape=jax.ShapeDtypeStruct(u.shape, jnp.float32),
        grid_spec=pltpu.PrefetchScalarGridSpec(
            num_scalar_prefetch=0,
            grid=(1,),
            in_specs=[pl.BlockSpec(u.shape, lambda i: (0, 0, 0))],
            out_specs=pl.BlockSpec(u.shape, lambda i: (0, 0, 0)),
        ),
        compiler_params=pltpu.CompilerParams(
            dimension_semantics=("arbitrary",),
            vmem_limit_bytes=_VMEM_LIMIT),
    )(u.astype(jnp.float32))


# ----------------------------------------------------------------------------
# Pallas kernel 3: digit-capsule dynamic routing, gridded over classes,
# batch-vectorized in-kernel.  Priors built as 8 VPU FMAs (no big temp).
# ----------------------------------------------------------------------------
def _routing_kernel(u_ref, w_ref, o_ref, *, num_iters):
    # u_ref: (B, 8, 1152)  squashed primary capsules
    # w_ref: (1, 8, 16, 1152)  route weights for this class: W[i, o, n]
    # o_ref: (1, B, 16)  digit-capsule vectors for this class
    u = u_ref[...]                                        # (B, 8, 1152)
    B = u.shape[0]
    n_nodes = u.shape[2]

    # priors[b, o, n] = sum_i u[b, i, n] * W[i, o, n]  -- 8 elementwise FMAs
    priors = None
    for i in range(8):
        term = u[:, i, None, :] * w_ref[0, i][None, :, :]   # (B, 16, 1152)
        priors = term if priors is None else priors + term

    logits = jnp.zeros((B, 1, n_nodes), jnp.float32)
    v = None
    for it in range(num_iters):
        # softmax over route nodes (leftthomas softmax(dim=2))
        m = jnp.max(logits, axis=-1, keepdims=True)
        e = jnp.exp(logits - m)
        probs = e / jnp.sum(e, axis=-1, keepdims=True)          # (B, 1, n)
        s = jnp.sum(probs * priors, axis=-1, keepdims=True)     # (B, 16, 1)
        ssq = jnp.sum(s * s, axis=1, keepdims=True)             # (B, 1, 1)
        v = s * (ssq / (1.0 + ssq)) * jax.lax.rsqrt(ssq + _EPS)  # (B, 16, 1)
        if it != num_iters - 1:
            delta = jnp.sum(priors * v, axis=1, keepdims=True)  # (B, 1, n)
            logits = logits + delta
    o_ref[...] = v[None, :, :, 0]                               # (1, B, 16)


def digit_capsules(u_sq, w_route_t, num_iters=NUM_ROUTING_ITERATIONS):
    """u_sq: (B, 8, 1152) squashed; w_route_t: (C, 8, 16, 1152) -> (C, B, 16)."""
    B = u_sq.shape[0]
    C = w_route_t.shape[0]
    kernel = functools.partial(_routing_kernel, num_iters=num_iters)
    return pl.pallas_call(
        kernel,
        out_shape=jax.ShapeDtypeStruct((C, B, 16), jnp.float32),
        grid_spec=pltpu.PrefetchScalarGridSpec(
            num_scalar_prefetch=0,
            grid=(C,),
            in_specs=[
                pl.BlockSpec((B, 8, 1152), lambda c: (0, 0, 0)),
                pl.BlockSpec((1, 8, 16, 1152), lambda c: (c, 0, 0, 0)),
            ],
            out_specs=pl.BlockSpec((1, B, 16), lambda c: (c, 0, 0)),
        ),
        compiler_params=pltpu.CompilerParams(
            dimension_semantics=("parallel",),
            vmem_limit_bytes=_VMEM_LIMIT),
    )(u_sq.astype(jnp.float32), w_route_t.astype(jnp.float32))


# ----------------------------------------------------------------------------
# Pallas kernel 4: fused decoder 160 -> 512 -> 1024 -> 784 (ReLU/ReLU/Sigmoid).
# All three weight matrices stay resident in VMEM (bf16, ~2.8 MB total).
# ----------------------------------------------------------------------------
def _decoder_kernel(x_ref, w1_ref, b1_ref, w2_ref, b2_ref, w3_ref, b3_ref,
                    o_ref):
    h = jnp.dot(x_ref[...], w1_ref[...],
                preferred_element_type=jnp.float32) + b1_ref[...]
    h = jnp.maximum(h, 0.0)
    h = jnp.dot(h.astype(jnp.bfloat16), w2_ref[...],
                preferred_element_type=jnp.float32) + b2_ref[...]
    h = jnp.maximum(h, 0.0)
    r = jnp.dot(h.astype(jnp.bfloat16), w3_ref[...],
                preferred_element_type=jnp.float32) + b3_ref[...]
    o_ref[...] = jax.nn.sigmoid(r)


def decoder_forward(x, w1, b1, w2, b2, w3, b3):
    """x: (B, 160); w_i are (in, out) -> (B, 784) f32."""
    B = x.shape[0]
    Bp = _round_up(B, 8)
    N3 = w3.shape[1]
    N3p = _round_up(N3, 128)          # 784 -> 896 for lane-dense stores

    x_p = x.astype(jnp.bfloat16)
    if Bp != B:
        x_p = jnp.pad(x_p, ((0, Bp - B), (0, 0)))
    w1b = w1.astype(jnp.bfloat16)
    w2b = w2.astype(jnp.bfloat16)
    w3b = w3.astype(jnp.bfloat16)
    b1r = b1.astype(jnp.float32).reshape(1, -1)
    b2r = b2.astype(jnp.float32).reshape(1, -1)
    b3r = b3.astype(jnp.float32).reshape(1, -1)
    if N3p != N3:
        w3b = jnp.pad(w3b, ((0, 0), (0, N3p - N3)))
        b3r = jnp.pad(b3r, ((0, 0), (0, N3p - N3)))

    operands = (x_p, w1b, b1r, w2b, b2r, w3b, b3r)
    out = pl.pallas_call(
        _decoder_kernel,
        out_shape=jax.ShapeDtypeStruct((Bp, N3p), jnp.float32),
        grid_spec=pltpu.PrefetchScalarGridSpec(
            num_scalar_prefetch=0,
            grid=(1,),
            in_specs=[pl.BlockSpec(op.shape, lambda i: (0, 0))
                      for op in operands],
            out_specs=pl.BlockSpec((Bp, N3p), lambda i: (0, 0)),
        ),
        compiler_params=pltpu.CompilerParams(
            dimension_semantics=("arbitrary",),
            vmem_limit_bytes=_VMEM_LIMIT),
    )(*operands)
    return out[:B, :N3]


# ----------------------------------------------------------------------------
# Conv2d via im2col (JAX glue) + Pallas matmul
# ----------------------------------------------------------------------------
def _im2col(x, k, stride):
    # x: (B, C, H, W) -> (B*OH*OW, C*k*k), patch flattened in (C, kh, kw) order
    B, C, H, W = x.shape
    OH = (H - k) // stride + 1
    OW = (W - k) // stride + 1
    ridx = (jnp.arange(OH) * stride)[:, None] + jnp.arange(k)[None, :]  # (OH,k)
    cidx = (jnp.arange(OW) * stride)[:, None] + jnp.arange(k)[None, :]  # (OW,k)
    t = x[:, :, ridx, :]                 # (B, C, OH, k, W)
    p = t[:, :, :, :, cidx]              # (B, C, OH, k, OW, k)
    p = p.transpose(0, 2, 4, 1, 3, 5)    # (B, OH, OW, C, k, k)
    return p.reshape(B * OH * OW, C * k * k), OH, OW


def conv2d(x, w, b, stride, activation=None):
    # x: (B, C, H, W) NCHW; w: (O, C, k, k); b: (O,) -> (B, O, OH, OW)
    B = x.shape[0]
    O, C, k, _ = w.shape
    patches, OH, OW = _im2col(x, k, stride)
    wmat = w.reshape(O, C * k * k).T
    out = matmul_bias_act(patches, wmat, b, activation=activation)
    return out.reshape(B, OH, OW, O).transpose(0, 3, 1, 2)


# ----------------------------------------------------------------------------
# Full CapsuleNet forward
# ----------------------------------------------------------------------------
def capsule_net_forward(params, x):
    # x: (B, 1, 28, 28) float32, NCHW
    B = x.shape[0]

    # conv1 + ReLU -> (B, 256, 20, 20)
    h = conv2d(x, params["w_conv1"], params["b_conv1"], stride=1,
               activation="relu")

    # primary capsules: 8 parallel convs 256->32, k=9, s=2 -> (B, 256, 6, 6)
    p = conv2d(h, params["w_prim"], params["b_prim"], stride=2)
    # -> (B, 8, 1152) with route node n = ch*36 + y*6 + x, capsule = chan // 32
    u = p.reshape(B, 8, 32 * 6 * 6)

    # squash along the 8-dim once (torch: squash(dim=-1) of (B, 1152, 8))
    u_sq = primary_squash(u)

    # digit capsules with dynamic routing -> (C, B, 16)
    v = digit_capsules(u_sq, params["w_route_t"])
    x_dig = jnp.transpose(v, (1, 0, 2))               # (B, C, 16)

    # class probabilities
    lengths = jnp.sqrt(jnp.sum(x_dig ** 2, axis=-1))  # (B, C)
    classes = jax.nn.softmax(lengths, axis=-1)

    # y = one-hot of argmax (inference branch, y is None)
    idx = jnp.argmax(classes, axis=1)
    y = jax.nn.one_hot(idx, NUM_CLASSES, dtype=jnp.float32)

    masked = (x_dig * y[:, :, None]).reshape(B, NUM_CLASSES * 16)  # (B, 160)

    # fused decoder: 160 -> 512 -> 1024 -> 784
    rec = decoder_forward(masked,
                          params["w_d1"].T, params["b_d1"],
                          params["w_d2"].T, params["b_d2"],
                          params["w_d3"].T, params["b_d3"])
    return classes, rec


def init_params(key):
    ks = jax.random.split(key, 12)

    def normal(k, shape, scale):
        return jax.random.normal(k, shape, jnp.float32) * scale

    p = {}
    # conv1: Conv2d(1, 256, k=9, s=1)
    p["w_conv1"] = normal(ks[0], (256, 1, 9, 9), 1.0 / (9 * 9) ** 0.5)
    p["b_conv1"] = normal(ks[1], (256,), 0.01)
    # primary capsules: 8 x Conv2d(256, 32, k=9, s=2), stacked along out-chan
    p["w_prim"] = normal(ks[2], (8 * 32, 256, 9, 9), 1.0 / (256 * 81) ** 0.5)
    p["b_prim"] = normal(ks[3], (8 * 32,), 0.01)
    # digit capsules route weights (torch.randn): (C, 1152, 8, 16) = [c, n, i, o]
    w_route = normal(ks[4], (NUM_CLASSES, 32 * 6 * 6, 8, 16), 1.0)
    p["w_route_t"] = jnp.transpose(w_route, (0, 2, 3, 1))  # (C, 8, 16, 1152)
    # decoder (PyTorch Linear weight layout: (out, in))
    p["w_d1"] = normal(ks[5], (512, 16 * NUM_CLASSES), 1.0 / 160 ** 0.5)
    p["b_d1"] = normal(ks[6], (512,), 0.01)
    p["w_d2"] = normal(ks[7], (1024, 512), 1.0 / 512 ** 0.5)
    p["b_d2"] = normal(ks[8], (1024,), 0.01)
    p["w_d3"] = normal(ks[9], (784, 1024), 1.0 / 1024 ** 0.5)
    p["b_d3"] = normal(ks[10], (784,), 0.01)
    return p


if __name__ == "__main__":
    key = jax.random.PRNGKey(0)
    k_param, k_x = jax.random.split(key)
    params = init_params(k_param)

    # Input shape is fixed by the architecture (32*6*6 route nodes, 784 recon):
    # MNIST-style (B, 1, 28, 28).  Use a small batch of 2.
    x = jax.random.uniform(k_x, (2, 1, 28, 28), jnp.float32)

    fwd = jax.jit(functools.partial(capsule_net_forward, params))
    classes, reconstructions = fwd(x)
    jax.block_until_ready((classes, reconstructions))

    assert classes.shape == (2, NUM_CLASSES)
    assert reconstructions.shape == (2, 784)
    assert bool(jnp.all(jnp.isfinite(classes)))
    assert bool(jnp.all(jnp.isfinite(reconstructions)))
    print("KERNEL_OK")
</pallas_src>

<mosaic_0001>
module attributes {stable_mosaic.version = 11 : i64} {
  func.func @_mm_kernel(%arg0: i32, %arg1: i32, %arg2: memref<160x81xbf16, #tpu.memory_space<vmem>>, %arg3: memref<81x256xbf16, #tpu.memory_space<vmem>>, %arg4: memref<1x256xf32, #tpu.memory_space<vmem>>, %arg5: memref<160x256xf32, #tpu.memory_space<vmem>>) attributes {dimension_semantics = [#tpu.dimension_semantics<parallel>, #tpu.dimension_semantics<arbitrary>], iteration_bounds = array<i64: 5, 1>, scalar_prefetch = 0 : i64, scratch_operands = 0 : i64, tpu.core_type = #tpu.core_type<tc>, window_params = [{transform_indices = @transform_0, window_bounds = array<i64: 160, 81>}, {transform_indices = @transform_1, window_bounds = array<i64: 81, 256>}, {pipeline_mode = #tpu.pipeline_mode<synchronous>, transform_indices = @transform_2, window_bounds = array<i64: 1, 256>}, {transform_indices = @transform_3, window_bounds = array<i64: 160, 256>}]} {
    %c0_i32 = arith.constant 0 : i32
    %0 = arith.cmpi eq, %arg1, %c0_i32 : i32
    %1 = arith.extui %0 : i1 to i32
    %c0_i32_0 = arith.constant 0 : i32
    %2 = arith.cmpi ne, %1, %c0_i32_0 : i32
    scf.if %2 {
      %cst_10 = arith.constant 0.000000e+00 : f32
      %12 = vector.broadcast %cst_10 : f32 to vector<160x256xf32>
      %c0_11 = arith.constant 0 : index
      %c0_12 = arith.constant 0 : index
      %13 = vector.load %arg5[%c0_11, %c0_12] : memref<160x256xf32, #tpu.memory_space<vmem>>, vector<160x256xf32>
      tpu.vector_store %arg5[%c0_11, %c0_12], %12 {strides = array<i32>} : memref<160x256xf32, #tpu.memory_space<vmem>>, vector<160x256xf32>,
    } else {
    }
    %c0 = arith.constant 0 : index
    %c0_1 = arith.constant 0 : index
    %3 = vector.load %arg5[%c0, %c0_1] : memref<160x256xf32, #tpu.memory_space<vmem>>, vector<160x256xf32>
    %c0_2 = arith.constant 0 : index
    %c0_3 = arith.constant 0 : index
    %4 = vector.load %arg2[%c0_2, %c0_3] : memref<160x81xbf16, #tpu.memory_space<vmem>>, vector<160x81xbf16>
    %c0_4 = arith.constant 0 : index
    %c0_5 = arith.constant 0 : index
    %5 = vector.load %arg3[%c0_4, %c0_5] : memref<81x256xbf16, #tpu.memory_space<vmem>>, vector<81x256xbf16>
    %cst = arith.constant dense<0.000000e+00> : vector<160x256xf32>
    %6 = tpu.matmul %4, %5, %cst {dimension_numbers = #tpu.dot_dimension_numbers<[1], [0], [0], [1], [0, 0, 1, 1], [], []>} : vector<160x81xbf16>, vector<81x256xbf16>, vector<160x256xf32> -> vector<160x256xf32>
    %7 = arith.addf %3, %6 : vector<160x256xf32>
    %c0_6 = arith.constant 0 : index
    %c0_7 = arith.constant 0 : index
    %8 = vector.load %arg5[%c0_6, %c0_7] : memref<160x256xf32, #tpu.memory_space<vmem>>, vector<160x256xf32>
    tpu.vector_store %arg5[%c0_6, %c0_7], %7 {strides = array<i32>} : memref<160x256xf32, #tpu.memory_space<vmem>>, vector<160x256xf32>,
    %c0_i32_8 = arith.constant 0 : i32
    %9 = arith.cmpi eq, %arg1, %c0_i32_8 : i32
    %10 = arith.extui %9 : i1 to i32
    %c0_i32_9 = arith.constant 0 : i32
    %11 = arith.cmpi ne, %10, %c0_i32_9 : i32
    scf.if %11 {
      %c0_10 = arith.constant 0 : index
      %c0_11 = arith.constant 0 : index
      %12 = vector.load %arg5[%c0_10, %c0_11] : memref<160x256xf32, #tpu.memory_space<vmem>>, vector<160x256xf32>
      %c0_12 = arith.constant 0 : index
      %c0_13 = arith.constant 0 : index
      %13 = vector.load %arg4[%c0_12, %c0_13] : memref<1x256xf32, #tpu.memory_space<vmem>>, vector<1x256xf32>
      %14 = vector.broadcast %13 : vector<1x256xf32> to vector<160x256xf32>
      %15 = arith.addf %12, %14 : vector<160x256xf32>
      %cst_14 = arith.constant 0.000000e+00 : f32
      %16 = vector.broadcast %cst_14 : f32 to vector<160x256xf32>
      %17 = arith.maximumf %15, %16 : vector<160x256xf32>
      %c0_15 = arith.constant 0 : index
      %c0_16 = arith.constant 0 : index
      %18 = vector.load %arg5[%c0_15, %c0_16] : memref<160x256xf32, #tpu.memory_space<vmem>>, vector<160x256xf32>
      tpu.vector_store %arg5[%c0_15, %c0_16], %17 {strides = array<i32>} : memref<160x256xf32, #tpu.memory_space<vmem>>, vector<160x256xf32>,
    } else {
    }
    return
  }
  func.func @transform_0(%arg0: i32, %arg1: i32) -> (i32, i32) {
    %c0_i32 = arith.constant 0 : i32
    return %arg0, %arg1 : i32, i32
  }
  func.func @transform_1(%arg0: i32, %arg1: i32) -> (i32, i32) {
    %c0_i32 = arith.constant 0 : i32
    %c0_i32_0 = arith.constant 0 : i32
    return %arg1, %c0_i32 : i32, i32
  }
  func.func @transform_2(%arg0: i32, %arg1: i32) -> (i32, i32) {
    %c0_i32 = arith.constant 0 : i32
    %c0_i32_0 = arith.constant 0 : i32
    %c0_i32_1 = arith.constant 0 : i32
    return %c0_i32, %c0_i32_0 : i32, i32
  }
  func.func @transform_3(%arg0: i32, %arg1: i32) -> (i32, i32) {
    %c0_i32 = arith.constant 0 : i32
    %c0_i32_0 = arith.constant 0 : i32
    return %arg0, %c0_i32 : i32, i32
  }
}

module attributes {stable_mosaic.version = 11 : i64} {
  func.func @_mm_kernel(%arg0: i32, %arg1: i32, %arg2: memref<80x2304xbf16, #tpu.memory_space<vmem>>, %arg3: memref<2304x256xbf16, #tpu.memory_space<vmem>>, %arg4: memref<1x256xf32, #tpu.memory_space<vmem>>, %arg5: memref<80x256xf32, #tpu.memory_space<vmem>>) attributes {dimension_semantics = [#tpu.dimension_semantics<parallel>, #tpu.dimension_semantics<arbitrary>], iteration_bounds = array<i64: 1, 9>, scalar_prefetch = 0 : i64, scratch_operands = 0 : i64, tpu.core_type = #tpu.core_type<tc>, window_params = [{transform_indices = @transform_0, window_bounds = array<i64: 80, 2304>}, {transform_indices = @transform_1, window_bounds = array<i64: 2304, 256>}, {pipeline_mode = #tpu.pipeline_mode<synchronous>, transform_indices = @transform_2, window_bounds = array<i64: 1, 256>}, {transform_indices = @transform_3, window_bounds = array<i64: 80, 256>}]} {
    %c0_i32 = arith.constant 0 : i32
    %0 = arith.cmpi eq, %arg1, %c0_i32 : i32
    %1 = arith.extui %0 : i1 to i32
    %c0_i32_0 = arith.constant 0 : i32
    %2 = arith.cmpi ne, %1, %c0_i32_0 : i32
    scf.if %2 {
      %cst_9 = arith.constant 0.000000e+00 : f32
      %12 = vector.broadcast %cst_9 : f32 to vector<80x256xf32>
      %c0_10 = arith.constant 0 : index
      %c0_11 = arith.constant 0 : index
      %13 = vector.load %arg5[%c0_10, %c0_11] : memref<80x256xf32, #tpu.memory_space<vmem>>, vector<80x256xf32>
      tpu.vector_store %arg5[%c0_10, %c0_11], %12 {strides = array<i32>} : memref<80x256xf32, #tpu.memory_space<vmem>>, vector<80x256xf32>,
    } else {
    }
    %c0 = arith.constant 0 : index
    %c0_1 = arith.constant 0 : index
    %3 = vector.load %arg5[%c0, %c0_1] : memref<80x256xf32, #tpu.memory_space<vmem>>, vector<80x256xf32>
    %c0_2 = arith.constant 0 : index
    %c0_3 = arith.constant 0 : index
    %4 = vector.load %arg2[%c0_2, %c0_3] : memref<80x2304xbf16, #tpu.memory_space<vmem>>, vector<80x2304xbf16>
    %c0_4 = arith.constant 0 : index
    %c0_5 = arith.constant 0 : index
    %5 = vector.load %arg3[%c0_4, %c0_5] : memref<2304x256xbf16, #tpu.memory_space<vmem>>, vector<2304x256xbf16>
    %cst = arith.constant dense<0.000000e+00> : vector<80x256xf32>
    %6 = tpu.matmul %4, %5, %cst {dimension_numbers = #tpu.dot_dimension_numbers<[1], [0], [0], [1], [0, 0, 1, 1], [], []>} : vector<80x2304xbf16>, vector<2304x256xbf16>, vector<80x256xf32> -> vector<80x256xf32>
    %7 = arith.addf %3, %6 : vector<80x256xf32>
    %c0_6 = arith.constant 0 : index
    %c0_7 = arith.constant 0 : index
    %8 = vector.load %arg5[%c0_6, %c0_7] : memref<80x256xf32, #tpu.memory_space<vmem>>, vector<80x256xf32>
    tpu.vector_store %arg5[%c0_6, %c0_7], %7 {strides = array<i32>} : memref<80x256xf32, #tpu.memory_space<vmem>>, vector<80x256xf32>,
    %c8_i32 = arith.constant 8 : i32
    %9 = arith.cmpi eq, %arg1, %c8_i32 : i32
    %10 = arith.extui %9 : i1 to i32
    %c0_i32_8 = arith.constant 0 : i32
    %11 = arith.cmpi ne, %10, %c0_i32_8 : i32
    scf.if %11 {
      %c0_9 = arith.constant 0 : index
      %c0_10 = arith.constant 0 : index
      %12 = vector.load %arg5[%c0_9, %c0_10] : memref<80x256xf32, #tpu.memory_space<vmem>>, vector<80x256xf32>
      %c0_11 = arith.constant 0 : index
      %c0_12 = arith.constant 0 : index
      %13 = vector.load %arg4[%c0_11, %c0_12] : memref<1x256xf32, #tpu.memory_space<vmem>>, vector<1x256xf32>
      %14 = vector.broadcast %13 : vector<1x256xf32> to vector<80x256xf32>
      %15 = arith.addf %12, %14 : vector<80x256xf32>
      %c0_13 = arith.constant 0 : index
      %c0_14 = arith.constant 0 : index
      %16 = vector.load %arg5[%c0_13, %c0_14] : memref<80x256xf32, #tpu.memory_space<vmem>>, vector<80x256xf32>
      tpu.vector_store %arg5[%c0_13, %c0_14], %15 {strides = array<i32>} : memref<80x256xf32, #tpu.memory_space<vmem>>, vector<80x256xf32>,
    } else {
    }
    return
  }
  func.func @transform_0(%arg0: i32, %arg1: i32) -> (i32, i32) {
    %c0_i32 = arith.constant 0 : i32
    return %arg0, %arg1 : i32, i32
  }
  func.func @transform_1(%arg0: i32, %arg1: i32) -> (i32, i32) {
    %c0_i32 = arith.constant 0 : i32
    %c0_i32_0 = arith.constant 0 : i32
    return %arg1, %c0_i32 : i32, i32
  }
  func.func @transform_2(%arg0: i32, %arg1: i32) -> (i32, i32) {
    %c0_i32 = arith.constant 0 : i32
    %c0_i32_0 = arith.constant 0 : i32
    %c0_i32_1 = arith.constant 0 : i32
    return %c0_i32, %c0_i32_0 : i32, i32
  }
  func.func @transform_3(%arg0: i32, %arg1: i32) -> (i32, i32) {
    %c0_i32 = arith.constant 0 : i32
    %c0_i32_0 = arith.constant 0 : i32
    return %arg0, %c0_i32 : i32, i32
  }
}

module attributes {stable_mosaic.version = 11 : i64} {
  func.func @_primary_squash_kernel(%arg0: i32, %arg1: memref<2x8x1152xf32, #tpu.memory_space<vmem>>, %arg2: memref<2x8x1152xf32, #tpu.memory_space<vmem>>) attributes {dimension_semantics = [#tpu.dimension_semantics<arbitrary>], iteration_bounds = array<i64: 1>, scalar_prefetch = 0 : i64, scratch_operands = 0 : i64, tpu.core_type = #tpu.core_type<tc>, window_params = [{pipeline_mode = #tpu.pipeline_mode<synchronous>, transform_indices = @transform_0, window_bounds = array<i64: 2, 8, 1152>}, {pipeline_mode = #tpu.pipeline_mode<synchronous>, transform_indices = @transform_1, window_bounds = array<i64: 2, 8, 1152>}]} {
    %c0 = arith.constant 0 : index
    %c0_0 = arith.constant 0 : index
    %c0_1 = arith.constant 0 : index
    %0 = vector.load %arg1[%c0, %c0_0, %c0_1] : memref<2x8x1152xf32, #tpu.memory_space<vmem>>, vector<2x8x1152xf32>
    %1 = arith.mulf %0, %0 : vector<2x8x1152xf32>
    %cst = arith.constant dense<0.000000e+00> : vector<2x1152xf32>
    %2 = vector.multi_reduction <add>, %1, %cst [1] : vector<2x8x1152xf32> to vector<2x1152xf32>
    %3 = vector.shape_cast %2 : vector<2x1152xf32> to vector<2x1x1152xf32>
    %cst_2 = arith.constant 1.000000e+00 : f32
    %4 = vector.broadcast %cst_2 : f32 to vector<2x1x1152xf32>
    %5 = arith.addf %4, %3 : vector<2x1x1152xf32>
    %6 = arith.divf %3, %5 : vector<2x1x1152xf32>
    %cst_3 = arith.constant 9.99999971E-10 : f32
    %7 = vector.broadcast %cst_3 : f32 to vector<2x1x1152xf32>
    %8 = arith.addf %3, %7 : vector<2x1x1152xf32>
    %9 = math.rsqrt %8 : vector<2x1x1152xf32>
    %10 = arith.mulf %6, %9 : vector<2x1x1152xf32>
    %11 = vector.broadcast %10 : vector<2x1x1152xf32> to vector<2x8x1152xf32>
    %12 = arith.mulf %0, %11 : vector<2x8x1152xf32>
    %c0_4 = arith.constant 0 : index
    %c0_5 = arith.constant 0 : index
    %c0_6 = arith.constant 0 : index
    %13 = vector.load %arg2[%c0_4, %c0_5, %c0_6] : memref<2x8x1152xf32, #tpu.memory_space<vmem>>, vector<2x8x1152xf32>
    tpu.vector_store %arg2[%c0_4, %c0_5, %c0_6], %12 {strides = array<i32>} : memref<2x8x1152xf32, #tpu.memory_space<vmem>>, vector<2x8x1152xf32>,
    return
  }
  func.func @transform_0(%arg0: i32) -> (i32, i32, i32) {
    %c0_i32 = arith.constant 0 : i32
    %c0_i32_0 = arith.constant 0 : i32
    %c0_i32_1 = arith.constant 0 : i32
    %c0_i32_2 = arith.constant 0 : i32
    return %c0_i32, %c0_i32_0, %c0_i32_1 : i32, i32, i32
  }
  func.func @transform_1(%arg0: i32) -> (i32, i32, i32) {
    %c0_i32 = arith.constant 0 : i32
    %c0_i32_0 = arith.constant 0 : i32
    %c0_i32_1 = arith.constant 0 : i32
    %c0_i32_2 = arith.constant 0 : i32
    return %c0_i32, %c0_i32_0, %c0_i32_1 : i32, i32, i32
  }
}

module attributes {stable_mosaic.version = 11 : i64} {
  func.func @_routing_kernel(%arg0: i32, %arg1: memref<2x8x1152xf32, #tpu.memory_space<vmem>>, %arg2: memref<1x8x16x1152xf32, #tpu.memory_space<vmem>>, %arg3: memref<1x2x16xf32, #tpu.memory_space<vmem>>) attributes {dimension_semantics = [#tpu.dimension_semantics<parallel>], iteration_bounds = array<i64: 10>, scalar_prefetch = 0 : i64, scratch_operands = 0 : i64, tpu.core_type = #tpu.core_type<tc>, window_params = [{pipeline_mode = #tpu.pipeline_mode<synchronous>, transform_indices = @transform_0, window_bounds = array<i64: 2, 8, 1152>}, {transform_indices = @transform_1, window_bounds = array<i64: 1, 8, 16, 1152>}, {transform_indices = @transform_2, window_bounds = array<i64: 1, 2, 16>}]} {
    %c0 = arith.constant 0 : index
    %c0_0 = arith.constant 0 : index
    %c0_1 = arith.constant 0 : index
    %0 = vector.load %arg1[%c0, %c0_0, %c0_1] : memref<2x8x1152xf32, #tpu.memory_space<vmem>>, vector<2x8x1152xf32>
    %1 = vector.extract_strided_slice %0 {offsets = [0, 0, 0], sizes = [2, 1, 1152], strides = [1, 1, 1]} : vector<2x8x1152xf32> to vector<2x1x1152xf32>
    %2 = vector.shape_cast %1 : vector<2x1x1152xf32> to vector<2x1152xf32>
    %3 = vector.shape_cast %2 : vector<2x1152xf32> to vector<2x1x1152xf32>
    %c0_2 = arith.constant 0 : index
    %c0_3 = arith.constant 0 : index
    %c0_4 = arith.constant 0 : index
    %c0_5 = arith.constant 0 : index
    %4 = vector.load %arg2[%c0_2, %c0_3, %c0_4, %c0_5] : memref<1x8x16x1152xf32, #tpu.memory_space<vmem>>, vector<1x1x16x1152xf32>
    %5 = vector.shape_cast %4 : vector<1x1x16x1152xf32> to vector<16x1152xf32>
    %6 = vector.shape_cast %5 : vector<16x1152xf32> to vector<1x16x1152xf32>
    %7 = vector.broadcast %3 : vector<2x1x1152xf32> to vector<2x16x1152xf32>
    %8 = vector.broadcast %6 : vector<1x16x1152xf32> to vector<2x16x1152xf32>
    %9 = arith.mulf %7, %8 : vector<2x16x1152xf32>
    %10 = vector.extract_strided_slice %0 {offsets = [0, 1, 0], sizes = [2, 1, 1152], strides = [1, 1, 1]} : vector<2x8x1152xf32> to vector<2x1x1152xf32>
    %11 = vector.shape_cast %10 : vector<2x1x1152xf32> to vector<2x1152xf32>
    %12 = vector.shape_cast %11 : vector<2x1152xf32> to vector<2x1x1152xf32>
    %c0_6 = arith.constant 0 : index
    %c1 = arith.constant 1 : index
    %c0_7 = arith.constant 0 : index
    %c0_8 = arith.constant 0 : index
    %13 = vector.load %arg2[%c0_6, %c1, %c0_7, %c0_8] : memref<1x8x16x1152xf32, #tpu.memory_space<vmem>>, vector<1x1x16x1152xf32>
    %14 = vector.shape_cast %13 : vector<1x1x16x1152xf32> to vector<16x1152xf32>
    %15 = vector.shape_cast %14 : vector<16x1152xf32> to vector<1x16x1152xf32>
    %16 = vector.broadcast %12 : vector<2x1x1152xf32> to vector<2x16x1152xf32>
    %17 = vector.broadcast %15 : vector<1x16x1152xf32> to vector<2x16x1152xf32>
    %18 = arith.mulf %16, %17 : vector<2x16x1152xf32>
    %19 = arith.addf %9, %18 : vector<2x16x1152xf32>
    %20 = vector.extract_strided_slice %0 {offsets = [0, 2, 0], sizes = [2, 1, 1152], strides = [1, 1, 1]} : vector<2x8x1152xf32> to vector<2x1x1152xf32>
    %21 = vector.shape_cast %20 : vector<2x1x1152xf32> to vector<2x1152xf32>
    %22 = vector.shape_cast %21 : vector<2x1152xf32> to vector<2x1x1152xf32>
    %c0_9 = arith.constant 0 : index
    %c2 = arith.constant 2 : index
    %c0_10 = arith.constant 0 : index
    %c0_11 = arith.constant 0 : index
    %23 = vector.load %arg2[%c0_9, %c2, %c0_10, %c0_11] : memref<1x8x16x1152xf32, #tpu.memory_space<vmem>>, vector<1x1x16x1152xf32>
    %24 = vector.shape_cast %23 : vector<1x1x16x1152xf32> to vector<16x1152xf32>
    %25 = vector.shape_cast %24 : vector<16x1152xf32> to vector<1x16x1152xf32>
    %26 = vector.broadcast %22 : vector<2x1x1152xf32> to vector<2x16x1152xf32>
    %27 = vector.broadcast %25 : vector<1x16x1152xf32> to vector<2x16x1152xf32>
    %28 = arith.mulf %26, %27 : vector<2x16x1152xf32>
    %29 = arith.addf %19, %28 : vector<2x16x1152xf32>
    %30 = vector.extract_strided_slice %0 {offsets = [0, 3, 0], sizes = [2, 1, 1152], strides = [1, 1, 1]} : vector<2x8x1152xf32> to vector<2x1x1152xf32>
    %31 = vector.shape_cast %30 : vector<2x1x1152xf32> to vector<2x1152xf32>
    %32 = vector.shape_cast %31 : vector<2x1152xf32> to vector<2x1x1152xf32>
    %c0_12 = arith.constant 0 : index
    %c3 = arith.constant 3 : index
    %c0_13 = arith.constant 0 : index
    %c0_14 = arith.constant 0 : index
    %33 = vector.load %arg2[%c0_12, %c3, %c0_13, %c0_14] : memref<1x8x16x1152xf32, #tpu.memory_space<vmem>>, vector<1x1x16x1152xf32>
    %34 = vector.shape_cast %33 : vector<1x1x16x1152xf32> to vector<16x1152xf32>
    %35 = vector.shape_cast %34 : vector<16x1152xf32> to vector<1x16x1152xf32>
    %36 = vector.broadcast %32 : vector<2x1x1152xf32> to vector<2x16x1152xf32>
    %37 = vector.broadcast %35 : vector<1x16x1152xf32> to vector<2x16x1152xf32>
    %38 = arith.mulf %36, %37 : vector<2x16x1152xf32>
    %39 = arith.addf %29, %38 : vector<2x16x1152xf32>
    %40 = vector.extract_strided_slice %0 {offsets = [0, 4, 0], sizes = [2, 1, 1152], strides = [1, 1, 1]} : vector<2x8x1152xf32> to vector<2x1x1152xf32>
    %41 = vector.shape_cast %40 : vector<2x1x1152xf32> to vector<2x1152xf32>
    %42 = vector.shape_cast %41 : vector<2x1152xf32> to vector<2x1x1152xf32>
    %c0_15 = arith.constant 0 : index
    %c4 = arith.constant 4 : index
    %c0_16 = arith.constant 0 : index
    %c0_17 = arith.constant 0 : index
    %43 = vector.load %arg2[%c0_15, %c4, %c0_16, %c0_17] : memref<1x8x16x1152xf32, #tpu.memory_space<vmem>>, vector<1x1x16x1152xf32>
    %44 = vector.shape_cast %43 : vector<1x1x16x1152xf32> to vector<16x1152xf32>
    %45 = vector.shape_cast %44 : vector<16x1152xf32> to vector<1x16x1152xf32>
    %46 = vector.broadcast %42 : vector<2x1x1152xf32> to vector<2x16x1152xf32>
    %47 = vector.broadcast %45 : vector<1x16x1152xf32> to vector<2x16x1152xf32>
    %48 = arith.mulf %46, %47 : vector<2x16x1152xf32>
    %49 = arith.addf %39, %48 : vector<2x16x1152xf32>
    %50 = vector.extract_strided_slice %0 {offsets = [0, 5, 0], sizes = [2, 1, 1152], strides = [1, 1, 1]} : vector<2x8x1152xf32> to vector<2x1x1152xf32>
    %51 = vector.shape_cast %50 : vector<2x1x1152xf32> to vector<2x1152xf32>
    %52 = vector.shape_cast %51 : vector<2x1152xf32> to vector<2x1x1152xf32>
    %c0_18 = arith.constant 0 : index
    %c5 = arith.constant 5 : index
    %c0_19 = arith.constant 0 : index
    %c0_20 = arith.constant 0 : index
    %53 = vector.load %arg2[%c0_18, %c5, %c0_19, %c0_20] : memref<1x8x16x1152xf32, #tpu.memory_space<vmem>>, vector<1x1x16x1152xf32>
    %54 = vector.shape_cast %53 : vector<1x1x16x1152xf32> to vector<16x1152xf32>
    %55 = vector.shape_cast %54 : vector<16x1152xf32> to vector<1x16x1152xf32>
    %56 = vector.broadcast %52 : vector<2x1x1152xf32> to vector<2x16x1152xf32>
    %57 = vector.broadcast %55 : vector<1x16x1152xf32> to vector<2x16x1152xf32>
    %58 = arith.mulf %56, %57 : vector<2x16x1152xf32>
    %59 = arith.addf %49, %58 : vector<2x16x1152xf32>
    %60 = vector.extract_strided_slice %0 {offsets = [0, 6, 0], sizes = [2, 1, 1152], strides = [1, 1, 1]} : vector<2x8x1152xf32> to vector<2x1x1152xf32>
    %61 = vector.shape_cast %60 : vector<2x1x1152xf32> to vector<2x1152xf32>
    %62 = vector.shape_cast %61 : vector<2x1152xf32> to vector<2x1x1152xf32>
    %c0_21 = arith.constant 0 : index
    %c6 = arith.constant 6 : index
    %c0_22 = arith.constant 0 : index
    %c0_23 = arith.constant 0 : index
    %63 = vector.load %arg2[%c0_21, %c6, %c0_22, %c0_23] : memref<1x8x16x1152xf32, #tpu.memory_space<vmem>>, vector<1x1x16x1152xf32>
    %64 = vector.shape_cast %63 : vector<1x1x16x1152xf32> to vector<16x1152xf32>
    %65 = vector.shape_cast %64 : vector<16x1152xf32> to vector<1x16x1152xf32>
    %66 = vector.broadcast %62 : vector<2x1x1152xf32> to vector<2x16x1152xf32>
    %67 = vector.broadcast %65 : vector<1x16x1152xf32> to vector<2x16x1152xf32>
    %68 = arith.mulf %66, %67 : vector<2x16x1152xf32>
    %69 = arith.addf %59, %68 : vector<2x16x1152xf32>
    %70 = vector.extract_strided_slice %0 {offsets = [0, 7, 0], sizes = [2, 1, 1152], strides = [1, 1, 1]} : vector<2x8x1152xf32> to vector<2x1x1152xf32>
    %71 = vector.shape_cast %70 : vector<2x1x1152xf32> to vector<2x1152xf32>
    %72 = vector.shape_cast %71 : vector<2x1152xf32> to vector<2x1x1152xf32>
    %c0_24 = arith.constant 0 : index
    %c7 = arith.constant 7 : index
    %c0_25 = arith.constant 0 : index
    %c0_26 = arith.constant 0 : index
    %73 = vector.load %arg2[%c0_24, %c7, %c0_25, %c0_26] : memref<1x8x16x1152xf32, #tpu.memory_space<vmem>>, vector<1x1x16x1152xf32>
    %74 = vector.shape_cast %73 : vector<1x1x16x1152xf32> to vector<16x1152xf32>
    %75 = vector.shape_cast %74 : vector<16x1152xf32> to vector<1x16x1152xf32>
    %76 = vector.broadcast %72 : vector<2x1x1152xf32> to vector<2x16x1152xf32>
    %77 = vector.broadcast %75 : vector<1x16x1152xf32> to vector<2x16x1152xf32>
    %78 = arith.mulf %76, %77 : vector<2x16x1152xf32>
    %79 = arith.addf %69, %78 : vector<2x16x1152xf32>
    %cst = arith.constant 0.000000e+00 : f32
    %80 = vector.broadcast %cst : f32 to vector<2x1x1152xf32>
    %cst_27 = arith.constant dense<0xFF800000> : vector<2x1xf32>
    %81 = vector.multi_reduction <maximumf>, %80, %cst_27 [2] : vector<2x1x1152xf32> to vector<2x1xf32>
    %82 = vector.shape_cast %81 : vector<2x1xf32> to vector<2x1x1xf32>
    %83 = vector.broadcast %82 : vector<2x1x1xf32> to vector<2x1x1152xf32>
    %84 = arith.subf %80, %83 : vector<2x1x1152xf32>
    %85 = math.exp %84 : vector<2x1x1152xf32>
    %cst_28 = arith.constant dense<0.000000e+00> : vector<2x1xf32>
    %86 = vector.multi_reduction <add>, %85, %cst_28 [2] : vector<2x1x1152xf32> to vector<2x1xf32>
    %87 = vector.shape_cast %86 : vector<2x1xf32> to vector<2x1x1xf32>
    %88 = vector.broadcast %87 : vector<2x1x1xf32> to vector<2x1x1152xf32>
    %89 = arith.divf %85, %88 : vector<2x1x1152xf32>
    %90 = vector.broadcast %89 : vector<2x1x1152xf32> to vector<2x16x1152xf32>
    %91 = arith.mulf %90, %79 : vector<2x16x1152xf32>
    %cst_29 = arith.constant dense<0.000000e+00> : vector<2x16xf32>
    %92 = vector.multi_reduction <add>, %91, %cst_29 [2] : vector<2x16x1152xf32> to vector<2x16xf32>
    %93 = vector.shape_cast %92 : vector<2x16xf32> to vector<2x16x1xf32>
    %94 = arith.mulf %93, %93 : vector<2x16x1xf32>
    %cst_30 = arith.constant dense<0.000000e+00> : vector<2x1xf32>
    %95 = vector.multi_reduction <add>, %94, %cst_30 [1] : vector<2x16x1xf32> to vector<2x1xf32>
    %96 = vector.shape_cast %95 : vector<2x1xf32> to vector<2x1x1xf32>
    %cst_31 = arith.constant 1.000000e+00 : f32
    %97 = vector.broadcast %cst_31 : f32 to vector<2x1x1xf32>
    %98 = arith.addf %97, %96 : vector<2x1x1xf32>
    %99 = arith.divf %96, %98 : vector<2x1x1xf32>
    %100 = vector.broadcast %99 : vector<2x1x1xf32> to vector<2x16x1xf32>
    %101 = arith.mulf %93, %100 : vector<2x16x1xf32>
    %cst_32 = arith.constant 9.99999971E-10 : f32
    %102 = vector.broadcast %cst_32 : f32 to vector<2x1x1xf32>
    %103 = arith.addf %96, %102 : vector<2x1x1xf32>
    %104 = math.rsqrt %103 : vector<2x1x1xf32>
    %105 = vector.broadcast %104 : vector<2x1x1xf32> to vector<2x16x1xf32>
    %106 = arith.mulf %101, %105 : vector<2x16x1xf32>
    %107 = vector.broadcast %106 : vector<2x16x1xf32> to vector<2x16x1152xf32>
    %108 = arith.mulf %79, %107 : vector<2x16x1152xf32>
    %cst_33 = arith.constant dense<0.000000e+00> : vector<2x1152xf32>
    %109 = vector.multi_reduction <add>, %108, %cst_33 [1] : vector<2x16x1152xf32> to vector<2x1152xf32>
    %110 = vector.shape_cast %109 : vector<2x1152xf32> to vector<2x1x1152xf32>
    %111 = arith.addf %80, %110 : vector<2x1x1152xf32>
    %cst_34 = arith.constant dense<0xFF800000> : vector<2x1xf32>
    %112 = vector.multi_reduction <maximumf>, %111, %cst_34 [2] : vector<2x1x1152xf32> to vector<2x1xf32>
    %113 = vector.shape_cast %112 : vector<2x1xf32> to vector<2x1x1xf32>
    %114 = vector.broadcast %113 : vector<2x1x1xf32> to vector<2x1x1152xf32>
    %115 = arith.subf %111, %114 : vector<2x1x1152xf32>
    %116 = math.exp %115 : vector<2x1x1152xf32>
    %cst_35 = arith.constant dense<0.000000e+00> : vector<2x1xf32>
    %117 = vector.multi_reduction <add>, %116, %cst_35 [2] : vector<2x1x1152xf32> to vector<2x1xf32>
    %118 = vector.shape_cast %117 : vector<2x1xf32> to vector<2x1x1xf32>
    %119 = vector.broadcast %118 : vector<2x1x1xf32> to vector<2x1x1152xf32>
    %120 = arith.divf %116, %119 : vector<2x1x1152xf32>
    %121 = vector.broadcast %120 : vector<2x1x1152xf32> to vector<2x16x1152xf32>
    %122 = arith.mulf %121, %79 : vector<2x16x1152xf32>
    %cst_36 = arith.constant dense<0.000000e+00> : vector<2x16xf32>
    %123 = vector.multi_reduction <add>, %122, %cst_36 [2] : vector<2x16x1152xf32> to vector<2x16xf32>
    %124 = vector.shape_cast %123 : vector<2x16xf32> to vector<2x16x1xf32>
    %125 = arith.mulf %124, %124 : vector<2x16x1xf32>
    %cst_37 = arith.constant dense<0.000000e+00> : vector<2x1xf32>
    %126 = vector.multi_reduction <add>, %125, %cst_37 [1] : vector<2x16x1xf32> to vector<2x1xf32>
    %127 = vector.shape_cast %126 : vector<2x1xf32> to vector<2x1x1xf32>
    %cst_38 = arith.constant 1.000000e+00 : f32
    %128 = vector.broadcast %cst_38 : f32 to vector<2x1x1xf32>
    %129 = arith.addf %128, %127 : vector<2x1x1xf32>
    %130 = arith.divf %127, %129 : vector<2x1x1xf32>
    %131 = vector.broadcast %130 : vector<2x1x1xf32> to vector<2x16x1xf32>
    %132 = arith.mulf %124, %131 : vector<2x16x1xf32>
    %cst_39 = arith.constant 9.99999971E-10 : f32
    %133 = vector.broadcast %cst_39 : f32 to vector<2x1x1xf32>
    %134 = arith.addf %127, %133 : vector<2x1x1xf32>
    %135 = math.rsqrt %134 : vector<2x1x1xf32>
    %136 = vector.broadcast %135 : vector<2x1x1xf32> to vector<2x16x1xf32>
    %137 = arith.mulf %132, %136 : vector<2x16x1xf32>
    %138 = vector.broadcast %137 : vector<2x16x1xf32> to vector<2x16x1152xf32>
    %139 = arith.mulf %79, %138 : vector<2x16x1152xf32>
    %cst_40 = arith.constant dense<0.000000e+00> : vector<2x1152xf32>
    %140 = vector.multi_reduction <add>, %139, %cst_40 [1] : vector<2x16x1152xf32> to vector<2x1152xf32>
    %141 = vector.shape_cast %140 : vector<2x1152xf32> to vector<2x1x1152xf32>
    %142 = arith.addf %111, %141 : vector<2x1x1152xf32>
    %cst_41 = arith.constant dense<0xFF800000> : vector<2x1xf32>
    %143 = vector.multi_reduction <maximumf>, %142, %cst_41 [2] : vector<2x1x1152xf32> to vector<2x1xf32>
    %144 = vector.shape_cast %143 : vector<2x1xf32> to vector<2x1x1xf32>
    %145 = vector.broadcast %144 : vector<2x1x1xf32> to vector<2x1x1152xf32>
    %146 = arith.subf %142, %145 : vector<2x1x1152xf32>
    %147 = math.exp %146 : vector<2x1x1152xf32>
    %cst_42 = arith.constant dense<0.000000e+00> : vector<2x1xf32>
    %148 = vector.multi_reduction <add>, %147, %cst_42 [2] : vector<2x1x1152xf32> to vector<2x1xf32>
    %149 = vector.shape_cast %148 : vector<2x1xf32> to vector<2x1x1xf32>
    %150 = vector.broadcast %149 : vector<2x1x1xf32> to vector<2x1x1152xf32>
    %151 = arith.divf %147, %150 : vector<2x1x1152xf32>
    %152 = vector.broadcast %151 : vector<2x1x1152xf32> to vector<2x16x1152xf32>
    %153 = arith.mulf %152, %79 : vector<2x16x1152xf32>
    %cst_43 = arith.constant dense<0.000000e+00> : vector<2x16xf32>
    %154 = vector.multi_reduction <add>, %153, %cst_43 [2] : vector<2x16x1152xf32> to vector<2x16xf32>
    %155 = vector.shape_cast %154 : vector<2x16xf32> to vector<2x16x1xf32>
    %156 = arith.mulf %155, %155 : vector<2x16x1xf32>
    %cst_44 = arith.constant dense<0.000000e+00> : vector<2x1xf32>
    %157 = vector.multi_reduction <add>, %156, %cst_44 [1] : vector<2x16x1xf32> to vector<2x1xf32>
    %158 = vector.shape_cast %157 : vector<2x1xf32> to vector<2x1x1xf32>
    %cst_45 = arith.constant 1.000000e+00 : f32
    %159 = vector.broadcast %cst_45 : f32 to vector<2x1x1xf32>
    %160 = arith.addf %159, %158 : vector<2x1x1xf32>
    %161 = arith.divf %158, %160 : vector<2x1x1xf32>
    %162 = vector.broadcast %161 : vector<2x1x1xf32> to vector<2x16x1xf32>
    %163 = arith.mulf %155, %162 : vector<2x16x1xf32>
    %cst_46 = arith.constant 9.99999971E-10 : f32
    %164 = vector.broadcast %cst_46 : f32 to vector<2x1x1xf32>
    %165 = arith.addf %158, %164 : vector<2x1x1xf32>
    %166 = math.rsqrt %165 : vector<2x1x1xf32>
    %167 = vector.broadcast %166 : vector<2x1x1xf32> to vector<2x16x1xf32>
    %168 = arith.mulf %163, %167 : vector<2x16x1xf32>
    %169 = vector.shape_cast %168 : vector<2x16x1xf32> to vector<2x16xf32>
    %170 = vector.shape_cast %169 : vector<2x16xf32> to vector<1x2x16xf32>
    %c0_47 = arith.constant 0 : index
    %c0_48 = arith.constant 0 : index
    %c0_49 = arith.constant 0 : index
    %171 = vector.load %arg3[%c0_47, %c0_48, %c0_49] : memref<1x2x16xf32, #tpu.memory_space<vmem>>, vector<1x2x16xf32>
    tpu.vector_store %arg3[%c0_47, %c0_48, %c0_49], %170 {strides = array<i32>} : memref<1x2x16xf32, #tpu.memory_space<vmem>>, vector<1x2x16xf32>,
    return
  }
  func.func @transform_0(%arg0: i32) -> (i32, i32, i32) {
    %c0_i32 = arith.constant 0 : i32
    %c0_i32_0 = arith.constant 0 : i32
    %c0_i32_1 = arith.constant 0 : i32
    %c0_i32_2 = arith.constant 0 : i32
    return %c0_i32, %c0_i32_0, %c0_i32_1 : i32, i32, i32
  }
  func.func @transform_1(%arg0: i32) -> (i32, i32, i32, i32) {
    %c0_i32 = arith.constant 0 : i32
    %c0_i32_0 = arith.constant 0 : i32
    %c0_i32_1 = arith.constant 0 : i32
    %c0_i32_2 = arith.constant 0 : i32
    return %arg0, %c0_i32, %c0_i32_0, %c0_i32_1 : i32, i32, i32, i32
  }
  func.func @transform_2(%arg0: i32) -> (i32, i32, i32) {
    %c0_i32 = arith.constant 0 : i32
    %c0_i32_0 = arith.constant 0 : i32
    %c0_i32_1 = arith.constant 0 : i32
    return %arg0, %c0_i32, %c0_i32_0 : i32, i32, i32
  }
}

module attributes {stable_mosaic.version = 11 : i64} {
  func.func @_decoder_kernel(%arg0: i32, %arg1: memref<8x160xbf16, #tpu.memory_space<vmem>>, %arg2: memref<160x512xbf16, #tpu.memory_space<vmem>>, %arg3: memref<1x512xf32, #tpu.memory_space<vmem>>, %arg4: memref<512x1024xbf16, #tpu.memory_space<vmem>>, %arg5: memref<1x1024xf32, #tpu.memory_space<vmem>>, %arg6: memref<1024x896xbf16, #tpu.memory_space<vmem>>, %arg7: memref<1x896xf32, #tpu.memory_space<vmem>>, %arg8: memref<8x896xf32, #tpu.memory_space<vmem>>) attributes {dimension_semantics = [#tpu.dimension_semantics<arbitrary>], iteration_bounds = array<i64: 1>, scalar_prefetch = 0 : i64, scratch_operands = 0 : i64, tpu.core_type = #tpu.core_type<tc>, window_params = [{pipeline_mode = #tpu.pipeline_mode<synchronous>, transform_indices = @transform_0, window_bounds = array<i64: 8, 160>}, {pipeline_mode = #tpu.pipeline_mode<synchronous>, transform_indices = @transform_1, window_bounds = array<i64: 160, 512>}, {pipeline_mode = #tpu.pipeline_mode<synchronous>, transform_indices = @transform_2, window_bounds = array<i64: 1, 512>}, {pipeline_mode = #tpu.pipeline_mode<synchronous>, transform_indices = @transform_3, window_bounds = array<i64: 512, 1024>}, {pipeline_mode = #tpu.pipeline_mode<synchronous>, transform_indices = @transform_4, window_bounds = array<i64: 1, 1024>}, {pipeline_mode = #tpu.pipeline_mode<synchronous>, transform_indices = @transform_5, window_bounds = array<i64: 1024, 896>}, {pipeline_mode = #tpu.pipeline_mode<synchronous>, transform_indices = @transform_6, window_bounds = array<i64: 1, 896>}, {pipeline_mode = #tpu.pipeline_mode<synchronous>, transform_indices = @transform_7, window_bounds = array<i64: 8, 896>}]} {
    %c0 = arith.constant 0 : index
    %c0_0 = arith.constant 0 : index
    %0 = vector.load %arg1[%c0, %c0_0] : memref<8x160xbf16, #tpu.memory_space<vmem>>, vector<8x160xbf16>
    %c0_1 = arith.constant 0 : index
    %c0_2 = arith.constant 0 : index
    %1 = vector.load %arg2[%c0_1, %c0_2] : memref<160x512xbf16, #tpu.memory_space<vmem>>, vector<160x512xbf16>
    %cst = arith.constant dense<0.000000e+00> : vector<8x512xf32>
    %2 = tpu.matmul %0, %1, %cst {dimension_numbers = #tpu.dot_dimension_numbers<[1], [0], [0], [1], [0, 0, 1, 1], [], []>} : vector<8x160xbf16>, vector<160x512xbf16>, vector<8x512xf32> -> vector<8x512xf32>
    %c0_3 = arith.constant 0 : index
    %c0_4 = arith.constant 0 : index
    %3 = vector.load %arg3[%c0_3, %c0_4] : memref<1x512xf32, #tpu.memory_space<vmem>>, vector<1x512xf32>
    %4 = vector.broadcast %3 : vector<1x512xf32> to vector<8x512xf32>
    %5 = arith.addf %2, %4 : vector<8x512xf32>
    %cst_5 = arith.constant 0.000000e+00 : f32
    %6 = vector.broadcast %cst_5 : f32 to vector<8x512xf32>
    %7 = arith.maximumf %5, %6 : vector<8x512xf32>
    %8 = arith.truncf %7 : vector<8x512xf32> to vector<8x512xbf16>
    %c0_6 = arith.constant 0 : index
    %c0_7 = arith.constant 0 : index
    %9 = vector.load %arg4[%c0_6, %c0_7] : memref<512x1024xbf16, #tpu.memory_space<vmem>>, vector<512x1024xbf16>
    %cst_8 = arith.constant dense<0.000000e+00> : vector<8x1024xf32>
    %10 = tpu.matmul %8, %9, %cst_8 {dimension_numbers = #tpu.dot_dimension_numbers<[1], [0], [0], [1], [0, 0, 1, 1], [], []>} : vector<8x512xbf16>, vector<512x1024xbf16>, vector<8x1024xf32> -> vector<8x1024xf32>
    %c0_9 = arith.constant 0 : index
    %c0_10 = arith.constant 0 : index
    %11 = vector.load %arg5[%c0_9, %c0_10] : memref<1x1024xf32, #tpu.memory_space<vmem>>, vector<1x1024xf32>
    %12 = vector.broadcast %11 : vector<1x1024xf32> to vector<8x1024xf32>
    %13 = arith.addf %10, %12 : vector<8x1024xf32>
    %cst_11 = arith.constant 0.000000e+00 : f32
    %14 = vector.broadcast %cst_11 : f32 to vector<8x1024xf32>
    %15 = arith.maximumf %13, %14 : vector<8x1024xf32>
    %16 = arith.truncf %15 : vector<8x1024xf32> to vector<8x1024xbf16>
    %c0_12 = arith.constant 0 : index
    %c0_13 = arith.constant 0 : index
    %17 = vector.load %arg6[%c0_12, %c0_13] : memref<1024x896xbf16, #tpu.memory_space<vmem>>, vector<1024x896xbf16>
    %cst_14 = arith.constant dense<0.000000e+00> : vector<8x896xf32>
    %18 = tpu.matmul %16, %17, %cst_14 {dimension_numbers = #tpu.dot_dimension_numbers<[1], [0], [0], [1], [0, 0, 1, 1], [], []>} : vector<8x1024xbf16>, vector<1024x896xbf16>, vector<8x896xf32> -> vector<8x896xf32>
    %c0_15 = arith.constant 0 : index
    %c0_16 = arith.constant 0 : index
    %19 = vector.load %arg7[%c0_15, %c0_16] : memref<1x896xf32, #tpu.memory_space<vmem>>, vector<1x896xf32>
    %20 = vector.broadcast %19 : vector<1x896xf32> to vector<8x896xf32>
    %21 = arith.addf %18, %20 : vector<8x896xf32>
    %22 = arith.negf %21 : vector<8x896xf32>
    %23 = math.exp %22 : vector<8x896xf32>
    %cst_17 = arith.constant 1.000000e+00 : f32
    %24 = vector.broadcast %cst_17 : f32 to vector<8x896xf32>
    %25 = arith.addf %24, %23 : vector<8x896xf32>
    %26 = arith.divf %24, %25 : vector<8x896xf32>
    %c0_18 = arith.constant 0 : index
    %c0_19 = arith.constant 0 : index
    %27 = vector.load %arg8[%c0_18, %c0_19] : memref<8x896xf32, #tpu.memory_space<vmem>>, vector<8x896xf32>
    tpu.vector_store %arg8[%c0_18, %c0_19], %26 {strides = array<i32>} : memref<8x896xf32, #tpu.memory_space<vmem>>, vector<8x896xf32>,
    return
  }
  func.func @transform_0(%arg0: i32) -> (i32, i32) {
    %c0_i32 = arith.constant 0 : i32
    %c0_i32_0 = arith.constant 0 : i32
    %c0_i32_1 = arith.constant 0 : i32
    return %c0_i32, %c0_i32_0 : i32, i32
  }
  func.func @transform_1(%arg0: i32) -> (i32, i32) {
    %c0_i32 = arith.constant 0 : i32
    %c0_i32_0 = arith.constant 0 : i32
    %c0_i32_1 = arith.constant 0 : i32
    return %c0_i32, %c0_i32_0 : i32, i32
  }
  func.func @transform_2(%arg0: i32) -> (i32, i32) {
    %c0_i32 = arith.constant 0 : i32
    %c0_i32_0 = arith.constant 0 : i32
    %c0_i32_1 = arith.constant 0 : i32
    return %c0_i32, %c0_i32_0 : i32, i32
  }
  func.func @transform_3(%arg0: i32) -> (i32, i32) {
    %c0_i32 = arith.constant 0 : i32
    %c0_i32_0 = arith.constant 0 : i32
    %c0_i32_1 = arith.constant 0 : i32
    return %c0_i32, %c0_i32_0 : i32, i32
  }
  func.func @transform_4(%arg0: i32) -> (i32, i32) {
    %c0_i32 = arith.constant 0 : i32
    %c0_i32_0 = arith.constant 0 : i32
    %c0_i32_1 = arith.constant 0 : i32
    return %c0_i32, %c0_i32_0 : i32, i32
  }
  func.func @transform_5(%arg0: i32) -> (i32, i32) {
    %c0_i32 = arith.constant 0 : i32
    %c0_i32_0 = arith.constant 0 : i32
    %c0_i32_1 = arith.constant 0 : i32
    return %c0_i32, %c0_i32_0 : i32, i32
  }
  func.func @transform_6(%arg0: i32) -> (i32, i32) {
    %c0_i32 = arith.constant 0 : i32
    %c0_i32_0 = arith.constant 0 : i32
    %c0_i32_1 = arith.constant 0 : i32
    return %c0_i32, %c0_i32_0 : i32, i32
  }
  func.func @transform_7(%arg0: i32) -> (i32, i32) {
    %c0_i32 = arith.constant 0 : i32
    %c0_i32_0 = arith.constant 0 : i32
    %c0_i32_1 = arith.constant 0 : i32
    return %c0_i32, %c0_i32_0 : i32, i32
  }
}

</mosaic_0001>

<bundles_post_ra>
// kernel: capsule_net_forward.5
= control target key start
LH: loop header
LB: loop body
LE: loop exit
PB: predicated region body
PF: predicated region fallthrough
CT: control target
= control target key end

     0   :  { %s1112_s12 = smov 0   ;;  %s1114_s13 = smov 0   ;;  %s1304_s0 = inlined_call_operand.vmem [shape: bf16[800,81], index: 0, kind: input, shape index: {}]   ;;  %s1305_s1 = inlined_call_operand.vmem [shape: bf16[81,256], index: 1, kind: input, shape index: {}]   ;;  %s1306_s2 = inlined_call_operand.vmem [shape: f32[1,256], index: 2, kind: input, shape index: {}]   ;;  %s1307_s3 = inlined_call_operand.vmem [shape: f32[800,256], index: 3, kind: output, shape index: {}]  }
   0x1   :  { %s1116_s14 = smov 0  }
   0x2 LB: > { %s25_s15 = sadd.s32 1, %s1085_s13  ;;  %p963_p0 = scmp.ge.s32.totalorder %s1089_s14, 1  ;;  %s1089_s14 = sphi %s1116_s14, %s13_s14   ;;  %s1085_s13 = sphi %s1114_s13, %s1309_s13   ;;  %s1081_s12 = sphi %s1112_s12, %s1308_s12  }
   0x3   : > { %p27_p1 = scmp.ge.s32.totalorder %s25_s15, 5  ;;  %p167_p2 = scmp.lt.s32.totalorder %s1089_s14, 6 }
   0x5   : > { %s1311_s15 = smov (%p27_p1, %s25_s15), 0  ;;  %p168_p3 = pnand %p963_p0, %p167_p2 }
   0x6   : > { %v1040_v0 = vld [vmem:[%s1305_s1 + $0x4] ss:$8 sps:$4 sm:$0xff] (!%p168_p3)   ;;  %v1042_v1 = vld [vmem:[%s1305_s1] ss:$8 sps:$4 sm:$0xff] (!%p168_p3)   ;;  %v1091_v2 = vmov (!%p168_p3), 0   ;;  %s201_s20 = smul.u32 (!%p168_p3), 20, %s1081_s12  ;;  %v743_v27 = vlaneseq (!%p168_p3) }
   0x7   : > { %171 = sbr.rel (%p168_p3) target bundleno = 284 (0x11c), region = 32  ;;  %517 = vmatprep.mubr.bf16.mxu0 (!%p168_p3), %v1091_v2  ;;  %567 = vmatprep.mubr.bf16.mxu1 (!%p168_p3), %v1091_v2  ;;  %v1043_v3 = vld [vmem:[%s1305_s1 + $0x14] ss:$8 sps:$4 sm:$0xff] (!%p168_p3)   ;;  %v1045_v4 = vld [vmem:[%s1305_s1 + $0x10] ss:$8 sps:$4 sm:$0xff] (!%p168_p3)   ;;  %vm476_vm0 = vcmask (!%p168_p3), 1040384  }
   0x8   : > { %485 = vmatprep.subr.bf16.mxu0 (!%p168_p3), %v1040_v0  ;;  %1002 = vmatprep.subr.bf16.mxu1 (!%p168_p3), %v1040_v0  ;;  %p202_p4 = scmp.lt.s32.totalorder (!%p168_p3), %s201_s20, 99  ;;  %v1046_v5 = vld [vmem:[%s1305_s1 + $0x24] ss:$8 sps:$4 sm:$0xff] (!%p168_p3)   ;;  %v1048_v6 = vld [vmem:[%s1305_s1 + $0x20] ss:$8 sps:$4 sm:$0xff] (!%p168_p3)   ;;  %v478_v12 = vsel (!%p168_p3), %vm476_vm0, 65535, %v1091_v2 }
   0x9   : > { %486 = vmatpush1.bf16.msra.mxu0 (!%p168_p3), %v1042_v1  ;;  %1008 = vmatpush1.bf16.msra.mxu1 (!%p168_p3), %v1042_v1  ;;  %v1049_v7 = vld [vmem:[%s1305_s1 + $0x34] ss:$8 sps:$4 sm:$0xff] (!%p168_p3)   ;;  %v1051_v9 = vld [vmem:[%s1305_s1 + $0x30] ss:$8 sps:$4 sm:$0xff] (!%p168_p3)   ;;  %v1052_v10 = vld [vmem:[%s1305_s1 + $0x44] ss:$8 sps:$4 sm:$0xff] (!%p168_p3)  }
   0xa   : > { %487 = vmatprep.subr.bf16.mxu0 (!%p168_p3), %v1043_v3  ;;  %1003 = vmatprep.subr.bf16.mxu1 (!%p168_p3), %v1043_v3  ;;  %v339_v8 = vld [vmem:[%s1305_s1 + $0x50] sm:$0x11] (!%p168_p3)  ;;  %v1054_v13 = vld [vmem:[%s1305_s1 + $0x40] ss:$8 sps:$4 sm:$0xff] (!%p168_p3)   ;;  %vm445_vm1 = vcmask (!%p168_p3), 662528   ;;  %v744_v28 = vshrl.u32 (!%p168_p3), %v743_v27, 7 }
   0xb   : > { %v988_v11 = vcombine.high (!%p168_p3), %v339_v8, %v339_v8  ;;  %v987_v14 = vcombine.low (!%p168_p3), %v339_v8, %v339_v8  ;;  %v741_v30 = vld [vmem:[%s1306_s2] sm:$0x3] (!%p168_p3) }
   0xc   : > { %v745_v29 = vsub.s32 (!%p168_p3), 0, %v744_v28  ;;  %v749_v31 = vsub.s32 (!%p168_p3), 1, %v744_v28 }
   0xd   : > { %488 = vmatpush1.bf16.msra.mxu0 (!%p168_p3), %v1045_v4  ;;  %1009 = vmatpush1.bf16.msra.mxu1 (!%p168_p3), %v1045_v4  ;;  %v483_v15 = vand.u32 (!%p168_p3), %v988_v11, %v478_v12  ;;  %v480_v16 = vand.u32 (!%p168_p3), %v987_v14, %v478_v12 }
   0xe   : > { %s1313_s20 = smov (!%p202_p4, %s201_s20), 99  ;;  %489 = vmatprep.subr.bf16.mxu0 %v1046_v5  ;;  %1004 = vmatprep.subr.bf16.mxu1 %v1046_v5  ;;  %v1205_v32 = vrot.slane %v741_v30, %v745_v29  ;;  %v1207_v35 = vrot.slane %v741_v30, %v749_v31 }
   0xf   : > { %s964_s29 = sshll.u32 %s1313_s20, 2  ;;  %s1001_s22 = sshll.u32 %s1313_s20, 4 }
  0x10   : > { %s1159_s7 = scalar_lea.vmem %s1304_s0, %s964_s29  ;;  %s1215_s25 = scalar_lea.vmem %s1307_s3, %s1001_s22 }
  0x11   : > { %490 = vmatpush1.bf16.msra.mxu0 %v1048_v6  ;;  %1010 = vmatpush1.bf16.msra.mxu1 %v1048_v6  ;;  %v1057_v17 = vld [vmem:[%s1159_s7] sm:$0xff]   ;;  %v1058_v18 = vld [vmem:[%s1159_s7 + $0x28] sm:$0xff]   ;;  %v1060_v20 = vld [vmem:[%s1159_s7 + $0x30] sm:$0xff]  }
  0x12   : > { %491 = vmatprep.subr.bf16.mxu0 %v1049_v7  ;;  %1005 = vmatprep.subr.bf16.mxu1 %v1049_v7  ;;  %v1059_v19 = vld [vmem:[%s1159_s7 + $0x8] sm:$0xff]   ;;  %v1061_v21 = vld [vmem:[%s1159_s7 + $0x10] sm:$0xff]   ;;  %v1062_v22 = vld [vmem:[%s1159_s7 + $0x38] sm:$0xff]  }
  0x13   : > { %v1063_v23 = vld [vmem:[%s1159_s7 + $0x18] sm:$0xff]   ;;  %v1064_v24 = vld [vmem:[%s1159_s7 + $0x40] sm:$0xff]   ;;  %v1066_v26 = vld [vmem:[%s1159_s7 + $0x48] sm:$0xff]  }
  0x14   : > { %v1065_v25 = vld [vmem:[%s1159_s7 + $0x20] sm:$0xff]  }
  0x15   : > { %492 = vmatpush1.bf16.msra.mxu0 %v1051_v9  ;;  %1011 = vmatpush1.bf16.msra.mxu1 %v1051_v9 }
  0x16   : > { %493 = vmatprep.subr.bf16.mxu0 %v1052_v10  ;;  %1006 = vmatprep.subr.bf16.mxu1 %v1052_v10 }
  0x19   : > { %494 = vmatpush1.bf16.msra.mxu0 %v1054_v13  ;;  %1012 = vmatpush1.bf16.msra.mxu1 %v1054_v13 }
  0x1a   : > { %495 = vmatprep.subr.bf16.mxu0 %v483_v15  ;;  %1007 = vmatprep.subr.bf16.mxu1 %v483_v15 }
  0x1d   : > { %496 = vmatpush1.bf16.msra.mxu0 %v480_v16  ;;  %1013 = vmatpush1.bf16.msra.mxu1 %v480_v16 }
  0x20   : > { %989 = vmatmul.mubr.msk.bf16.vlgmr.msra.gmra.mrb[0].mxu0 %vm445_vm1, %v1057_v17  ;;  %994 = vmatmul.mubr.msk.bf16.vlgmr.msra.gmra.mrb[0].mxu1 %vm445_vm1, %v1058_v18 }
  0x21   : > { %527 = vmatprep.mubr.bf16.mxu0 %v1091_v2  ;;  %577 = vmatprep.mubr.bf16.mxu1 %v1091_v2 }
  0x28   : > { %990 = vmatmul.mubr.msk.bf16.gmra.mrb[4].mxu0 %vm445_vm1, %v1059_v19  ;;  %995 = vmatmul.mubr.msk.bf16.gmra.mrb[4].mxu1 %vm445_vm1, %v1060_v20 }
  0x29   : > { %537 = vmatprep.mubr.bf16.mxu0 %v1091_v2  ;;  %587 = vmatprep.mubr.bf16.mxu1 %v1091_v2 }
  0x30   : > { %991 = vmatmul.mubr.msk.bf16.gmra.mrb[8].mxu0 %vm445_vm1, %v1061_v21  ;;  %996 = vmatmul.mubr.msk.bf16.gmra.mrb[8].mxu1 %vm445_vm1, %v1062_v22 }
  0x31   : > { %547 = vmatprep.mubr.bf16.mxu0 %v1091_v2  ;;  %597 = vmatprep.mubr.bf16.mxu1 %v1091_v2 }
  0x38   : > { %992 = vmatmul.mubr.msk.bf16.gmra.mrb[12].mxu0 %vm445_vm1, %v1063_v23  ;;  %997 = vmatmul.mubr.msk.bf16.gmra.mrb[12].mxu1 %vm445_vm1, %v1064_v24 }
  0x39   : > { %557 = vmatprep.mubr.bf16.mxu0 %v1091_v2  ;;  %607 = vmatprep.mubr.bf16.mxu1 %v1091_v2 }
  0x40   : > { %993 = vmatmul.mubr.msk.bf16.gmra.mrb[16].mxu0 %vm445_vm1, %v1065_v25  ;;  %998 = vmatmul.mubr.msk.bf16.gmra.mrb[16].mxu1 %vm445_vm1, %v1066_v26 }
  0xf3   : > { %v519_v33 = vpop.f32.mrb[0].mxu0  ;;  %v569_v34 = vpop.f32.mrb[0].mxu1 }
  0xf4   : > { %v521_v36 = vpop.f32.mrb[1].mxu0  ;;  %v571_v37 = vpop.f32.mrb[1].mxu1  ;;  %v753_v40 = vadd.f32 %v1205_v32, %v519_v33  ;;  %v773_v41 = vadd.f32 %v1205_v32, %v569_v34 }
  0xf5   : > { %v523_v38 = vpop.f32.mrb[2].mxu0  ;;  %v573_v39 = vpop.f32.mrb[2].mxu1  ;;  %v754_v44 = vadd.f32 %v1207_v35, %v521_v36  ;;  %v774_v45 = vadd.f32 %v1207_v35, %v571_v37 }
  0xf6   : > { %v525_v42 = vpop.f32.mrb[3].mxu0  ;;  %v575_v43 = vpop.f32.mrb[3].mxu1  ;;  %v793_v46 = vmax.f32 %v753_v40, 0.0  ;;  %v813_v47 = vmax.f32 %v773_v41, 0.0  ;;  %v755_v48 = vadd.f32 %v1205_v32, %v523_v38  ;;  %v775_v49 = vadd.f32 %v1205_v32, %v573_v39 }
  0xf7   : > { %v794_v50 = vmax.f32 %v754_v44, 0.0  ;;  %v814_v51 = vmax.f32 %v774_v45, 0.0  ;;  %v756_v52 = vadd.f32 %v1207_v35, %v525_v42  ;;  %v776_v53 = vadd.f32 %v1207_v35, %v575_v43 }
  0xf8   : > { %833 = vst [vmem:[%s1215_s25] sm:$0xff] %v793_v46  ;;  %853 = vst [vmem:[%s1215_s25 + $0xa0] sm:$0xff] %v813_v47  ;;  %v795_v54 = vmax.f32 %v755_v48, 0.0  ;;  %v815_v55 = vmax.f32 %v775_v49, 0.0 }
  0xf9   : > { %834 = vst [vmem:[%s1215_s25 + $0x8] sm:$0xff] %v794_v50  ;;  %854 = vst [vmem:[%s1215_s25 + $0xa8] sm:$0xff] %v814_v51  ;;  %v796_v56 = vmax.f32 %v756_v52, 0.0  ;;  %v816_v57 = vmax.f32 %v776_v53, 0.0 }
  0xfa   : > { %835 = vst [vmem:[%s1215_s25 + $0x10] sm:$0xff] %v795_v54  ;;  %855 = vst [vmem:[%s1215_s25 + $0xb0] sm:$0xff] %v815_v55 }
  0xfb   : > { %v529_v58 = vpop.f32.mrb[4].mxu0  ;;  %v579_v59 = vpop.f32.mrb[4].mxu1  ;;  %836 = vst [vmem:[%s1215_s25 + $0x18] sm:$0xff] %v796_v56  ;;  %856 = vst [vmem:[%s1215_s25 + $0xb8] sm:$0xff] %v816_v57 }
  0xfc   : > { %v531_v60 = vpop.f32.mrb[5].mxu0  ;;  %v581_v61 = vpop.f32.mrb[5].mxu1  ;;  %v757_v0 = vadd.f32 %v1205_v32, %v529_v58  ;;  %v777_v1 = vadd.f32 %v1205_v32, %v579_v59 }
  0xfd   : > { %v533_v62 = vpop.f32.mrb[6].mxu0  ;;  %v583_v63 = vpop.f32.mrb[6].mxu1  ;;  %v758_v4 = vadd.f32 %v1207_v35, %v531_v60  ;;  %v778_v5 = vadd.f32 %v1207_v35, %v581_v61 }
  0xfe   : > { %v535_v2 = vpop.f32.mrb[7].mxu0  ;;  %v585_v3 = vpop.f32.mrb[7].mxu1  ;;  %v797_v6 = vmax.f32 %v757_v0, 0.0  ;;  %v817_v7 = vmax.f32 %v777_v1, 0.0  ;;  %v759_v8 = vadd.f32 %v1205_v32, %v533_v62  ;;  %v779_v9 = vadd.f32 %v1205_v32, %v583_v63 }
  0xff   : > { %v798_v10 = vmax.f32 %v758_v4, 0.0  ;;  %v818_v11 = vmax.f32 %v778_v5, 0.0  ;;  %v760_v12 = vadd.f32 %v1207_v35, %v535_v2  ;;  %v780_v13 = vadd.f32 %v1207_v35, %v585_v3 }
 0x100   : > { %837 = vst [vmem:[%s1215_s25 + $0x20] sm:$0xff] %v797_v6  ;;  %857 = vst [vmem:[%s1215_s25 + $0xc0] sm:$0xff] %v817_v7  ;;  %v799_v14 = vmax.f32 %v759_v8, 0.0  ;;  %v819_v15 = vmax.f32 %v779_v9, 0.0 }
 0x101   : > { %838 = vst [vmem:[%s1215_s25 + $0x28] sm:$0xff] %v798_v10  ;;  %858 = vst [vmem:[%s1215_s25 + $0xc8] sm:$0xff] %v818_v11  ;;  %v800_v16 = vmax.f32 %v760_v12, 0.0  ;;  %v820_v17 = vmax.f32 %v780_v13, 0.0 }
 0x102   : > { %839 = vst [vmem:[%s1215_s25 + $0x30] sm:$0xff] %v799_v14  ;;  %859 = vst [vmem:[%s1215_s25 + $0xd0] sm:$0xff] %v819_v15 }
 0x103   : > { %v539_v18 = vpop.f32.mrb[8].mxu0  ;;  %v589_v19 = vpop.f32.mrb[8].mxu1  ;;  %840 = vst [vmem:[%s1215_s25 + $0x38] sm:$0xff] %v800_v16  ;;  %860 = vst [vmem:[%s1215_s25 + $0xd8] sm:$0xff] %v820_v17 }
 0x104   : > { %v541_v20 = vpop.f32.mrb[9].mxu0  ;;  %v591_v21 = vpop.f32.mrb[9].mxu1  ;;  %v761_v24 = vadd.f32 %v1205_v32, %v539_v18  ;;  %v781_v25 = vadd.f32 %v1205_v32, %v589_v19 }
 0x105   : > { %v543_v22 = vpop.f32.mrb[10].mxu0  ;;  %v593_v23 = vpop.f32.mrb[10].mxu1  ;;  %v762_v28 = vadd.f32 %v1207_v35, %v541_v20  ;;  %v782_v29 = vadd.f32 %v1207_v35, %v591_v21 }
 0x106   : > { %v545_v26 = vpop.f32.mrb[11].mxu0  ;;  %v595_v27 = vpop.f32.mrb[11].mxu1  ;;  %v801_v30 = vmax.f32 %v761_v24, 0.0  ;;  %v821_v31 = vmax.f32 %v781_v25, 0.0  ;;  %v763_v33 = vadd.f32 %v1205_v32, %v543_v22  ;;  %v783_v34 = vadd.f32 %v1205_v32, %v593_v23 }
 0x107   : > { %v802_v36 = vmax.f32 %v762_v28, 0.0  ;;  %v822_v37 = vmax.f32 %v782_v29, 0.0  ;;  %v764_v38 = vadd.f32 %v1207_v35, %v545_v26  ;;  %v784_v39 = vadd.f32 %v1207_v35, %v595_v27 }
 0x108   : > { %841 = vst [vmem:[%s1215_s25 + $0x40] sm:$0xff] %v801_v30  ;;  %861 = vst [vmem:[%s1215_s25 + $0xe0] sm:$0xff] %v821_v31  ;;  %v803_v40 = vmax.f32 %v763_v33, 0.0  ;;  %v823_v41 = vmax.f32 %v783_v34, 0.0 }
 0x109   : > { %842 = vst [vmem:[%s1215_s25 + $0x48] sm:$0xff] %v802_v36  ;;  %862 = vst [vmem:[%s1215_s25 + $0xe8] sm:$0xff] %v822_v37  ;;  %v804_v42 = vmax.f32 %v764_v38, 0.0  ;;  %v824_v43 = vmax.f32 %v784_v39, 0.0 }
 0x10a   : > { %843 = vst [vmem:[%s1215_s25 + $0x50] sm:$0xff] %v803_v40  ;;  %863 = vst [vmem:[%s1215_s25 + $0xf0] sm:$0xff] %v823_v41 }
 0x10b   : > { %v549_v44 = vpop.f32.mrb[12].mxu0  ;;  %v599_v45 = vpop.f32.mrb[12].mxu1  ;;  %844 = vst [vmem:[%s1215_s25 + $0x58] sm:$0xff] %v804_v42  ;;  %864 = vst [vmem:[%s1215_s25 + $0xf8] sm:$0xff] %v824_v43 }
 0x10c   : > { %v551_v46 = vpop.f32.mrb[13].mxu0  ;;  %v601_v47 = vpop.f32.mrb[13].mxu1  ;;  %v765_v50 = vadd.f32 %v1205_v32, %v549_v44  ;;  %v785_v51 = vadd.f32 %v1205_v32, %v599_v45 }
 0x10d   : > { %v553_v48 = vpop.f32.mrb[14].mxu0  ;;  %v603_v49 = vpop.f32.mrb[14].mxu1  ;;  %v766_v54 = vadd.f32 %v1207_v35, %v551_v46  ;;  %v786_v55 = vadd.f32 %v1207_v35, %v601_v47 }
 0x10e   : > { %v555_v52 = vpop.f32.mrb[15].mxu0  ;;  %v605_v53 = vpop.f32.mrb[15].mxu1  ;;  %v805_v56 = vmax.f32 %v765_v50, 0.0  ;;  %v825_v57 = vmax.f32 %v785_v51, 0.0  ;;  %v767_v58 = vadd.f32 %v1205_v32, %v553_v48  ;;  %v787_v59 = vadd.f32 %v1205_v32, %v603_v49 }
 0x10f   : > { %v806_v60 = vmax.f32 %v766_v54, 0.0  ;;  %v826_v61 = vmax.f32 %v786_v55, 0.0  ;;  %v768_v62 = vadd.f32 %v1207_v35, %v555_v52  ;;  %v788_v63 = vadd.f32 %v1207_v35, %v605_v53 }
 0x110   : > { %845 = vst [vmem:[%s1215_s25 + $0x60] sm:$0xff] %v805_v56  ;;  %865 = vst [vmem:[%s1215_s25 + $0x100] sm:$0xff] %v825_v57  ;;  %v807_v0 = vmax.f32 %v767_v58, 0.0  ;;  %v827_v1 = vmax.f32 %v787_v59, 0.0 }
 0x111   : > { %846 = vst [vmem:[%s1215_s25 + $0x68] sm:$0xff] %v806_v60  ;;  %866 = vst [vmem:[%s1215_s25 + $0x108] sm:$0xff] %v826_v61  ;;  %v808_v2 = vmax.f32 %v768_v62, 0.0  ;;  %v828_v3 = vmax.f32 %v788_v63, 0.0 }
 0x112   : > { %847 = vst [vmem:[%s1215_s25 + $0x70] sm:$0xff] %v807_v0  ;;  %867 = vst [vmem:[%s1215_s25 + $0x110] sm:$0xff] %v827_v1 }
 0x113   : > { %v559_v4 = vpop.f32.mrb[16].mxu0  ;;  %v609_v5 = vpop.f32.mrb[16].mxu1  ;;  %848 = vst [vmem:[%s1215_s25 + $0x78] sm:$0xff] %v808_v2  ;;  %868 = vst [vmem:[%s1215_s25 + $0x118] sm:$0xff] %v828_v3 }
 0x114   : > { %v561_v6 = vpop.f32.mrb[17].mxu0  ;;  %v611_v7 = vpop.f32.mrb[17].mxu1  ;;  %v769_v10 = vadd.f32 %v1205_v32, %v559_v4  ;;  %v789_v11 = vadd.f32 %v1205_v32, %v609_v5 }
 0x115   : > { %v563_v8 = vpop.f32.mrb[18].mxu0  ;;  %v613_v9 = vpop.f32.mrb[18].mxu1  ;;  %v770_v14 = vadd.f32 %v1207_v35, %v561_v6  ;;  %v790_v15 = vadd.f32 %v1207_v35, %v611_v7 }
 0x116   : > { %v565_v12 = vpop.f32.mrb[19].mxu0  ;;  %v615_v13 = vpop.f32.mrb[19].mxu1  ;;  %v809_v16 = vmax.f32 %v769_v10, 0.0  ;;  %v829_v17 = vmax.f32 %v789_v11, 0.0  ;;  %v771_v18 = vadd.f32 %v1205_v32, %v563_v8  ;;  %v791_v19 = vadd.f32 %v1205_v32, %v613_v9 }
 0x117   : > { %v810_v20 = vmax.f32 %v770_v14, 0.0  ;;  %v830_v21 = vmax.f32 %v790_v15, 0.0  ;;  %v772_v22 = vadd.f32 %v1207_v35, %v565_v12  ;;  %v792_v23 = vadd.f32 %v1207_v35, %v615_v13 }
 0x118   : > { %849 = vst [vmem:[%s1215_s25 + $0x80] sm:$0xff] %v809_v16  ;;  %869 = vst [vmem:[%s1215_s25 + $0x120] sm:$0xff] %v829_v17  ;;  %v811_v24 = vmax.f32 %v771_v18, 0.0  ;;  %v831_v25 = vmax.f32 %v791_v19, 0.0 }
 0x119   : > { %850 = vst [vmem:[%s1215_s25 + $0x88] sm:$0xff] %v810_v20  ;;  %870 = vst [vmem:[%s1215_s25 + $0x128] sm:$0xff] %v830_v21  ;;  %v812_v26 = vmax.f32 %v772_v22, 0.0  ;;  %v832_v27 = vmax.f32 %v792_v23, 0.0 }
 0x11a   : > { %851 = vst [vmem:[%s1215_s25 + $0x90] sm:$0xff] %v811_v24  ;;  %871 = vst [vmem:[%s1215_s25 + $0x130] sm:$0xff] %v831_v25 }
 0x11b   : > { %852 = vst [vmem:[%s1215_s25 + $0x98] sm:$0xff] %v812_v26  ;;  %872 = vst [vmem:[%s1215_s25 + $0x138] sm:$0xff] %v832_v27 }
 0x11c PF: > { %s13_s14 = sadd.s32 1, %s1089_s14   ;;  %s1308_s12 = smov %s1085_s13 }
 0x11d   : > { %p10_p5 = scmp.ge.s32.totalorder %s13_s14, 7   ;;  %s1309_s13 = smov %s1311_s15 }
 0x11f   :  { %12 = sbr.rel (!%p10_p5) target bundleno = 2 (0x2), region = 73 }

// kernel: capsule_net_forward.6
= control target key start
LH: loop header
LB: loop body
LE: loop exit
PB: predicated region body
PF: predicated region fallthrough
CT: control target
= control target key end

     0   :  { %s4932_s12 = smov 0   ;;  %s4934_s13 = smov 0   ;;  %s5898_s0 = inlined_call_operand.vmem [shape: bf16[80,20736], index: 0, kind: input, shape index: {}]   ;;  %s5899_s1 = inlined_call_operand.vmem [shape: bf16[20736,256], index: 1, kind: input, shape index: {}]   ;;  %s5900_s2 = inlined_call_operand.vmem [shape: f32[1,256], index: 2, kind: input, shape index: {}]   ;;  %s5901_s3 = inlined_call_operand.vmem [shape: f32[80,256], index: 3, kind: output, shape index: {}]  }
   0x1   :  { %s4936_s14 = smov 0   ;;  %s4938_s15 = smov 0  }
   0x2   :  { %s4940_s16 = smov 0  }
   0x3 LB: > { %s22_s17 = sadd.s32 1, %s4905_s15  ;;  %p41_p1 = scmp.ne.s32.totalorder %s4897_s13, %s4893_s12  ;;  %s4909_s16 = sphi %s4940_s16, %s13_s16   ;;  %s4905_s15 = sphi %s4938_s15, %s5905_s15   ;;  %s4901_s14 = sphi %s4936_s14, %s5904_s14   ;;  %s4897_s13 = sphi %s4934_s13, %s5903_s13   ;;  %s4893_s12 = sphi %s4932_s12, %s5902_s12  }
   0x4   : > { %p23_p0 = scmp.ge.s32.totalorder %s22_s17, 9  ;;  %p42_p2 = scmp.eq.s32.totalorder %s4909_s16, 0 }
   0x5   : > { %s34_s19 = sadd.s32 1, %s4897_s13  ;;  %p3678_p5 = scmp.ge.s32.totalorder %s4909_s16, 9 }
   0x6   : > { %s5907_s17 = smov (%p23_p0, %s22_s17), 0  ;;  %p43_p3 = por %p42_p2, %p41_p1 }
   0x7   : > { %s30_s18 = ssub.s32 %s4905_s15, %s5907_s17  ;;  %143 = sbr.rel (%p3678_p5) target bundleno = 64 (0x40), region = 20 }
   0x8   : > { %p32_p4 = scmp.eq.s32.totalorder %s30_s18, 0 }
   0xa   : > { %s4967_s20 = scalar_select %p32_p4, %s4897_s13, %s34_s19  }
   0xe   : > { %146 = sbr.rel (!%p43_p3) target bundleno = 64 (0x40), region = 24  ;;  %s148_s21 = sand.u32 (%p43_p3), 1, %s4897_s13  }
   0xf   : > { %s4067_s22 = smul.u32 (%p43_p3), 72, %s4905_s15 }
  0x10   : > { %s4261_s23 = smul.u32 (%p43_p3), 720, %s148_s21 }
  0x11   : > { %s4975_s26 = scalar_lea.vmem (%p43_p3), %s5898_s0, %s4067_s22 }
  0x12   : > { %v169_v0 = vld [vmem:[%s4975_s26] sm:$0xff] (%p43_p3)  ;;  %v171_v1 = vld [vmem:[%s4975_s26 + $0x8] sm:$0xff] (%p43_p3)  ;;  %v173_v2 = vld [vmem:[%s4975_s26 + $0x10] sm:$0xff] (%p43_p3)  ;;  %s4980_s27 = scalar_lea.vmem (%p43_p3), [#allocation2], %s4261_s23 }
  0x13   : > { %170 = vst [vmem:[%s4980_s27] sm:$0xff] (%p43_p3), %v169_v0  ;;  %172 = vst [vmem:[%s4980_s27 + $0x8] sm:$0xff] (%p43_p3), %v171_v1  ;;  %v175_v3 = vld [vmem:[%s4975_s26 + $0x18] sm:$0xff] (%p43_p3)  ;;  %v177_v4 = vld [vmem:[%s4975_s26 + $0x20] sm:$0xff] (%p43_p3) }
  0x14   : > { %174 = vst [vmem:[%s4980_s27 + $0x10] sm:$0xff] (%p43_p3), %v173_v2  ;;  %v179_v5 = vld [vmem:[%s4975_s26 + $0x28] sm:$0xff] (%p43_p3)  ;;  %176 = vst [vmem:[%s4980_s27 + $0x18] sm:$0xff] (%p43_p3), %v175_v3  ;;  %v181_v6 = vld [vmem:[%s4975_s26 + $0x30] sm:$0xff] (%p43_p3) }
  0x15   : > { %178 = vst [vmem:[%s4980_s27 + $0x20] sm:$0xff] %v177_v4  ;;  %180 = vst [vmem:[%s4980_s27 + $0x28] sm:$0xff] %v179_v5  ;;  %v183_v7 = vld [vmem:[%s4975_s26 + $0x38] sm:$0xff]  ;;  %v185_v8 = vld [vmem:[%s4975_s26 + $0x40] sm:$0xff] }
  0x16   : > { %182 = vst [vmem:[%s4980_s27 + $0x30] sm:$0xff] %v181_v6  ;;  %184 = vst [vmem:[%s4980_s27 + $0x38] sm:$0xff] %v183_v7  ;;  %v187_v9 = vld [vmem:[%s4975_s26 + $0x288] sm:$0xff]  ;;  %v189_v10 = vld [vmem:[%s4975_s26 + $0x290] sm:$0xff] }
  0x17   : > { %186 = vst [vmem:[%s4980_s27 + $0x40] sm:$0xff] %v185_v8  ;;  %v191_v11 = vld [vmem:[%s4975_s26 + $0x298] sm:$0xff]  ;;  %188 = vst [vmem:[%s4980_s27 + $0x48] sm:$0xff] %v187_v9  ;;  %v193_v12 = vld [vmem:[%s4975_s26 + $0x2a0] sm:$0xff] }
  0x18   : > { %190 = vst [vmem:[%s4980_s27 + $0x50] sm:$0xff] %v189_v10  ;;  %192 = vst [vmem:[%s4980_s27 + $0x58] sm:$0xff] %v191_v11  ;;  %v195_v13 = vld [vmem:[%s4975_s26 + $0x2a8] sm:$0xff]  ;;  %v197_v14 = vld [vmem:[%s4975_s26 + $0x2b0] sm:$0xff] }
  0x19   : > { %194 = vst [vmem:[%s4980_s27 + $0x60] sm:$0xff] %v193_v12  ;;  %196 = vst [vmem:[%s4980_s27 + $0x68] sm:$0xff] %v195_v13  ;;  %v199_v15 = vld [vmem:[%s4975_s26 + $0x2b8] sm:$0xff]  ;;  %v201_v16 = vld [vmem:[%s4975_s26 + $0x2c0] sm:$0xff] }
  0x1a   : > { %198 = vst [vmem:[%s4980_s27 + $0x70] sm:$0xff] %v197_v14  ;;  %v203_v17 = vld [vmem:[%s4975_s26 + $0x2c8] sm:$0xff]  ;;  %200 = vst [vmem:[%s4980_s27 + $0x78] sm:$0xff] %v199_v15  ;;  %v205_v18 = vld [vmem:[%s4975_s26 + $0x510] sm:$0xff] }
  0x1b   : > { %202 = vst [vmem:[%s4980_s27 + $0x80] sm:$0xff] %v201_v16  ;;  %204 = vst [vmem:[%s4980_s27 + $0x88] sm:$0xff] %v203_v17  ;;  %v207_v19 = vld [vmem:[%s4975_s26 + $0x518] sm:$0xff]  ;;  %v209_v20 = vld [vmem:[%s4975_s26 + $0x520] sm:$0xff] }
  0x1c   : > { %206 = vst [vmem:[%s4980_s27 + $0x90] sm:$0xff] %v205_v18  ;;  %208 = vst [vmem:[%s4980_s27 + $0x98] sm:$0xff] %v207_v19  ;;  %v211_v21 = vld [vmem:[%s4975_s26 + $0x528] sm:$0xff]  ;;  %v213_v22 = vld [vmem:[%s4975_s26 + $0x530] sm:$0xff] }
  0x1d   : > { %210 = vst [vmem:[%s4980_s27 + $0xa0] sm:$0xff] %v209_v20  ;;  %v215_v23 = vld [vmem:[%s4975_s26 + $0x538] sm:$0xff]  ;;  %212 = vst [vmem:[%s4980_s27 + $0xa8] sm:$0xff] %v211_v21  ;;  %v217_v24 = vld [vmem:[%s4975_s26 + $0x540] sm:$0xff] }
  0x1e   : > { %214 = vst [vmem:[%s4980_s27 + $0xb0] sm:$0xff] %v213_v22  ;;  %216 = vst [vmem:[%s4980_s27 + $0xb8] sm:$0xff] %v215_v23  ;;  %v219_v25 = vld [vmem:[%s4975_s26 + $0x548] sm:$0xff]  ;;  %v221_v26 = vld [vmem:[%s4975_s26 + $0x550] sm:$0xff] }
  0x1f   : > { %218 = vst [vmem:[%s4980_s27 + $0xc0] sm:$0xff] %v217_v24  ;;  %220 = vst [vmem:[%s4980_s27 + $0xc8] sm:$0xff] %v219_v25  ;;  %v223_v27 = vld [vmem:[%s4975_s26 + $0x798] sm:$0xff]  ;;  %v225_v28 = vld [vmem:[%s4975_s26 + $0x7a0] sm:$0xff] }
  0x20   : > { %222 = vst [vmem:[%s4980_s27 + $0xd0] sm:$0xff] %v221_v26  ;;  %v227_v29 = vld [vmem:[%s4975_s26 + $0x7a8] sm:$0xff]  ;;  %224 = vst [vmem:[%s4980_s27 + $0xd8] sm:$0xff] %v223_v27  ;;  %v229_v30 = vld [vmem:[%s4975_s26 + $0x7b0] sm:$0xff] }
  0x21   : > { %226 = vst [vmem:[%s4980_s27 + $0xe0] sm:$0xff] %v225_v28  ;;  %228 = vst [vmem:[%s4980_s27 + $0xe8] sm:$0xff] %v227_v29  ;;  %v231_v31 = vld [vmem:[%s4975_s26 + $0x7b8] sm:$0xff]  ;;  %v233_v32 = vld [vmem:[%s4975_s26 + $0x7c0] sm:$0xff] }
  0x22   : > { %230 = vst [vmem:[%s4980_s27 + $0xf0] sm:$0xff] %v229_v30  ;;  %232 = vst [vmem:[%s4980_s27 + $0xf8] sm:$0xff] %v231_v31  ;;  %v235_v33 = vld [vmem:[%s4975_s26 + $0x7c8] sm:$0xff]  ;;  %v237_v34 = vld [vmem:[%s4975_s26 + $0x7d0] sm:$0xff] }
  0x23   : > { %234 = vst [vmem:[%s4980_s27 + $0x100] sm:$0xff] %v233_v32  ;;  %v239_v35 = vld [vmem:[%s4975_s26 + $0x7d8] sm:$0xff]  ;;  %236 = vst [vmem:[%s4980_s27 + $0x108] sm:$0xff] %v235_v33  ;;  %v241_v36 = vld [vmem:[%s4975_s26 + $0xa20] sm:$0xff] }
  0x24   : > { %238 = vst [vmem:[%s4980_s27 + $0x110] sm:$0xff] %v237_v34  ;;  %240 = vst [vmem:[%s4980_s27 + $0x118] sm:$0xff] %v239_v35  ;;  %v243_v37 = vld [vmem:[%s4975_s26 + $0xa28] sm:$0xff]  ;;  %v245_v38 = vld [vmem:[%s4975_s26 + $0xa30] sm:$0xff] }
  0x25   : > { %242 = vst [vmem:[%s4980_s27 + $0x120] sm:$0xff] %v241_v36  ;;  %244 = vst [vmem:[%s4980_s27 + $0x128] sm:$0xff] %v243_v37  ;;  %v247_v39 = vld [vmem:[%s4975_s26 + $0xa38] sm:$0xff]  ;;  %v249_v40 = vld [vmem:[%s4975_s26 + $0xa40] sm:$0xff] }
  0x26   : > { %246 = vst [vmem:[%s4980_s27 + $0x130] sm:$0xff] %v245_v38  ;;  %v251_v41 = vld [vmem:[%s4975_s26 + $0xa48] sm:$0xff]  ;;  %248 = vst [vmem:[%s4980_s27 + $0x138] sm:$0xff] %v247_v39  ;;  %v253_v42 = vld [vmem:[%s4975_s26 + $0xa50] sm:$0xff] }
  0x27   : > { %250 = vst [vmem:[%s4980_s27 + $0x140] sm:$0xff] %v249_v40  ;;  %252 = vst [vmem:[%s4980_s27 + $0x148] sm:$0xff] %v251_v41  ;;  %v255_v43 = vld [vmem:[%s4975_s26 + $0xa58] sm:$0xff]  ;;  %v257_v44 = vld [vmem:[%s4975_s26 + $0xa60] sm:$0xff] }
  0x28   : > { %254 = vst [vmem:[%s4980_s27 + $0x150] sm:$0xff] %v253_v42  ;;  %256 = vst [vmem:[%s4980_s27 + $0x158] sm:$0xff] %v255_v43  ;;  %v259_v45 = vld [vmem:[%s4975_s26 + $0xca8] sm:$0xff]  ;;  %v261_v46 = vld [vmem:[%s4975_s26 + $0xcb0] sm:$0xff] }
  0x29   : > { %258 = vst [vmem:[%s4980_s27 + $0x160] sm:$0xff] %v257_v44  ;;  %v263_v47 = vld [vmem:[%s4975_s26 + $0xcb8] sm:$0xff]  ;;  %260 = vst [vmem:[%s4980_s27 + $0x168] sm:$0xff] %v259_v45  ;;  %v265_v48 = vld [vmem:[%s4975_s26 + $0xcc0] sm:$0xff] }
  0x2a   : > { %262 = vst [vmem:[%s4980_s27 + $0x170] sm:$0xff] %v261_v46  ;;  %264 = vst [vmem:[%s4980_s27 + $0x178] sm:$0xff] %v263_v47  ;;  %v267_v49 = vld [vmem:[%s4975_s26 + $0xcc8] sm:$0xff]  ;;  %v269_v50 = vld [vmem:[%s4975_s26 + $0xcd0] sm:$0xff] }
  0x2b   : > { %266 = vst [vmem:[%s4980_s27 + $0x180] sm:$0xff] %v265_v48  ;;  %268 = vst [vmem:[%s4980_s27 + $0x188] sm:$0xff] %v267_v49  ;;  %v271_v51 = vld [vmem:[%s4975_s26 + $0xcd8] sm:$0xff]  ;;  %v273_v52 = vld [vmem:[%s4975_s26 + $0xce0] sm:$0xff] }
  0x2c   : > { %270 = vst [vmem:[%s4980_s27 + $0x190] sm:$0xff] %v269_v50  ;;  %v275_v53 = vld [vmem:[%s4975_s26 + $0xce8] sm:$0xff]  ;;  %272 = vst [vmem:[%s4980_s27 + $0x198] sm:$0xff] %v271_v51  ;;  %v277_v54 = vld [vmem:[%s4975_s26 + $0xf30] sm:$0xff] }
  0x2d   : > { %274 = vst [vmem:[%s4980_s27 + $0x1a0] sm:$0xff] %v273_v52  ;;  %276 = vst [vmem:[%s4980_s27 + $0x1a8] sm:$0xff] %v275_v53  ;;  %v279_v55 = vld [vmem:[%s4975_s26 + $0xf38] sm:$0xff]  ;;  %v281_v56 = vld [vmem:[%s4975_s26 + $0xf40] sm:$0xff] }
  0x2e   : > { %278 = vst [vmem:[%s4980_s27 + $0x1b0] sm:$0xff] %v277_v54  ;;  %280 = vst [vmem:[%s4980_s27 + $0x1b8] sm:$0xff] %v279_v55  ;;  %v283_v57 = vld [vmem:[%s4975_s26 + $0xf48] sm:$0xff]  ;;  %v285_v58 = vld [vmem:[%s4975_s26 + $0xf50] sm:$0xff] }
  0x2f   : > { %282 = vst [vmem:[%s4980_s27 + $0x1c0] sm:$0xff] %v281_v56  ;;  %v287_v59 = vld [vmem:[%s4975_s26 + $0xf58] sm:$0xff]  ;;  %284 = vst [vmem:[%s4980_s27 + $0x1c8] sm:$0xff] %v283_v57  ;;  %v289_v60 = vld [vmem:[%s4975_s26 + $0xf60] sm:$0xff] }
  0x30   : > { %286 = vst [vmem:[%s4980_s27 + $0x1d0] sm:$0xff] %v285_v58  ;;  %288 = vst [vmem:[%s4980_s27 + $0x1d8] sm:$0xff] %v287_v59  ;;  %v291_v61 = vld [vmem:[%s4975_s26 + $0xf68] sm:$0xff]  ;;  %v293_v62 = vld [vmem:[%s4975_s26 + $0xf70] sm:$0xff] }
  0x31   : > { %290 = vst [vmem:[%s4980_s27 + $0x1e0] sm:$0xff] %v289_v60  ;;  %292 = vst [vmem:[%s4980_s27 + $0x1e8] sm:$0xff] %v291_v61  ;;  %v295_v63 = vld [vmem:[%s4975_s26 + $0x11b8] sm:$0xff]  ;;  %v297_v0 = vld [vmem:[%s4975_s26 + $0x11c0] sm:$0xff] }
  0x32   : > { %294 = vst [vmem:[%s4980_s27 + $0x1f0] sm:$0xff] %v293_v62  ;;  %v299_v1 = vld [vmem:[%s4975_s26 + $0x11c8] sm:$0xff]  ;;  %296 = vst [vmem:[%s4980_s27 + $0x1f8] sm:$0xff] %v295_v63  ;;  %v301_v2 = vld [vmem:[%s4975_s26 + $0x11d0] sm:$0xff] }
  0x33   : > { %298 = vst [vmem:[%s4980_s27 + $0x200] sm:$0xff] %v297_v0  ;;  %300 = vst [vmem:[%s4980_s27 + $0x208] sm:$0xff] %v299_v1  ;;  %v303_v3 = vld [vmem:[%s4975_s26 + $0x11d8] sm:$0xff]  ;;  %v305_v4 = vld [vmem:[%s4975_s26 + $0x11e0] sm:$0xff] }
  0x34   : > { %302 = vst [vmem:[%s4980_s27 + $0x210] sm:$0xff] %v301_v2  ;;  %304 = vst [vmem:[%s4980_s27 + $0x218] sm:$0xff] %v303_v3  ;;  %v307_v5 = vld [vmem:[%s4975_s26 + $0x11e8] sm:$0xff]  ;;  %v309_v6 = vld [vmem:[%s4975_s26 + $0x11f0] sm:$0xff] }
  0x35   : > { %306 = vst [vmem:[%s4980_s27 + $0x220] sm:$0xff] %v305_v4  ;;  %v311_v7 = vld [vmem:[%s4975_s26 + $0x11f8] sm:$0xff]  ;;  %308 = vst [vmem:[%s4980_s27 + $0x228] sm:$0xff] %v307_v5  ;;  %v313_v8 = vld [vmem:[%s4975_s26 + $0x1440] sm:$0xff] }
  0x36   : > { %310 = vst [vmem:[%s4980_s27 + $0x230] sm:$0xff] %v309_v6  ;;  %312 = vst [vmem:[%s4980_s27 + $0x238] sm:$0xff] %v311_v7  ;;  %v315_v9 = vld [vmem:[%s4975_s26 + $0x1448] sm:$0xff]  ;;  %v317_v10 = vld [vmem:[%s4975_s26 + $0x1450] sm:$0xff] }
  0x37   : > { %314 = vst [vmem:[%s4980_s27 + $0x240] sm:$0xff] %v313_v8  ;;  %316 = vst [vmem:[%s4980_s27 + $0x248] sm:$0xff] %v315_v9  ;;  %v319_v11 = vld [vmem:[%s4975_s26 + $0x1458] sm:$0xff]  ;;  %v321_v12 = vld [vmem:[%s4975_s26 + $0x1460] sm:$0xff] }
  0x38   : > { %318 = vst [vmem:[%s4980_s27 + $0x250] sm:$0xff] %v317_v10  ;;  %v323_v13 = vld [vmem:[%s4975_s26 + $0x1468] sm:$0xff]  ;;  %320 = vst [vmem:[%s4980_s27 + $0x258] sm:$0xff] %v319_v11  ;;  %v325_v14 = vld [vmem:[%s4975_s26 + $0x1470] sm:$0xff] }
  0x39   : > { %322 = vst [vmem:[%s4980_s27 + $0x260] sm:$0xff] %v321_v12  ;;  %324 = vst [vmem:[%s4980_s27 + $0x268] sm:$0xff] %v323_v13  ;;  %v327_v15 = vld [vmem:[%s4975_s26 + $0x1478] sm:$0xff]  ;;  %v329_v16 = vld [vmem:[%s4975_s26 + $0x1480] sm:$0xff] }
  0x3a   : > { %326 = vst [vmem:[%s4980_s27 + $0x270] sm:$0xff] %v325_v14  ;;  %328 = vst [vmem:[%s4980_s27 + $0x278] sm:$0xff] %v327_v15  ;;  %v331_v17 = vld [vmem:[%s4975_s26 + $0x16c8] sm:$0xff]  ;;  %v333_v18 = vld [vmem:[%s4975_s26 + $0x16d0] sm:$0xff] }
  0x3b   : > { %330 = vst [vmem:[%s4980_s27 + $0x280] sm:$0xff] %v329_v16  ;;  %v335_v19 = vld [vmem:[%s4975_s26 + $0x16d8] sm:$0xff]  ;;  %332 = vst [vmem:[%s4980_s27 + $0x288] sm:$0xff] %v331_v17  ;;  %v337_v20 = vld [vmem:[%s4975_s26 + $0x16e0] sm:$0xff] }
  0x3c   : > { %334 = vst [vmem:[%s4980_s27 + $0x290] sm:$0xff] %v333_v18  ;;  %336 = vst [vmem:[%s4980_s27 + $0x298] sm:$0xff] %v335_v19  ;;  %v339_v21 = vld [vmem:[%s4975_s26 + $0x16e8] sm:$0xff]  ;;  %v341_v22 = vld [vmem:[%s4975_s26 + $0x16f0] sm:$0xff] }
  0x3d   : > { %338 = vst [vmem:[%s4980_s27 + $0x2a0] sm:$0xff] %v337_v20  ;;  %340 = vst [vmem:[%s4980_s27 + $0x2a8] sm:$0xff] %v339_v21  ;;  %v343_v23 = vld [vmem:[%s4975_s26 + $0x16f8] sm:$0xff]  ;;  %v345_v24 = vld [vmem:[%s4975_s26 + $0x1700] sm:$0xff] }
  0x3e   : > { %342 = vst [vmem:[%s4980_s27 + $0x2b0] sm:$0xff] %v341_v22  ;;  %v347_v25 = vld [vmem:[%s4975_s26 + $0x1708] sm:$0xff]  ;;  %344 = vst [vmem:[%s4980_s27 + $0x2b8] sm:$0xff] %v343_v23 }
  0x3f   : > { %346 = vst [vmem:[%s4980_s27 + $0x2c0] sm:$0xff] %v345_v24  ;;  %348 = vst [vmem:[%s4980_s27 + $0x2c8] sm:$0xff] %v347_v25 }
  0x40 PF: > { %p3680_p6 = scmp.ge.s32.totalorder %s4909_s16, 1  ;;  %p363_p7 = scmp.lt.s32.totalorder %s4909_s16, 10 }
  0x42   : > { %p364_p8 = pnand %p3680_p6, %p363_p7 }
  0x43   : > { %s370_s28 = sand.u32 (!%p364_p8), 1, %s4893_s12   ;;  %s402_s29 = smul.u32 (!%p364_p8), 288, %s4901_s14 }
  0x44   : > { %367 = sbr.rel (%p364_p8) target bundleno = 659 (0x293), region = 51  ;;  %p3683_p10 = scmp.ne.s32.totalorder (!%p364_p8), %s4901_s14, 0 }
  0x45   : > { %s4262_s30 = smul.u32 (!%p364_p8), 720, %s370_s28  ;;  %p403_p9 = scmp.lt.s32.totalorder (!%p364_p8), %s402_s29, 2591 }
  0x47   : > { %s5168_s8 = scalar_lea.vmem (!%p364_p8), [#allocation2], %s4262_s30 }
  0x4b   : > { %s5909_s29 = smov (!%p403_p9, %s402_s29), 2591  ;;  %419 = sbr.rel (%p3683_p10) target bundleno = 87 (0x57), region = 59 }
  0x4c   : > { %s4068_s4 = sshll.u32 %s5909_s29, 3  ;;  %v4911_v26 = vmov (!%p3683_p10), 0.0  }
  0x4d   : > { %s5166_s7 = scalar_lea.vmem %s5899_s1, %s4068_s4  ;;  %420 = vst [vmem:[%s5901_s3] sm:$0xff] (!%p3683_p10), %v4911_v26  ;;  %421 = vst [vmem:[%s5901_s3 + $0x8] sm:$0xff] (!%p3683_p10), %v4911_v26 }
  0x4e   : > { %422 = vst [vmem:[%s5901_s3 + $0x10] sm:$0xff] (!%p3683_p10), %v4911_v26  ;;  %423 = vst [vmem:[%s5901_s3 + $0x18] sm:$0xff] (!%p3683_p10), %v4911_v26 }
  0x4f   : > { %424 = vst [vmem:[%s5901_s3 + $0x20] sm:$0xff] (!%p3683_p10), %v4911_v26  ;;  %425 = vst [vmem:[%s5901_s3 + $0x28] sm:$0xff] (!%p3683_p10), %v4911_v26 }
  0x50   : > { %426 = vst [vmem:[%s5901_s3 + $0x30] sm:$0xff] (!%p3683_p10), %v4911_v26  ;;  %427 = vst [vmem:[%s5901_s3 + $0x38] sm:$0xff] (!%p3683_p10), %v4911_v26 }
  0x51   : > { %428 = vst [vmem:[%s5901_s3 + $0x40] sm:$0xff] (!%p3683_p10), %v4911_v26  ;;  %429 = vst [vmem:[%s5901_s3 + $0x48] sm:$0xff] (!%p3683_p10), %v4911_v26 }
  0x52   : > { %430 = vst [vmem:[%s5901_s3 + $0x50] sm:$0xff] %v4911_v26  ;;  %431 = vst [vmem:[%s5901_s3 + $0x58] sm:$0xff] %v4911_v26 }
  0x53   : > { %432 = vst [vmem:[%s5901_s3 + $0x60] sm:$0xff] %v4911_v26  ;;  %433 = vst [vmem:[%s5901_s3 + $0x68] sm:$0xff] %v4911_v26 }
  0x54   : > { %434 = vst [vmem:[%s5901_s3 + $0x70] sm:$0xff] %v4911_v26  ;;  %435 = vst [vmem:[%s5901_s3 + $0x78] sm:$0xff] %v4911_v26 }
  0x55   : > { %436 = vst [vmem:[%s5901_s3 + $0x80] sm:$0xff] %v4911_v26  ;;  %437 = vst [vmem:[%s5901_s3 + $0x88] sm:$0xff] %v4911_v26 }
  0x56   : > { %438 = vst [vmem:[%s5901_s3 + $0x90] sm:$0xff] %v4911_v26  ;;  %439 = vst [vmem:[%s5901_s3 + $0x98] sm:$0xff] %v4911_v26 }
  0x57 PF: > { %v4304_v27 = vld [vmem:[%s5166_s7 + $0x4] ss:$8 sps:$4 sm:$0xff]   ;;  %v4308_v29 = vld [vmem:[%s5166_s7] ss:$8 sps:$4 sm:$0xff]   ;;  %v4310_v31 = vld [vmem:[%s5166_s7 + $0x14] ss:$8 sps:$4 sm:$0xff]  }
  0x58   : > { %v4306_v28 = vld [vmem:[%s5166_s7 + $0x404] ss:$8 sps:$4 sm:$0xff]   ;;  %2728 = vmatprep.subr.bf16.mxu1 %v4304_v27  ;;  %v4309_v30 = vld [vmem:[%s5166_s7 + $0x400] ss:$8 sps:$4 sm:$0xff]   ;;  %v4312_v32 = vld [vmem:[%s5166_s7 + $0x414] ss:$8 sps:$4 sm:$0xff]  }
  0x59   : > { %3060 = vmatprep.subr.bf16.mxu0 %v4306_v28  ;;  %2729 = vmatpush1.bf16.msra.mxu1 %v4308_v29  ;;  %v4314_v33 = vld [vmem:[%s5166_s7 + $0x10] ss:$8 sps:$4 sm:$0xff]   ;;  %v4316_v35 = vld [vmem:[%s5166_s7 + $0x24] ss:$8 sps:$4 sm:$0xff]   ;;  %v4320_v37 = vld [vmem:[%s5166_s7 + $0x20] ss:$8 sps:$4 sm:$0xff]  }
  0x5a   : > { %3061 = vmatpush1.bf16.msra.mxu0 %v4309_v30  ;;  %2730 = vmatprep.subr.bf16.mxu1 %v4310_v31  ;;  %v4315_v34 = vld [vmem:[%s5166_s7 + $0x410] ss:$8 sps:$4 sm:$0xff]   ;;  %v4318_v36 = vld [vmem:[%s5166_s7 + $0x424] ss:$8 sps:$4 sm:$0xff]   ;;  %v4321_v38 = vld [vmem:[%s5166_s7 + $0x420] ss:$8 sps:$4 sm:$0xff]  }
  0x5b   : > { %3062 = vmatprep.subr.bf16.mxu0 %v4312_v32  ;;  %v4322_v39 = vld [vmem:[%s5166_s7 + $0x34] ss:$8 sps:$4 sm:$0xff]   ;;  %v4326_v41 = vld [vmem:[%s5166_s7 + $0x30] ss:$8 sps:$4 sm:$0xff]   ;;  %v4328_v43 = vld [vmem:[%s5166_s7 + $0x44] ss:$8 sps:$4 sm:$0xff]  }
  0x5c   : > { %v4324_v40 = vld [vmem:[%s5166_s7 + $0x434] ss:$8 sps:$4 sm:$0xff]   ;;  %v4327_v42 = vld [vmem:[%s5166_s7 + $0x430] ss:$8 sps:$4 sm:$0xff]   ;;  %v4330_v44 = vld [vmem:[%s5166_s7 + $0x444] ss:$8 sps:$4 sm:$0xff]  }
  0x5d   : > { %2731 = vmatpush1.bf16.msra.mxu1 %v4314_v33  ;;  %v4332_v45 = vld [vmem:[%s5166_s7 + $0x40] ss:$8 sps:$4 sm:$0xff]   ;;  %v4334_v47 = vld [vmem:[%s5166_s7 + $0x54] ss:$8 sps:$4 sm:$0xff]   ;;  %v4338_v49 = vld [vmem:[%s5166_s7 + $0x50] ss:$8 sps:$4 sm:$0xff]  }
  0x5e   : > { %3063 = vmatpush1.bf16.msra.mxu0 %v4315_v34  ;;  %2732 = vmatprep.subr.bf16.mxu1 %v4316_v35  ;;  %v4333_v46 = vld [vmem:[%s5166_s7 + $0x440] ss:$8 sps:$4 sm:$0xff]   ;;  %v4336_v48 = vld [vmem:[%s5166_s7 + $0x454] ss:$8 sps:$4 sm:$0xff]   ;;  %v4339_v50 = vld [vmem:[%s5166_s7 + $0x450] ss:$8 sps:$4 sm:$0xff]  }
  0x5f   : > { %3064 = vmatprep.subr.bf16.mxu0 %v4318_v36  ;;  %v4340_v51 = vld [vmem:[%s5166_s7 + $0x64] ss:$8 sps:$4 sm:$0xff]   ;;  %v4344_v53 = vld [vmem:[%s5166_s7 + $0x60] ss:$8 sps:$4 sm:$0xff]   ;;  %v4346_v55 = vld [vmem:[%s5166_s7 + $0x74] ss:$8 sps:$4 sm:$0xff]  }
  0x60   : > { %v4342_v52 = vld [vmem:[%s5166_s7 + $0x464] ss:$8 sps:$4 sm:$0xff]   ;;  %v4345_v54 = vld [vmem:[%s5166_s7 + $0x460] ss:$8 sps:$4 sm:$0xff]   ;;  %v4348_v56 = vld [vmem:[%s5166_s7 + $0x474] ss:$8 sps:$4 sm:$0xff]  }
  0x61   : > { %2733 = vmatpush1.bf16.msra.mxu1 %v4320_v37  ;;  %v4350_v57 = vld [vmem:[%s5166_s7 + $0x70] ss:$8 sps:$4 sm:$0xff]   ;;  %v4352_v59 = vld [vmem:[%s5166_s7 + $0x84] ss:$8 sps:$4 sm:$0xff]   ;;  %v4356_v61 = vld [vmem:[%s5166_s7 + $0x80] ss:$8 sps:$4 sm:$0xff]  }
  0x62   : > { %3065 = vmatpush1.bf16.msra.mxu0 %v4321_v38  ;;  %2734 = vmatprep.subr.bf16.mxu1 %v4322_v39  ;;  %v4351_v58 = vld [vmem:[%s5166_s7 + $0x470] ss:$8 sps:$4 sm:$0xff]   ;;  %v4354_v60 = vld [vmem:[%s5166_s7 + $0x484] ss:$8 sps:$4 sm:$0xff]   ;;  %v4357_v62 = vld [vmem:[%s5166_s7 + $0x480] ss:$8 sps:$4 sm:$0xff]  }
  0x63   : > { %3066 = vmatprep.subr.bf16.mxu0 %v4324_v40  ;;  %v4358_v63 = vld [vmem:[%s5166_s7 + $0x94] ss:$8 sps:$4 sm:$0xff]   ;;  %v4362_v1 = vld [vmem:[%s5166_s7 + $0x90] ss:$8 sps:$4 sm:$0xff]   ;;  %v4364_v3 = vld [vmem:[%s5166_s7 + $0xa4] ss:$8 sps:$4 sm:$0xff]  }
  0x64   : > { %v4360_v0 = vld [vmem:[%s5166_s7 + $0x494] ss:$8 sps:$4 sm:$0xff]   ;;  %v4363_v2 = vld [vmem:[%s5166_s7 + $0x490] ss:$8 sps:$4 sm:$0xff]   ;;  %v4366_v4 = vld [vmem:[%s5166_s7 + $0x4a4] ss:$8 sps:$4 sm:$0xff]  }
  0x65   : > { %2735 = vmatpush1.bf16.msra.mxu1 %v4326_v41  ;;  %v4368_v5 = vld [vmem:[%s5166_s7 + $0xa0] ss:$8 sps:$4 sm:$0xff]   ;;  %v4370_v7 = vld [vmem:[%s5166_s7 + $0xb4] ss:$8 sps:$4 sm:$0xff]   ;;  %v4374_v9 = vld [vmem:[%s5166_s7 + $0xb0] ss:$8 sps:$4 sm:$0xff]  }
  0x66   : > { %3067 = vmatpush1.bf16.msra.mxu0 %v4327_v42  ;;  %2736 = vmatprep.subr.bf16.mxu1 %v4328_v43  ;;  %v4369_v6 = vld [vmem:[%s5166_s7 + $0x4a0] ss:$8 sps:$4 sm:$0xff]   ;;  %v4372_v8 = vld [vmem:[%s5166_s7 + $0x4b4] ss:$8 sps:$4 sm:$0xff]   ;;  %v4375_v10 = vld [vmem:[%s5166_s7 + $0x4b0] ss:$8 sps:$4 sm:$0xff]  }
  0x67   : > { %3068 = vmatprep.subr.bf16.mxu0 %v4330_v44  ;;  %v4402_v11 = vld [vmem:[%s5168_s8 + $0x4] ss:$72 sps:$4 sm:$0xff]   ;;  %v4380_v15 = vld [vmem:[%s5166_s7 + $0xc0] ss:$8 sps:$4 sm:$0xff]   ;;  %v4386_v19 = vld [vmem:[%s5166_s7 + $0xd0] ss:$8 sps:$4 sm:$0xff]  }
  0x68   : > { %v4376_v12 = vld [vmem:[%s5166_s7 + $0xc4] ss:$8 sps:$4 sm:$0xff]   ;;  %2760 = vmatprep.mubr.bf16.mxu1 %v4402_v11  ;;  %v4381_v16 = vld [vmem:[%s5166_s7 + $0x4c0] ss:$8 sps:$4 sm:$0xff]   ;;  %v4382_v17 = vld [vmem:[%s5166_s7 + $0xd4] ss:$8 sps:$4 sm:$0xff]  }
  0x69   : > { %2737 = vmatpush1.bf16.msra.mxu1 %v4332_v45  ;;  %v4378_v13 = vld [vmem:[%s5166_s7 + $0x4c4] ss:$8 sps:$4 sm:$0xff]   ;;  %v4384_v18 = vld [vmem:[%s5166_s7 + $0x4d4] ss:$8 sps:$4 sm:$0xff]   ;;  %v4387_v20 = vld [vmem:[%s5166_s7 + $0x4d0] ss:$8 sps:$4 sm:$0xff]  }
  0x6a   : > { %3069 = vmatpush1.bf16.msra.mxu0 %v4333_v46  ;;  %2738 = vmatprep.subr.bf16.mxu1 %v4334_v47  ;;  %v4408_v14 = vld [vmem:[%s5168_s8 + $0x24] ss:$72 sps:$4 sm:$0xff]   ;;  %v4392_v23 = vld [vmem:[%s5166_s7 + $0xe0] ss:$8 sps:$4 sm:$0xff]   ;;  %v4398_v27 = vld [vmem:[%s5166_s7 + $0xf0] ss:$8 sps:$4 sm:$0xff]  }
  0x6b   : > { %3070 = vmatprep.subr.bf16.mxu0 %v4336_v48  ;;  %3092 = vmatprep.mubr.bf16.mxu0 %v4408_v14  ;;  %v4388_v21 = vld [vmem:[%s5166_s7 + $0xe4] ss:$8 sps:$4 sm:$0xff]   ;;  %v4393_v24 = vld [vmem:[%s5166_s7 + $0x4e0] ss:$8 sps:$4 sm:$0xff]   ;;  %v4394_v25 = vld [vmem:[%s5166_s7 + $0xf4] ss:$8 sps:$4 sm:$0xff]  }
  0x6c   : > { %v4390_v22 = vld [vmem:[%s5166_s7 + $0x4e4] ss:$8 sps:$4 sm:$0xff]   ;;  %v4396_v26 = vld [vmem:[%s5166_s7 + $0x4f4] ss:$8 sps:$4 sm:$0xff]   ;;  %v4399_v28 = vld [vmem:[%s5166_s7 + $0x4f0] ss:$8 sps:$4 sm:$0xff]  }
  0x6d   : > { %2739 = vmatpush1.bf16.msra.mxu1 %v4338_v49  ;;  %v4405_v29 = vld [vmem:[%s5166_s7 + $0x104] ss:$8 sps:$4 sm:$0xff]   ;;  %v4400_v31 = vld [vmem:[%s5168_s8] ss:$72 sps:$4 sm:$0xff]   ;;  %v4414_v35 = vld [vmem:[%s5166_s7 + $0x114] ss:$8 sps:$4 sm:$0xff]  }
  0x6e   : > { %3071 = vmatpush1.bf16.msra.mxu0 %v4339_v50  ;;  %2740 = vmatprep.subr.bf16.mxu1 %v4340_v51  ;;  %v4411_v30 = vld [vmem:[%s5166_s7 + $0x504] ss:$8 sps:$4 sm:$0xff]   ;;  %v4403_v32 = vld [vmem:[%s5166_s7 + $0x100] ss:$8 sps:$4 sm:$0xff]   ;;  %v4417_v36 = vld [vmem:[%s5166_s7 + $0x514] ss:$8 sps:$4 sm:$0xff]  }
  0x6f   : > { %3072 = vmatprep.subr.bf16.mxu0 %v4342_v52  ;;  %v4406_v33 = vld [vmem:[%s5168_s8 + $0x20] ss:$72 sps:$4 sm:$0xff]   ;;  %v4454_v39 = vld [vmem:[%s5168_s8 + $0x94] ss:$72 sps:$4 sm:$0xff]   ;;  %v4464_v45 = vld [vmem:[%s5168_s8 + $0x90] ss:$72 sps:$4 sm:$0xff]  }
  0x70   : > { %v4409_v34 = vld [vmem:[%s5166_s7 + $0x500] ss:$8 sps:$4 sm:$0xff]   ;;  %v4412_v37 = vld [vmem:[%s5166_s7 + $0x110] ss:$8 sps:$4 sm:$0xff]   ;;  %v4420_v40 = vld [vmem:[%s5166_s7 + $0x124] ss:$8 sps:$4 sm:$0xff]  }
  0x71   : > { %2741 = vmatpush1.bf16.msra.mxu1 %v4344_v53  ;;  %v4415_v38 = vld [vmem:[%s5166_s7 + $0x510] ss:$8 sps:$4 sm:$0xff]   ;;  %v4423_v41 = vld [vmem:[%s5166_s7 + $0x524] ss:$8 sps:$4 sm:$0xff]   ;;  %v4418_v43 = vld [vmem:[%s5166_s7 + $0x120] ss:$8 sps:$4 sm:$0xff]  }
  0x72   : > { %3073 = vmatpush1.bf16.msra.mxu0 %v4345_v54  ;;  %2742 = vmatprep.subr.bf16.mxu1 %v4346_v55  ;;  %v4459_v42 = vld [vmem:[%s5168_s8 + $0xb4] ss:$72 sps:$4 sm:$0xff]   ;;  %v4421_v44 = vld [vmem:[%s5166_s7 + $0x520] ss:$8 sps:$4 sm:$0xff]   ;;  %v4424_v49 = vld [vmem:[%s5166_s7 + $0x130] ss:$8 sps:$4 sm:$0xff]  }
  0x73   : > { %3074 = vmatprep.subr.bf16.mxu0 %v4348_v56  ;;  %v4465_v46 = vld [vmem:[%s5168_s8 + $0xb0] ss:$72 sps:$4 sm:$0xff]   ;;  %v4426_v47 = vld [vmem:[%s5166_s7 + $0x134] ss:$8 sps:$4 sm:$0xff]   ;;  %v4432_v52 = vld [vmem:[%s5166_s7 + $0x144] ss:$8 sps:$4 sm:$0xff]  }
  0x74   : > { %v4429_v48 = vld [vmem:[%s5166_s7 + $0x534] ss:$8 sps:$4 sm:$0xff]   ;;  %v4427_v50 = vld [vmem:[%s5166_s7 + $0x530] ss:$8 sps:$4 sm:$0xff]   ;;  %v4435_v53 = vld [vmem:[%s5166_s7 + $0x544] ss:$8 sps:$4 sm:$0xff]  }
  0x75   : > { %2743 = vmatpush1.bf16.msra.mxu1 %v4350_v57  ;;  %v4472_v51 = vld [vmem:[%s5168_s8 + $0x124] ss:$72 sps:$4 sm:$0xff]   ;;  %v4430_v55 = vld [vmem:[%s5166_s7 + $0x140] ss:$8 sps:$4 sm:$0xff]   ;;  %p4062_p11 = scmp.ne.s32.totalorder %s4901_s14, 8 }
  0x76   : > { %3075 = vmatpush1.bf16.msra.mxu0 %v4351_v58  ;;  %2744 = vmatprep.subr.bf16.mxu1 %v4352_v59  ;;  %v4477_v54 = vld [vmem:[%s5168_s8 + $0x144] ss:$72 sps:$4 sm:$0xff]   ;;  %v4433_v56 = vld [vmem:[%s5166_s7 + $0x540] ss:$8 sps:$4 sm:$0xff]  }
  0x77   : > { %3076 = vmatprep.subr.bf16.mxu0 %v4354_v60  ;;  %v4482_v57 = vld [vmem:[%s5168_s8 + $0x120] ss:$72 sps:$4 sm:$0xff]   ;;  %v4438_v59 = vld [vmem:[%s5166_s7 + $0x154] ss:$8 sps:$4 sm:$0xff]  }
  0x78   : > { %v4483_v58 = vld [vmem:[%s5168_s8 + $0x140] ss:$72 sps:$4 sm:$0xff]   ;;  %v4441_v60 = vld [vmem:[%s5166_s7 + $0x554] ss:$8 sps:$4 sm:$0xff]  }
  0x79   : > { %2745 = vmatpush1.bf16.msra.mxu1 %v4356_v61  ;;  %v4436_v61 = vld [vmem:[%s5166_s7 + $0x150] ss:$8 sps:$4 sm:$0xff]   ;;  %v4508_v11 = vld [vmem:[%s5168_s8 + $0x244] ss:$72 sps:$4 sm:$0xff]  }
  0x7a   : > { %3077 = vmatpush1.bf16.msra.mxu0 %v4357_v62  ;;  %2746 = vmatprep.subr.bf16.mxu1 %v4358_v63  ;;  %v4439_v62 = vld [vmem:[%s5166_s7 + $0x550] ss:$8 sps:$4 sm:$0xff]   ;;  %v4490_v63 = vld [vmem:[%s5168_s8 + $0x1b4] ss:$72 sps:$4 sm:$0xff]   ;;  %v4513_v14 = vld [vmem:[%s5168_s8 + $0x264] ss:$72 sps:$4 sm:$0xff]  }
  0x7b   : > { %3078 = vmatprep.subr.bf16.mxu0 %v4360_v0  ;;  %v4444_v0 = vld [vmem:[%s5166_s7 + $0x164] ss:$8 sps:$4 sm:$0xff]  }
  0x7d   : > { %2747 = vmatpush1.bf16.msra.mxu1 %v4362_v1  ;;  %v4447_v1 = vld [vmem:[%s5166_s7 + $0x564] ss:$8 sps:$4 sm:$0xff]  }
  0x7e   : > { %3079 = vmatpush1.bf16.msra.mxu0 %v4363_v2  ;;  %2748 = vmatprep.subr.bf16.mxu1 %v4364_v3  ;;  %v4495_v2 = vld [vmem:[%s5168_s8 + $0x1d4] ss:$72 sps:$4 sm:$0xff]   ;;  %v4442_v3 = vld [vmem:[%s5166_s7 + $0x160] ss:$8 sps:$4 sm:$0xff]  }
  0x7f   : > { %3080 = vmatprep.subr.bf16.mxu0 %v4366_v4  ;;  %v4445_v4 = vld [vmem:[%s5166_s7 + $0x560] ss:$8 sps:$4 sm:$0xff]  }
  0x81   : > { %2749 = vmatpush1.bf16.msra.mxu1 %v4368_v5  ;;  %v4500_v5 = vld [vmem:[%s5168_s8 + $0x1b0] ss:$72 sps:$4 sm:$0xff]  }
  0x82   : > { %3081 = vmatpush1.bf16.msra.mxu0 %v4369_v6  ;;  %2750 = vmatprep.subr.bf16.mxu1 %v4370_v7  ;;  %v4501_v6 = vld [vmem:[%s5168_s8 + $0x1d0] ss:$72 sps:$4 sm:$0xff]   ;;  %v4450_v7 = vld [vmem:[%s5166_s7 + $0x174] ss:$8 sps:$4 sm:$0xff]  }
  0x83   : > { %3082 = vmatprep.subr.bf16.mxu0 %v4372_v8  ;;  %v4453_v8 = vld [vmem:[%s5166_s7 + $0x574] ss:$8 sps:$4 sm:$0xff]  }
  0x85   : > { %2751 = vmatpush1.bf16.msra.mxu1 %v4374_v9  ;;  %v4448_v9 = vld [vmem:[%s5166_s7 + $0x170] ss:$8 sps:$4 sm:$0xff]  }
  0x86   : > { %3083 = vmatpush1.bf16.msra.mxu0 %v4375_v10  ;;  %2752 = vmatprep.subr.bf16.mxu1 %v4376_v12  ;;  %v4451_v10 = vld [vmem:[%s5166_s7 + $0x570] ss:$8 sps:$4 sm:$0xff]   ;;  %v4458_v12 = vld [vmem:[%s5166_s7 + $0x184] ss:$8 sps:$4 sm:$0xff]  }
  0x87   : > { %3084 = vmatprep.subr.bf16.mxu0 %v4378_v13  ;;  %v4463_v13 = vld [vmem:[%s5166_s7 + $0x584] ss:$8 sps:$4 sm:$0xff]  }
  0x89   : > { %2753 = vmatpush1.bf16.msra.mxu1 %v4380_v15  ;;  %v4456_v15 = vld [vmem:[%s5166_s7 + $0x180] ss:$8 sps:$4 sm:$0xff]  }
  0x8a   : > { %3085 = vmatpush1.bf16.msra.mxu0 %v4381_v16  ;;  %2754 = vmatprep.subr.bf16.mxu1 %v4382_v17  ;;  %v4461_v16 = vld [vmem:[%s5166_s7 + $0x580] ss:$8 sps:$4 sm:$0xff]  }
  0x8b   : > { %3086 = vmatprep.subr.bf16.mxu0 %v4384_v18  ;;  %v4518_v17 = vld [vmem:[%s5168_s8 + $0x240] ss:$72 sps:$4 sm:$0xff]  }
  0x8c   : > { %v4519_v18 = vld [vmem:[%s5168_s8 + $0x260] ss:$72 sps:$4 sm:$0xff]  }
  0x8d   : > { %2755 = vmatpush1.bf16.msra.mxu1 %v4386_v19  ;;  %v4468_v19 = vld [vmem:[%s5166_s7 + $0x194] ss:$8 sps:$4 sm:$0xff]  }
  0x8e   : > { %3087 = vmatpush1.bf16.msra.mxu0 %v4387_v20  ;;  %2756 = vmatprep.subr.bf16.mxu1 %v4388_v21  ;;  %v4471_v20 = vld [vmem:[%s5166_s7 + $0x594] ss:$8 sps:$4 sm:$0xff]   ;;  %v4466_v21 = vld [vmem:[%s5166_s7 + $0x190] ss:$8 sps:$4 sm:$0xff]  }
  0x8f   : > { %3088 = vmatprep.subr.bf16.mxu0 %v4390_v22  ;;  %v4469_v22 = vld [vmem:[%s5166_s7 + $0x590] ss:$8 sps:$4 sm:$0xff]  }
  0x91   : > { %2757 = vmatpush1.bf16.msra.mxu1 %v4392_v23  ;;  %v4528_v23 = vld [vmem:[%s5168_s8 + $0xc] ss:$72 sps:$4 sm:$0xff]  }
  0x92   : > { %3089 = vmatpush1.bf16.msra.mxu0 %v4393_v24  ;;  %2758 = vmatprep.subr.bf16.mxu1 %v4394_v25  ;;  %v4476_v24 = vld [vmem:[%s5166_s7 + $0x1a4] ss:$8 sps:$4 sm:$0xff]  }
  0x93   : > { %3090 = vmatprep.subr.bf16.mxu0 %v4396_v26  ;;  %v4481_v25 = vld [vmem:[%s5166_s7 + $0x5a4] ss:$8 sps:$4 sm:$0xff]  }
  0x94   : > { %v4534_v26 = vld [vmem:[%s5168_s8 + $0x2c] ss:$72 sps:$4 sm:$0xff]  }
  0x95   : > { %2759 = vmatpush1.bf16.msra.mxu1 %v4398_v27  ;;  %v4474_v27 = vld [vmem:[%s5166_s7 + $0x1a0] ss:$8 sps:$4 sm:$0xff]  }
  0x96   : > { %3091 = vmatpush1.bf16.msra.mxu0 %v4399_v28  ;;  %2811 = vmatprep.subr.bf16.mxu1 %v4405_v29  ;;  %v4479_v28 = vld [vmem:[%s5166_s7 + $0x5a0] ss:$8 sps:$4 sm:$0xff]   ;;  %v4486_v29 = vld [vmem:[%s5166_s7 + $0x1b4] ss:$8 sps:$4 sm:$0xff]  }
  0x97   : > { %3143 = vmatprep.subr.bf16.mxu0 %v4411_v30  ;;  %v4489_v30 = vld [vmem:[%s5166_s7 + $0x5b4] ss:$8 sps:$4 sm:$0xff]  }
  0x98   : > { %2761 = vmatmul.mubr.bf16.vlgmr.msra.gmra.mrb[0].mxu1 %v4400_v31  ;;  %v4484_v31 = vld [vmem:[%s5166_s7 + $0x1b0] ss:$8 sps:$4 sm:$0xff]  }
  0x99   : > { %3093 = vmatmul.mubr.bf16.vlgmr.msra.gmra.mrb[0].mxu0 %v4406_v33  ;;  %2812 = vmatpush1.bf16.msra.mxu1 %v4403_v32  ;;  %v4487_v32 = vld [vmem:[%s5166_s7 + $0x5b0] ss:$8 sps:$4 sm:$0xff]   ;;  %v4494_v33 = vld [vmem:[%s5166_s7 + $0x1c4] ss:$8 sps:$4 sm:$0xff]  }
  0x9a   : > { %3144 = vmatpush1.bf16.msra.mxu0 %v4409_v34  ;;  %2813 = vmatprep.subr.bf16.mxu1 %v4414_v35  ;;  %v4499_v34 = vld [vmem:[%s5166_s7 + $0x5c4] ss:$8 sps:$4 sm:$0xff]   ;;  %v4492_v35 = vld [vmem:[%s5166_s7 + $0x1c0] ss:$8 sps:$4 sm:$0xff]  }
  0x9b   : > { %3145 = vmatprep.subr.bf16.mxu0 %v4417_v36  ;;  %2770 = vmatprep.mubr.bf16.mxu1 %v4454_v39  ;;  %v4497_v36 = vld [vmem:[%s5166_s7 + $0x5c0] ss:$8 sps:$4 sm:$0xff]   ;;  %v4502_v39 = vld [vmem:[%s5166_s7 + $0x1d0] ss:$8 sps:$4 sm:$0xff]  }
  0x9c   : > { %3102 = vmatprep.mubr.bf16.mxu0 %v4459_v42  ;;  %v4517_v42 = vld [vmem:[%s5166_s7 + $0x5e4] ss:$8 sps:$4 sm:$0xff]  }
  0x9d   : > { %2814 = vmatpush1.bf16.msra.mxu1 %v4412_v37  ;;  %v4504_v37 = vld [vmem:[%s5166_s7 + $0x1d4] ss:$8 sps:$4 sm:$0xff]  }
  0x9e   : > { %3146 = vmatpush1.bf16.msra.mxu0 %v4415_v38  ;;  %2815 = vmatprep.subr.bf16.mxu1 %v4420_v40  ;;  %v4507_v38 = vld [vmem:[%s5166_s7 + $0x5d4] ss:$8 sps:$4 sm:$0xff]   ;;  %v4505_v40 = vld [vmem:[%s5166_s7 + $0x5d0] ss:$8 sps:$4 sm:$0xff]  }
  0x9f   : > { %3147 = vmatprep.subr.bf16.mxu0 %v4423_v41  ;;  %v4512_v41 = vld [vmem:[%s5166_s7 + $0x1e4] ss:$8 sps:$4 sm:$0xff]  }
  0xa0   : > { %2771 = vmatmul.mubr.bf16.gmra.mrb[4].mxu1 %v4464_v45  ;;  %v4522_v45 = vld [vmem:[%s5166_s7 + $0x1f4] ss:$8 sps:$4 sm:$0xff]  }
  0xa1   : > { %3103 = vmatmul.mubr.bf16.gmra.mrb[4].mxu0 %v4465_v46  ;;  %2816 = vmatpush1.bf16.msra.mxu1 %v4418_v43  ;;  %v4510_v43 = vld [vmem:[%s5166_s7 + $0x1e0] ss:$8 sps:$4 sm:$0xff]   ;;  %v4525_v46 = vld [vmem:[%s5166_s7 + $0x5f4] ss:$8 sps:$4 sm:$0xff]  }
  0xa2   : > { %3148 = vmatpush1.bf16.msra.mxu0 %v4421_v44  ;;  %2817 = vmatprep.subr.bf16.mxu1 %v4426_v47  ;;  %v4515_v44 = vld [vmem:[%s5166_s7 + $0x5e0] ss:$8 sps:$4 sm:$0xff]   ;;  %v4520_v47 = vld [vmem:[%s5166_s7 + $0x1f0] ss:$8 sps:$4 sm:$0xff]  }
  0xa3   : > { %3149 = vmatprep.subr.bf16.mxu0 %v4429_v48  ;;  %2780 = vmatprep.mubr.bf16.mxu1 %v4472_v51  ;;  %v4523_v48 = vld [vmem:[%s5166_s7 + $0x5f0] ss:$8 sps:$4 sm:$0xff]  }
  0xa4   : > { %3112 = vmatprep.mubr.bf16.mxu0 %v4477_v54  ;;  %v4526_v51 = vld [vmem:[%s5168_s8 + $0x8] ss:$72 sps:$4 sm:$0xff]  }
  0xa5   : > { %2818 = vmatpush1.bf16.msra.mxu1 %v4424_v49  ;;  %v4531_v49 = vld [vmem:[%s5166_s7 + $0x204] ss:$8 sps:$4 sm:$0xff]   ;;  %v4535_v54 = vld [vmem:[%s5166_s7 + $0x600] ss:$8 sps:$4 sm:$0xff]  }
  0xa6   : > { %3150 = vmatpush1.bf16.msra.mxu0 %v4427_v50  ;;  %2819 = vmatprep.subr.bf16.mxu1 %v4432_v52  ;;  %v4537_v50 = vld [vmem:[%s5166_s7 + $0x604] ss:$8 sps:$4 sm:$0xff]   ;;  %v4529_v52 = vld [vmem:[%s5166_s7 + $0x200] ss:$8 sps:$4 sm:$0xff]  }
  0xa7   : > { %3151 = vmatprep.subr.bf16.mxu0 %v4435_v53  ;;  %v4532_v53 = vld [vmem:[%s5168_s8 + $0x28] ss:$72 sps:$4 sm:$0xff]  }
  0xa8   : > { %2781 = vmatmul.mubr.bf16.gmra.mrb[8].mxu1 %v4482_v57  ;;  %v4580_v57 = vld [vmem:[%s5168_s8 + $0x9c] ss:$72 sps:$4 sm:$0xff]  }
  0xa9   : > { %3113 = vmatmul.mubr.bf16.gmra.mrb[8].mxu0 %v4483_v58  ;;  %2820 = vmatpush1.bf16.msra.mxu1 %v4430_v55  ;;  %v4540_v55 = vld [vmem:[%s5166_s7 + $0x214] ss:$8 sps:$4 sm:$0xff]  }
  0xaa   : > { %3152 = vmatpush1.bf16.msra.mxu0 %v4433_v56  ;;  %2821 = vmatprep.subr.bf16.mxu1 %v4438_v59  ;;  %v4543_v56 = vld [vmem:[%s5166_s7 + $0x614] ss:$8 sps:$4 sm:$0xff]   ;;  %v4538_v59 = vld [vmem:[%s5166_s7 + $0x210] ss:$8 sps:$4 sm:$0xff]  }
  0xab   : > { %3153 = vmatprep.subr.bf16.mxu0 %v4441_v60  ;;  %2790 = vmatprep.mubr.bf16.mxu1 %v4490_v63  ;;  %v4585_v58 = vld [vmem:[%s5168_s8 + $0xbc] ss:$72 sps:$4 sm:$0xff]   ;;  %v4541_v60 = vld [vmem:[%s5166_s7 + $0x610] ss:$8 sps:$4 sm:$0xff]   ;;  %v4544_v63 = vld [vmem:[%s5166_s7 + $0x220] ss:$8 sps:$4 sm:$0xff]  }
  0xac   : > { %3122 = vmatprep.mubr.bf16.mxu0 %v4495_v2  ;;  %v4591_v2 = vld [vmem:[%s5168_s8 + $0xb8] ss:$72 sps:$4 sm:$0xff]  }
  0xad   : > { %2822 = vmatpush1.bf16.msra.mxu1 %v4436_v61  ;;  %v4546_v61 = vld [vmem:[%s5166_s7 + $0x224] ss:$8 sps:$4 sm:$0xff]  }
  0xae   : > { %3154 = vmatpush1.bf16.msra.mxu0 %v4439_v62  ;;  %2823 = vmatprep.subr.bf16.mxu1 %v4444_v0  ;;  %v4549_v62 = vld [vmem:[%s5166_s7 + $0x624] ss:$8 sps:$4 sm:$0xff]   ;;  %v4547_v0 = vld [vmem:[%s5166_s7 + $0x620] ss:$8 sps:$4 sm:$0xff]  }
  0xaf   : > { %3155 = vmatprep.subr.bf16.mxu0 %v4447_v1  ;;  %v4590_v1 = vld [vmem:[%s5168_s8 + $0x98] ss:$72 sps:$4 sm:$0xff]  }
  0xb0   : > { %2791 = vmatmul.mubr.bf16.gmra.mrb[12].mxu1 %v4500_v5  ;;  %v4598_v5 = vld [vmem:[%s5168_s8 + $0x12c] ss:$72 sps:$4 sm:$0xff]  }
  0xb1   : > { %3123 = vmatmul.mubr.bf16.gmra.mrb[12].mxu0 %v4501_v6  ;;  %2824 = vmatpush1.bf16.msra.mxu1 %v4442_v3  ;;  %v4552_v3 = vld [vmem:[%s5166_s7 + $0x234] ss:$8 sps:$4 sm:$0xff]  }
  0xb2   : > { %3156 = vmatpush1.bf16.msra.mxu0 %v4445_v4  ;;  %2825 = vmatprep.subr.bf16.mxu1 %v4450_v7  ;;  %v4555_v4 = vld [vmem:[%s5166_s7 + $0x634] ss:$8 sps:$4 sm:$0xff]   ;;  %v4550_v7 = vld [vmem:[%s5166_s7 + $0x230] ss:$8 sps:$4 sm:$0xff]  }
  0xb3   : > { %3157 = vmatprep.subr.bf16.mxu0 %v4453_v8  ;;  %2800 = vmatprep.mubr.bf16.mxu1 %v4508_v11  ;;  %v4603_v6 = vld [vmem:[%s5168_s8 + $0x14c] ss:$72 sps:$4 sm:$0xff]   ;;  %v4553_v8 = vld [vmem:[%s5166_s7 + $0x630] ss:$8 sps:$4 sm:$0xff]   ;;  %v4556_v11 = vld [vmem:[%s5166_s7 + $0x240] ss:$8 sps:$4 sm:$0xff]  }
  0xb4   : > { %3132 = vmatprep.mubr.bf16.mxu0 %v4513_v14  ;;  %v4609_v14 = vld [vmem:[%s5168_s8 + $0x148] ss:$72 sps:$4 sm:$0xff]  }
  0xb5   : > { %2826 = vmatpush1.bf16.msra.mxu1 %v4448_v9  ;;  %v4558_v9 = vld [vmem:[%s5166_s7 + $0x244] ss:$8 sps:$4 sm:$0xff]  }
  0xb6   : > { %3158 = vmatpush1.bf16.msra.mxu0 %v4451_v10  ;;  %2827 = vmatprep.subr.bf16.mxu1 %v4458_v12  ;;  %v4561_v10 = vld [vmem:[%s5166_s7 + $0x644] ss:$8 sps:$4 sm:$0xff]   ;;  %v4559_v12 = vld [vmem:[%s5166_s7 + $0x640] ss:$8 sps:$4 sm:$0xff]  }
  0xb7   : > { %3159 = vmatprep.subr.bf16.mxu0 %v4463_v13  ;;  %v4608_v13 = vld [vmem:[%s5168_s8 + $0x128] ss:$72 sps:$4 sm:$0xff]  }
  0xb8   : > { %2801 = vmatmul.mubr.bf16.gmra.mrb[16].mxu1 %v4518_v17  ;;  %v4616_v17 = vld [vmem:[%s5168_s8 + $0x1bc] ss:$72 sps:$4 sm:$0xff]  }
  0xb9   : > { %3133 = vmatmul.mubr.bf16.gmra.mrb[16].mxu0 %v4519_v18  ;;  %2828 = vmatpush1.bf16.msra.mxu1 %v4456_v15  ;;  %v4564_v15 = vld [vmem:[%s5166_s7 + $0x254] ss:$8 sps:$4 sm:$0xff]  }
  0xba   : > { %3160 = vmatpush1.bf16.msra.mxu0 %v4461_v16  ;;  %2829 = vmatprep.subr.bf16.mxu1 %v4468_v19  ;;  %v4567_v16 = vld [vmem:[%s5166_s7 + $0x654] ss:$8 sps:$4 sm:$0xff]   ;;  %v4562_v19 = vld [vmem:[%s5166_s7 + $0x250] ss:$8 sps:$4 sm:$0xff]  }
  0xbb   : > { %3161 = vmatprep.subr.bf16.mxu0 %v4471_v20  ;;  %2843 = vmatprep.mubr.bf16.mxu1 %v4528_v23  ;;  %v4621_v18 = vld [vmem:[%s5168_s8 + $0x1dc] ss:$72 sps:$4 sm:$0xff]   ;;  %v4565_v20 = vld [vmem:[%s5166_s7 + $0x650] ss:$8 sps:$4 sm:$0xff]   ;;  %v4568_v23 = vld [vmem:[%s5166_s7 + $0x260] ss:$8 sps:$4 sm:$0xff]  }
  0xbc   : > { %3175 = vmatprep.mubr.bf16.mxu0 %v4534_v26  ;;  %v4627_v26 = vld [vmem:[%s5168_s8 + $0x1d8] ss:$72 sps:$4 sm:$0xff]  }
  0xbd   : > { %2830 = vmatpush1.bf16.msra.mxu1 %v4466_v21  ;;  %v4570_v21 = vld [vmem:[%s5166_s7 + $0x264] ss:$8 sps:$4 sm:$0xff]  }
  0xbe   : > { %3162 = vmatpush1.bf16.msra.mxu0 %v4469_v22  ;;  %2831 = vmatprep.subr.bf16.mxu1 %v4476_v24  ;;  %v4573_v22 = vld [vmem:[%s5166_s7 + $0x664] ss:$8 sps:$4 sm:$0xff]   ;;  %v4571_v24 = vld [vmem:[%s5166_s7 + $0x660] ss:$8 sps:$4 sm:$0xff]  }
  0xbf   : > { %3163 = vmatprep.subr.bf16.mxu0 %v4481_v25  ;;  %v4626_v25 = vld [vmem:[%s5168_s8 + $0x1b8] ss:$72 sps:$4 sm:$0xff]  }
  0xc1   : > { %2832 = vmatpush1.bf16.msra.mxu1 %v4474_v27  ;;  %v4576_v27 = vld [vmem:[%s5166_s7 + $0x274] ss:$8 sps:$4 sm:$0xff]  }
  0xc2   : > { %3164 = vmatpush1.bf16.msra.mxu0 %v4479_v28  ;;  %2833 = vmatprep.subr.bf16.mxu1 %v4486_v29  ;;  %v4579_v28 = vld [vmem:[%s5166_s7 + $0x674] ss:$8 sps:$4 sm:$0xff]  }
  0xc3   : > { %3165 = vmatprep.subr.bf16.mxu0 %v4489_v30  ;;  %v4634_v29 = vld [vmem:[%s5168_s8 + $0x24c] ss:$72 sps:$4 sm:$0xff]  }
  0xc4   : > { %v4639_v30 = vld [vmem:[%s5168_s8 + $0x26c] ss:$72 sps:$4 sm:$0xff]  }
  0xc5   : > { %2834 = vmatpush1.bf16.msra.mxu1 %v4484_v31  ;;  %v4574_v31 = vld [vmem:[%s5166_s7 + $0x270] ss:$8 sps:$4 sm:$0xff]  }
  0xc6   : > { %3166 = vmatpush1.bf16.msra.mxu0 %v4487_v32  ;;  %2835 = vmatprep.subr.bf16.mxu1 %v4494_v33  ;;  %v4577_v32 = vld [vmem:[%s5166_s7 + $0x670] ss:$8 sps:$4 sm:$0xff]   ;;  %v4584_v33 = vld [vmem:[%s5166_s7 + $0x284] ss:$8 sps:$4 sm:$0xff]  }
  0xc7   : > { %3167 = vmatprep.subr.bf16.mxu0 %v4499_v34  ;;  %v4589_v34 = vld [vmem:[%s5166_s7 + $0x684] ss:$8 sps:$4 sm:$0xff]  }
  0xc9   : > { %2836 = vmatpush1.bf16.msra.mxu1 %v4492_v35  ;;  %v4582_v35 = vld [vmem:[%s5166_s7 + $0x280] ss:$8 sps:$4 sm:$0xff]  }
  0xca   : > { %3168 = vmatpush1.bf16.msra.mxu0 %v4497_v36  ;;  %2837 = vmatprep.subr.bf16.mxu1 %v4504_v37  ;;  %v4587_v36 = vld [vmem:[%s5166_s7 + $0x680] ss:$8 sps:$4 sm:$0xff]  }
  0xcb   : > { %3169 = vmatprep.subr.bf16.mxu0 %v4507_v38  ;;  %v4644_v37 = vld [vmem:[%s5168_s8 + $0x248] ss:$72 sps:$4 sm:$0xff]  }
  0xcc   : > { %v4645_v38 = vld [vmem:[%s5168_s8 + $0x268] ss:$72 sps:$4 sm:$0xff]  }
  0xcd   : > { %2838 = vmatpush1.bf16.msra.mxu1 %v4502_v39  ;;  %v4594_v39 = vld [vmem:[%s5166_s7 + $0x294] ss:$8 sps:$4 sm:$0xff]  }
  0xce   : > { %3170 = vmatpush1.bf16.msra.mxu0 %v4505_v40  ;;  %2839 = vmatprep.subr.bf16.mxu1 %v4512_v41  ;;  %v4597_v40 = vld [vmem:[%s5166_s7 + $0x694] ss:$8 sps:$4 sm:$0xff]  }
  0xcf   : > { %3171 = vmatprep.subr.bf16.mxu0 %v4517_v42  ;;  %v4654_v41 = vld [vmem:[%s5168_s8 + $0x14] ss:$72 sps:$4 sm:$0xff]  }
  0xd0   : > { %v4660_v42 = vld [vmem:[%s5168_s8 + $0x34] ss:$72 sps:$4 sm:$0xff]  }
  0xd1   : > { %2840 = vmatpush1.bf16.msra.mxu1 %v4510_v43  ;;  %v4592_v43 = vld [vmem:[%s5166_s7 + $0x290] ss:$8 sps:$4 sm:$0xff]  }
  0xd2   : > { %3172 = vmatpush1.bf16.msra.mxu0 %v4515_v44  ;;  %2841 = vmatprep.subr.bf16.mxu1 %v4522_v45  ;;  %v4595_v44 = vld [vmem:[%s5166_s7 + $0x690] ss:$8 sps:$4 sm:$0xff]   ;;  %v4602_v45 = vld [vmem:[%s5166_s7 + $0x2a4] ss:$8 sps:$4 sm:$0xff]  }
  0xd3   : > { %3173 = vmatprep.subr.bf16.mxu0 %v4525_v46  ;;  %v4607_v46 = vld [vmem:[%s5166_s7 + $0x6a4] ss:$8 sps:$4 sm:$0xff]  }
  0xd5   : > { %2842 = vmatpush1.bf16.msra.mxu1 %v4520_v47  ;;  %v4600_v47 = vld [vmem:[%s5166_s7 + $0x2a0] ss:$8 sps:$4 sm:$0xff]  }
  0xd6   : > { %3174 = vmatpush1.bf16.msra.mxu0 %v4523_v48  ;;  %2894 = vmatprep.subr.bf16.mxu1 %v4531_v49  ;;  %v4605_v48 = vld [vmem:[%s5166_s7 + $0x6a0] ss:$8 sps:$4 sm:$0xff]   ;;  %v4612_v49 = vld [vmem:[%s5166_s7 + $0x2b4] ss:$8 sps:$4 sm:$0xff]  }
  0xd7   : > { %3226 = vmatprep.subr.bf16.mxu0 %v4537_v50  ;;  %v4615_v50 = vld [vmem:[%s5166_s7 + $0x6b4] ss:$8 sps:$4 sm:$0xff]  }
  0xd8   : > { %2844 = vmatmul.mubr.bf16.vlgmr.msra.gmra.mrb[0].mxu1 %v4526_v51  ;;  %v4610_v51 = vld [vmem:[%s5166_s7 + $0x2b0] ss:$8 sps:$4 sm:$0xff]  }
  0xd9   : > { %3176 = vmatmul.mubr.bf16.vlgmr.msra.gmra.mrb[0].mxu0 %v4532_v53  ;;  %2895 = vmatpush1.bf16.msra.mxu1 %v4529_v52  ;;  %v4613_v52 = vld [vmem:[%s5166_s7 + $0x6b0] ss:$8 sps:$4 sm:$0xff]   ;;  %v4620_v53 = vld [vmem:[%s5166_s7 + $0x2c4] ss:$8 sps:$4 sm:$0xff]  }
  0xda   : > { %3227 = vmatpush1.bf16.msra.mxu0 %v4535_v54  ;;  %2896 = vmatprep.subr.bf16.mxu1 %v4540_v55  ;;  %v4625_v54 = vld [vmem:[%s5166_s7 + $0x6c4] ss:$8 sps:$4 sm:$0xff]   ;;  %v4618_v55 = vld [vmem:[%s5166_s7 + $0x2c0] ss:$8 sps:$4 sm:$0xff]  }
  0xdb   : > { %3228 = vmatprep.subr.bf16.mxu0 %v4543_v56  ;;  %2853 = vmatprep.mubr.bf16.mxu1 %v4580_v57  ;;  %v4623_v56 = vld [vmem:[%s5166_s7 + $0x6c0] ss:$8 sps:$4 sm:$0xff]   ;;  %v4630_v57 = vld [vmem:[%s5166_s7 + $0x2d4] ss:$8 sps:$4 sm:$0xff]  }
  0xdc   : > { %3185 = vmatprep.mubr.bf16.mxu0 %v4585_v58  ;;  %v4633_v58 = vld [vmem:[%s5166_s7 + $0x6d4] ss:$8 sps:$4 sm:$0xff]  }
  0xdd   : > { %2897 = vmatpush1.bf16.msra.mxu1 %v4538_v59  ;;  %v4628_v59 = vld [vmem:[%s5166_s7 + $0x2d0] ss:$8 sps:$4 sm:$0xff]  }
  0xde   : > { %3229 = vmatpush1.bf16.msra.mxu0 %v4541_v60  ;;  %2898 = vmatprep.subr.bf16.mxu1 %v4546_v61  ;;  %v4631_v60 = vld [vmem:[%s5166_s7 + $0x6d0] ss:$8 sps:$4 sm:$0xff]   ;;  %v4638_v61 = vld [vmem:[%s5166_s7 + $0x2e4] ss:$8 sps:$4 sm:$0xff]  }
  0xdf   : > { %3230 = vmatprep.subr.bf16.mxu0 %v4549_v62  ;;  %v4643_v62 = vld [vmem:[%s5166_s7 + $0x6e4] ss:$8 sps:$4 sm:$0xff]  }
  0xe0   : > { %2854 = vmatmul.mubr.bf16.gmra.mrb[4].mxu1 %v4590_v1  ;;  %v4648_v1 = vld [vmem:[%s5166_s7 + $0x2f4] ss:$8 sps:$4 sm:$0xff]  }
  0xe1   : > { %3186 = vmatmul.mubr.bf16.gmra.mrb[4].mxu0 %v4591_v2  ;;  %2899 = vmatpush1.bf16.msra.mxu1 %v4544_v63  ;;  %v4636_v63 = vld [vmem:[%s5166_s7 + $0x2e0] ss:$8 sps:$4 sm:$0xff]   ;;  %v4651_v2 = vld [vmem:[%s5166_s7 + $0x6f4] ss:$8 sps:$4 sm:$0xff]  }
  0xe2   : > { %3231 = vmatpush1.bf16.msra.mxu0 %v4547_v0  ;;  %2900 = vmatprep.subr.bf16.mxu1 %v4552_v3  ;;  %v4641_v0 = vld [vmem:[%s5166_s7 + $0x6e0] ss:$8 sps:$4 sm:$0xff]   ;;  %v4646_v3 = vld [vmem:[%s5166_s7 + $0x2f0] ss:$8 sps:$4 sm:$0xff]  }
  0xe3   : > { %3232 = vmatprep.subr.bf16.mxu0 %v4555_v4  ;;  %2863 = vmatprep.mubr.bf16.mxu1 %v4598_v5  ;;  %v4649_v4 = vld [vmem:[%s5166_s7 + $0x6f0] ss:$8 sps:$4 sm:$0xff]   ;;  %v4657_v5 = vld [vmem:[%s5166_s7 + $0x304] ss:$8 sps:$4 sm:$0xff]  }
  0xe4   : > { %3195 = vmatprep.mubr.bf16.mxu0 %v4603_v6  ;;  %v4663_v6 = vld [vmem:[%s5166_s7 + $0x704] ss:$8 sps:$4 sm:$0xff]  }
  0xe5   : > { %2901 = vmatpush1.bf16.msra.mxu1 %v4550_v7  ;;  %v4652_v7 = vld [vmem:[%s5168_s8 + $0x10] ss:$72 sps:$4 sm:$0xff]  }
  0xe6   : > { %3233 = vmatpush1.bf16.msra.mxu0 %v4553_v8  ;;  %2902 = vmatprep.subr.bf16.mxu1 %v4558_v9  ;;  %v4655_v8 = vld [vmem:[%s5166_s7 + $0x300] ss:$8 sps:$4 sm:$0xff]  }
  0xe7   : > { %3234 = vmatprep.subr.bf16.mxu0 %v4561_v10  ;;  %v4658_v9 = vld [vmem:[%s5168_s8 + $0x30] ss:$72 sps:$4 sm:$0xff]  }
  0xe8   : > { %2864 = vmatmul.mubr.bf16.gmra.mrb[8].mxu1 %v4608_v13  ;;  %v4661_v10 = vld [vmem:[%s5166_s7 + $0x700] ss:$8 sps:$4 sm:$0xff]   ;;  %v4706_v13 = vld [vmem:[%s5168_s8 + $0xa4] ss:$72 sps:$4 sm:$0xff]  }
  0xe9   : > { %3196 = vmatmul.mubr.bf16.gmra.mrb[8].mxu0 %v4609_v14  ;;  %2903 = vmatpush1.bf16.msra.mxu1 %v4556_v11  ;;  %v4666_v11 = vld [vmem:[%s5166_s7 + $0x314] ss:$8 sps:$4 sm:$0xff]  }
  0xea   : > { %3235 = vmatpush1.bf16.msra.mxu0 %v4559_v12  ;;  %2904 = vmatprep.subr.bf16.mxu1 %v4564_v15  ;;  %v4669_v12 = vld [vmem:[%s5166_s7 + $0x714] ss:$8 sps:$4 sm:$0xff]   ;;  %v4664_v15 = vld [vmem:[%s5166_s7 + $0x310] ss:$8 sps:$4 sm:$0xff]  }
  0xeb   : > { %3236 = vmatprep.subr.bf16.mxu0 %v4567_v16  ;;  %2873 = vmatprep.mubr.bf16.mxu1 %v4616_v17  ;;  %v4708_v14 = vld [vmem:[%s5168_s8 + $0xc4] ss:$72 sps:$4 sm:$0xff]   ;;  %v4667_v16 = vld [vmem:[%s5166_s7 + $0x710] ss:$8 sps:$4 sm:$0xff]  }
  0xec   : > { %3205 = vmatprep.mubr.bf16.mxu0 %v4621_v18  ;;  %v4672_v17 = vld [vmem:[%s5166_s7 + $0x324] ss:$8 sps:$4 sm:$0xff]  }
  0xed   : > { %2905 = vmatpush1.bf16.msra.mxu1 %v4562_v19  ;;  %v4675_v18 = vld [vmem:[%s5166_s7 + $0x724] ss:$8 sps:$4 sm:$0xff]   ;;  %v4670_v19 = vld [vmem:[%s5166_s7 + $0x320] ss:$8 sps:$4 sm:$0xff]  }
  0xee   : > { %3237 = vmatpush1.bf16.msra.mxu0 %v4565_v20  ;;  %2906 = vmatprep.subr.bf16.mxu1 %v4570_v21  ;;  %v4673_v20 = vld [vmem:[%s5166_s7 + $0x720] ss:$8 sps:$4 sm:$0xff]  }
  0xef   : > { %3238 = vmatprep.subr.bf16.mxu0 %v4573_v22  ;;  %v4710_v21 = vld [vmem:[%s5168_s8 + $0xa0] ss:$72 sps:$4 sm:$0xff]  }
  0xf0   : > { %2874 = vmatmul.mubr.bf16.gmra.mrb[12].mxu1 %v4626_v25  ;;  %v4714_v22 = vld [vmem:[%s5168_s8 + $0xc0] ss:$72 sps:$4 sm:$0xff]   ;;  %v4724_v25 = vld [vmem:[%s5168_s8 + $0x134] ss:$72 sps:$4 sm:$0xff]  }
  0xf1   : > { %3206 = vmatmul.mubr.bf16.gmra.mrb[12].mxu0 %v4627_v26  ;;  %2907 = vmatpush1.bf16.msra.mxu1 %v4568_v23  ;;  %v4678_v23 = vld [vmem:[%s5166_s7 + $0x334] ss:$8 sps:$4 sm:$0xff]  }
  0xf2   : > { %3239 = vmatpush1.bf16.msra.mxu0 %v4571_v24  ;;  %2908 = vmatprep.subr.bf16.mxu1 %v4576_v27  ;;  %v4681_v24 = vld [vmem:[%s5166_s7 + $0x734] ss:$8 sps:$4 sm:$0xff]   ;;  %v4676_v27 = vld [vmem:[%s5166_s7 + $0x330] ss:$8 sps:$4 sm:$0xff]  }
  0xf3   : > { %3240 = vmatprep.subr.bf16.mxu0 %v4579_v28  ;;  %2883 = vmatprep.mubr.bf16.mxu1 %v4634_v29  ;;  %v4726_v26 = vld [vmem:[%s5168_s8 + $0x154] ss:$72 sps:$4 sm:$0xff]   ;;  %v4679_v28 = vld [vmem:[%s5166_s7 + $0x730] ss:$8 sps:$4 sm:$0xff]  }
  0xf4   : > { %3215 = vmatprep.mubr.bf16.mxu0 %v4639_v30  ;;  %v4684_v29 = vld [vmem:[%s5166_s7 + $0x344] ss:$8 sps:$4 sm:$0xff]  }
  0xf5   : > { %2909 = vmatpush1.bf16.msra.mxu1 %v4574_v31  ;;  %v4687_v30 = vld [vmem:[%s5166_s7 + $0x744] ss:$8 sps:$4 sm:$0xff]   ;;  %v4682_v31 = vld [vmem:[%s5166_s7 + $0x340] ss:$8 sps:$4 sm:$0xff]  }
  0xf6   : > { %3241 = vmatpush1.bf16.msra.mxu0 %v4577_v32  ;;  %2910 = vmatprep.subr.bf16.mxu1 %v4584_v33  ;;  %v4685_v32 = vld [vmem:[%s5166_s7 + $0x740] ss:$8 sps:$4 sm:$0xff]  }
  0xf7   : > { %3242 = vmatprep.subr.bf16.mxu0 %v4589_v34  ;;  %v4728_v33 = vld [vmem:[%s5168_s8 + $0x130] ss:$72 sps:$4 sm:$0xff]  }
  0xf8   : > { %2884 = vmatmul.mubr.bf16.gmra.mrb[16].mxu1 %v4644_v37  ;;  %v4732_v34 = vld [vmem:[%s5168_s8 + $0x150] ss:$72 sps:$4 sm:$0xff]   ;;  %v4742_v37 = vld [vmem:[%s5168_s8 + $0x1c4] ss:$72 sps:$4 sm:$0xff]  }
  0xf9   : > { %3216 = vmatmul.mubr.bf16.gmra.mrb[16].mxu0 %v4645_v38  ;;  %2911 = vmatpush1.bf16.msra.mxu1 %v4582_v35  ;;  %v4690_v35 = vld [vmem:[%s5166_s7 + $0x354] ss:$8 sps:$4 sm:$0xff]  }
  0xfa   : > { %3243 = vmatpush1.bf16.msra.mxu0 %v4587_v36  ;;  %2912 = vmatprep.subr.bf16.mxu1 %v4594_v39  ;;  %v4693_v36 = vld [vmem:[%s5166_s7 + $0x754] ss:$8 sps:$4 sm:$0xff]   ;;  %v4688_v39 = vld [vmem:[%s5166_s7 + $0x350] ss:$8 sps:$4 sm:$0xff]  }
  0xfb   : > { %3244 = vmatprep.subr.bf16.mxu0 %v4597_v40  ;;  %2926 = vmatprep.mubr.bf16.mxu1 %v4654_v41  ;;  %v4744_v38 = vld [vmem:[%s5168_s8 + $0x1e4] ss:$72 sps:$4 sm:$0xff]   ;;  %v4691_v40 = vld [vmem:[%s5166_s7 + $0x750] ss:$8 sps:$4 sm:$0xff]  }
  0xfc   : > { %3258 = vmatprep.mubr.bf16.mxu0 %v4660_v42  ;;  %v4696_v41 = vld [vmem:[%s5166_s7 + $0x364] ss:$8 sps:$4 sm:$0xff]  }
  0xfd   : > { %2913 = vmatpush1.bf16.msra.mxu1 %v4592_v43  ;;  %v4699_v42 = vld [vmem:[%s5166_s7 + $0x764] ss:$8 sps:$4 sm:$0xff]   ;;  %v4694_v43 = vld [vmem:[%s5166_s7 + $0x360] ss:$8 sps:$4 sm:$0xff]  }
  0xfe   : > { %3245 = vmatpush1.bf16.msra.mxu0 %v4595_v44  ;;  %2914 = vmatprep.subr.bf16.mxu1 %v4602_v45  ;;  %v4697_v44 = vld [vmem:[%s5166_s7 + $0x760] ss:$8 sps:$4 sm:$0xff]  }
  0xff   : > { %3246 = vmatprep.subr.bf16.mxu0 %v4607_v46  ;;  %v4746_v45 = vld [vmem:[%s5168_s8 + $0x1c0] ss:$72 sps:$4 sm:$0xff]  }
 0x100   : > { %v4750_v46 = vld [vmem:[%s5168_s8 + $0x1e0] ss:$72 sps:$4 sm:$0xff]  }
 0x101   : > { %2915 = vmatpush1.bf16.msra.mxu1 %v4600_v47  ;;  %v4702_v47 = vld [vmem:[%s5166_s7 + $0x374] ss:$8 sps:$4 sm:$0xff]  }
 0x102   : > { %3247 = vmatpush1.bf16.msra.mxu0 %v4605_v48  ;;  %2916 = vmatprep.subr.bf16.mxu1 %v4612_v49  ;;  %v4705_v48 = vld [vmem:[%s5166_s7 + $0x774] ss:$8 sps:$4 sm:$0xff]  }
 0x103   : > { %3248 = vmatprep.subr.bf16.mxu0 %v4615_v50  ;;  %v4760_v49 = vld [vmem:[%s5168_s8 + $0x254] ss:$72 sps:$4 sm:$0xff]  }
 0x104   : > { %v4762_v50 = vld [vmem:[%s5168_s8 + $0x274] ss:$72 sps:$4 sm:$0xff]  }
 0x105   : > { %2917 = vmatpush1.bf16.msra.mxu1 %v4610_v51  ;;  %v4700_v51 = vld [vmem:[%s5166_s7 + $0x370] ss:$8 sps:$4 sm:$0xff]  }
 0x106   : > { %3249 = vmatpush1.bf16.msra.mxu0 %v4613_v52  ;;  %2918 = vmatprep.subr.bf16.mxu1 %v4620_v53  ;;  %v4703_v52 = vld [vmem:[%s5166_s7 + $0x770] ss:$8 sps:$4 sm:$0xff]   ;;  %v4713_v53 = vld [vmem:[%s5166_s7 + $0x384] ss:$8 sps:$4 sm:$0xff]  }
 0x107   : > { %3250 = vmatprep.subr.bf16.mxu0 %v4625_v54  ;;  %v4717_v54 = vld [vmem:[%s5166_s7 + $0x784] ss:$8 sps:$4 sm:$0xff]  }
 0x109   : > { %2919 = vmatpush1.bf16.msra.mxu1 %v4618_v55  ;;  %v4711_v55 = vld [vmem:[%s5166_s7 + $0x380] ss:$8 sps:$4 sm:$0xff]  }
 0x10a   : > { %3251 = vmatpush1.bf16.msra.mxu0 %v4623_v56  ;;  %2920 = vmatprep.subr.bf16.mxu1 %v4630_v57  ;;  %v4715_v56 = vld [vmem:[%s5166_s7 + $0x780] ss:$8 sps:$4 sm:$0xff]  }
 0x10b   : > { %3252 = vmatprep.subr.bf16.mxu0 %v4633_v58  ;;  %v4764_v57 = vld [vmem:[%s5168_s8 + $0x250] ss:$72 sps:$4 sm:$0xff]  }
 0x10c   : > { %v4768_v58 = vld [vmem:[%s5168_s8 + $0x270] ss:$72 sps:$4 sm:$0xff]  }
 0x10d   : > { %2921 = vmatpush1.bf16.msra.mxu1 %v4628_v59  ;;  %v4720_v59 = vld [vmem:[%s5166_s7 + $0x394] ss:$8 sps:$4 sm:$0xff]  }
 0x10e   : > { %3253 = vmatpush1.bf16.msra.mxu0 %v4631_v60  ;;  %2922 = vmatprep.subr.bf16.mxu1 %v4638_v61  ;;  %v4723_v60 = vld [vmem:[%s5166_s7 + $0x794] ss:$8 sps:$4 sm:$0xff]  }
 0x10f   : > { %3254 = vmatprep.subr.bf16.mxu0 %v4643_v62  ;;  %v4780_v61 = vld [vmem:[%s5168_s8 + $0x1c] ss:$72 sps:$4 sm:$0xff]  }
 0x110   : > { %v4783_v62 = vld [vmem:[%s5168_s8 + $0x3c] ss:$72 sps:$4 sm:$0xff]  }
 0x111   : > { %2923 = vmatpush1.bf16.msra.mxu1 %v4636_v63  ;;  %v4718_v63 = vld [vmem:[%s5166_s7 + $0x390] ss:$8 sps:$4 sm:$0xff]  }
 0x112   : > { %3255 = vmatpush1.bf16.msra.mxu0 %v4641_v0  ;;  %2924 = vmatprep.subr.bf16.mxu1 %v4648_v1  ;;  %v4721_v0 = vld [vmem:[%s5166_s7 + $0x790] ss:$8 sps:$4 sm:$0xff]   ;;  %v4731_v1 = vld [vmem:[%s5166_s7 + $0x3a4] ss:$8 sps:$4 sm:$0xff]  }
 0x113   : > { %3256 = vmatprep.subr.bf16.mxu0 %v4651_v2  ;;  %v4735_v2 = vld [vmem:[%s5166_s7 + $0x7a4] ss:$8 sps:$4 sm:$0xff]  }
 0x115   : > { %2925 = vmatpush1.bf16.msra.mxu1 %v4646_v3  ;;  %v4729_v3 = vld [vmem:[%s5166_s7 + $0x3a0] ss:$8 sps:$4 sm:$0xff]  }
 0x116   : > { %3257 = vmatpush1.bf16.msra.mxu0 %v4649_v4  ;;  %2977 = vmatprep.subr.bf16.mxu1 %v4657_v5  ;;  %v4733_v4 = vld [vmem:[%s5166_s7 + $0x7a0] ss:$8 sps:$4 sm:$0xff]   ;;  %v4738_v5 = vld [vmem:[%s5166_s7 + $0x3b4] ss:$8 sps:$4 sm:$0xff]  }
 0x117   : > { %3309 = vmatprep.subr.bf16.mxu0 %v4663_v6  ;;  %v4741_v6 = vld [vmem:[%s5166_s7 + $0x7b4] ss:$8 sps:$4 sm:$0xff]  }
 0x118   : > { %2927 = vmatmul.mubr.bf16.vlgmr.msra.gmra.mrb[0].mxu1 %v4652_v7  ;;  %v4736_v7 = vld [vmem:[%s5166_s7 + $0x3b0] ss:$8 sps:$4 sm:$0xff]  }
 0x119   : > { %3259 = vmatmul.mubr.bf16.vlgmr.msra.gmra.mrb[0].mxu0 %v4658_v9  ;;  %2978 = vmatpush1.bf16.msra.mxu1 %v4655_v8  ;;  %v4739_v8 = vld [vmem:[%s5166_s7 + $0x7b0] ss:$8 sps:$4 sm:$0xff]   ;;  %v4749_v9 = vld [vmem:[%s5166_s7 + $0x3c4] ss:$8 sps:$4 sm:$0xff]  }
 0x11a   : > { %3310 = vmatpush1.bf16.msra.mxu0 %v4661_v10  ;;  %2979 = vmatprep.subr.bf16.mxu1 %v4666_v11  ;;  %v4753_v10 = vld [vmem:[%s5166_s7 + $0x7c4] ss:$8 sps:$4 sm:$0xff]   ;;  %v4747_v11 = vld [vmem:[%s5166_s7 + $0x3c0] ss:$8 sps:$4 sm:$0xff]  }
 0x11b   : > { %3311 = vmatprep.subr.bf16.mxu0 %v4669_v12  ;;  %2936 = vmatprep.mubr.bf16.mxu1 %v4706_v13  ;;  %v4751_v12 = vld [vmem:[%s5166_s7 + $0x7c0] ss:$8 sps:$4 sm:$0xff]   ;;  %v4756_v13 = vld [vmem:[%s5166_s7 + $0x3d4] ss:$8 sps:$4 sm:$0xff]  }
 0x11c   : > { %3268 = vmatprep.mubr.bf16.mxu0 %v4708_v14  ;;  %v4759_v14 = vld [vmem:[%s5166_s7 + $0x7d4] ss:$8 sps:$4 sm:$0xff]  }
 0x11d   : > { %2980 = vmatpush1.bf16.msra.mxu1 %v4664_v15  ;;  %v4754_v15 = vld [vmem:[%s5166_s7 + $0x3d0] ss:$8 sps:$4 sm:$0xff]  }
 0x11e   : > { %3312 = vmatpush1.bf16.msra.mxu0 %v4667_v16  ;;  %2981 = vmatprep.subr.bf16.mxu1 %v4672_v17  ;;  %v4757_v16 = vld [vmem:[%s5166_s7 + $0x7d0] ss:$8 sps:$4 sm:$0xff]   ;;  %v4767_v17 = vld [vmem:[%s5166_s7 + $0x3e4] ss:$8 sps:$4 sm:$0xff]  }
 0x11f   : > { %3313 = vmatprep.subr.bf16.mxu0 %v4675_v18  ;;  %v4771_v18 = vld [vmem:[%s5166_s7 + $0x7e4] ss:$8 sps:$4 sm:$0xff]  }
 0x120   : > { %2937 = vmatmul.mubr.bf16.gmra.mrb[4].mxu1 %v4710_v21  ;;  %v4774_v21 = vld [vmem:[%s5166_s7 + $0x3f4] ss:$8 sps:$4 sm:$0xff]  }
 0x121   : > { %3269 = vmatmul.mubr.bf16.gmra.mrb[4].mxu0 %v4714_v22  ;;  %2982 = vmatpush1.bf16.msra.mxu1 %v4670_v19  ;;  %v4765_v19 = vld [vmem:[%s5166_s7 + $0x3e0] ss:$8 sps:$4 sm:$0xff]   ;;  %v4777_v22 = vld [vmem:[%s5166_s7 + $0x7f4] ss:$8 sps:$4 sm:$0xff]  }
 0x122   : > { %3314 = vmatpush1.bf16.msra.mxu0 %v4673_v20  ;;  %2983 = vmatprep.subr.bf16.mxu1 %v4678_v23  ;;  %v4769_v20 = vld [vmem:[%s5166_s7 + $0x7e0] ss:$8 sps:$4 sm:$0xff]   ;;  %v4772_v23 = vld [vmem:[%s5166_s7 + $0x3f0] ss:$8 sps:$4 sm:$0xff]  }
 0x123   : > { %3315 = vmatprep.subr.bf16.mxu0 %v4681_v24  ;;  %2946 = vmatprep.mubr.bf16.mxu1 %v4724_v25  ;;  %v4775_v24 = vld [vmem:[%s5166_s7 + $0x7f0] ss:$8 sps:$4 sm:$0xff]   ;;  %v4786_v25 = vld [vmem:[%s5166_s7 + $0x804] ss:$8 sps:$4 sm:$0xff]  }
 0x124   : > { %3278 = vmatprep.mubr.bf16.mxu0 %v4726_v26  ;;  %v4778_v26 = vld [vmem:[%s5168_s8 + $0x18] ss:$72 sps:$4 sm:$0xff]  }
 0x125   : > { %2984 = vmatpush1.bf16.msra.mxu1 %v4676_v27  ;;  %v4781_v27 = vld [vmem:[%s5168_s8 + $0x38] ss:$72 sps:$4 sm:$0xff]  }
 0x126   : > { %3316 = vmatpush1.bf16.msra.mxu0 %v4679_v28  ;;  %2985 = vmatprep.subr.bf16.mxu1 %v4684_v29  ;;  %v4784_v28 = vld [vmem:[%s5166_s7 + $0x800] ss:$8 sps:$4 sm:$0xff]   ;;  %v4789_v29 = vld [vmem:[%s5166_s7 + $0x814] ss:$8 sps:$4 sm:$0xff]  }
 0x127   : > { %3317 = vmatprep.subr.bf16.mxu0 %v4687_v30  ;;  %v4790_v30 = vld [vmem:[%s5168_s8 + $0xac] ss:$72 sps:$4 sm:$0xff]  }
 0x128   : > { %2947 = vmatmul.mubr.bf16.gmra.mrb[8].mxu1 %v4728_v33  ;;  %v4798_v33 = vld [vmem:[%s5166_s7 + $0x824] ss:$8 sps:$4 sm:$0xff]  }
 0x129   : > { %3279 = vmatmul.mubr.bf16.gmra.mrb[8].mxu0 %v4732_v34  ;;  %2986 = vmatpush1.bf16.msra.mxu1 %v4682_v31  ;;  %v4792_v31 = vld [vmem:[%s5168_s8 + $0xcc] ss:$72 sps:$4 sm:$0xff]   ;;  %v4794_v34 = vld [vmem:[%s5168_s8 + $0xa8] ss:$72 sps:$4 sm:$0xff]  }
 0x12a   : > { %3318 = vmatpush1.bf16.msra.mxu0 %v4685_v32  ;;  %2987 = vmatprep.subr.bf16.mxu1 %v4690_v35  ;;  %v4787_v32 = vld [vmem:[%s5166_s7 + $0x810] ss:$8 sps:$4 sm:$0xff]  }
 0x12b   : > { %3319 = vmatprep.subr.bf16.mxu0 %v4693_v36  ;;  %2956 = vmatprep.mubr.bf16.mxu1 %v4742_v37  ;;  %v4795_v35 = vld [vmem:[%s5168_s8 + $0xc8] ss:$72 sps:$4 sm:$0xff]   ;;  %v4801_v37 = vld [vmem:[%s5166_s7 + $0x834] ss:$8 sps:$4 sm:$0xff]  }
 0x12c   : > { %3288 = vmatprep.mubr.bf16.mxu0 %v4744_v38  ;;  %v4796_v36 = vld [vmem:[%s5166_s7 + $0x820] ss:$8 sps:$4 sm:$0xff]   ;;  %v4802_v38 = vld [vmem:[%s5168_s8 + $0x13c] ss:$72 sps:$4 sm:$0xff]  }
 0x12d   : > { %2988 = vmatpush1.bf16.msra.mxu1 %v4688_v39  ;;  %v4804_v39 = vld [vmem:[%s5168_s8 + $0x15c] ss:$72 sps:$4 sm:$0xff]  }
 0x12e   : > { %3320 = vmatpush1.bf16.msra.mxu0 %v4691_v40  ;;  %2989 = vmatprep.subr.bf16.mxu1 %v4696_v41  ;;  %v4799_v40 = vld [vmem:[%s5166_s7 + $0x830] ss:$8 sps:$4 sm:$0xff]   ;;  %v4810_v41 = vld [vmem:[%s5166_s7 + $0x844] ss:$8 sps:$4 sm:$0xff]  }
 0x12f   : > { %3321 = vmatprep.subr.bf16.mxu0 %v4699_v42  ;;  %v4806_v42 = vld [vmem:[%s5168_s8 + $0x138] ss:$72 sps:$4 sm:$0xff]  }
 0x130   : > { %2957 = vmatmul.mubr.bf16.gmra.mrb[12].mxu1 %v4746_v45  ;;  %v4813_v45 = vld [vmem:[%s5166_s7 + $0x854] ss:$8 sps:$4 sm:$0xff]  }
 0x131   : > { %3289 = vmatmul.mubr.bf16.gmra.mrb[12].mxu0 %v4750_v46  ;;  %2990 = vmatpush1.bf16.msra.mxu1 %v4694_v43  ;;  %v4807_v43 = vld [vmem:[%s5168_s8 + $0x158] ss:$72 sps:$4 sm:$0xff]   ;;  %v4814_v46 = vld [vmem:[%s5168_s8 + $0x1cc] ss:$72 sps:$4 sm:$0xff]  }
 0x132   : > { %3322 = vmatpush1.bf16.msra.mxu0 %v4697_v44  ;;  %2991 = vmatprep.subr.bf16.mxu1 %v4702_v47  ;;  %v4808_v44 = vld [vmem:[%s5166_s7 + $0x840] ss:$8 sps:$4 sm:$0xff]   ;;  %v4816_v47 = vld [vmem:[%s5168_s8 + $0x1ec] ss:$72 sps:$4 sm:$0xff]  }
 0x133   : > { %3323 = vmatprep.subr.bf16.mxu0 %v4705_v48  ;;  %2966 = vmatprep.mubr.bf16.mxu1 %v4760_v49  ;;  %v4811_v48 = vld [vmem:[%s5166_s7 + $0x850] ss:$8 sps:$4 sm:$0xff]   ;;  %v4822_v49 = vld [vmem:[%s5166_s7 + $0x864] ss:$8 sps:$4 sm:$0xff]  }
 0x134   : > { %3298 = vmatprep.mubr.bf16.mxu0 %v4762_v50  ;;  %v4818_v50 = vld [vmem:[%s5168_s8 + $0x1c8] ss:$72 sps:$4 sm:$0xff]  }
 0x135   : > { %2992 = vmatpush1.bf16.msra.mxu1 %v4700_v51  ;;  %v4819_v51 = vld [vmem:[%s5168_s8 + $0x1e8] ss:$72 sps:$4 sm:$0xff]  }
 0x136   : > { %3324 = vmatpush1.bf16.msra.mxu0 %v4703_v52  ;;  %2993 = vmatprep.subr.bf16.mxu1 %v4713_v53  ;;  %v4820_v52 = vld [vmem:[%s5166_s7 + $0x860] ss:$8 sps:$4 sm:$0xff]   ;;  %v4825_v53 = vld [vmem:[%s5166_s7 + $0x874] ss:$8 sps:$4 sm:$0xff]  }
 0x137   : > { %3325 = vmatprep.subr.bf16.mxu0 %v4717_v54  ;;  %v4826_v54 = vld [vmem:[%s5168_s8 + $0x25c] ss:$72 sps:$4 sm:$0xff]  }
 0x138   : > { %2967 = vmatmul.mubr.bf16.gmra.mrb[16].mxu1 %v4764_v57  ;;  %v4834_v57 = vld [vmem:[%s5166_s7 + $0x884] ss:$8 sps:$4 sm:$0xff]  }
 0x139   : > { %3299 = vmatmul.mubr.bf16.gmra.mrb[16].mxu0 %v4768_v58  ;;  %2994 = vmatpush1.bf16.msra.mxu1 %v4711_v55  ;;  %v4828_v55 = vld [vmem:[%s5168_s8 + $0x27c] ss:$72 sps:$4 sm:$0xff]   ;;  %v4830_v58 = vld [vmem:[%s5168_s8 + $0x258] ss:$72 sps:$4 sm:$0xff]  }
 0x13a   : > { %3326 = vmatpush1.bf16.msra.mxu0 %v4715_v56  ;;  %2995 = vmatprep.subr.bf16.mxu1 %v4720_v59  ;;  %v4823_v56 = vld [vmem:[%s5166_s7 + $0x870] ss:$8 sps:$4 sm:$0xff]  }
 0x13b   : > { %3327 = vmatprep.subr.bf16.mxu0 %v4723_v60  ;;  %3009 = vmatprep.mubr.bf16.mxu1 %v4780_v61  ;;  %v4831_v59 = vld [vmem:[%s5168_s8 + $0x278] ss:$72 sps:$4 sm:$0xff]   ;;  %v4837_v61 = vld [vmem:[%s5166_s7 + $0x894] ss:$8 sps:$4 sm:$0xff]  }
 0x13c   : > { %3341 = vmatprep.mubr.bf16.mxu0 %v4783_v62  ;;  %v4832_v60 = vld [vmem:[%s5166_s7 + $0x880] ss:$8 sps:$4 sm:$0xff]   ;;  %v4858_v62 = vld [vmem:[%s5168_s8 + $0x44] ss:$72 sps:$4 sm:$0xff]  }
 0x13d   : > { %2996 = vmatpush1.bf16.msra.mxu1 %v4718_v63  ;;  %v4861_v63 = vld [vmem:[%s5168_s8 + $0x1f4] ss:$72 sps:$4 sm:$0xff]  }
 0x13e   : > { %3328 = vmatpush1.bf16.msra.mxu0 %v4721_v0  ;;  %2997 = vmatprep.subr.bf16.mxu1 %v4731_v1  ;;  %v4835_v0 = vld [vmem:[%s5166_s7 + $0x890] ss:$8 sps:$4 sm:$0xff]   ;;  %v4840_v1 = vld [vmem:[%s5166_s7 + $0x8a4] ss:$8 sps:$4 sm:$0xff]  }
 0x13f   : > { %3329 = vmatprep.subr.bf16.mxu0 %v4735_v2  ;;  %v4838_v2 = vld [vmem:[%s5166_s7 + $0x8a0] ss:$8 sps:$4 sm:$0xff]  }
 0x141   : > { %2998 = vmatpush1.bf16.msra.mxu1 %v4729_v3  ;;  %v4843_v3 = vld [vmem:[%s5166_s7 + $0x8b4] ss:$8 sps:$4 sm:$0xff]  }
 0x142   : > { %3330 = vmatpush1.bf16.msra.mxu0 %v4733_v4  ;;  %2999 = vmatprep.subr.bf16.mxu1 %v4738_v5  ;;  %v4841_v4 = vld [vmem:[%s5166_s7 + $0x8b0] ss:$8 sps:$4 sm:$0xff]   ;;  %v4846_v5 = vld [vmem:[%s5166_s7 + $0x8c4] ss:$8 sps:$4 sm:$0xff]  }
 0x143   : > { %3331 = vmatprep.subr.bf16.mxu0 %v4741_v6  ;;  %v4844_v6 = vld [vmem:[%s5166_s7 + $0x8c0] ss:$8 sps:$4 sm:$0xff]  }
 0x145   : > { %3000 = vmatpush1.bf16.msra.mxu1 %v4736_v7  ;;  %v4849_v7 = vld [vmem:[%s5166_s7 + $0x8d4] ss:$8 sps:$4 sm:$0xff]  }
 0x146   : > { %3332 = vmatpush1.bf16.msra.mxu0 %v4739_v8  ;;  %3001 = vmatprep.subr.bf16.mxu1 %v4749_v9  ;;  %v4847_v8 = vld [vmem:[%s5166_s7 + $0x8d0] ss:$8 sps:$4 sm:$0xff]   ;;  %v4852_v9 = vld [vmem:[%s5166_s7 + $0x8e4] ss:$8 sps:$4 sm:$0xff]  }
 0x147   : > { %3333 = vmatprep.subr.bf16.mxu0 %v4753_v10  ;;  %v4850_v10 = vld [vmem:[%s5166_s7 + $0x8e0] ss:$8 sps:$4 sm:$0xff]  }
 0x149   : > { %3002 = vmatpush1.bf16.msra.mxu1 %v4747_v11  ;;  %v4855_v11 = vld [vmem:[%s5166_s7 + $0x8f4] ss:$8 sps:$4 sm:$0xff]  }
 0x14a   : > { %3334 = vmatpush1.bf16.msra.mxu0 %v4751_v12  ;;  %3003 = vmatprep.subr.bf16.mxu1 %v4756_v13  ;;  %v4853_v12 = vld [vmem:[%s5166_s7 + $0x8f0] ss:$8 sps:$4 sm:$0xff]  }
 0x14b   : > { %3335 = vmatprep.subr.bf16.mxu0 %v4759_v14  ;;  %v4856_v13 = vld [vmem:[%s5168_s8 + $0x40] ss:$72 sps:$4 sm:$0xff]   ;;  %v4859_v14 = vld [vmem:[%s5168_s8 + $0x1f0] ss:$72 sps:$4 sm:$0xff]  }
 0x14d   : > { %3004 = vmatpush1.bf16.msra.mxu1 %v4754_v15  ;;  %v4862_v15 = vld [vmem:[%s5168_s8 + $0xd4] ss:$72 sps:$4 sm:$0xff]  }
 0x14e   : > { %3336 = vmatpush1.bf16.msra.mxu0 %v4757_v16  ;;  %3005 = vmatprep.subr.bf16.mxu1 %v4767_v17  ;;  %v4864_v16 = vld [vmem:[%s5168_s8 + $0x284] ss:$72 sps:$4 sm:$0xff]   ;;  %v4866_v17 = vld [vmem:[%s5168_s8 + $0xd0] ss:$72 sps:$4 sm:$0xff]  }
 0x14f   : > { %3337 = vmatprep.subr.bf16.mxu0 %v4771_v18  ;;  %v4867_v18 = vld [vmem:[%s5168_s8 + $0x280] ss:$72 sps:$4 sm:$0xff]  }
 0x151   : > { %3006 = vmatpush1.bf16.msra.mxu1 %v4765_v19  ;;  %v4868_v19 = vld [vmem:[%s5168_s8 + $0x164] ss:$72 sps:$4 sm:$0xff]  }
 0x152   : > { %3338 = vmatpush1.bf16.msra.mxu0 %v4769_v20  ;;  %3007 = vmatprep.subr.bf16.mxu1 %v4774_v21  ;;  %v4870_v20 = vld [vmem:[%s5168_s8 + $0x160] ss:$72 sps:$4 sm:$0xff]  }
 0x153   : > { %3339 = vmatprep.subr.bf16.mxu0 %v4777_v22 }
 0x155   : > { %3008 = vmatpush1.bf16.msra.mxu1 %v4772_v23 }
 0x156   : > { %3340 = vmatpush1.bf16.msra.mxu0 %v4775_v24  ;;  %4069 = vmatprep.subr.bf16.mxu1 %v4786_v25 }
 0x157   : > { %3392 = vmatprep.subr.bf16.mxu0 %v4786_v25 }
 0x158   : > { %3010 = vmatmul.mubr.bf16.vlgmr.msra.gmra.mrb[0].mxu1 %v4778_v26 }
 0x159   : > { %3342 = vmatmul.mubr.bf16.vlgmr.msra.gmra.mrb[0].mxu0 %v4781_v27  ;;  %4085 = vmatpush1.bf16.msra.mxu1 %v4784_v28 }
 0x15a   : > { %3393 = vmatpush1.bf16.msra.mxu0 %v4784_v28  ;;  %4070 = vmatprep.subr.bf16.mxu1 %v4789_v29 }
 0x15b   : > { %3394 = vmatprep.subr.bf16.mxu0 %v4789_v29  ;;  %3019 = vmatprep.mubr.bf16.mxu1 %v4790_v30 }
 0x15c   : > { %3351 = vmatprep.mubr.bf16.mxu0 %v4792_v31 }
 0x15d   : > { %4086 = vmatpush1.bf16.msra.mxu1 %v4787_v32 }
 0x15e   : > { %3395 = vmatpush1.bf16.msra.mxu0 %v4787_v32  ;;  %4071 = vmatprep.subr.bf16.mxu1 %v4798_v33 }
 0x15f   : > { %3396 = vmatprep.subr.bf16.mxu0 %v4798_v33 }
 0x160   : > { %3020 = vmatmul.mubr.bf16.gmra.mrb[4].mxu1 %v4794_v34 }
 0x161   : > { %3352 = vmatmul.mubr.bf16.gmra.mrb[4].mxu0 %v4795_v35  ;;  %4087 = vmatpush1.bf16.msra.mxu1 %v4796_v36 }
 0x162   : > { %3397 = vmatpush1.bf16.msra.mxu0 %v4796_v36  ;;  %4072 = vmatprep.subr.bf16.mxu1 %v4801_v37 }
 0x163   : > { %3398 = vmatprep.subr.bf16.mxu0 %v4801_v37  ;;  %3029 = vmatprep.mubr.bf16.mxu1 %v4802_v38 }
 0x164   : > { %3361 = vmatprep.mubr.bf16.mxu0 %v4804_v39 }
 0x165   : > { %4088 = vmatpush1.bf16.msra.mxu1 %v4799_v40 }
 0x166   : > { %3399 = vmatpush1.bf16.msra.mxu0 %v4799_v40  ;;  %4073 = vmatprep.subr.bf16.mxu1 %v4810_v41 }
 0x167   : > { %3400 = vmatprep.subr.bf16.mxu0 %v4810_v41 }
 0x168   : > { %3030 = vmatmul.mubr.bf16.gmra.mrb[8].mxu1 %v4806_v42 }
 0x169   : > { %3362 = vmatmul.mubr.bf16.gmra.mrb[8].mxu0 %v4807_v43  ;;  %4089 = vmatpush1.bf16.msra.mxu1 %v4808_v44 }
 0x16a   : > { %3401 = vmatpush1.bf16.msra.mxu0 %v4808_v44  ;;  %4074 = vmatprep.subr.bf16.mxu1 %v4813_v45 }
 0x16b   : > { %3402 = vmatprep.subr.bf16.mxu0 %v4813_v45  ;;  %3039 = vmatprep.mubr.bf16.mxu1 %v4814_v46 }
 0x16c   : > { %3371 = vmatprep.mubr.bf16.mxu0 %v4816_v47 }
 0x16d   : > { %4090 = vmatpush1.bf16.msra.mxu1 %v4811_v48 }
 0x16e   : > { %3403 = vmatpush1.bf16.msra.mxu0 %v4811_v48  ;;  %4075 = vmatprep.subr.bf16.mxu1 %v4822_v49 }
 0x16f   : > { %3404 = vmatprep.subr.bf16.mxu0 %v4822_v49 }
 0x170   : > { %3040 = vmatmul.mubr.bf16.gmra.mrb[12].mxu1 %v4818_v50 }
 0x171   : > { %3372 = vmatmul.mubr.bf16.gmra.mrb[12].mxu0 %v4819_v51  ;;  %4091 = vmatpush1.bf16.msra.mxu1 %v4820_v52 }
 0x172   : > { %3405 = vmatpush1.bf16.msra.mxu0 %v4820_v52  ;;  %4076 = vmatprep.subr.bf16.mxu1 %v4825_v53 }
 0x173   : > { %3406 = vmatprep.subr.bf16.mxu0 %v4825_v53  ;;  %3049 = vmatprep.mubr.bf16.mxu1 %v4826_v54 }
 0x174   : > { %3381 = vmatprep.mubr.bf16.mxu0 %v4828_v55 }
 0x175   : > { %4092 = vmatpush1.bf16.msra.mxu1 %v4823_v56 }
 0x176   : > { %3407 = vmatpush1.bf16.msra.mxu0 %v4823_v56  ;;  %4077 = vmatprep.subr.bf16.mxu1 %v4834_v57 }
 0x177   : > { %3408 = vmatprep.subr.bf16.mxu0 %v4834_v57  ;;  %v440_v57 = vld [vmem:[%s5901_s3] sm:$0xff] }
 0x178   : > { %3050 = vmatmul.mubr.bf16.gmra.mrb[16].mxu1 %v4830_v58 }
 0x179   : > { %3382 = vmatmul.mubr.bf16.gmra.mrb[16].mxu0 %v4831_v59  ;;  %4093 = vmatpush1.bf16.msra.mxu1 %v4832_v60  ;;  %v452_v59 = vld [vmem:[%s5901_s3 + $0x60] sm:$0xff] }
 0x17a   : > { %3409 = vmatpush1.bf16.msra.mxu0 %v4832_v60  ;;  %4078 = vmatprep.subr.bf16.mxu1 %v4837_v61 }
 0x17b   : > { %3410 = vmatprep.subr.bf16.mxu0 %v4837_v61  ;;  %3424 = vmatprep.mubr.bf16.mxu0 %v4858_v62 }
 0x17c   : > { %3454 = vmatprep.mubr.bf16.mxu1 %v4861_v63  ;;  %v441_v63 = vld [vmem:[%s5901_s3 + $0x8] sm:$0xff] }
 0x17d   : > { %4094 = vmatpush1.bf16.msra.mxu1 %v4835_v0 }
 0x17e   : > { %3411 = vmatpush1.bf16.msra.mxu0 %v4835_v0  ;;  %4079 = vmatprep.subr.bf16.mxu1 %v4840_v1 }
 0x17f   : > { %3412 = vmatprep.subr.bf16.mxu0 %v4840_v1  ;;  %v453_v1 = vld [vmem:[%s5901_s3 + $0x68] sm:$0xff] }
 0x181   : > { %4095 = vmatpush1.bf16.msra.mxu1 %v4838_v2 }
 0x182   : > { %3413 = vmatpush1.bf16.msra.mxu0 %v4838_v2  ;;  %4080 = vmatprep.subr.bf16.mxu1 %v4843_v3 }
 0x183   : > { %3414 = vmatprep.subr.bf16.mxu0 %v4843_v3 }
 0x185   : > { %4096 = vmatpush1.bf16.msra.mxu1 %v4841_v4 }
 0x186   : > { %3415 = vmatpush1.bf16.msra.mxu0 %v4841_v4  ;;  %4081 = vmatprep.subr.bf16.mxu1 %v4846_v5 }
 0x187   : > { %3416 = vmatprep.subr.bf16.mxu0 %v4846_v5  ;;  %v442_v5 = vld [vmem:[%s5901_s3 + $0x10] sm:$0xff] }
 0x189   : > { %4097 = vmatpush1.bf16.msra.mxu1 %v4844_v6 }
 0x18a   : > { %3417 = vmatpush1.bf16.msra.mxu0 %v4844_v6  ;;  %4082 = vmatprep.subr.bf16.mxu1 %v4849_v7 }
 0x18b   : > { %3418 = vmatprep.subr.bf16.mxu0 %v4849_v7  ;;  %v454_v7 = vld [vmem:[%s5901_s3 + $0x70] sm:$0xff] }
 0x18d   : > { %4098 = vmatpush1.bf16.msra.mxu1 %v4847_v8 }
 0x18e   : > { %3419 = vmatpush1.bf16.msra.mxu0 %v4847_v8  ;;  %4083 = vmatprep.subr.bf16.mxu1 %v4852_v9 }
 0x18f   : > { %3420 = vmatprep.subr.bf16.mxu0 %v4852_v9 }
 0x191   : > { %4099 = vmatpush1.bf16.msra.mxu1 %v4850_v10 }
 0x192   : > { %3421 = vmatpush1.bf16.msra.mxu0 %v4850_v10  ;;  %4084 = vmatprep.subr.bf16.mxu1 %v4855_v11 }
 0x193   : > { %3422 = vmatprep.subr.bf16.mxu0 %v4855_v11 }
 0x195   : > { %4100 = vmatpush1.bf16.msra.mxu1 %v4853_v12 }
 0x196   : > { %3423 = vmatpush1.bf16.msra.mxu0 %v4853_v12 }
 0x198   : > { %3455 = vmatmul.mubr.bf16.vlgmr.msra.gmra.mrb[20].mxu1 %v4859_v14 }
 0x199   : > { %3425 = vmatmul.mubr.bf16.vlgmr.msra.gmra.mrb[0].mxu0 %v4856_v13  ;;  %3464 = vmatprep.mubr.bf16.mxu1 %v4864_v16  ;;  %v443_v13 = vld [vmem:[%s5901_s3 + $0x18] sm:$0xff] }
 0x19a   : > { %3434 = vmatprep.mubr.bf16.mxu0 %v4862_v15  ;;  %v455_v15 = vld [vmem:[%s5901_s3 + $0x78] sm:$0xff] }
 0x1a0   : > { %3465 = vmatmul.mubr.bf16.gmra.mrb[24].mxu1 %v4867_v18 }
 0x1a1   : > { %3435 = vmatmul.mubr.bf16.gmra.mrb[4].mxu0 %v4866_v17 }
 0x1a2   : > { %3444 = vmatprep.mubr.bf16.mxu0 %v4868_v19 }
 0x1a9   : > { %3445 = vmatmul.mubr.bf16.gmra.mrb[8].mxu0 %v4870_v20 }
 0x22b   : > { %v3011_v21 = vpop.f32.mrb[0].mxu1 }
 0x22c   : > { %v3013_v22 = vpop.f32.mrb[1].mxu1 }
 0x22d   : > { %v3015_v23 = vpop.f32.mrb[2].mxu1 }
 0x22e   : > { %v3017_v24 = vpop.f32.mrb[3].mxu1 }
 0x233   : > { %v5609_v25 = vpop.f32.mrb[4].mxu1 }
 0x234   : > { %v5611_v26 = vpop.f32.mrb[5].mxu1 }
 0x235   : > { %v5613_v27 = vpop.f32.mrb[6].mxu1 }
 0x236   : > { %v5615_v28 = vpop.f32.mrb[7].mxu1 }
 0x23b   : > { %v5617_v29 = vpop.f32.mrb[8].mxu1 }
 0x23c   : > { %v5619_v30 = vpop.f32.mrb[9].mxu1 }
 0x23d   : > { %v5621_v31 = vpop.f32.mrb[10].mxu1 }
 0x23e   : > { %v5623_v32 = vpop.f32.mrb[11].mxu1 }
 0x243   : > { %v3041_v33 = vpop.f32.mrb[12].mxu1 }
 0x244   : > { %v3373_v34 = vpop.f32.mrb[12].mxu0  ;;  %v3043_v36 = vpop.f32.mrb[13].mxu1 }
 0x245   : > { %v4113_v35 = vadd.f32 %v3373_v34, %v3041_v33  ;;  %v3375_v37 = vpop.f32.mrb[13].mxu0  ;;  %v3045_v39 = vpop.f32.mrb[14].mxu1  ;;  %v444_v33 = vld [vmem:[%s5901_s3 + $0x20] sm:$0xff] }
 0x246   : > { %v4115_v38 = vadd.f32 %v3375_v37, %v3043_v36  ;;  %v3377_v40 = vpop.f32.mrb[14].mxu0  ;;  %v3047_v42 = vpop.f32.mrb[15].mxu1 }
 0x247   : > { %v4117_v41 = vadd.f32 %v3377_v40, %v3045_v39  ;;  %v3379_v43 = vpop.f32.mrb[15].mxu0  ;;  %v445_v39 = vld [vmem:[%s5901_s3 + $0x28] sm:$0xff] }
 0x248   : > { %v4119_v44 = vadd.f32 %v3379_v43, %v3047_v42 }
 0x24b   : > { %v3051_v45 = vpop.f32.mrb[16].mxu1 }
 0x24c   : > { %v3383_v46 = vpop.f32.mrb[16].mxu0  ;;  %v3053_v48 = vpop.f32.mrb[17].mxu1 }
 0x24d   : > { %v4121_v47 = vadd.f32 %v3383_v46, %v3051_v45  ;;  %v3385_v49 = vpop.f32.mrb[17].mxu0  ;;  %v3055_v51 = vpop.f32.mrb[18].mxu1  ;;  %v446_v45 = vld [vmem:[%s5901_s3 + $0x30] sm:$0xff] }
 0x24e   : > { %v4123_v50 = vadd.f32 %v3385_v49, %v3053_v48  ;;  %v3387_v52 = vpop.f32.mrb[18].mxu0  ;;  %v3057_v54 = vpop.f32.mrb[19].mxu1 }
 0x24f   : > { %v5625_v53 = vadd.f32 %v3387_v52, %v3055_v51  ;;  %v3389_v55 = vpop.f32.mrb[19].mxu0 }
 0x250   : > { %v5627_v56 = vadd.f32 %v3389_v55, %v3057_v54  ;;  %v459_v54 = vld [vmem:[%s5901_s3 + $0x98] sm:$0xff] }
 0x26b   : > { %v3456_v60 = vpop.f32.mrb[20].mxu1 }
 0x26c   : > { %v3426_v58 = vpop.f32.mrb[0].mxu0  ;;  %v4114_v62 = vadd.f32 %v4113_v35, %v3456_v60  ;;  %v3458_v2 = vpop.f32.mrb[21].mxu1  ;;  %v456_v35 = vld [vmem:[%s5901_s3 + $0x80] sm:$0xff] }
 0x26d   : > { %v4101_v61 = vadd.f32 %v3426_v58, %v3011_v21  ;;  %v3428_v0 = vpop.f32.mrb[1].mxu0  ;;  %v4116_v4 = vadd.f32 %v4115_v38, %v3458_v2  ;;  %v3460_v8 = vpop.f32.mrb[22].mxu1 }
 0x26e   : > { %v4102_v3 = vadd.f32 %v3428_v0, %v3013_v22  ;;  %v3430_v6 = vpop.f32.mrb[2].mxu0  ;;  %v3487_v10 = vadd.f32 %v4114_v62, %v452_v59  ;;  %v4118_v12 = vadd.f32 %v4117_v41, %v3460_v8  ;;  %v3462_v16 = vpop.f32.mrb[23].mxu1  ;;  %v457_v41 = vld [vmem:[%s5901_s3 + $0x88] sm:$0xff] }
 0x26f   : > { %v3475_v9 = vadd.f32 %v4101_v61, %v440_v57  ;;  %v4103_v11 = vadd.f32 %v3430_v6, %v3015_v23  ;;  %v3432_v14 = vpop.f32.mrb[3].mxu0  ;;  %v3488_v18 = vadd.f32 %v4116_v4, %v453_v1  ;;  %v4120_v20 = vadd.f32 %v4119_v44, %v3462_v16  ;;  %v448_v61 = vld [vmem:[%s5901_s3 + $0x40] sm:$0xff]  ;;  %v449_v0 = vld [vmem:[%s5901_s3 + $0x48] sm:$0xff] }
 0x270   : > { %v3476_v17 = vadd.f32 %v4102_v3, %v441_v63  ;;  %v4104_v19 = vadd.f32 %v3432_v14, %v3017_v24  ;;  %3507 = vst [vmem:[%s5901_s3 + $0x60] sm:$0xff] %v3487_v10  ;;  %v3489_v22 = vadd.f32 %v4118_v12, %v454_v7  ;;  %v450_v3 = vld [vmem:[%s5901_s3 + $0x50] sm:$0xff]  ;;  %v451_v7 = vld [vmem:[%s5901_s3 + $0x58] sm:$0xff]  ;;  %v3539_v12 = vld [vmem:[%s5900_s2] sm:$0x3] (!%p4062_p11) }
 0x271   : > { %3495 = vst [vmem:[%s5901_s3] sm:$0xff] %v3475_v9  ;;  %v3477_v21 = vadd.f32 %v4103_v11, %v442_v5  ;;  %3508 = vst [vmem:[%s5901_s3 + $0x68] sm:$0xff] %v3488_v18  ;;  %v3490_v24 = vadd.f32 %v4120_v20, %v455_v15 }
 0x272   : > { %3496 = vst [vmem:[%s5901_s3 + $0x8] sm:$0xff] %v3476_v17  ;;  %v3478_v23 = vadd.f32 %v4104_v19, %v443_v13  ;;  %3509 = vst [vmem:[%s5901_s3 + $0x70] sm:$0xff] %v3489_v22 }
 0x273   : > { %3497 = vst [vmem:[%s5901_s3 + $0x10] sm:$0xff] %v3477_v21  ;;  %3510 = vst [vmem:[%s5901_s3 + $0x78] sm:$0xff] %v3490_v24  ;;  %v3466_v36 = vpop.f32.mrb[24].mxu1 }
 0x274   : > { %3498 = vst [vmem:[%s5901_s3 + $0x18] sm:$0xff] %v3478_v23  ;;  %v3436_v34 = vpop.f32.mrb[4].mxu0  ;;  %v4122_v38 = vadd.f32 %v4121_v47, %v3466_v36  ;;  %v3468_v42 = vpop.f32.mrb[25].mxu1 }
 0x275   : > { %v4105_v37 = vadd.f32 %v3436_v34, %v5609_v25  ;;  %v3438_v40 = vpop.f32.mrb[5].mxu0  ;;  %v4124_v44 = vadd.f32 %v4123_v50, %v3468_v42  ;;  %v458_v25 = vld [vmem:[%s5901_s3 + $0x90] sm:$0xff]  ;;  %v3470_v47 = vpop.f32.mrb[26].mxu1 }
 0x276   : > { %v4106_v43 = vadd.f32 %v3438_v40, %v5611_v26  ;;  %v3440_v46 = vpop.f32.mrb[6].mxu0  ;;  %v3491_v49 = vadd.f32 %v4122_v38, %v456_v35  ;;  %v4126_v52 = vadd.f32 %v5625_v53, %v3470_v47  ;;  %v447_v26 = vld [vmem:[%s5901_s3 + $0x38] sm:$0xff]  ;;  %v3472_v55 = vpop.f32.mrb[27].mxu1 }
 0x277   : > { %v3479_v48 = vadd.f32 %v4105_v37, %v444_v33  ;;  %v4107_v51 = vadd.f32 %v3440_v46, %v5613_v27  ;;  %v3442_v50 = vpop.f32.mrb[7].mxu0  ;;  %v3492_v58 = vadd.f32 %v4124_v44, %v457_v41  ;;  %v4128_v60 = vadd.f32 %v5627_v56, %v3472_v55  ;;  %v3531_v36 = vld [vmem:[%s5901_s3 + $0x60] sm:$0xff] (!%p4062_p11) }
 0x278   : > { %v3480_v57 = vadd.f32 %v4106_v43, %v445_v39  ;;  %v4108_v59 = vadd.f32 %v3442_v50, %v5615_v28  ;;  %3511 = vst [vmem:[%s5901_s3 + $0x80] sm:$0xff] %v3491_v49  ;;  %v3493_v53 = vadd.f32 %v4126_v52, %v458_v25  ;;  %v3519_v11 = vld [vmem:[%s5901_s3] sm:$0xff] (!%p4062_p11)  ;;  %v3532_v37 = vld [vmem:[%s5901_s3 + $0x68] sm:$0xff] (!%p4062_p11) }
 0x279   : > { %3499 = vst [vmem:[%s5901_s3 + $0x20] sm:$0xff] %v3479_v48  ;;  %v3481_v27 = vadd.f32 %v4107_v51, %v446_v45  ;;  %3512 = vst [vmem:[%s5901_s3 + $0x88] sm:$0xff] %v3492_v58  ;;  %v3494_v56 = vadd.f32 %v4128_v60, %v459_v54  ;;  %v3520_v13 = vld [vmem:[%s5901_s3 + $0x8] sm:$0xff] (!%p4062_p11)  ;;  %v3533_v42 = vld [vmem:[%s5901_s3 + $0x70] sm:$0xff] (!%p4062_p11) }
 0x27a   : > { %3500 = vst [vmem:[%s5901_s3 + $0x28] sm:$0xff] %v3480_v57  ;;  %v3482_v28 = vadd.f32 %v4108_v59, %v447_v26  ;;  %3513 = vst [vmem:[%s5901_s3 + $0x90] sm:$0xff] %v3493_v53  ;;  %v3521_v16 = vld [vmem:[%s5901_s3 + $0x10] sm:$0xff] (!%p4062_p11)  ;;  %v3534_v43 = vld [vmem:[%s5901_s3 + $0x78] sm:$0xff] (!%p4062_p11) }
 0x27b   : > { %3501 = vst [vmem:[%s5901_s3 + $0x30] sm:$0xff] %v3481_v27  ;;  %3514 = vst [vmem:[%s5901_s3 + $0x98] sm:$0xff] %v3494_v56  ;;  %v3522_v17 = vld [vmem:[%s5901_s3 + $0x18] sm:$0xff] (!%p4062_p11) }
 0x27c   : > { %3502 = vst [vmem:[%s5901_s3 + $0x38] sm:$0xff] %v3482_v28  ;;  %v3446_v62 = vpop.f32.mrb[8].mxu0 }
 0x27d   : > { %v4109_v63 = vadd.f32 %v3446_v62, %v5617_v29  ;;  %v3448_v1 = vpop.f32.mrb[9].mxu0 }
 0x27e   : > { %v4110_v2 = vadd.f32 %v3448_v1, %v5619_v30  ;;  %v3450_v4 = vpop.f32.mrb[10].mxu0  ;;  %3518 = sbr.rel (%p4062_p11) target bundleno = 659 (0x293), region = 63 }
 0x27f   : > { %v3483_v5 = vadd.f32 %v4109_v63, %v448_v61  ;;  %v4111_v6 = vadd.f32 %v3450_v4, %v5621_v31  ;;  %v3452_v29 = vpop.f32.mrb[11].mxu0  ;;  %v3541_v31 = vlaneseq (!%p4062_p11)  ;;  %v3535_v44 = vld [vmem:[%s5901_s3 + $0x80] sm:$0xff] (!%p4062_p11) }
 0x280   : > { %v3484_v8 = vadd.f32 %v4110_v2, %v449_v0  ;;  %v4112_v9 = vadd.f32 %v3452_v29, %v5623_v32  ;;  %v3523_v18 = vld [vmem:[%s5901_s3 + $0x20] sm:$0xff] (!%p4062_p11)  ;;  %v3536_v48 = vld [vmem:[%s5901_s3 + $0x88] sm:$0xff] (!%p4062_p11) }
 0x281   : > { %3503 = vst [vmem:[%s5901_s3 + $0x40] sm:$0xff] %v3483_v5  ;;  %v3485_v30 = vadd.f32 %v4111_v6, %v450_v3  ;;  %v3542_v32 = vshrl.u32 (!%p4062_p11), %v3541_v31, 7  ;;  %v3524_v19 = vld [vmem:[%s5901_s3 + $0x28] sm:$0xff] (!%p4062_p11)  ;;  %v3537_v49 = vld [vmem:[%s5901_s3 + $0x90] sm:$0xff] (!%p4062_p11) }
 0x282   : > { %3504 = vst [vmem:[%s5901_s3 + $0x48] sm:$0xff] %v3484_v8  ;;  %v3486_v10 = vadd.f32 %v4112_v9, %v451_v7  ;;  %v3525_v20 = vld [vmem:[%s5901_s3 + $0x30] sm:$0xff] (!%p4062_p11)  ;;  %v3538_v51 = vld [vmem:[%s5901_s3 + $0x98] sm:$0xff] (!%p4062_p11) }
 0x283   : > { %3505 = vst [vmem:[%s5901_s3 + $0x50] sm:$0xff] %v3485_v30  ;;  %v3543_v14 = vsub.s32 (!%p4062_p11), 0, %v3542_v32  ;;  %v3547_v15 = vsub.s32 (!%p4062_p11), 1, %v3542_v32  ;;  %v3526_v21 = vld [vmem:[%s5901_s3 + $0x38] sm:$0xff] (!%p4062_p11) }
 0x284   : > { %3506 = vst [vmem:[%s5901_s3 + $0x58] sm:$0xff] %v3486_v10 }
 0x285   : > { %v3544_v22 = vrot.slane %v3539_v12, %v3543_v14  ;;  %v3548_v23 = vrot.slane %v3539_v12, %v3547_v15 }
 0x287   : > { %v3551_v38 = vadd.f32 %v3544_v22, %v3519_v11  ;;  %v3552_v39 = vadd.f32 %v3548_v23, %v3520_v13  ;;  %v3553_v40 = vadd.f32 %v3544_v22, %v3521_v16  ;;  %v3554_v41 = vadd.f32 %v3548_v23, %v3522_v17 }
 0x288   : > { %v3527_v24 = vld [vmem:[%s5901_s3 + $0x40] sm:$0xff]  ;;  %v3555_v45 = vadd.f32 %v3544_v22, %v3523_v18  ;;  %v3556_v46 = vadd.f32 %v3548_v23, %v3524_v19  ;;  %v3557_v25 = vadd.f32 %v3544_v22, %v3525_v20  ;;  %v3558_v47 = vadd.f32 %v3548_v23, %v3526_v21 }
 0x289   : > { %v3528_v33 = vld [vmem:[%s5901_s3 + $0x48] sm:$0xff]  ;;  %3571 = vst [vmem:[%s5901_s3] sm:$0xff] %v3551_v38  ;;  %3572 = vst [vmem:[%s5901_s3 + $0x8] sm:$0xff] %v3552_v39  ;;  %v3559_v52 = vadd.f32 %v3544_v22, %v3527_v24  ;;  %v3563_v55 = vadd.f32 %v3544_v22, %v3531_v36  ;;  %v3564_v57 = vadd.f32 %v3548_v23, %v3532_v37 }
 0x28a   : > { %v3529_v34 = vld [vmem:[%s5901_s3 + $0x50] sm:$0xff]  ;;  %3573 = vst [vmem:[%s5901_s3 + $0x10] sm:$0xff] %v3553_v40  ;;  %3574 = vst [vmem:[%s5901_s3 + $0x18] sm:$0xff] %v3554_v41  ;;  %v3560_v26 = vadd.f32 %v3548_v23, %v3528_v33  ;;  %v3565_v58 = vadd.f32 %v3544_v22, %v3533_v42  ;;  %v3566_v59 = vadd.f32 %v3548_v23, %v3534_v43 }
 0x28b   : > { %v3530_v35 = vld [vmem:[%s5901_s3 + $0x58] sm:$0xff]  ;;  %v3561_v50 = vadd.f32 %v3544_v22, %v3529_v34  ;;  %3575 = vst [vmem:[%s5901_s3 + $0x20] sm:$0xff] %v3555_v45  ;;  %3576 = vst [vmem:[%s5901_s3 + $0x28] sm:$0xff] %v3556_v46  ;;  %v3567_v60 = vadd.f32 %v3544_v22, %v3535_v44  ;;  %v3568_v27 = vadd.f32 %v3548_v23, %v3536_v48 }
 0x28c   : > { %v3562_v54 = vadd.f32 %v3548_v23, %v3530_v35  ;;  %3577 = vst [vmem:[%s5901_s3 + $0x30] sm:$0xff] %v3557_v25  ;;  %3578 = vst [vmem:[%s5901_s3 + $0x38] sm:$0xff] %v3558_v47  ;;  %v3569_v53 = vadd.f32 %v3544_v22, %v3537_v49  ;;  %v3570_v28 = vadd.f32 %v3548_v23, %v3538_v51 }
 0x28d   : > { %3579 = vst [vmem:[%s5901_s3 + $0x40] sm:$0xff] %v3559_v52  ;;  %3580 = vst [vmem:[%s5901_s3 + $0x48] sm:$0xff] %v3560_v26 }
 0x28e   : > { %3581 = vst [vmem:[%s5901_s3 + $0x50] sm:$0xff] %v3561_v50  ;;  %3582 = vst [vmem:[%s5901_s3 + $0x58] sm:$0xff] %v3562_v54 }
 0x28f   : > { %3583 = vst [vmem:[%s5901_s3 + $0x60] sm:$0xff] %v3563_v55  ;;  %3584 = vst [vmem:[%s5901_s3 + $0x68] sm:$0xff] %v3564_v57 }
 0x290   : > { %3585 = vst [vmem:[%s5901_s3 + $0x70] sm:$0xff] %v3565_v58  ;;  %3586 = vst [vmem:[%s5901_s3 + $0x78] sm:$0xff] %v3566_v59 }
 0x291   : > { %3587 = vst [vmem:[%s5901_s3 + $0x80] sm:$0xff] %v3567_v60  ;;  %3588 = vst [vmem:[%s5901_s3 + $0x88] sm:$0xff] %v3568_v27 }
 0x292   : > { %3589 = vst [vmem:[%s5901_s3 + $0x90] sm:$0xff] %v3569_v53  ;;  %3590 = vst [vmem:[%s5901_s3 + $0x98] sm:$0xff] %v3570_v28 }
 0x293 PF: > { %s13_s16 = sadd.s32 1, %s4909_s16   ;;  %s5902_s12 = smov %s4897_s13 }
 0x294   : > { %p10_p12 = scmp.ge.s32.totalorder %s13_s16, 11   ;;  %s5903_s13 = smov %s4967_s20 }
 0x295   : > { %s5904_s14 = smov %s4905_s15  ;;  %s5905_s15 = smov %s5907_s17 }
 0x296   :  { %12 = sbr.rel (!%p10_p12) target bundleno = 3 (0x3), region = 101 }

// kernel: capsule_net_forward.7
= control target key start
LH: loop header
LB: loop body
LE: loop exit
PB: predicated region body
PF: predicated region fallthrough
CT: control target
= control target key end

     0   :  { %s654_s0 = inlined_call_operand.vmem [shape: f32[2,8,1152], index: 0, kind: input, shape index: {}]   ;;  %s655_s1 = inlined_call_operand.vmem [shape: f32[2,8,1152], index: 1, kind: output, shape index: {}]  }
   0x1   :  { %v385_v0 = vld [vmem:[%s654_s0] sm:$0xff]  ;;  %v390_v1 = vld [vmem:[%s654_s0 + $0x8] sm:$0xff]  ;;  %v395_v2 = vld [vmem:[%s654_s0 + $0x10] sm:$0xff] }
   0x2   :  { %v26_v3 = vmul.f32 %v385_v0, %v385_v0  ;;  %v27_v4 = vmul.f32 %v390_v1, %v390_v1  ;;  %v28_v5 = vmul.f32 %v395_v2, %v395_v2  ;;  %v406_v6 = vld [vmem:[%s654_s0 + $0x18] sm:$0xff]  ;;  %v411_v7 = vld [vmem:[%s654_s0 + $0x20] sm:$0xff]  ;;  %v416_v8 = vld [vmem:[%s654_s0 + $0x28] sm:$0xff] }
   0x3   :  { %v29_v9 = vmul.f32 %v406_v6, %v406_v6  ;;  %v30_v10 = vmul.f32 %v411_v7, %v411_v7  ;;  %v31_v11 = vmul.f32 %v416_v8, %v416_v8  ;;  %v427_v12 = vld [vmem:[%s654_s0 + $0x30] sm:$0xff]  ;;  %v432_v13 = vld [vmem:[%s654_s0 + $0x38] sm:$0xff]  ;;  %v453_v62 = vld [vmem:[%s654_s0 + $0x40] sm:$0xff] }
   0x4   :  { %v44_v14 = vrot.slane %v26_v3, 4  ;;  %v50_v15 = vrot.slane %v27_v4, 4  ;;  %v56_v16 = vrot.slane %v28_v5, 4  ;;  %v32_v17 = vmul.f32 %v427_v12, %v427_v12  ;;  %v458_v63 = vld [vmem:[%s654_s0 + $0x48] sm:$0xff] }
   0x5   :  { %v62_v18 = vrot.slane %v29_v9, 4  ;;  %v68_v19 = vrot.slane %v30_v10, 4  ;;  %v74_v20 = vrot.slane %v31_v11, 4  ;;  %v33_v21 = vmul.f32 %v432_v13, %v432_v13 }
   0x6   :  { %v45_v22 = vadd.f32 %v44_v14, %v26_v3  ;;  %v51_v23 = vadd.f32 %v50_v15, %v27_v4  ;;  %v57_v24 = vadd.f32 %v56_v16, %v28_v5  ;;  %v80_v25 = vrot.slane %v32_v17, 4  ;;  %v463_v3 = vld [vmem:[%s654_s0 + $0x50] sm:$0xff] }
   0x7   :  { %v63_v26 = vadd.f32 %v62_v18, %v29_v9  ;;  %v69_v27 = vadd.f32 %v68_v19, %v30_v10  ;;  %v75_v28 = vadd.f32 %v74_v20, %v31_v11  ;;  %v86_v29 = vrot.slane %v33_v21, 4 }
   0x8   :  { %v46_v30 = vrot.slane %v45_v22, 2  ;;  %v52_v31 = vrot.slane %v51_v23, 2  ;;  %v58_v32 = vrot.slane %v57_v24, 2  ;;  %v81_v33 = vadd.f32 %v80_v25, %v32_v17 }
   0x9   :  { %v64_v34 = vrot.slane %v63_v26, 2  ;;  %v70_v35 = vrot.slane %v69_v27, 2  ;;  %v76_v36 = vrot.slane %v75_v28, 2  ;;  %v87_v37 = vadd.f32 %v86_v29, %v33_v21 }
   0xa   :  { %v47_v38 = vadd.f32 %v46_v30, %v45_v22  ;;  %v53_v39 = vadd.f32 %v52_v31, %v51_v23  ;;  %v59_v40 = vadd.f32 %v58_v32, %v57_v24  ;;  %v82_v41 = vrot.slane %v81_v33, 2  ;;  %v503_v31 = vld [vmem:[%s654_s0 + $0x68] sm:$0xff] }
   0xb   :  { %v65_v42 = vadd.f32 %v64_v34, %v63_v26  ;;  %v71_v43 = vadd.f32 %v70_v35, %v69_v27  ;;  %v77_v44 = vadd.f32 %v76_v36, %v75_v28  ;;  %v88_v45 = vrot.slane %v87_v37, 2  ;;  %v490_v26 = vld [vmem:[%s654_s0 + $0x58] sm:$0xff]  ;;  %v495_v27 = vld [vmem:[%s654_s0 + $0x60] sm:$0xff] }
   0xc   :  { %v48_v46 = vrot.slane %v47_v38, 1  ;;  %v54_v47 = vrot.slane %v53_v39, 1  ;;  %v60_v48 = vrot.slane %v59_v40, 1  ;;  %v83_v49 = vadd.f32 %v82_v41, %v81_v33 }
   0xd   :  { %v66_v50 = vrot.slane %v65_v42, 1  ;;  %v72_v51 = vrot.slane %v71_v43, 1  ;;  %v78_v52 = vrot.slane %v77_v44, 1  ;;  %v89_v53 = vadd.f32 %v88_v45, %v87_v37 }
   0xe   :  { %v438_v54 = vadd.f32 %v48_v46, %v47_v38  ;;  %v440_v55 = vadd.f32 %v54_v47, %v53_v39  ;;  %v442_v56 = vadd.f32 %v60_v48, %v59_v40  ;;  %v84_v57 = vrot.slane %v83_v49, 1 }
   0xf   :  { %v444_v58 = vadd.f32 %v66_v50, %v65_v42  ;;  %v446_v59 = vadd.f32 %v72_v51, %v71_v43  ;;  %v448_v60 = vadd.f32 %v78_v52, %v77_v44  ;;  %v90_v61 = vrot.slane %v89_v53, 1 }
  0x10   :  { %v152_v4 = vadd.f32 1.0, %v438_v54  ;;  %v206_v5 = vadd.f32 1e-09, %v438_v54  ;;  %v153_v9 = vadd.f32 1.0, %v440_v55  ;;  %v207_v10 = vadd.f32 1e-09, %v440_v55 }
  0x11   :  { %v154_v11 = vadd.f32 1.0, %v442_v56  ;;  %v208_v14 = vadd.f32 1e-09, %v442_v56  ;;  %v155_v15 = vadd.f32 1.0, %v444_v58  ;;  %v209_v16 = vadd.f32 1e-09, %v444_v58 }
  0x12   :  { %300 = vrcp.f32 %v152_v4  ;;  %v156_v17 = vadd.f32 1.0, %v446_v59  ;;  %v210_v18 = vadd.f32 1e-09, %v446_v59  ;;  %v157_v19 = vadd.f32 1.0, %v448_v60 }
  0x13   :  { %302 = vrsqrt.f32 %v206_v5  ;;  %v211_v20 = vadd.f32 1e-09, %v448_v60  ;;  %v477_v21 = vadd.f32 %v84_v57, %v83_v49  ;;  %v479_v22 = vadd.f32 %v90_v61, %v89_v53 }
  0x14   :  { %304 = vrcp.f32 %v153_v9  ;;  %v34_v23 = vmul.f32 %v453_v62, %v453_v62  ;;  %v35_v24 = vmul.f32 %v458_v63, %v458_v63  ;;  %v36_v25 = vmul.f32 %v463_v3, %v463_v3 }
  0x15   :  { %306 = vrsqrt.f32 %v207_v10  ;;  %v158_v28 = vadd.f32 1.0, %v477_v21  ;;  %v212_v29 = vadd.f32 1e-09, %v477_v21  ;;  %v159_v30 = vadd.f32 1.0, %v479_v22 }
  0x16   :  { %308 = vrcp.f32 %v154_v11  ;;  %v213_v32 = vadd.f32 1e-09, %v479_v22  ;;  %v92_v33 = vrot.slane %v34_v23, 4  ;;  %v98_v34 = vrot.slane %v35_v24, 4 }
  0x17   :  { %310 = vrsqrt.f32 %v208_v14  ;;  %v104_v35 = vrot.slane %v36_v25, 4  ;;  %v37_v36 = vmul.f32 %v490_v26, %v490_v26  ;;  %v38_v37 = vmul.f32 %v495_v27, %v495_v27 }
  0x18   :  { %312 = vrcp.f32 %v155_v15  ;;  %v93_v38 = vadd.f32 %v92_v33, %v34_v23  ;;  %v99_v39 = vadd.f32 %v98_v34, %v35_v24  ;;  %v39_v40 = vmul.f32 %v503_v31, %v503_v31 }
  0x19   :  { %314 = vrsqrt.f32 %v209_v16  ;;  %v105_v41 = vadd.f32 %v104_v35, %v36_v25  ;;  %v110_v42 = vrot.slane %v37_v36, 4  ;;  %v116_v43 = vrot.slane %v38_v37, 4 }
  0x1a   :  { %316 = vrcp.f32 %v156_v17  ;;  %v94_v44 = vrot.slane %v93_v38, 2  ;;  %v100_v45 = vrot.slane %v99_v39, 2  ;;  %v122_v46 = vrot.slane %v39_v40, 4 }
  0x1b   :  { %318 = vrsqrt.f32 %v210_v18  ;;  %v106_v47 = vrot.slane %v105_v41, 2  ;;  %v111_v48 = vadd.f32 %v110_v42, %v37_v36  ;;  %v117_v49 = vadd.f32 %v116_v43, %v38_v37 }
  0x1c   :  { %v301_v50 = vpop.eup %300  ;;  %320 = vrcp.f32 %v157_v19  ;;  %v95_v51 = vadd.f32 %v94_v44, %v93_v38  ;;  %v101_v52 = vadd.f32 %v100_v45, %v99_v39  ;;  %v512_v53 = vadd.f32 %v122_v46, %v39_v40 }
  0x1d   :  { %v303_v57 = vpop.eup %302  ;;  %v171_v61 = vmul.f32 %v301_v50, %v438_v54  ;;  %322 = vrsqrt.f32 %v211_v20  ;;  %v107_v4 = vadd.f32 %v106_v47, %v105_v41  ;;  %v112_v5 = vrot.slane %v111_v48, 2 }
  0x1e   :  { %v305_v9 = vpop.eup %304  ;;  %324 = vrcp.f32 %v158_v28  ;;  %v96_v10 = vrot.slane %v95_v51, 1  ;;  %v102_v11 = vrot.slane %v101_v52, 1  ;;  %v118_v14 = vrot.slane %v117_v49, 2 }
  0x1f   :  { %v307_v15 = vpop.eup %306  ;;  %v242_v16 = vmul.f32 %v303_v57, %v171_v61  ;;  %v173_v17 = vmul.f32 %v305_v9, %v440_v55  ;;  %326 = vrsqrt.f32 %v212_v29  ;;  %v108_v18 = vrot.slane %v107_v4, 1 }
  0x20   :  { %v309_v19 = vpop.eup %308  ;;  %328 = vrcp.f32 %v159_v30  ;;  %v516_v23 = vadd.f32 %v96_v10, %v95_v51  ;;  %v518_v24 = vadd.f32 %v102_v11, %v101_v52  ;;  %v113_v54 = vadd.f32 %v112_v5, %v111_v48 }
  0x21   :  { %v311_v20 = vpop.eup %310  ;;  %v260_v25 = vmul.f32 %v242_v16, %v385_v0  ;;  %v243_v28 = vmul.f32 %v307_v15, %v173_v17  ;;  %v175_v33 = vmul.f32 %v309_v19, %v442_v56  ;;  %330 = vrsqrt.f32 %v213_v32  ;;  %v568_v15 = vld [vmem:[%s654_s0 + $0x78] sm:$0xff] }
  0x22   :  { %v313_v34 = vpop.eup %312  ;;  %v160_v35 = vadd.f32 1.0, %v516_v23  ;;  %v214_v55 = vadd.f32 1e-09, %v516_v23  ;;  %v161_v29 = vadd.f32 1.0, %v518_v24  ;;  %v215_v30 = vadd.f32 1e-09, %v518_v24 }
  0x23   :  { %v315_v36 = vpop.eup %314  ;;  %278 = vst [vmem:[%s655_s1] sm:$0xff] %v260_v25  ;;  %v261_v0 = vmul.f32 %v243_v28, %v390_v1  ;;  %v244_v37 = vmul.f32 %v311_v20, %v175_v33  ;;  %v177_v56 = vmul.f32 %v313_v34, %v444_v58  ;;  %v531_v32 = vadd.f32 %v108_v18, %v107_v4  ;;  %v583_v18 = vld [vmem:[%s654_s0 + $0x88] sm:$0xff] }
  0x24   :  { %v317_v38 = vpop.eup %316  ;;  %332 = vrcp.f32 %v160_v35  ;;  %v114_v39 = vrot.slane %v113_v54, 1  ;;  %v119_v40 = vadd.f32 %v118_v14, %v117_v49  ;;  %v124_v41 = vrot.slane %v512_v53, 2 }
  0x25   :  { %v319_v42 = vpop.eup %318  ;;  %279 = vst [vmem:[%s655_s1 + $0x8] sm:$0xff] %v261_v0  ;;  %v262_v43 = vmul.f32 %v244_v37, %v395_v2  ;;  %v245_v44 = vmul.f32 %v315_v36, %v177_v56  ;;  %v179_v1 = vmul.f32 %v317_v38, %v446_v59  ;;  %334 = vrsqrt.f32 %v214_v55  ;;  %v551_v59 = vld [vmem:[%s654_s0 + $0x70] sm:$0xff] }
  0x26   :  { %v321_v58 = vpop.eup %320  ;;  %336 = vrcp.f32 %v161_v29  ;;  %v162_v45 = vadd.f32 1.0, %v531_v32  ;;  %v216_v46 = vadd.f32 1e-09, %v531_v32  ;;  %v541_v47 = vadd.f32 %v114_v39, %v113_v54 }
  0x27   :  { %v323_v48 = vpop.eup %322  ;;  %280 = vst [vmem:[%s655_s1 + $0x10] sm:$0xff] %v262_v43  ;;  %v263_v49 = vmul.f32 %v245_v44, %v406_v6  ;;  %v246_v2 = vmul.f32 %v319_v42, %v179_v1  ;;  %v181_v50 = vmul.f32 %v321_v58, %v448_v60  ;;  %338 = vrsqrt.f32 %v215_v30 }
  0x28   :  { %v325_v51 = vpop.eup %324  ;;  %340 = vrcp.f32 %v162_v45  ;;  %v163_v52 = vadd.f32 1.0, %v541_v47  ;;  %v217_v57 = vadd.f32 1e-09, %v541_v47  ;;  %v120_v61 = vrot.slane %v119_v40, 1 }
  0x29   :  { %v327_v4 = vpop.eup %326  ;;  %281 = vst [vmem:[%s655_s1 + $0x18] sm:$0xff] %v263_v49  ;;  %v264_v6 = vmul.f32 %v246_v2, %v411_v7  ;;  %v247_v60 = vmul.f32 %v323_v48, %v181_v50  ;;  %v183_v5 = vmul.f32 %v325_v51, %v477_v21  ;;  %342 = vrsqrt.f32 %v216_v46  ;;  %v573_v7 = vld [vmem:[%s654_s0 + $0x80] sm:$0xff] }
  0x2a   :  { %v329_v9 = vpop.eup %328  ;;  %344 = vrcp.f32 %v163_v52  ;;  %v560_v10 = vadd.f32 %v120_v61, %v119_v40  ;;  %v125_v11 = vadd.f32 %v124_v41, %v512_v53  ;;  %v40_v14 = vmul.f32 %v551_v59, %v551_v59 }
  0x2b   :  { %v331_v21 = vpop.eup %330  ;;  %282 = vst [vmem:[%s655_s1 + $0x20] sm:$0xff] %v264_v6  ;;  %v265_v53 = vmul.f32 %v247_v60, %v416_v8  ;;  %v248_v16 = vmul.f32 %v327_v4, %v183_v5  ;;  %v185_v17 = vmul.f32 %v329_v9, %v479_v22  ;;  %346 = vrsqrt.f32 %v217_v57 }
  0x2c   :  { %v164_v19 = vadd.f32 1.0, %v560_v10  ;;  %v218_v54 = vadd.f32 1e-09, %v560_v10  ;;  %v126_v20 = vrot.slane %v125_v11, 1  ;;  %v128_v25 = vrot.slane %v40_v14, 4 }
  0x2d   :  { %283 = vst [vmem:[%s655_s1 + $0x28] sm:$0xff] %v265_v53  ;;  %v266_v8 = vmul.f32 %v248_v16, %v427_v12  ;;  %v249_v28 = vmul.f32 %v331_v21, %v185_v17  ;;  %v41_v22 = vmul.f32 %v568_v15, %v568_v15  ;;  %v42_v33 = vmul.f32 %v573_v7, %v573_v7 }
  0x2e   :  { %v333_v34 = vpop.eup %332  ;;  %348 = vrcp.f32 %v164_v19  ;;  %v595_v35 = vadd.f32 %v126_v20, %v125_v11  ;;  %v129_v55 = vadd.f32 %v128_v25, %v40_v14  ;;  %v43_v29 = vmul.f32 %v583_v18, %v583_v18 }
  0x2f   :  { %v335_v30 = vpop.eup %334  ;;  %284 = vst [vmem:[%s655_s1 + $0x30] sm:$0xff] %v266_v8  ;;  %v267_v12 = vmul.f32 %v249_v28, %v432_v13  ;;  %v187_v36 = vmul.f32 %v333_v34, %v516_v23  ;;  %350 = vrsqrt.f32 %v218_v54  ;;  %v134_v0 = vrot.slane %v41_v22, 4 }
  0x30   :  { %v337_v37 = vpop.eup %336  ;;  %v165_v56 = vadd.f32 1.0, %v595_v35  ;;  %v219_v38 = vadd.f32 1e-09, %v595_v35  ;;  %v130_v39 = vrot.slane %v129_v55, 2  ;;  %v140_v40 = vrot.slane %v42_v33, 4 }
  0x31   :  { %v339_v41 = vpop.eup %338  ;;  %285 = vst [vmem:[%s655_s1 + $0x38] sm:$0xff] %v267_v12  ;;  %v250_v42 = vmul.f32 %v335_v30, %v187_v36  ;;  %v189_v43 = vmul.f32 %v337_v37, %v518_v24  ;;  %v135_v13 = vadd.f32 %v134_v0, %v41_v22  ;;  %v146_v44 = vrot.slane %v43_v29, 4 }
  0x32   :  { %v341_v23 = vpop.eup %340  ;;  %352 = vrcp.f32 %v165_v56  ;;  %v131_v1 = vadd.f32 %v130_v39, %v129_v55  ;;  %v141_v58 = vadd.f32 %v140_v40, %v42_v33 }
  0x33   :  { %v343_v45 = vpop.eup %342  ;;  %v268_v46 = vmul.f32 %v250_v42, %v453_v62  ;;  %v251_v48 = vmul.f32 %v339_v41, %v189_v43  ;;  %v191_v49 = vmul.f32 %v341_v23, %v531_v32  ;;  %354 = vrsqrt.f32 %v219_v38 }
  0x34   :  { %v345_v2 = vpop.eup %344  ;;  %v132_v50 = vrot.slane %v131_v1, 1  ;;  %v136_v51 = vrot.slane %v135_v13, 2  ;;  %v142_v52 = vrot.slane %v141_v58, 2  ;;  %v147_v57 = vadd.f32 %v146_v44, %v43_v29 }
  0x35   :  { %v347_v61 = vpop.eup %346  ;;  %286 = vst [vmem:[%s655_s1 + $0x40] sm:$0xff] %v268_v46  ;;  %v269_v24 = vmul.f32 %v251_v48, %v458_v63  ;;  %v252_v4 = vmul.f32 %v343_v45, %v191_v49  ;;  %v193_v6 = vmul.f32 %v345_v2, %v541_v47 }
  0x36   :  { %v133_v62 = vadd.f32 %v132_v50, %v131_v1  ;;  %v137_v60 = vadd.f32 %v136_v51, %v135_v13  ;;  %v143_v5 = vadd.f32 %v142_v52, %v141_v58  ;;  %v148_v32 = vrot.slane %v147_v57, 2 }
  0x37   :  { %287 = vst [vmem:[%s655_s1 + $0x48] sm:$0xff] %v269_v24  ;;  %v270_v9 = vmul.f32 %v252_v4, %v463_v3  ;;  %v253_v11 = vmul.f32 %v347_v61, %v193_v6 }
  0x38   :  { %v349_v14 = vpop.eup %348  ;;  %v166_v21 = vadd.f32 1.0, %v133_v62  ;;  %v220_v53 = vadd.f32 1e-09, %v133_v62  ;;  %v138_v16 = vrot.slane %v137_v60, 1  ;;  %v144_v17 = vrot.slane %v143_v5, 1 }
  0x39   :  { %v351_v63 = vpop.eup %350  ;;  %288 = vst [vmem:[%s655_s1 + $0x50] sm:$0xff] %v270_v9  ;;  %v271_v47 = vmul.f32 %v253_v11, %v490_v26  ;;  %v195_v19 = vmul.f32 %v349_v14, %v560_v10  ;;  %v149_v54 = vadd.f32 %v148_v32, %v147_v57 }
  0x3a   :  { %356 = vrcp.f32 %v166_v21  ;;  %v139_v20 = vadd.f32 %v138_v16, %v137_v60  ;;  %v145_v25 = vadd.f32 %v144_v17, %v143_v5 }
  0x3b   :  { %289 = vst [vmem:[%s655_s1 + $0x58] sm:$0xff] %v271_v47  ;;  %v254_v3 = vmul.f32 %v351_v63, %v195_v19  ;;  %358 = vrsqrt.f32 %v220_v53  ;;  %v150_v8 = vrot.slane %v149_v54, 1 }
  0x3c   :  { %v353_v28 = vpop.eup %352  ;;  %v167_v22 = vadd.f32 1.0, %v139_v20  ;;  %v221_v33 = vadd.f32 1e-09, %v139_v20  ;;  %v168_v34 = vadd.f32 1.0, %v145_v25  ;;  %v222_v29 = vadd.f32 1e-09, %v145_v25 }
  0x3d   :  { %v355_v55 = vpop.eup %354  ;;  %v272_v26 = vmul.f32 %v254_v3, %v495_v27  ;;  %v197_v10 = vmul.f32 %v353_v28, %v595_v35  ;;  %v151_v30 = vadd.f32 %v150_v8, %v149_v54 }
  0x3e   :  { %360 = vrcp.f32 %v167_v22 }
  0x3f   :  { %290 = vst [vmem:[%s655_s1 + $0x60] sm:$0xff] %v272_v26  ;;  %v255_v12 = vmul.f32 %v355_v55, %v197_v10  ;;  %362 = vrsqrt.f32 %v221_v33  ;;  %v169_v36 = vadd.f32 1.0, %v151_v30  ;;  %v223_v0 = vadd.f32 1e-09, %v151_v30 }
  0x40   :  { %364 = vrcp.f32 %v168_v34 }
  0x41   :  { %v273_v37 = vmul.f32 %v255_v12, %v503_v31  ;;  %366 = vrsqrt.f32 %v222_v29 }
  0x42   :  { %368 = vrcp.f32 %v169_v36 }
  0x43   :  { %291 = vst [vmem:[%s655_s1 + $0x68] sm:$0xff] %v273_v37  ;;  %370 = vrsqrt.f32 %v223_v0 }
  0x44   :  { %v357_v27 = vpop.eup %356 }
  0x45   :  { %v359_v35 = vpop.eup %358  ;;  %v199_v56 = vmul.f32 %v357_v27, %v133_v62 }
  0x47   :  { %v256_v38 = vmul.f32 %v359_v35, %v199_v56 }
  0x48   :  { %v361_v39 = vpop.eup %360 }
  0x49   :  { %v363_v40 = vpop.eup %362  ;;  %v274_v41 = vmul.f32 %v256_v38, %v551_v59  ;;  %v201_v42 = vmul.f32 %v361_v39, %v139_v20 }
  0x4a   :  { %v365_v43 = vpop.eup %364 }
  0x4b   :  { %v367_v13 = vpop.eup %366  ;;  %292 = vst [vmem:[%s655_s1 + $0x70] sm:$0xff] %v274_v41  ;;  %v257_v31 = vmul.f32 %v363_v40, %v201_v42  ;;  %v203_v44 = vmul.f32 %v365_v43, %v145_v25 }
  0x4c   :  { %v369_v23 = vpop.eup %368 }
  0x4d   :  { %v371_v1 = vpop.eup %370  ;;  %v275_v58 = vmul.f32 %v257_v31, %v568_v15  ;;  %v258_v45 = vmul.f32 %v367_v13, %v203_v44  ;;  %v205_v46 = vmul.f32 %v369_v23, %v151_v30 }
  0x4f   :  { %293 = vst [vmem:[%s655_s1 + $0x78] sm:$0xff] %v275_v58  ;;  %v276_v59 = vmul.f32 %v258_v45, %v573_v7  ;;  %v259_v48 = vmul.f32 %v371_v1, %v205_v46 }
  0x51   :  { %294 = vst [vmem:[%s655_s1 + $0x80] sm:$0xff] %v276_v59  ;;  %v277_v49 = vmul.f32 %v259_v48, %v583_v18 }
  0x53   :  { %295 = vst [vmem:[%s655_s1 + $0x88] sm:$0xff] %v277_v49 }

// kernel: capsule_net_forward.8
= control target key start
LH: loop header
LB: loop body
LE: loop exit
PB: predicated region body
PF: predicated region fallthrough
CT: control target
= control target key end

     0   :  { %s2786_s9 = smov 0   ;;  %s5030_s0 = inlined_call_operand.vmem [shape: f32[2,8,1152], index: 0, kind: input, shape index: {}]   ;;  %s5031_s1 = inlined_call_operand.vmem [shape: f32[10,8,16,1152], index: 1, kind: input, shape index: {}]   ;;  %s5032_s2 = inlined_call_operand.vmem [shape: f32[10,2,16], index: 2, kind: output, shape index: {}]  }
   0x1 LB: > { %s2439_s10 = sadd.s32 4294967295, %s2768_s9   ;;  %p2443_p0 = scmp.ge.s32.totalorder %s2768_s9, 1  ;;  %s2768_s9 = sphi %s2786_s9, %s12_s9  }
   0x2   : > { %p112_p1 = scmp.lt.s32.totalorder %s2768_s9, 11 }
   0x4   : > { %p113_p2 = pnand %p2443_p0, %p112_p1 }
   0x6   : > { %116 = sbr.rel (%p113_p2) target bundleno = 1553 (0x611), region = 28 }
   0xd   : > { %v2770_v0 = vmov 9.0   ;;  %p133_p3 = scmp.lt.s32.totalorder %s2439_s10, 9  ;;  %v5033_v1 = vlaneseq  ;;  %v2806_v4 = vld [vmem:[%s5030_s0] sm:$0xff]  ;;  %v2811_v5 = vld [vmem:[%s5030_s0 + $0x8] sm:$0xff]  ;;  %v2824_v7 = vld [vmem:[%s5030_s0 + $0x10] sm:$0xff]  ;;  %vm2370_vm0 = vcmask 130112  }
   0xe   : > { %1427 = vadd.xlane.f32.xlu0 %v2770_v0  ;;  %v2829_v8 = vld [vmem:[%s5030_s0 + $0x18] sm:$0xff]  ;;  %v2834_v9 = vld [vmem:[%s5030_s0 + $0x20] sm:$0xff]  ;;  %v2839_v10 = vld [vmem:[%s5030_s0 + $0x28] sm:$0xff]  ;;  %vm2381_vm1 = vcmask 1041409   ;;  %vm2384_vm2 = vcmask 123904  }
   0xf   : > { %s5809_s10 = smov (!%p133_p3, %s2439_s10), 9  ;;  %v2797_v2 = vshrl.u32 %v5033_v1, 7  ;;  %v2844_v11 = vld [vmem:[%s5030_s0 + $0x30] sm:$0xff]  ;;  %v2849_v12 = vld [vmem:[%s5030_s0 + $0x38] sm:$0xff]  ;;  %v2854_v13 = vld [vmem:[%s5030_s0 + $0x40] sm:$0xff] }
  0x10   : > { %s2574_s11 = smul.u32 1152, %s5809_s10 }
  0x11   : > { %5301 = vst [vmem:[#allocation2_spill] sm:$0xff] %v2797_v2  ;;  %v2801_v3 = vsub.s32 0, %v2797_v2  ;;  %v2814_v6 = vsub.s32 1, %v2797_v2  ;;  %v2961_v0 = vsub.s32 2, %v2797_v2 }
  0x12   : > { %s2819_s18 = scalar_lea.vmem %s5031_s1, %s2574_s11 }
  0x13   : > { %5302 = vst [vmem:[#allocation3_spill] sm:$0xff] %v2801_v3  ;;  %5303 = vst [vmem:[#allocation4_spill] sm:$0xff] %v2814_v6  ;;  %v2858_v14 = vrot.slane %v2806_v4, %v2801_v3  ;;  %v2862_v15 = vrot.slane %v2811_v5, %v2801_v3  ;;  %v169_v16 = vld [vmem:[%s2819_s18 + $0x48] sm:$0xff]  ;;  %v170_v17 = vld [vmem:[%s2819_s18 + $0x50] sm:$0xff]  ;;  %v2869_v19 = vrot.slane %v2824_v7, %v2801_v3 }
  0x14   : > { %v171_v18 = vld [vmem:[%s2819_s18 + $0x58] sm:$0xff]  ;;  %v2873_v20 = vrot.slane %v2829_v8, %v2801_v3  ;;  %v2877_v21 = vrot.slane %v2834_v9, %v2801_v3  ;;  %v2881_v22 = vrot.slane %v2806_v4, %v2814_v6  ;;  %v172_v23 = vld [vmem:[%s2819_s18 + $0x60] sm:$0xff]  ;;  %v173_v24 = vld [vmem:[%s2819_s18 + $0x68] sm:$0xff]  ;;  %v2888_v26 = vrot.slane %v2839_v10, %v2801_v3  ;;  %5312 = vst [vmem:[#allocation13_spill] sm:$0xff] %v2961_v0 }
  0x15   : > { %v174_v25 = vld [vmem:[%s2819_s18 + $0x70] sm:$0xff]  ;;  %v2892_v27 = vrot.slane %v2844_v11, %v2801_v3  ;;  %v2896_v28 = vrot.slane %v2811_v5, %v2814_v6  ;;  %v2900_v29 = vrot.slane %v2824_v7, %v2814_v6  ;;  %v2904_v30 = vrot.slane %v2849_v12, %v2801_v3  ;;  %v2455_v31 = vld [vmem:[%s2819_s18 + $0xd8] sm:$0xff]  ;;  %v2456_v32 = vld [vmem:[%s2819_s18 + $0xe0] sm:$0xff] }
  0x16   : > { %5304 = vst [vmem:[#allocation5_spill] sm:$0xff] %v2888_v26  ;;  %v2457_v33 = vld [vmem:[%s2819_s18 + $0xe8] sm:$0xff]  ;;  %v2911_v34 = vrot.slane %v2829_v8, %v2814_v6  ;;  %v2915_v35 = vrot.slane %v2834_v9, %v2814_v6  ;;  %v2919_v36 = vrot.slane %v2839_v10, %v2814_v6  ;;  %v2923_v37 = vrot.slane %v2854_v13, %v2801_v3  ;;  %v2458_v40 = vld [vmem:[%s2819_s18 + $0xf0] sm:$0xff]  ;;  %v2459_v41 = vld [vmem:[%s2819_s18 + $0xf8] sm:$0xff] }
  0x17   : > { %5305 = vst [vmem:[#allocation6_spill] sm:$0xff] %v2892_v27  ;;  %5306 = vst [vmem:[#allocation7_spill] sm:$0xff] %v2904_v30  ;;  %v259_v38 = vmul.f32 %v2858_v14, %v169_v16  ;;  %v260_v39 = vmul.f32 %v2862_v15, %v170_v17  ;;  %v2460_v42 = vld [vmem:[%s2819_s18 + $0x100] sm:$0xff]  ;;  %v2932_v43 = vrot.slane %v2844_v11, %v2814_v6  ;;  %v175_v44 = vld [vmem:[%s2819_s18 + $0x78] sm:$0xff]  ;;  %v3018_v3 = vsub.s32 4, %v2797_v2 }
  0x18   : > { %5307 = vst [vmem:[#allocation8_spill] sm:$0xff] %v2919_v36  ;;  %5308 = vst [vmem:[#allocation9_spill] sm:$0xff] %v2923_v37  ;;  %v176_v45 = vld [vmem:[%s2819_s18 + $0x80] sm:$0xff]  ;;  %v261_v46 = vmul.f32 %v2869_v19, %v171_v18  ;;  %v262_v47 = vmul.f32 %v2873_v20, %v172_v23  ;;  %v2461_v48 = vld [vmem:[%s2819_s18 + $0x108] sm:$0xff]  ;;  %v2941_v49 = vrot.slane %v2849_v12, %v2814_v6 }
  0x19   : > { %5309 = vst [vmem:[#allocation10_spill] sm:$0xff] %v2932_v43  ;;  %v2945_v50 = vrot.slane %v2854_v13, %v2814_v6  ;;  %v177_v51 = vld [vmem:[%s2819_s18 + $0x88] sm:$0xff]  ;;  %v263_v52 = vmul.f32 %v2877_v21, %v173_v24  ;;  %v2462_v53 = vld [vmem:[%s2819_s18 + $0x110] sm:$0xff]  ;;  %v2463_v54 = vld [vmem:[%s2819_s18 + $0x118] sm:$0xff]  ;;  %v386_v55 = vmul.f32 %v2455_v31, %v2881_v22  ;;  %v387_v56 = vmul.f32 %v2456_v32, %v2896_v28 }
  0x1a   : > { %5310 = vst [vmem:[#allocation11_spill] sm:$0xff] %v2941_v49  ;;  %v388_v57 = vmul.f32 %v2457_v33, %v2900_v29  ;;  %v264_v58 = vmul.f32 %v2888_v26, %v174_v25  ;;  %v389_v59 = vmul.f32 %v2458_v40, %v2911_v34  ;;  %v390_v60 = vmul.f32 %v2459_v41, %v2915_v35  ;;  %v2481_v1 = vld [vmem:[%s2819_s18 + $0x1a8] sm:$0xff] }
  0x1b   : > { %5311 = vst [vmem:[#allocation12_spill] sm:$0xff] %v2945_v50  ;;  %v391_v61 = vmul.f32 %v2460_v42, %v2919_v36  ;;  %v265_v62 = vmul.f32 %v2892_v27, %v175_v44  ;;  %v392_v63 = vmul.f32 %v2461_v48, %v2932_v43  ;;  %v266_v16 = vmul.f32 %v2904_v30, %v176_v45  ;;  %v2473_v42 = vld [vmem:[%s2819_s18 + $0x168] sm:$0xff]  ;;  %v2475_v48 = vld [vmem:[%s2819_s18 + $0x178] sm:$0xff]  ;;  %v2498_v30 = vld [vmem:[%s2819_s18 + $0x230] sm:$0xff] }
  0x1c   : > { %v267_v17 = vmul.f32 %v2923_v37, %v177_v51  ;;  %v393_v18 = vmul.f32 %v2462_v53, %v2941_v49  ;;  %v394_v23 = vmul.f32 %v2463_v54, %v2945_v50  ;;  %v422_v24 = vadd.f32 %v386_v55, %v259_v38  ;;  %v2474_v38 = vld [vmem:[%s2819_s18 + $0x170] sm:$0xff]  ;;  %v2476_v51 = vld [vmem:[%s2819_s18 + $0x180] sm:$0xff]  ;;  %5323 = vst [vmem:[#allocation24_spill] sm:$0xff] %v3018_v3  ;;  %v2497_v37 = vld [vmem:[%s2819_s18 + $0x228] sm:$0xff] }
  0x1d   : > { %v423_v25 = vadd.f32 %v387_v56, %v260_v39  ;;  %v424_v31 = vadd.f32 %v388_v57, %v261_v46  ;;  %v2969_v32 = vrot.slane %v2806_v4, %v2961_v0  ;;  %v425_v33 = vadd.f32 %v389_v59, %v262_v47  ;;  %v2478_v59 = vld [vmem:[%s2819_s18 + $0x190] sm:$0xff] }
  0x1e   : > { %v426_v40 = vadd.f32 %v390_v60, %v263_v52  ;;  %v427_v41 = vadd.f32 %v391_v61, %v264_v58  ;;  %v2974_v44 = vrot.slane %v2811_v5, %v2961_v0  ;;  %v428_v45 = vadd.f32 %v392_v63, %v265_v62  ;;  %v2477_v52 = vld [vmem:[%s2819_s18 + $0x188] sm:$0xff]  ;;  %v2479_v60 = vld [vmem:[%s2819_s18 + $0x198] sm:$0xff]  ;;  %v2480_v61 = vld [vmem:[%s2819_s18 + $0x1a0] sm:$0xff] }
  0x1f   : > { %5313 = vst [vmem:[#allocation14_spill] sm:$0xff] %v2969_v32  ;;  %v2979_v39 = vrot.slane %v2824_v7, %v2961_v0  ;;  %v2983_v46 = vrot.slane %v2829_v8, %v2961_v0  ;;  %v2987_v47 = vrot.slane %v2834_v9, %v2961_v0  ;;  %v2994_v53 = vrot.slane %v2839_v10, %v2961_v0 }
  0x20   : > { %5314 = vst [vmem:[#allocation15_spill] sm:$0xff] %v2974_v44  ;;  %v2998_v54 = vrot.slane %v2844_v11, %v2961_v0  ;;  %v3002_v55 = vrot.slane %v2849_v12, %v2961_v0  ;;  %v3005_v56 = vsub.s32 3, %v2797_v2  ;;  %v429_v57 = vadd.f32 %v393_v18, %v266_v16 }
  0x21   : > { %5315 = vst [vmem:[#allocation16_spill] sm:$0xff] %v2979_v39  ;;  %5316 = vst [vmem:[#allocation17_spill] sm:$0xff] %v2983_v46  ;;  %v430_v58 = vadd.f32 %v394_v23, %v267_v17  ;;  %v3012_v62 = vrot.slane %v2854_v13, %v2961_v0  ;;  %v549_v63 = vmul.f32 %v2473_v42, %v2969_v32  ;;  %v3021_v50 = vsub.s32 5, %v2797_v2 }
  0x22   : > { %5317 = vst [vmem:[#allocation18_spill] sm:$0xff] %v2987_v47  ;;  %5318 = vst [vmem:[#allocation19_spill] sm:$0xff] %v2994_v53  ;;  %v550_v6 = vmul.f32 %v2474_v38, %v2974_v44  ;;  %v3024_v16 = vsub.s32 6, %v2797_v2  ;;  %v551_v17 = vmul.f32 %v2475_v48, %v2979_v39  ;;  %v552_v18 = vmul.f32 %v2476_v51, %v2983_v46 }
  0x23   : > { %5319 = vst [vmem:[#allocation20_spill] sm:$0xff] %v2998_v54  ;;  %5320 = vst [vmem:[#allocation21_spill] sm:$0xff] %v3002_v55  ;;  %v553_v23 = vmul.f32 %v2477_v52, %v2987_v47  ;;  %v3030_v42 = vsub.s32 7, %v2797_v2  ;;  %v554_v38 = vmul.f32 %v2478_v59, %v2994_v53  ;;  %v555_v0 = vmul.f32 %v2479_v60, %v2998_v54  ;;  %v2491_v52 = vld [vmem:[%s2819_s18 + $0x1f8] sm:$0xff]  ;;  %v2494_v53 = vld [vmem:[%s2819_s18 + $0x210] sm:$0xff] }
  0x24   : > { %5321 = vst [vmem:[#allocation22_spill] sm:$0xff] %v3005_v56  ;;  %5322 = vst [vmem:[#allocation23_spill] sm:$0xff] %v3012_v62  ;;  %v556_v44 = vmul.f32 %v2480_v61, %v3002_v55  ;;  %v3037_v32 = vrot.slane %v2806_v4, %v3005_v56  ;;  %v557_v48 = vmul.f32 %v2481_v1, %v3012_v62  ;;  %v2492_v61 = vld [vmem:[%s2819_s18 + $0x200] sm:$0xff]  ;;  %v2493_v55 = vld [vmem:[%s2819_s18 + $0x208] sm:$0xff] }
  0x25   : > { %5324 = vst [vmem:[#allocation25_spill] sm:$0xff] %v3021_v50  ;;  %5325 = vst [vmem:[#allocation26_spill] sm:$0xff] %v3024_v16  ;;  %v585_v51 = vadd.f32 %v549_v63, %v422_v24  ;;  %v3043_v2 = vrot.slane %v2811_v5, %v3005_v56  ;;  %v3047_v59 = vrot.slane %v2824_v7, %v3005_v56 }
  0x26   : > { %5326 = vst [vmem:[#allocation27_spill] sm:$0xff] %v3030_v42  ;;  %5327 = vst [vmem:[#allocation28_spill] sm:$0xff] %v3037_v32  ;;  %v586_v60 = vadd.f32 %v550_v6, %v423_v25  ;;  %v3053_v54 = vrot.slane %v2829_v8, %v3005_v56  ;;  %v3057_v1 = vrot.slane %v2834_v9, %v3005_v56  ;;  %v2495_v6 = vld [vmem:[%s2819_s18 + $0x218] sm:$0xff]  ;;  %v2496_v25 = vld [vmem:[%s2819_s18 + $0x220] sm:$0xff] }
  0x27   : > { %5328 = vst [vmem:[#allocation29_spill] sm:$0xff] %v3043_v2  ;;  %5329 = vst [vmem:[#allocation30_spill] sm:$0xff] %v3047_v59  ;;  %v3061_v24 = vrot.slane %v2839_v10, %v3005_v56  ;;  %v587_v63 = vadd.f32 %v551_v17, %v424_v31  ;;  %v588_v62 = vadd.f32 %v552_v18, %v425_v33  ;;  %v2499_v18 = vld [vmem:[%s2819_s18 + $0x238] sm:$0xff] }
  0x28   : > { %5330 = vst [vmem:[#allocation31_spill] sm:$0xff] %v3053_v54  ;;  %5331 = vst [vmem:[#allocation32_spill] sm:$0xff] %v3057_v1  ;;  %v3068_v47 = vrot.slane %v2844_v11, %v3005_v56  ;;  %v3072_v46 = vrot.slane %v2849_v12, %v3005_v56  ;;  %v589_v39 = vadd.f32 %v553_v23, %v426_v40 }
  0x29   : > { %5332 = vst [vmem:[#allocation33_spill] sm:$0xff] %v3061_v24  ;;  %v590_v49 = vadd.f32 %v554_v38, %v427_v41  ;;  %v3078_v43 = vrot.slane %v2854_v13, %v3005_v56  ;;  %v712_v31 = vmul.f32 %v2491_v52, %v3037_v32  ;;  %v591_v33 = vadd.f32 %v555_v0, %v428_v45  ;;  %v2514_v56 = vld [vmem:[%s2819_s18 + $0x2b0] sm:$0xff] }
  0x2a   : > { %5333 = vst [vmem:[#allocation34_spill] sm:$0xff] %v3068_v47  ;;  %5334 = vst [vmem:[#allocation35_spill] sm:$0xff] %v3072_v46  ;;  %v592_v17 = vadd.f32 %v556_v44, %v429_v57  ;;  %v713_v36 = vmul.f32 %v2492_v61, %v3043_v2  ;;  %v714_v27 = vmul.f32 %v2493_v55, %v3047_v59  ;;  %v2509_v57 = vld [vmem:[%s2819_s18 + $0x288] sm:$0xff]  ;;  %v2511_v61 = vld [vmem:[%s2819_s18 + $0x298] sm:$0xff] }
  0x2b   : > { %5335 = vst [vmem:[#allocation36_spill] sm:$0xff] %v3078_v43  ;;  %v593_v26 = vadd.f32 %v557_v48, %v430_v58  ;;  %v715_v40 = vmul.f32 %v2494_v53, %v3053_v54  ;;  %v716_v41 = vmul.f32 %v2495_v6, %v3057_v1  ;;  %v717_v23 = vmul.f32 %v2496_v25, %v3061_v24  ;;  %v2510_v58 = vld [vmem:[%s2819_s18 + $0x290] sm:$0xff]  ;;  %v2512_v6 = vld [vmem:[%s2819_s18 + $0x2a0] sm:$0xff] }
  0x2c   : > { %v718_v38 = vmul.f32 %v2497_v37, %v3068_v47  ;;  %v719_v0 = vmul.f32 %v2498_v30, %v3072_v46  ;;  %v3091_v44 = vrot.slane %v2806_v4, %v3018_v3  ;;  %v3095_v45 = vrot.slane %v2811_v5, %v3018_v3  ;;  %v2515_v46 = vld [vmem:[%s2819_s18 + $0x2b8] sm:$0xff]  ;;  %v2516_v47 = vld [vmem:[%s2819_s18 + $0x2c0] sm:$0xff] }
  0x2d   : > { %v720_v53 = vmul.f32 %v2499_v18, %v3078_v43  ;;  %v748_v55 = vadd.f32 %v712_v31, %v585_v51  ;;  %v3102_v37 = vrot.slane %v2824_v7, %v3018_v3  ;;  %v3106_v30 = vrot.slane %v2829_v8, %v3018_v3  ;;  %v2513_v18 = vld [vmem:[%s2819_s18 + $0x2a8] sm:$0xff] }
  0x2e   : > { %5336 = vst [vmem:[#allocation37_spill] sm:$0xff] %v3091_v44  ;;  %5337 = vst [vmem:[#allocation38_spill] sm:$0xff] %v3095_v45  ;;  %v749_v48 = vadd.f32 %v713_v36, %v586_v60  ;;  %v750_v52 = vadd.f32 %v714_v27, %v587_v63  ;;  %v3112_v51 = vrot.slane %v2834_v9, %v3018_v3 }
  0x2f   : > { %5338 = vst [vmem:[#allocation39_spill] sm:$0xff] %v3102_v37  ;;  %5339 = vst [vmem:[#allocation40_spill] sm:$0xff] %v3106_v30  ;;  %v3116_v25 = vrot.slane %v2839_v10, %v3018_v3  ;;  %v751_v31 = vadd.f32 %v715_v40, %v588_v62  ;;  %v3122_v43 = vrot.slane %v2844_v11, %v3018_v3  ;;  %v2517_v62 = vld [vmem:[%s2819_s18 + $0x2c8] sm:$0xff] }
  0x30   : > { %5340 = vst [vmem:[#allocation41_spill] sm:$0xff] %v3112_v51  ;;  %v3126_v27 = vrot.slane %v2849_v12, %v3018_v3  ;;  %v3130_v36 = vrot.slane %v2854_v13, %v3018_v3  ;;  %v752_v60 = vadd.f32 %v716_v41, %v589_v39  ;;  %v753_v63 = vadd.f32 %v717_v23, %v590_v49 }
  0x31   : > { %5341 = vst [vmem:[#allocation42_spill] sm:$0xff] %v3116_v25  ;;  %5342 = vst [vmem:[#allocation43_spill] sm:$0xff] %v3122_v43  ;;  %v875_v40 = vmul.f32 %v2509_v57, %v3091_v44  ;;  %v876_v24 = vmul.f32 %v2510_v58, %v3095_v45  ;;  %v754_v1 = vadd.f32 %v718_v38, %v591_v33  ;;  %v2527_v38 = vld [vmem:[%s2819_s18 + $0x318] sm:$0xff] }
  0x32   : > { %5343 = vst [vmem:[#allocation44_spill] sm:$0xff] %v3126_v27  ;;  %5344 = vst [vmem:[#allocation45_spill] sm:$0xff] %v3130_v36  ;;  %v755_v54 = vadd.f32 %v719_v0, %v592_v17  ;;  %v877_v59 = vmul.f32 %v2511_v61, %v3102_v37  ;;  %v878_v2 = vmul.f32 %v2512_v6, %v3106_v30  ;;  %v2529_v61 = vld [vmem:[%s2819_s18 + $0x328] sm:$0xff]  ;;  %v2530_v6 = vld [vmem:[%s2819_s18 + $0x330] sm:$0xff] }
  0x33   : > { %v756_v32 = vadd.f32 %v720_v53, %v593_v26  ;;  %v879_v39 = vmul.f32 %v2513_v18, %v3112_v51  ;;  %v880_v49 = vmul.f32 %v2514_v56, %v3116_v25  ;;  %v3143_v41 = vrot.slane %v2806_v4, %v3021_v50  ;;  %v2528_v56 = vld [vmem:[%s2819_s18 + $0x320] sm:$0xff] }
  0x34   : > { %v881_v23 = vmul.f32 %v2515_v46, %v3122_v43  ;;  %v882_v33 = vmul.f32 %v2516_v47, %v3126_v27  ;;  %v883_v17 = vmul.f32 %v2517_v62, %v3130_v36  ;;  %v3151_v26 = vrot.slane %v2811_v5, %v3021_v50  ;;  %v2532_v18 = vld [vmem:[%s2819_s18 + $0x340] sm:$0xff]  ;;  %v2533_v36 = vld [vmem:[%s2819_s18 + $0x348] sm:$0xff]  ;;  %v2534_v27 = vld [vmem:[%s2819_s18 + $0x350] sm:$0xff] }
  0x35   : > { %5345 = vst [vmem:[#allocation46_spill] sm:$0xff] %v3143_v41  ;;  %v911_v0 = vadd.f32 %v875_v40, %v748_v55  ;;  %v912_v53 = vadd.f32 %v876_v24, %v749_v48  ;;  %v3156_v57 = vrot.slane %v2824_v7, %v3021_v50  ;;  %v3160_v46 = vrot.slane %v2829_v8, %v3021_v50  ;;  %v2531_v48 = vld [vmem:[%s2819_s18 + $0x338] sm:$0xff] }
  0x36   : > { %5346 = vst [vmem:[#allocation47_spill] sm:$0xff] %v3151_v26  ;;  %v913_v47 = vadd.f32 %v877_v59, %v750_v52  ;;  %v914_v58 = vadd.f32 %v878_v2, %v751_v31  ;;  %v3166_v55 = vrot.slane %v2834_v9, %v3021_v50  ;;  %v3170_v24 = vrot.slane %v2839_v10, %v3021_v50  ;;  %v2535_v43 = vld [vmem:[%s2819_s18 + $0x358] sm:$0xff] }
  0x37   : > { %5347 = vst [vmem:[#allocation48_spill] sm:$0xff] %v3156_v57  ;;  %5348 = vst [vmem:[#allocation49_spill] sm:$0xff] %v3160_v46  ;;  %v3176_v62 = vrot.slane %v2844_v11, %v3021_v50  ;;  %v3180_v2 = vrot.slane %v2849_v12, %v3021_v50  ;;  %v3184_v59 = vrot.slane %v2854_v13, %v3021_v50 }
  0x38   : > { %5349 = vst [vmem:[#allocation50_spill] sm:$0xff] %v3166_v55  ;;  %5350 = vst [vmem:[#allocation51_spill] sm:$0xff] %v3170_v24  ;;  %v1038_v52 = vmul.f32 %v2527_v38, %v3143_v41  ;;  %v915_v31 = vadd.f32 %v879_v39, %v752_v60  ;;  %v916_v40 = vadd.f32 %v880_v49, %v753_v63 }
  0x39   : > { %5351 = vst [vmem:[#allocation52_spill] sm:$0xff] %v3176_v62  ;;  %5352 = vst [vmem:[#allocation53_spill] sm:$0xff] %v3180_v2  ;;  %v917_v3 = vadd.f32 %v881_v23, %v754_v1  ;;  %v1039_v25 = vmul.f32 %v2528_v56, %v3151_v26  ;;  %v918_v51 = vadd.f32 %v882_v33, %v755_v54  ;;  %v2545_v23 = vld [vmem:[%s2819_s18 + $0x3a8] sm:$0xff]  ;;  %v2546_v33 = vld [vmem:[%s2819_s18 + $0x3b0] sm:$0xff] }
  0x3a   : > { %5353 = vst [vmem:[#allocation54_spill] sm:$0xff] %v3184_v59  ;;  %v919_v30 = vadd.f32 %v883_v17, %v756_v32  ;;  %v1040_v37 = vmul.f32 %v2529_v61, %v3156_v57  ;;  %v1041_v50 = vmul.f32 %v2530_v6, %v3160_v46  ;;  %v1042_v38 = vmul.f32 %v2531_v48, %v3166_v55  ;;  %v2547_v56 = vld [vmem:[%s2819_s18 + $0x3b8] sm:$0xff] }
  0x3b   : > { %v1043_v1 = vmul.f32 %v2532_v18, %v3170_v24  ;;  %v3197_v60 = vrot.slane %v2806_v4, %v3024_v16  ;;  %v3201_v63 = vrot.slane %v2811_v5, %v3024_v16  ;;  %v1044_v32 = vmul.f32 %v2533_v36, %v3176_v62  ;;  %v2549_v36 = vld [vmem:[%s2819_s18 + $0x3c8] sm:$0xff]  ;;  %v2552_v62 = vld [vmem:[%s2819_s18 + $0x3e0] sm:$0xff] }
  0x3c   : > { %v1045_v54 = vmul.f32 %v2534_v27, %v3180_v2  ;;  %v1046_v39 = vmul.f32 %v2535_v43, %v3184_v59  ;;  %v1074_v49 = vadd.f32 %v1038_v52, %v911_v0  ;;  %v1075_v17 = vadd.f32 %v1039_v25, %v912_v53  ;;  %v2548_v43 = vld [vmem:[%s2819_s18 + $0x3c0] sm:$0xff]  ;;  %v2550_v0 = vld [vmem:[%s2819_s18 + $0x3d0] sm:$0xff]  ;;  %v2551_v2 = vld [vmem:[%s2819_s18 + $0x3d8] sm:$0xff] }
  0x3d   : > { %v3211_v61 = vrot.slane %v2824_v7, %v3024_v16  ;;  %v3215_v6 = vrot.slane %v2829_v8, %v3024_v16  ;;  %v3219_v27 = vrot.slane %v2834_v9, %v3024_v16  ;;  %v3226_v25 = vrot.slane %v2839_v10, %v3024_v16  ;;  %v2553_v24 = vld [vmem:[%s2819_s18 + $0x3e8] sm:$0xff] }
  0x3e   : > { %v3230_v53 = vrot.slane %v2844_v11, %v3024_v16  ;;  %v3234_v48 = vrot.slane %v2849_v12, %v3024_v16  ;;  %v3238_v18 = vrot.slane %v2854_v13, %v3024_v16  ;;  %v1076_v52 = vadd.f32 %v1040_v37, %v913_v47  ;;  %v3385_v16 = vld [vmem:[%s2819_s18 + $0xc0] sm:$0xff] }
  0x3f   : > { %v1077_v59 = vadd.f32 %v1041_v50, %v914_v58  ;;  %v1201_v55 = vmul.f32 %v2545_v23, %v3197_v60  ;;  %v1202_v46 = vmul.f32 %v2546_v33, %v3201_v63  ;;  %v1078_v57 = vadd.f32 %v1042_v38, %v915_v31  ;;  %v2564_v38 = vld [vmem:[%s2819_s18 + $0x440] sm:$0xff]  ;;  %5376 = vst [vmem:[#allocation77_spill] sm:$0xff] %v3385_v16 }
  0x40   : > { %v1079_v26 = vadd.f32 %v1043_v1, %v916_v40  ;;  %v1080_v41 = vadd.f32 %v1044_v32, %v917_v3  ;;  %v1081_v45 = vadd.f32 %v1045_v54, %v918_v51  ;;  %v1082_v44 = vadd.f32 %v1046_v39, %v919_v30  ;;  %v2563_v3 = vld [vmem:[%s2819_s18 + $0x438] sm:$0xff]  ;;  %v2565_v1 = vld [vmem:[%s2819_s18 + $0x448] sm:$0xff]  ;;  %v2566_v32 = vld [vmem:[%s2819_s18 + $0x450] sm:$0xff] }
  0x41   : > { %v1203_v37 = vmul.f32 %v2547_v56, %v3211_v61  ;;  %v1204_v50 = vmul.f32 %v2548_v43, %v3215_v6  ;;  %v1205_v47 = vmul.f32 %v2549_v36, %v3219_v27  ;;  %v1206_v58 = vmul.f32 %v2550_v0, %v3226_v25  ;;  %v3321_v0 = vld [vmem:[%s2819_s18 + $0x20] sm:$0xff] }
  0x42   : > { %v1207_v23 = vmul.f32 %v2551_v2, %v3230_v53  ;;  %v1208_v31 = vmul.f32 %v2552_v62, %v3234_v48  ;;  %v1209_v40 = vmul.f32 %v2553_v24, %v3238_v18  ;;  %v3253_v51 = vadd.f32 %v1201_v55, %v1074_v49  ;;  %v2567_v24 = vld [vmem:[%s2819_s18 + $0x458] sm:$0xff]  ;;  %v2568_v2 = vld [vmem:[%s2819_s18 + $0x460] sm:$0xff]  ;;  %v2569_v55 = vld [vmem:[%s2819_s18 + $0x468] sm:$0xff]  ;;  %5366 = vst [vmem:[#allocation67_spill] sm:$0xff] %v3321_v0 }
  0x43   : > { %v3255_v30 = vadd.f32 %v1202_v46, %v1075_v17  ;;  %v3262_v54 = vrot.slane %v2806_v4, %v3030_v42  ;;  %v3266_v62 = vrot.slane %v2811_v5, %v3030_v42  ;;  %v3273_v46 = vrot.slane %v2824_v7, %v3030_v42  ;;  %v2570_v7 = vld [vmem:[%s2819_s18 + $0x470] sm:$0xff] }
  0x44   : > { %v3277_v39 = vrot.slane %v2829_v8, %v3030_v42  ;;  %v3281_v4 = vrot.slane %v2834_v9, %v3030_v42  ;;  %v3285_v5 = vrot.slane %v2839_v10, %v3030_v42  ;;  %v3287_v49 = vadd.f32 %v1203_v37, %v1076_v52  ;;  %v3301_v9 = vld [vmem:[%s2819_s18] sm:$0xff]  ;;  %v3304_v10 = vld [vmem:[%s2819_s18 + $0x8] sm:$0xff]  ;;  %v3339_v37 = vld [vmem:[%s2819_s18 + $0x30] sm:$0xff] }
  0x45   : > { %5354 = vst [vmem:[#allocation55_spill] sm:$0xff] %v3262_v54  ;;  %5355 = vst [vmem:[#allocation56_spill] sm:$0xff] %v3266_v62  ;;  %v3289_v33 = vadd.f32 %v1204_v50, %v1077_v59  ;;  %v3294_v17 = vrot.slane %v2844_v11, %v3030_v42  ;;  %v3298_v8 = vrot.slane %v2849_v12, %v3030_v42  ;;  %v3315_v11 = vld [vmem:[%s2819_s18 + $0x10] sm:$0xff]  ;;  %v3318_v12 = vld [vmem:[%s2819_s18 + $0x18] sm:$0xff] }
  0x46   : > { %5356 = vst [vmem:[#allocation57_spill] sm:$0xff] %v3273_v46  ;;  %5357 = vst [vmem:[#allocation58_spill] sm:$0xff] %v3277_v39  ;;  %v3306_v56 = vadd.f32 %v1205_v47, %v1078_v57  ;;  %v3308_v59 = vadd.f32 %v1206_v58, %v1079_v26  ;;  %v3310_v43 = vadd.f32 %v1207_v23, %v1080_v41  ;;  %v3336_v26 = vld [vmem:[%s2819_s18 + $0x28] sm:$0xff]  ;;  %v3342_v50 = vld [vmem:[%s2819_s18 + $0x90] sm:$0xff] }
  0x47   : > { %5358 = vst [vmem:[#allocation59_spill] sm:$0xff] %v3281_v4  ;;  %5359 = vst [vmem:[#allocation60_spill] sm:$0xff] %v3285_v5  ;;  %v3312_v36 = vadd.f32 %v1208_v31, %v1081_v45  ;;  %v3323_v52 = vadd.f32 %v1209_v40, %v1082_v44  ;;  %v3327_v57 = vrot.slane %v2854_v13, %v3030_v42  ;;  %v3345_v44 = vld [vmem:[%s2819_s18 + $0x98] sm:$0xff]  ;;  %v3360_v31 = vld [vmem:[%s2819_s18 + $0xa0] sm:$0xff] }
  0x48   : > { %5360 = vst [vmem:[#allocation61_spill] sm:$0xff] %v3294_v17  ;;  %5361 = vst [vmem:[#allocation62_spill] sm:$0xff] %v3298_v8  ;;  %v3330_v41 = vmul.f32 %v2563_v3, %v3262_v54  ;;  %v3333_v45 = vmul.f32 %v2564_v38, %v3266_v62  ;;  %v3348_v13 = vmul.f32 %v2565_v1, %v3273_v46  ;;  %v3363_v40 = vld [vmem:[%s2819_s18 + $0xa8] sm:$0xff]  ;;  %v3366_v3 = vld [vmem:[%s2819_s18 + $0xb0] sm:$0xff] }
  0x49   : > { %5362 = vst [vmem:[#allocation63_spill] sm:$0xff] %v3301_v9  ;;  %5363 = vst [vmem:[#allocation64_spill] sm:$0xff] %v3304_v10  ;;  %v3351_v47 = vmul.f32 %v2566_v32, %v3277_v39  ;;  %v3354_v58 = vmul.f32 %v2567_v24, %v3281_v4  ;;  %v3357_v23 = vmul.f32 %v2568_v2, %v3285_v5  ;;  %v3375_v32 = vld [vmem:[%s2819_s18 + $0x38] sm:$0xff]  ;;  %v3388_v5 = vld [vmem:[%s2819_s18 + $0x40] sm:$0xff] }
  0x4a   : > { %5364 = vst [vmem:[#allocation65_spill] sm:$0xff] %v3315_v11  ;;  %5365 = vst [vmem:[#allocation66_spill] sm:$0xff] %v3318_v12  ;;  %v3369_v38 = vmul.f32 %v2569_v55, %v3294_v17  ;;  %v3372_v1 = vmul.f32 %v2570_v7, %v3298_v8  ;;  %v250_v24 = vmul.f32 %v2858_v14, %v3301_v9  ;;  %v3382_v42 = vld [vmem:[%s2819_s18 + $0xb8] sm:$0xff]  ;;  %v3397_v9 = vld [vmem:[%s2819_s18 + $0xc8] sm:$0xff] }
  0x4b   : > { %5367 = vst [vmem:[#allocation68_spill] sm:$0xff] %v3336_v26  ;;  %5368 = vst [vmem:[#allocation69_spill] sm:$0xff] %v3339_v37  ;;  %v251_v2 = vmul.f32 %v2862_v15, %v3304_v10  ;;  %v252_v55 = vmul.f32 %v2869_v19, %v3315_v11  ;;  %v253_v7 = vmul.f32 %v2873_v20, %v3318_v12  ;;  %v3400_v15 = vld [vmem:[%s2819_s18 + $0xd0] sm:$0xff]  ;;  %v5381_v11 = vld [vmem:[#allocation6_spill] sm:$0xff] }
  0x4c   : > { %5369 = vst [vmem:[#allocation70_spill] sm:$0xff] %v3342_v50  ;;  %5370 = vst [vmem:[#allocation71_spill] sm:$0xff] %v3345_v44  ;;  %v254_v14 = vmul.f32 %v2877_v21, %v3321_v0  ;;  %v377_v10 = vmul.f32 %v3342_v50, %v2881_v22  ;;  %v378_v8 = vmul.f32 %v3345_v44, %v2896_v28  ;;  %v5380_v0 = vld [vmem:[#allocation5_spill] sm:$0xff]  ;;  %v5382_v50 = vld [vmem:[#allocation8_spill] sm:$0xff] }
  0x4d   : > { %5371 = vst [vmem:[#allocation72_spill] sm:$0xff] %v3360_v31  ;;  %5372 = vst [vmem:[#allocation73_spill] sm:$0xff] %v3363_v40  ;;  %v379_v19 = vmul.f32 %v3360_v31, %v2900_v29  ;;  %v380_v20 = vmul.f32 %v3363_v40, %v2911_v34  ;;  %v381_v21 = vmul.f32 %v3366_v3, %v2915_v35  ;;  %v5383_v44 = vld [vmem:[#allocation10_spill] sm:$0xff]  ;;  %v3424_v34 = vld [vmem:[%s2819_s18 + $0x128] sm:$0xff] }
  0x4e   : > { %5373 = vst [vmem:[#allocation74_spill] sm:$0xff] %v3366_v3  ;;  %5374 = vst [vmem:[#allocation75_spill] sm:$0xff] %v3375_v32  ;;  %v255_v12 = vmul.f32 %v5380_v0, %v3336_v26  ;;  %v256_v22 = vmul.f32 %v5381_v11, %v3339_v37  ;;  %v382_v28 = vmul.f32 %v3382_v42, %v5382_v50  ;;  %v3421_v31 = vld [vmem:[%s2819_s18 + $0x120] sm:$0xff]  ;;  %v3427_v35 = vld [vmem:[%s2819_s18 + $0x130] sm:$0xff] }
  0x4f   : > { %5375 = vst [vmem:[#allocation76_spill] sm:$0xff] %v3382_v42  ;;  %5377 = vst [vmem:[#allocation78_spill] sm:$0xff] %v3388_v5  ;;  %v383_v29 = vmul.f32 %v3385_v16, %v5383_v44  ;;  %v5387_v0 = vld [vmem:[#allocation7_spill] sm:$0xff]  ;;  %v5388_v11 = vld [vmem:[#allocation9_spill] sm:$0xff]  ;;  %v413_v17 = vadd.f32 %v377_v10, %v250_v24  ;;  %v414_v4 = vadd.f32 %v378_v8, %v251_v2 }
  0x50   : > { %5378 = vst [vmem:[#allocation79_spill] sm:$0xff] %v3397_v9  ;;  %5379 = vst [vmem:[#allocation80_spill] sm:$0xff] %v3400_v15  ;;  %v257_v3 = vmul.f32 %v5387_v0, %v3375_v32  ;;  %v258_v40 = vmul.f32 %v5388_v11, %v3388_v5  ;;  %v5389_v37 = vld [vmem:[#allocation11_spill] sm:$0xff]  ;;  %v5390_v42 = vld [vmem:[#allocation12_spill] sm:$0xff]  ;;  %v415_v39 = vadd.f32 %v379_v19, %v252_v55 }
  0x51   : > { %5384 = vst [vmem:[#allocation5_spill] sm:$0xff] %v3421_v31  ;;  %5385 = vst [vmem:[#allocation6_spill] sm:$0xff] %v3424_v34  ;;  %v384_v50 = vmul.f32 %v3397_v9, %v5389_v37  ;;  %v385_v44 = vmul.f32 %v3400_v15, %v5390_v42  ;;  %v3438_v16 = vld [vmem:[%s2819_s18 + $0x138] sm:$0xff]  ;;  %v3441_v26 = vld [vmem:[%s2819_s18 + $0x140] sm:$0xff]  ;;  %v416_v46 = vadd.f32 %v380_v20, %v253_v7 }
  0x52   : > { %5386 = vst [vmem:[#allocation8_spill] sm:$0xff] %v3427_v35  ;;  %5391 = vst [vmem:[#allocation10_spill] sm:$0xff] %v3438_v16  ;;  %v3444_v0 = vld [vmem:[%s2819_s18 + $0x148] sm:$0xff]  ;;  %v3447_v32 = vld [vmem:[%s2819_s18 + $0x150] sm:$0xff]  ;;  %v417_v37 = vadd.f32 %v381_v21, %v254_v14  ;;  %v418_v7 = vadd.f32 %v382_v28, %v255_v12  ;;  %v419_v19 = vadd.f32 %v383_v29, %v256_v22 }
  0x53   : > { %5392 = vst [vmem:[#allocation7_spill] sm:$0xff] %v3441_v26  ;;  %5393 = vst [vmem:[#allocation9_spill] sm:$0xff] %v3444_v0  ;;  %v3450_v11 = vld [vmem:[%s2819_s18 + $0x158] sm:$0xff]  ;;  %v3453_v42 = vld [vmem:[%s2819_s18 + $0x160] sm:$0xff] }
  0x54   : > { %5394 = vst [vmem:[#allocation11_spill] sm:$0xff] %v3447_v32  ;;  %5395 = vst [vmem:[#allocation12_spill] sm:$0xff] %v3450_v11  ;;  %v5397_v15 = vld [vmem:[#allocation14_spill] sm:$0xff]  ;;  %v5398_v24 = vld [vmem:[#allocation15_spill] sm:$0xff] }
  0x55   : > { %5396 = vst [vmem:[#allocation81_spill] sm:$0xff] %v3453_v42  ;;  %v540_v10 = vmul.f32 %v3421_v31, %v5397_v15  ;;  %v541_v8 = vmul.f32 %v3424_v34, %v5398_v24  ;;  %v5399_v2 = vld [vmem:[#allocation16_spill] sm:$0xff]  ;;  %v5400_v20 = vld [vmem:[#allocation17_spill] sm:$0xff]  ;;  %v5401_v14 = vld [vmem:[#allocation18_spill] sm:$0xff]  ;;  %v420_v15 = vadd.f32 %v384_v50, %v257_v3 }
  0x56   : > { %v542_v55 = vmul.f32 %v3427_v35, %v5399_v2  ;;  %v543_v9 = vmul.f32 %v3438_v16, %v5400_v20  ;;  %v544_v21 = vmul.f32 %v3441_v26, %v5401_v14  ;;  %v3466_v5 = vld [vmem:[%s2819_s18 + $0x1b0] sm:$0xff]  ;;  %v3469_v62 = vld [vmem:[%s2819_s18 + $0x1b8] sm:$0xff]  ;;  %v5404_v31 = vld [vmem:[#allocation19_spill] sm:$0xff]  ;;  %v421_v26 = vadd.f32 %v385_v44, %v258_v40 }
  0x57   : > { %5402 = vst [vmem:[#allocation14_spill] sm:$0xff] %v3466_v5  ;;  %5403 = vst [vmem:[#allocation15_spill] sm:$0xff] %v3469_v62  ;;  %v545_v24 = vmul.f32 %v3444_v0, %v5404_v31  ;;  %v5405_v2 = vld [vmem:[#allocation20_spill] sm:$0xff]  ;;  %v5406_v22 = vld [vmem:[#allocation21_spill] sm:$0xff]  ;;  %v576_v50 = vadd.f32 %v540_v10, %v413_v17  ;;  %v577_v35 = vadd.f32 %v541_v8, %v414_v4 }
  0x58   : > { %v546_v12 = vmul.f32 %v3447_v32, %v5405_v2  ;;  %v547_v28 = vmul.f32 %v3450_v11, %v5406_v22  ;;  %v3478_v29 = vld [vmem:[%s2819_s18 + $0x1c0] sm:$0xff]  ;;  %v3481_v20 = vld [vmem:[%s2819_s18 + $0x1c8] sm:$0xff]  ;;  %v3484_v14 = vld [vmem:[%s2819_s18 + $0x1d0] sm:$0xff]  ;;  %v578_v0 = vadd.f32 %v542_v55, %v415_v39  ;;  %v579_v2 = vadd.f32 %v543_v9, %v416_v46 }
  0x59   : > { %5407 = vst [vmem:[#allocation16_spill] sm:$0xff] %v3478_v29  ;;  %5408 = vst [vmem:[#allocation17_spill] sm:$0xff] %v3481_v20  ;;  %v5410_v16 = vld [vmem:[#allocation23_spill] sm:$0xff]  ;;  %v3489_v31 = vld [vmem:[%s2819_s18 + $0x1d8] sm:$0xff]  ;;  %v580_v22 = vadd.f32 %v544_v21, %v417_v37  ;;  %v581_v8 = vadd.f32 %v545_v24, %v418_v7 }
  0x5a   : > { %5409 = vst [vmem:[#allocation18_spill] sm:$0xff] %v3484_v14  ;;  %v548_v3 = vmul.f32 %v3453_v42, %v5410_v16  ;;  %5411 = vst [vmem:[#allocation19_spill] sm:$0xff] %v3489_v31  ;;  %v3492_v11 = vld [vmem:[%s2819_s18 + $0x1e0] sm:$0xff]  ;;  %v3495_v32 = vld [vmem:[%s2819_s18 + $0x1e8] sm:$0xff]  ;;  %v582_v55 = vadd.f32 %v546_v12, %v419_v19  ;;  %v583_v21 = vadd.f32 %v547_v28, %v420_v15 }
  0x5b   : > { %5412 = vst [vmem:[#allocation20_spill] sm:$0xff] %v3492_v11  ;;  %5413 = vst [vmem:[#allocation21_spill] sm:$0xff] %v3495_v32  ;;  %v3498_v34 = vld [vmem:[%s2819_s18 + $0x1f0] sm:$0xff]  ;;  %v5416_v16 = vld [vmem:[#allocation29_spill] sm:$0xff] }
  0x5c   : > { %5414 = vst [vmem:[#allocation23_spill] sm:$0xff] %v3498_v34  ;;  %v5415_v40 = vld [vmem:[#allocation28_spill] sm:$0xff]  ;;  %v704_v4 = vmul.f32 %v3469_v62, %v5416_v16  ;;  %v5417_v17 = vld [vmem:[#allocation30_spill] sm:$0xff]  ;;  %v5418_v46 = vld [vmem:[#allocation31_spill] sm:$0xff] }
  0x5d   : > { %v703_v44 = vmul.f32 %v3466_v5, %v5415_v40  ;;  %v705_v39 = vmul.f32 %v3478_v29, %v5417_v17  ;;  %v706_v9 = vmul.f32 %v3481_v20, %v5418_v46  ;;  %v5419_v37 = vld [vmem:[#allocation32_spill] sm:$0xff]  ;;  %v5420_v40 = vld [vmem:[#allocation33_spill] sm:$0xff]  ;;  %v3513_v42 = vld [vmem:[%s2819_s18 + $0x240] sm:$0xff]  ;;  %v584_v46 = vadd.f32 %v548_v3, %v421_v26 }
  0x5e   : > { %v707_v10 = vmul.f32 %v3484_v14, %v5419_v37  ;;  %v708_v5 = vmul.f32 %v3489_v31, %v5420_v40  ;;  %v3516_v16 = vld [vmem:[%s2819_s18 + $0x248] sm:$0xff]  ;;  %v3519_v17 = vld [vmem:[%s2819_s18 + $0x250] sm:$0xff]  ;;  %v5422_v20 = vld [vmem:[#allocation34_spill] sm:$0xff]  ;;  %v740_v14 = vadd.f32 %v704_v4, %v577_v35 }
  0x5f   : > { %5421 = vst [vmem:[#allocation28_spill] sm:$0xff] %v3519_v17  ;;  %v709_v29 = vmul.f32 %v3492_v11, %v5422_v20  ;;  %v5423_v37 = vld [vmem:[#allocation35_spill] sm:$0xff]  ;;  %v5424_v19 = vld [vmem:[#allocation36_spill] sm:$0xff]  ;;  %v3528_v24 = vld [vmem:[%s2819_s18 + $0x258] sm:$0xff]  ;;  %v739_v31 = vadd.f32 %v703_v44, %v576_v50  ;;  %v741_v62 = vadd.f32 %v705_v39, %v578_v0  ;;  %v742_v26 = vadd.f32 %v706_v9, %v579_v2 }
  0x60   : > { %v710_v7 = vmul.f32 %v3495_v32, %v5423_v37  ;;  %v711_v15 = vmul.f32 %v3498_v34, %v5424_v19  ;;  %5425 = vst [vmem:[#allocation29_spill] sm:$0xff] %v3528_v24  ;;  %v3531_v12 = vld [vmem:[%s2819_s18 + $0x260] sm:$0xff]  ;;  %v3534_v28 = vld [vmem:[%s2819_s18 + $0x268] sm:$0xff]  ;;  %v2571_v40 = vld [vmem:[%s2819_s18 + $0x478] sm:$0xff]  ;;  %v743_v3 = vadd.f32 %v707_v10, %v580_v22  ;;  %v744_v0 = vadd.f32 %v708_v5, %v581_v8 }
  0x61   : > { %5426 = vst [vmem:[#allocation30_spill] sm:$0xff] %v3531_v12  ;;  %5427 = vst [vmem:[#allocation31_spill] sm:$0xff] %v3534_v28  ;;  %v3538_v20 = vld [vmem:[%s2819_s18 + $0x270] sm:$0xff]  ;;  %v3541_v37 = vld [vmem:[%s2819_s18 + $0x278] sm:$0xff]  ;;  %v745_v10 = vadd.f32 %v709_v29, %v582_v55 }
  0x62   : > { %5428 = vst [vmem:[#allocation32_spill] sm:$0xff] %v3538_v20  ;;  %5429 = vst [vmem:[#allocation33_spill] sm:$0xff] %v3541_v37  ;;  %v3544_v19 = vld [vmem:[%s2819_s18 + $0x280] sm:$0xff]  ;;  %v5431_v34 = vld [vmem:[#allocation37_spill] sm:$0xff]  ;;  %v746_v5 = vadd.f32 %v710_v7, %v583_v21 }
  0x63   : > { %5430 = vst [vmem:[#allocation34_spill] sm:$0xff] %v3544_v19  ;;  %v866_v32 = vmul.f32 %v3513_v42, %v5431_v34  ;;  %v5432_v11 = vld [vmem:[#allocation38_spill] sm:$0xff]  ;;  %v5433_v50 = vld [vmem:[#allocation39_spill] sm:$0xff]  ;;  %v5434_v2 = vld [vmem:[#allocation40_spill] sm:$0xff]  ;;  %v3559_v34 = vmul.f32 %v2571_v40, %v3327_v57 }
  0x64   : > { %v867_v54 = vmul.f32 %v3516_v16, %v5432_v11  ;;  %v868_v35 = vmul.f32 %v3519_v17, %v5433_v50  ;;  %v869_v22 = vmul.f32 %v3528_v24, %v5434_v2  ;;  %v5435_v44 = vld [vmem:[#allocation41_spill] sm:$0xff]  ;;  %v5436_v39 = vld [vmem:[#allocation42_spill] sm:$0xff]  ;;  %v3563_v11 = vadd.f32 %v3330_v41, %v3253_v51  ;;  %v3566_v8 = vld [vmem:[%s2819_s18 + $0x2d0] sm:$0xff] }
  0x65   : > { %v870_v4 = vmul.f32 %v3531_v12, %v5435_v44  ;;  %v871_v9 = vmul.f32 %v3534_v28, %v5436_v39  ;;  %v3569_v50 = vld [vmem:[%s2819_s18 + $0x2d8] sm:$0xff]  ;;  %v3572_v2 = vld [vmem:[%s2819_s18 + $0x2e0] sm:$0xff]  ;;  %v747_v44 = vadd.f32 %v711_v15, %v584_v46  ;;  %v5438_v39 = vld [vmem:[#allocation43_spill] sm:$0xff]  ;;  %v902_v7 = vadd.f32 %v866_v32, %v739_v31 }
  0x66   : > { %5437 = vst [vmem:[#allocation35_spill] sm:$0xff] %v3563_v11  ;;  %v872_v40 = vmul.f32 %v3538_v20, %v5438_v39  ;;  %v5439_v28 = vld [vmem:[#allocation44_spill] sm:$0xff]  ;;  %v5440_v51 = vld [vmem:[#allocation45_spill] sm:$0xff]  ;;  %v3581_v29 = vld [vmem:[%s2819_s18 + $0x2e8] sm:$0xff]  ;;  %v903_v11 = vadd.f32 %v867_v54, %v740_v14  ;;  %v904_v24 = vadd.f32 %v868_v35, %v741_v62  ;;  %v905_v17 = vadd.f32 %v869_v22, %v742_v26 }
  0x67   : > { %v873_v12 = vmul.f32 %v3541_v37, %v5439_v28  ;;  %v874_v41 = vmul.f32 %v3544_v19, %v5440_v51  ;;  %v3584_v55 = vld [vmem:[%s2819_s18 + $0x2f0] sm:$0xff]  ;;  %v3587_v21 = vld [vmem:[%s2819_s18 + $0x2f8] sm:$0xff]  ;;  %v906_v46 = vadd.f32 %v870_v4, %v743_v3  ;;  %v907_v15 = vadd.f32 %v871_v9, %v744_v0  ;;  %v3590_v39 = vld [vmem:[%s2819_s18 + $0x300] sm:$0xff] }
  0x68   : > { %5441 = vst [vmem:[#allocation36_spill] sm:$0xff] %v3584_v55  ;;  %v3593_v20 = vld [vmem:[%s2819_s18 + $0x308] sm:$0xff]  ;;  %v3596_v28 = vld [vmem:[%s2819_s18 + $0x310] sm:$0xff]  ;;  %v5443_v51 = vld [vmem:[#allocation46_spill] sm:$0xff]  ;;  %v3612_v22 = vadd.f32 %v3333_v45, %v3255_v30  ;;  %v908_v4 = vadd.f32 %v872_v40, %v745_v10  ;;  %v3638_v10 = vadd.f32 %v3351_v47, %v3289_v33 }
  0x69   : > { %5442 = vst [vmem:[#allocation37_spill] sm:$0xff] %v3596_v28  ;;  %v1029_v19 = vmul.f32 %v3566_v8, %v5443_v51  ;;  %v5444_v37 = vld [vmem:[#allocation47_spill] sm:$0xff]  ;;  %v5445_v54 = vld [vmem:[#allocation48_spill] sm:$0xff]  ;;  %v5446_v14 = vld [vmem:[#allocation49_spill] sm:$0xff]  ;;  %v909_v9 = vadd.f32 %v873_v12, %v746_v5  ;;  %v3642_v5 = vadd.f32 %v3354_v58, %v3306_v56 }
  0x6a   : > { %v1030_v32 = vmul.f32 %v3569_v50, %v5444_v37  ;;  %v1031_v62 = vmul.f32 %v3572_v2, %v5445_v54  ;;  %v1032_v31 = vmul.f32 %v3581_v29, %v5446_v14  ;;  %v5447_v26 = vld [vmem:[#allocation50_spill] sm:$0xff]  ;;  %v5448_v35 = vld [vmem:[#allocation51_spill] sm:$0xff]  ;;  %5449 = vst [vmem:[#allocation38_spill] sm:$0xff] %v3612_v22  ;;  %v3616_v37 = vadd.f32 %v3348_v13, %v3287_v49  ;;  %v5451_v14 = vld [vmem:[#allocation52_spill] sm:$0xff] }
  0x6b   : > { %v1033_v3 = vmul.f32 %v3584_v55, %v5447_v26  ;;  %v1034_v0 = vmul.f32 %v3587_v21, %v5448_v35  ;;  %v3619_v51 = vld [vmem:[%s2819_s18 + $0x360] sm:$0xff]  ;;  %v910_v54 = vadd.f32 %v874_v41, %v747_v44  ;;  %v1035_v26 = vmul.f32 %v3590_v39, %v5451_v14  ;;  %v5452_v55 = vld [vmem:[#allocation53_spill] sm:$0xff]  ;;  %v3628_v49 = vld [vmem:[%s2819_s18 + $0x368] sm:$0xff]  ;;  %5454 = vst [vmem:[#allocation40_spill] sm:$0xff] %v3638_v10 }
  0x6c   : > { %5450 = vst [vmem:[#allocation39_spill] sm:$0xff] %v3616_v37  ;;  %v1036_v35 = vmul.f32 %v3593_v20, %v5452_v55  ;;  %v5453_v30 = vld [vmem:[#allocation54_spill] sm:$0xff]  ;;  %v3631_v13 = vld [vmem:[%s2819_s18 + $0x370] sm:$0xff]  ;;  %v3634_v12 = vld [vmem:[%s2819_s18 + $0x378] sm:$0xff]  ;;  %v1065_v44 = vadd.f32 %v1029_v19, %v902_v7  ;;  %v1066_v40 = vadd.f32 %v1030_v32, %v903_v11  ;;  %v1067_v14 = vadd.f32 %v1031_v62, %v904_v24 }
  0x6d   : > { %v1037_v45 = vmul.f32 %v3596_v28, %v5453_v30  ;;  %5455 = vst [vmem:[#allocation41_spill] sm:$0xff] %v3642_v5  ;;  %v3645_v41 = vld [vmem:[%s2819_s18 + $0x380] sm:$0xff]  ;;  %v3648_v55 = vld [vmem:[%s2819_s18 + $0x388] sm:$0xff]  ;;  %v1068_v30 = vadd.f32 %v1032_v31, %v905_v17  ;;  %v1069_v37 = vadd.f32 %v1033_v3, %v906_v46  ;;  %v1070_v22 = vadd.f32 %v1034_v0, %v907_v15  ;;  %v3651_v28 = vld [vmem:[%s2819_s18 + $0x390] sm:$0xff] }
  0x6e   : > { %5456 = vst [vmem:[#allocation42_spill] sm:$0xff] %v3645_v41  ;;  %5457 = vst [vmem:[#allocation43_spill] sm:$0xff] %v3648_v55  ;;  %v3654_v33 = vld [vmem:[%s2819_s18 + $0x398] sm:$0xff]  ;;  %v3657_v47 = vld [vmem:[%s2819_s18 + $0x3a0] sm:$0xff]  ;;  %v1192_v56 = vmul.f32 %v3619_v51, %v3197_v60  ;;  %v1193_v58 = vmul.f32 %v3628_v49, %v3201_v63  ;;  %v1194_v17 = vmul.f32 %v3631_v13, %v3211_v61 }
  0x6f   : > { %5458 = vst [vmem:[#allocation44_spill] sm:$0xff] %v3651_v28  ;;  %5459 = vst [vmem:[#allocation45_spill] sm:$0xff] %v3654_v33  ;;  %v1195_v24 = vmul.f32 %v3634_v12, %v3215_v6  ;;  %v1071_v19 = vadd.f32 %v1035_v26, %v908_v4  ;;  %v1072_v11 = vadd.f32 %v1036_v35, %v909_v9  ;;  %v3678_v15 = vld [vmem:[%s2819_s18 + $0x3f0] sm:$0xff]  ;;  %v3681_v32 = vld [vmem:[%s2819_s18 + $0x3f8] sm:$0xff] }
  0x70   : > { %5460 = vst [vmem:[#allocation46_spill] sm:$0xff] %v3657_v47  ;;  %v1073_v7 = vadd.f32 %v1037_v45, %v910_v54  ;;  %v1196_v46 = vmul.f32 %v3645_v41, %v3219_v27  ;;  %v1197_v60 = vmul.f32 %v3648_v55, %v3226_v25  ;;  %v1198_v63 = vmul.f32 %v3651_v28, %v3230_v53  ;;  %v3684_v27 = vld [vmem:[%s2819_s18 + $0x400] sm:$0xff]  ;;  %v3703_v62 = vld [vmem:[%s2819_s18 + $0x408] sm:$0xff]  ;;  %v3706_v31 = vld [vmem:[%s2819_s18 + $0x410] sm:$0xff] }
  0x71   : > { %v1199_v61 = vmul.f32 %v3654_v33, %v3234_v48  ;;  %v1200_v6 = vmul.f32 %v3657_v47, %v3238_v18  ;;  %5461 = vst [vmem:[#allocation47_spill] sm:$0xff] %v3678_v15  ;;  %5462 = vst [vmem:[#allocation48_spill] sm:$0xff] %v3681_v32  ;;  %v3688_v25 = vadd.f32 %v3357_v23, %v3308_v59  ;;  %v3711_v4 = vld [vmem:[%s2819_s18 + $0x418] sm:$0xff]  ;;  %v5477_v54 = vld [vmem:[#allocation56_spill] sm:$0xff] }
  0x72   : > { %5463 = vst [vmem:[#allocation49_spill] sm:$0xff] %v3684_v27  ;;  %v3692_v53 = vadd.f32 %v3369_v38, %v3310_v43  ;;  %v3696_v48 = vadd.f32 %v3372_v1, %v3312_v36  ;;  %v3700_v18 = vadd.f32 %v3559_v34, %v3323_v52  ;;  %5468 = vst [vmem:[#allocation54_spill] sm:$0xff] %v3703_v62  ;;  %v3714_v43 = vld [vmem:[%s2819_s18 + $0x420] sm:$0xff]  ;;  %v3719_v36 = vld [vmem:[%s5030_s0 + $0x48] sm:$0xff] }
  0x73   : > { %5464 = vst [vmem:[#allocation50_spill] sm:$0xff] %v3688_v25  ;;  %5469 = vst [vmem:[#allocation82_spill] sm:$0xff] %v3706_v31  ;;  %v1228_v3 = vadd.f32 %v1192_v56, %v1065_v44  ;;  %v1229_v0 = vadd.f32 %v1193_v58, %v1066_v40  ;;  %v1230_v59 = vadd.f32 %v1194_v17, %v1067_v14  ;;  %v3724_v38 = vld [vmem:[%s2819_s18 + $0x428] sm:$0xff]  ;;  %v3727_v1 = vld [vmem:[%s2819_s18 + $0x430] sm:$0xff] }
  0x74   : > { %5465 = vst [vmem:[#allocation51_spill] sm:$0xff] %v3692_v53  ;;  %5466 = vst [vmem:[#allocation52_spill] sm:$0xff] %v3696_v48  ;;  %v3708_v23 = vadd.f32 %v1195_v24, %v1068_v30  ;;  %v3721_v52 = vadd.f32 %v1196_v46, %v1069_v37  ;;  %v5476_v34 = vld [vmem:[#allocation55_spill] sm:$0xff]  ;;  %v1356_v26 = vmul.f32 %v3681_v32, %v5477_v54  ;;  %v5478_v35 = vld [vmem:[#allocation57_spill] sm:$0xff] }
  0x75   : > { %5467 = vst [vmem:[#allocation53_spill] sm:$0xff] %v3700_v18  ;;  %5471 = vst [vmem:[#allocation84_spill] sm:$0xff] %v3711_v4  ;;  %v1355_v9 = vmul.f32 %v3678_v15, %v5476_v34  ;;  %v1357_v45 = vmul.f32 %v3684_v27, %v5478_v35  ;;  %v3738_v44 = vld [vmem:[%s5030_s0 + $0x50] sm:$0xff]  ;;  %v3740_v37 = vadd.f32 %v1197_v60, %v1070_v22  ;;  %v3751_v56 = vld [vmem:[%s5030_s0 + $0x58] sm:$0xff] }
  0x76   : > { %5470 = vst [vmem:[#allocation83_spill] sm:$0xff] %v3708_v23  ;;  %5472 = vst [vmem:[#allocation85_spill] sm:$0xff] %v3714_v43  ;;  %v3742_v40 = vadd.f32 %v1198_v63, %v1071_v19  ;;  %v3744_v14 = vadd.f32 %v1199_v61, %v1072_v11  ;;  %v3746_v30 = vadd.f32 %v1200_v6, %v1073_v7  ;;  %v3756_v58 = vld [vmem:[%s5030_s0 + $0x60] sm:$0xff]  ;;  %v5485_v24 = vld [vmem:[#allocation59_spill] sm:$0xff] }
  0x77   : > { %5473 = vst [vmem:[#allocation86_spill] sm:$0xff] %v3721_v52  ;;  %5474 = vst [vmem:[#allocation87_spill] sm:$0xff] %v3724_v38  ;;  %v5483_v17 = vld [vmem:[#allocation58_spill] sm:$0xff]  ;;  %v3764_v19 = vmul.f32 %v3706_v31, %v5485_v24  ;;  %v5487_v11 = vld [vmem:[#allocation60_spill] sm:$0xff]  ;;  %v3799_v24 = vmul.f32 %v3727_v1, %v3327_v57  ;;  %v3817_v48 = vadd.f32 %v1356_v26, %v1229_v0 }
  0x78   : > { %5475 = vst [vmem:[#allocation88_spill] sm:$0xff] %v3727_v1  ;;  %5479 = vst [vmem:[#allocation55_spill] sm:$0xff] %v3740_v37  ;;  %v3760_v22 = vmul.f32 %v3703_v62, %v5483_v17  ;;  %v3768_v7 = vmul.f32 %v3711_v4, %v5487_v11  ;;  %v3773_v46 = vld [vmem:[%s5030_s0 + $0x68] sm:$0xff]  ;;  %v3778_v60 = vld [vmem:[%s5030_s0 + $0x70] sm:$0xff]  ;;  %v3819_v57 = vadd.f32 %v1357_v45, %v1230_v59 }
  0x79   : > { %5480 = vst [vmem:[#allocation56_spill] sm:$0xff] %v3742_v40  ;;  %5481 = vst [vmem:[#allocation57_spill] sm:$0xff] %v3744_v14  ;;  %v3783_v63 = vld [vmem:[%s5030_s0 + $0x78] sm:$0xff]  ;;  %v5489_v61 = vld [vmem:[#allocation3_spill] sm:$0xff] }
  0x7a   : > { %5482 = vst [vmem:[#allocation89_spill] sm:$0xff] %v3746_v30  ;;  %5484 = vst [vmem:[#allocation58_spill] sm:$0xff] %v3760_v22  ;;  %v3787_v6 = vrot.slane %v3719_v36, %v5489_v61  ;;  %v5491_v34 = vld [vmem:[#allocation61_spill] sm:$0xff]  ;;  %v5493_v35 = vld [vmem:[#allocation62_spill] sm:$0xff]  ;;  %v3823_v53 = vrot.slane %v3751_v56, %v5489_v61  ;;  %v3827_v25 = vrot.slane %v3756_v58, %v5489_v61 }
  0x7b   : > { %5486 = vst [vmem:[#allocation59_spill] sm:$0xff] %v3764_v19  ;;  %5488 = vst [vmem:[#allocation60_spill] sm:$0xff] %v3768_v7  ;;  %v3791_v54 = vmul.f32 %v3714_v43, %v5491_v34  ;;  %v3795_v17 = vmul.f32 %v3724_v38, %v5493_v35  ;;  %v3804_v11 = vld [vmem:[%s5030_s0 + $0x80] sm:$0xff]  ;;  %v3809_v18 = vld [vmem:[%s5030_s0 + $0x88] sm:$0xff]  ;;  %v3813_v34 = vrot.slane %v3738_v44, %v5489_v61 }
  0x7c   : > { %5490 = vst [vmem:[#allocation3_spill] sm:$0xff] %v3787_v6  ;;  %5495 = vst [vmem:[#allocation90_spill] sm:$0xff] %v3799_v24  ;;  %v3815_v35 = vadd.f32 %v1355_v9, %v1228_v3  ;;  %v3831_v5 = vrot.slane %v3773_v46, %v5489_v61  ;;  %v3835_v3 = vrot.slane %v3778_v60, %v5489_v61  ;;  %v5507_v26 = vld [vmem:[#allocation63_spill] sm:$0xff]  ;;  %v5521_v37 = vld [vmem:[#allocation70_spill] sm:$0xff] }
  0x7d   : > { %5492 = vst [vmem:[#allocation61_spill] sm:$0xff] %v3791_v54  ;;  %5494 = vst [vmem:[#allocation62_spill] sm:$0xff] %v3795_v17  ;;  %v3839_v0 = vrot.slane %v3783_v63, %v5489_v61  ;;  %v3843_v59 = vrot.slane %v3804_v11, %v5489_v61  ;;  %v3847_v9 = vrot.slane %v3809_v18, %v5489_v61  ;;  %v5518_v17 = vld [vmem:[#allocation65_spill] sm:$0xff]  ;;  %v5519_v54 = vld [vmem:[#allocation66_spill] sm:$0xff] }
  0x7e   : > { %5496 = vst [vmem:[#allocation91_spill] sm:$0xff] %v3813_v34  ;;  %5497 = vst [vmem:[#allocation92_spill] sm:$0xff] %v3815_v35  ;;  %v268_v45 = vmul.f32 %v3787_v6, %v5507_v26  ;;  %v270_v14 = vmul.f32 %v3823_v53, %v5518_v17  ;;  %v271_v40 = vmul.f32 %v3827_v25, %v5519_v54  ;;  %v5522_v52 = vld [vmem:[#allocation67_spill] sm:$0xff]  ;;  %v5523_v23 = vld [vmem:[#allocation68_spill] sm:$0xff] }
  0x7f   : > { %5498 = vst [vmem:[#allocation93_spill] sm:$0xff] %v3817_v48  ;;  %5499 = vst [vmem:[#allocation94_spill] sm:$0xff] %v3819_v57  ;;  %v5508_v57 = vld [vmem:[#allocation4_spill] sm:$0xff]  ;;  %v272_v22 = vmul.f32 %v3831_v5, %v5522_v52  ;;  %v273_v1 = vmul.f32 %v3835_v3, %v5523_v23  ;;  %v5524_v38 = vld [vmem:[#allocation69_spill] sm:$0xff] }
  0x80   : > { %5500 = vst [vmem:[#allocation95_spill] sm:$0xff] %v3823_v53  ;;  %5501 = vst [vmem:[#allocation96_spill] sm:$0xff] %v3827_v25  ;;  %v3853_v10 = vrot.slane %v3719_v36, %v5508_v57  ;;  %v5510_v48 = vld [vmem:[#allocation64_spill] sm:$0xff]  ;;  %v3859_v24 = vrot.slane %v3738_v44, %v5508_v57  ;;  %v3863_v30 = vrot.slane %v3751_v56, %v5508_v57  ;;  %v5525_v17 = vld [vmem:[#allocation71_spill] sm:$0xff] }
  0x81   : > { %5502 = vst [vmem:[#allocation97_spill] sm:$0xff] %v3831_v5  ;;  %5503 = vst [vmem:[#allocation98_spill] sm:$0xff] %v3835_v3  ;;  %v269_v35 = vmul.f32 %v3813_v34, %v5510_v48  ;;  %v3867_v61 = vrot.slane %v3756_v58, %v5508_v57  ;;  %v3871_v26 = vrot.slane %v3773_v46, %v5508_v57  ;;  %v5526_v54 = vld [vmem:[#allocation75_spill] sm:$0xff]  ;;  %v5529_v52 = vld [vmem:[#allocation73_spill] sm:$0xff] }
  0x82   : > { %5504 = vst [vmem:[#allocation99_spill] sm:$0xff] %v3839_v0  ;;  %5505 = vst [vmem:[#allocation100_spill] sm:$0xff] %v3843_v59  ;;  %v3875_v6 = vrot.slane %v3778_v60, %v5508_v57  ;;  %v3879_v48 = vrot.slane %v3783_v63, %v5508_v57  ;;  %v3883_v34 = vrot.slane %v3804_v11, %v5508_v57  ;;  %v5530_v23 = vld [vmem:[#allocation74_spill] sm:$0xff]  ;;  %v5547_v47 = vld [vmem:[#allocation8_spill] sm:$0xff] }
  0x83   : > { %5506 = vst [vmem:[#allocation101_spill] sm:$0xff] %v3847_v9  ;;  %5509 = vst [vmem:[#allocation63_spill] sm:$0xff] %v3853_v10  ;;  %v3891_v7 = vrot.slane %v3809_v18, %v5508_v57  ;;  %v395_v19 = vmul.f32 %v5521_v37, %v3853_v10  ;;  %v274_v43 = vmul.f32 %v3839_v0, %v5524_v38  ;;  %v5527_v57 = vld [vmem:[#allocation78_spill] sm:$0xff]  ;;  %v5528_v37 = vld [vmem:[#allocation72_spill] sm:$0xff] }
  0x84   : > { %5511 = vst [vmem:[#allocation4_spill] sm:$0xff] %v3859_v24  ;;  %5512 = vst [vmem:[#allocation64_spill] sm:$0xff] %v3863_v30  ;;  %v396_v53 = vmul.f32 %v5525_v17, %v3859_v24  ;;  %v275_v25 = vmul.f32 %v3843_v59, %v5526_v54  ;;  %v276_v4 = vmul.f32 %v3847_v9, %v5527_v57  ;;  %v5531_v38 = vld [vmem:[#allocation76_spill] sm:$0xff]  ;;  %v5532_v17 = vld [vmem:[#allocation77_spill] sm:$0xff] }
  0x85   : > { %5513 = vst [vmem:[#allocation102_spill] sm:$0xff] %v3867_v61  ;;  %5514 = vst [vmem:[#allocation103_spill] sm:$0xff] %v3871_v26  ;;  %v397_v10 = vmul.f32 %v5528_v37, %v3863_v30  ;;  %v398_v5 = vmul.f32 %v5529_v52, %v3867_v61  ;;  %v399_v3 = vmul.f32 %v5530_v23, %v3871_v26  ;;  %v5533_v54 = vld [vmem:[#allocation79_spill] sm:$0xff]  ;;  %v5534_v57 = vld [vmem:[#allocation80_spill] sm:$0xff] }
  0x86   : > { %5515 = vst [vmem:[#allocation104_spill] sm:$0xff] %v3875_v6  ;;  %5516 = vst [vmem:[#allocation105_spill] sm:$0xff] %v3879_v48  ;;  %v400_v0 = vmul.f32 %v5531_v38, %v3875_v6  ;;  %v401_v24 = vmul.f32 %v5532_v17, %v3879_v48  ;;  %v402_v59 = vmul.f32 %v5533_v54, %v3883_v34  ;;  %v5535_v37 = vld [vmem:[#allocation13_spill] sm:$0xff]  ;;  %v5546_v6 = vld [vmem:[#allocation6_spill] sm:$0xff] }
  0x87   : > { %5517 = vst [vmem:[#allocation106_spill] sm:$0xff] %v3883_v34  ;;  %5520 = vst [vmem:[#allocation65_spill] sm:$0xff] %v3891_v7  ;;  %v403_v9 = vmul.f32 %v5534_v57, %v3891_v7  ;;  %v431_v31 = vadd.f32 %v395_v19, %v268_v45  ;;  %v3923_v30 = vrot.slane %v3719_v36, %v5535_v37  ;;  %v5545_v34 = vld [vmem:[#allocation5_spill] sm:$0xff]  ;;  %v5548_v28 = vld [vmem:[#allocation10_spill] sm:$0xff] }
  0x88   : > { %v3927_v52 = vrot.slane %v3738_v44, %v5535_v37  ;;  %v432_v23 = vadd.f32 %v396_v53, %v269_v35  ;;  %v3931_v38 = vrot.slane %v3751_v56, %v5535_v37  ;;  %v3935_v17 = vrot.slane %v3756_v58, %v5535_v37  ;;  %v5564_v55 = vld [vmem:[#allocation18_spill] sm:$0xff] }
  0x89   : > { %5536 = vst [vmem:[#allocation66_spill] sm:$0xff] %v3923_v30  ;;  %v3939_v19 = vrot.slane %v3773_v46, %v5535_v37  ;;  %v3943_v45 = vrot.slane %v3778_v60, %v5535_v37  ;;  %v3947_v54 = vrot.slane %v3783_v63, %v5535_v37  ;;  %v3951_v53 = vrot.slane %v3804_v11, %v5535_v37 }
  0x8a   : > { %5537 = vst [vmem:[#allocation70_spill] sm:$0xff] %v3927_v52  ;;  %5538 = vst [vmem:[#allocation67_spill] sm:$0xff] %v3931_v38  ;;  %v3955_v35 = vrot.slane %v3809_v18, %v5535_v37  ;;  %v433_v57 = vadd.f32 %v397_v10, %v270_v14  ;;  %v434_v7 = vadd.f32 %v398_v5, %v271_v40  ;;  %v5549_v10 = vld [vmem:[#allocation7_spill] sm:$0xff]  ;;  %v5550_v40 = vld [vmem:[#allocation9_spill] sm:$0xff] }
  0x8b   : > { %5539 = vst [vmem:[#allocation68_spill] sm:$0xff] %v3935_v17  ;;  %5540 = vst [vmem:[#allocation69_spill] sm:$0xff] %v3939_v19  ;;  %v558_v48 = vmul.f32 %v5545_v34, %v3923_v30  ;;  %v559_v26 = vmul.f32 %v5546_v6, %v3927_v52  ;;  %v435_v61 = vadd.f32 %v399_v3, %v272_v22  ;;  %v5551_v34 = vld [vmem:[#allocation11_spill] sm:$0xff]  ;;  %v5563_v30 = vld [vmem:[#allocation17_spill] sm:$0xff] }
  0x8c   : > { %5541 = vst [vmem:[#allocation71_spill] sm:$0xff] %v3943_v45  ;;  %5542 = vst [vmem:[#allocation75_spill] sm:$0xff] %v3947_v54  ;;  %v436_v62 = vadd.f32 %v400_v0, %v273_v1  ;;  %v437_v27 = vadd.f32 %v401_v24, %v274_v43  ;;  %v438_v32 = vadd.f32 %v402_v59, %v275_v25  ;;  %v5552_v1 = vld [vmem:[#allocation12_spill] sm:$0xff]  ;;  %v5553_v25 = vld [vmem:[#allocation81_spill] sm:$0xff] }
  0x8d   : > { %5543 = vst [vmem:[#allocation78_spill] sm:$0xff] %v3951_v53  ;;  %5544 = vst [vmem:[#allocation72_spill] sm:$0xff] %v3955_v35  ;;  %v439_v15 = vadd.f32 %v403_v9, %v276_v4  ;;  %v560_v33 = vmul.f32 %v5547_v47, %v3931_v38  ;;  %v561_v37 = vmul.f32 %v5548_v28, %v3935_v17  ;;  %v5554_v24 = vld [vmem:[#allocation22_spill] sm:$0xff]  ;;  %v5562_v38 = vld [vmem:[#allocation16_spill] sm:$0xff] }
  0x8e   : > { %v562_v5 = vmul.f32 %v5549_v10, %v3939_v19  ;;  %v563_v14 = vmul.f32 %v5550_v40, %v3943_v45  ;;  %v564_v6 = vmul.f32 %v5551_v34, %v3947_v54  ;;  %v565_v43 = vmul.f32 %v5552_v1, %v3951_v53  ;;  %v5560_v10 = vld [vmem:[#allocation14_spill] sm:$0xff] }
  0x8f   : > { %v566_v4 = vmul.f32 %v5553_v25, %v3955_v35  ;;  %v594_v22 = vadd.f32 %v558_v48, %v431_v31  ;;  %v595_v47 = vadd.f32 %v559_v26, %v432_v23  ;;  %v3977_v28 = vrot.slane %v3719_v36, %v5554_v24  ;;  %v5561_v35 = vld [vmem:[#allocation15_spill] sm:$0xff] }
  0x90   : > { %v3981_v3 = vrot.slane %v3738_v44, %v5554_v24  ;;  %v3985_v0 = vrot.slane %v3751_v56, %v5554_v24  ;;  %v3989_v59 = vrot.slane %v3756_v58, %v5554_v24  ;;  %v3993_v31 = vrot.slane %v3773_v46, %v5554_v24 }
  0x91   : > { %v3997_v9 = vrot.slane %v3778_v60, %v5554_v24  ;;  %v4001_v26 = vrot.slane %v3783_v63, %v5554_v24  ;;  %v4005_v48 = vrot.slane %v3804_v11, %v5554_v24  ;;  %v4009_v23 = vrot.slane %v3809_v18, %v5554_v24 }
  0x92   : > { %5555 = vst [vmem:[#allocation73_spill] sm:$0xff] %v3993_v31  ;;  %v721_v40 = vmul.f32 %v5560_v10, %v3977_v28  ;;  %v596_v34 = vadd.f32 %v560_v33, %v433_v57  ;;  %v597_v1 = vadd.f32 %v561_v37, %v434_v7  ;;  %v598_v25 = vadd.f32 %v562_v5, %v435_v61  ;;  %v5565_v33 = vld [vmem:[#allocation19_spill] sm:$0xff]  ;;  %v5566_v61 = vld [vmem:[#allocation20_spill] sm:$0xff] }
  0x93   : > { %5556 = vst [vmem:[#allocation74_spill] sm:$0xff] %v3997_v9  ;;  %5557 = vst [vmem:[#allocation76_spill] sm:$0xff] %v4001_v26  ;;  %v722_v53 = vmul.f32 %v5561_v35, %v3981_v3  ;;  %v599_v54 = vadd.f32 %v563_v14, %v436_v62  ;;  %v600_v45 = vadd.f32 %v564_v6, %v437_v27  ;;  %v5567_v62 = vld [vmem:[#allocation21_spill] sm:$0xff]  ;;  %v5569_v37 = vld [vmem:[#allocation24_spill] sm:$0xff] }
  0x94   : > { %5558 = vst [vmem:[#allocation77_spill] sm:$0xff] %v4005_v48  ;;  %5559 = vst [vmem:[#allocation79_spill] sm:$0xff] %v4009_v23  ;;  %v601_v19 = vadd.f32 %v565_v43, %v438_v32  ;;  %v602_v17 = vadd.f32 %v566_v4, %v439_v15  ;;  %v723_v52 = vmul.f32 %v5562_v38, %v3985_v0  ;;  %v5568_v15 = vld [vmem:[#allocation23_spill] sm:$0xff] }
  0x95   : > { %v724_v24 = vmul.f32 %v5563_v30, %v3989_v59  ;;  %v725_v41 = vmul.f32 %v5564_v55, %v3993_v31  ;;  %v726_v7 = vmul.f32 %v5565_v33, %v3997_v9  ;;  %v727_v57 = vmul.f32 %v5566_v61, %v4001_v26  ;;  %v5576_v26 = vld [vmem:[#allocation29_spill] sm:$0xff] }
  0x96   : > { %v728_v27 = vmul.f32 %v5567_v62, %v4005_v48  ;;  %v729_v32 = vmul.f32 %v5568_v15, %v4009_v23  ;;  %v757_v35 = vadd.f32 %v721_v40, %v594_v22  ;;  %v758_v38 = vadd.f32 %v722_v53, %v595_v47 }
  0x97   : > { %v4031_v30 = vrot.slane %v3719_v36, %v5569_v37  ;;  %v4035_v55 = vrot.slane %v3738_v44, %v5569_v37  ;;  %v4039_v5 = vrot.slane %v3751_v56, %v5569_v37  ;;  %v4043_v14 = vrot.slane %v3756_v58, %v5569_v37 }
  0x98   : > { %v4047_v6 = vrot.slane %v3773_v46, %v5569_v37  ;;  %v4051_v53 = vrot.slane %v3778_v60, %v5569_v37  ;;  %v4055_v43 = vrot.slane %v3783_v63, %v5569_v37  ;;  %v759_v4 = vadd.f32 %v723_v52, %v596_v34  ;;  %v5575_v34 = vld [vmem:[#allocation28_spill] sm:$0xff] }
  0x99   : > { %v4059_v22 = vrot.slane %v3804_v11, %v5569_v37  ;;  %v4063_v47 = vrot.slane %v3809_v18, %v5569_v37  ;;  %v884_v10 = vmul.f32 %v3513_v42, %v4031_v30  ;;  %v760_v40 = vadd.f32 %v724_v24, %v597_v1  ;;  %v5577_v37 = vld [vmem:[#allocation30_spill] sm:$0xff]  ;;  %v5578_v42 = vld [vmem:[#allocation31_spill] sm:$0xff]  ;;  %v5582_v24 = vld [vmem:[#allocation25_spill] sm:$0xff] }
  0x9a   : > { %5570 = vst [vmem:[#allocation80_spill] sm:$0xff] %v4047_v6  ;;  %5571 = vst [vmem:[#allocation13_spill] sm:$0xff] %v4051_v53  ;;  %v761_v33 = vadd.f32 %v725_v41, %v598_v25  ;;  %v762_v61 = vadd.f32 %v726_v7, %v599_v54  ;;  %v885_v62 = vmul.f32 %v3516_v16, %v4035_v55  ;;  %v5579_v41 = vld [vmem:[#allocation32_spill] sm:$0xff]  ;;  %v5580_v16 = vld [vmem:[#allocation33_spill] sm:$0xff] }
  0x9b   : > { %5572 = vst [vmem:[#allocation5_spill] sm:$0xff] %v4055_v43  ;;  %5573 = vst [vmem:[#allocation6_spill] sm:$0xff] %v4059_v22  ;;  %v763_v15 = vadd.f32 %v727_v57, %v600_v45  ;;  %v764_v23 = vadd.f32 %v728_v27, %v601_v19  ;;  %v765_v52 = vadd.f32 %v729_v32, %v602_v17  ;;  %v5581_v17 = vld [vmem:[#allocation34_spill] sm:$0xff] }
  0x9c   : > { %5574 = vst [vmem:[#allocation8_spill] sm:$0xff] %v4063_v47  ;;  %v886_v48 = vmul.f32 %v5575_v34, %v4039_v5  ;;  %v887_v9 = vmul.f32 %v5576_v26, %v4043_v14  ;;  %v888_v31 = vmul.f32 %v5577_v37, %v4047_v6  ;;  %v889_v1 = vmul.f32 %v5578_v42, %v4051_v53 }
  0x9d   : > { %v890_v54 = vmul.f32 %v5579_v41, %v4055_v43  ;;  %v891_v45 = vmul.f32 %v5580_v16, %v4059_v22  ;;  %v892_v19 = vmul.f32 %v5581_v17, %v4063_v47  ;;  %v920_v25 = vadd.f32 %v884_v10, %v757_v35 }
  0x9e   : > { %v4085_v7 = vrot.slane %v3719_v36, %v5582_v24  ;;  %v921_v26 = vadd.f32 %v885_v62, %v758_v38  ;;  %v4089_v57 = vrot.slane %v3738_v44, %v5582_v24  ;;  %v4093_v27 = vrot.slane %v3751_v56, %v5582_v24 }
  0x9f   : > { %v4097_v32 = vrot.slane %v3756_v58, %v5582_v24  ;;  %v4101_v35 = vrot.slane %v3773_v46, %v5582_v24  ;;  %v4105_v10 = vrot.slane %v3778_v60, %v5582_v24  ;;  %v4109_v38 = vrot.slane %v3783_v63, %v5582_v24 }
  0xa0   : > { %v4113_v62 = vrot.slane %v3804_v11, %v5582_v24  ;;  %v922_v34 = vadd.f32 %v886_v48, %v759_v4  ;;  %v923_v37 = vadd.f32 %v887_v9, %v760_v40  ;;  %v4117_v42 = vrot.slane %v3809_v18, %v5582_v24  ;;  %v5587_v48 = vld [vmem:[#allocation36_spill] sm:$0xff] }
  0xa1   : > { %5583 = vst [vmem:[#allocation10_spill] sm:$0xff] %v4105_v10  ;;  %5584 = vst [vmem:[#allocation7_spill] sm:$0xff] %v4109_v38  ;;  %v1047_v41 = vmul.f32 %v3566_v8, %v4085_v7  ;;  %v924_v16 = vadd.f32 %v888_v31, %v761_v33  ;;  %v925_v17 = vadd.f32 %v889_v1, %v762_v61 }
  0xa2   : > { %5585 = vst [vmem:[#allocation9_spill] sm:$0xff] %v4113_v62  ;;  %5586 = vst [vmem:[#allocation11_spill] sm:$0xff] %v4117_v42  ;;  %v926_v47 = vadd.f32 %v890_v54, %v763_v15  ;;  %v1048_v22 = vmul.f32 %v3569_v50, %v4089_v57  ;;  %v927_v43 = vadd.f32 %v891_v45, %v764_v23  ;;  %v5588_v23 = vld [vmem:[#allocation37_spill] sm:$0xff] }
  0xa3   : > { %v928_v53 = vadd.f32 %v892_v19, %v765_v52  ;;  %v1049_v6 = vmul.f32 %v3572_v2, %v4093_v27  ;;  %v1050_v9 = vmul.f32 %v3581_v29, %v4097_v32  ;;  %v1051_v4 = vmul.f32 %v5587_v48, %v4101_v35  ;;  %v5589_v2 = vld [vmem:[#allocation26_spill] sm:$0xff] }
  0xa4   : > { %v1052_v8 = vmul.f32 %v3587_v21, %v4105_v10  ;;  %v1053_v31 = vmul.f32 %v3590_v39, %v4109_v38  ;;  %v1054_v50 = vmul.f32 %v3593_v20, %v4113_v62  ;;  %v1055_v40 = vmul.f32 %v5588_v23, %v4117_v42  ;;  %v2705_v38 = vld [vmem:[%s2819_s18 + $0x88] sm:$0xff]  ;;  %v2707_v10 = vld [vmem:[%s2819_s18 + $0x118] sm:$0xff] }
  0xa5   : > { %v1083_v33 = vadd.f32 %v1047_v41, %v920_v25  ;;  %v4139_v61 = vrot.slane %v3719_v36, %v5589_v2  ;;  %v4143_v29 = vrot.slane %v3738_v44, %v5589_v2  ;;  %v1084_v15 = vadd.f32 %v1048_v22, %v921_v26 }
  0xa6   : > { %v4147_v21 = vrot.slane %v3751_v56, %v5589_v2  ;;  %v4151_v20 = vrot.slane %v3756_v58, %v5589_v2  ;;  %v4155_v39 = vrot.slane %v3773_v46, %v5589_v2  ;;  %v4159_v52 = vrot.slane %v3778_v60, %v5589_v2 }
  0xa7   : > { %5590 = vst [vmem:[#allocation12_spill] sm:$0xff] %v4139_v61  ;;  %5591 = vst [vmem:[#allocation81_spill] sm:$0xff] %v4143_v29  ;;  %v4163_v1 = vrot.slane %v3783_v63, %v5589_v2  ;;  %v4167_v22 = vrot.slane %v3804_v11, %v5589_v2  ;;  %v4171_v54 = vrot.slane %v3809_v18, %v5589_v2 }
  0xa8   : > { %5592 = vst [vmem:[#allocation22_spill] sm:$0xff] %v4147_v21  ;;  %5593 = vst [vmem:[#allocation14_spill] sm:$0xff] %v4151_v20  ;;  %v1085_v45 = vadd.f32 %v1049_v6, %v922_v34  ;;  %v1086_v19 = vadd.f32 %v1050_v9, %v923_v37  ;;  %v1210_v25 = vmul.f32 %v3619_v51, %v4139_v61  ;;  %v5599_v6 = vld [vmem:[#allocation42_spill] sm:$0xff]  ;;  %v5600_v37 = vld [vmem:[#allocation43_spill] sm:$0xff] }
  0xa9   : > { %5594 = vst [vmem:[#allocation15_spill] sm:$0xff] %v4155_v39  ;;  %5595 = vst [vmem:[#allocation16_spill] sm:$0xff] %v4159_v52  ;;  %v1211_v24 = vmul.f32 %v3628_v49, %v4143_v29  ;;  %v1087_v26 = vadd.f32 %v1051_v4, %v924_v16  ;;  %v1088_v41 = vadd.f32 %v1052_v8, %v925_v17  ;;  %v5601_v9 = vld [vmem:[#allocation44_spill] sm:$0xff]  ;;  %v5602_v16 = vld [vmem:[#allocation45_spill] sm:$0xff] }
  0xaa   : > { %5596 = vst [vmem:[#allocation17_spill] sm:$0xff] %v4163_v1  ;;  %5597 = vst [vmem:[#allocation18_spill] sm:$0xff] %v4167_v22  ;;  %v1089_v48 = vadd.f32 %v1053_v31, %v926_v47  ;;  %v1090_v23 = vadd.f32 %v1054_v50, %v927_v43  ;;  %v1091_v42 = vadd.f32 %v1055_v40, %v928_v53  ;;  %v5603_v53 = vld [vmem:[#allocation46_spill] sm:$0xff]  ;;  %v5604_v4 = vld [vmem:[#allocation27_spill] sm:$0xff] }
  0xab   : > { %5598 = vst [vmem:[#allocation19_spill] sm:$0xff] %v4171_v54  ;;  %v1212_v62 = vmul.f32 %v3631_v13, %v4147_v21  ;;  %v1213_v2 = vmul.f32 %v3634_v12, %v4151_v20  ;;  %v1214_v34 = vmul.f32 %v5599_v6, %v4155_v39  ;;  %v1215_v51 = vmul.f32 %v5600_v37, %v4159_v52  ;;  %v2706_v20 = vld [vmem:[%s2819_s18 + $0x110] sm:$0xff] }
  0xac   : > { %v1216_v49 = vmul.f32 %v5601_v9, %v4163_v1  ;;  %v1217_v47 = vmul.f32 %v5602_v16, %v4167_v22  ;;  %v1218_v43 = vmul.f32 %v5603_v53, %v4171_v54  ;;  %v1246_v17 = vadd.f32 %v1210_v25, %v1083_v33  ;;  %v1428_v33 = vpop.xlane.xlu0 %1427  ;;  %v5616_v9 = vld [vmem:[#allocation49_spill] sm:$0xff]  ;;  %v5617_v16 = vld [vmem:[#allocation54_spill] sm:$0xff]  ;;  %v2700_v22 = vld [vmem:[%s2819_s18 + $0xe8] sm:$0xff] }
  0xad   : > { %v1247_v13 = vadd.f32 %v1211_v24, %v1084_v15  ;;  %v4193_v12 = vrot.slane %v3719_v36, %v5604_v4  ;;  %v4197_v8 = vrot.slane %v3738_v44, %v5604_v4  ;;  %v4201_v31 = vrot.slane %v3751_v56, %v5604_v4  ;;  %v2702_v1 = vld [vmem:[%s2819_s18 + $0xf8] sm:$0xff]  ;;  %v5671_v61 = vld [vmem:[#allocation92_spill] sm:$0xff] }
  0xae   : > { %v4205_v50 = vrot.slane %v3756_v58, %v5604_v4  ;;  %v4209_v40 = vrot.slane %v3773_v46, %v5604_v4  ;;  %v4213_v36 = vrot.slane %v3778_v60, %v5604_v4  ;;  %v1248_v15 = vadd.f32 %v1212_v62, %v1085_v45  ;;  %v5614_v62 = vld [vmem:[#allocation47_spill] sm:$0xff] }
  0xaf   : > { %5605 = vst [vmem:[#allocation20_spill] sm:$0xff] %v4193_v12  ;;  %5606 = vst [vmem:[#allocation21_spill] sm:$0xff] %v4197_v8  ;;  %v4217_v44 = vrot.slane %v3783_v63, %v5604_v4  ;;  %v4221_v56 = vrot.slane %v3804_v11, %v5604_v4  ;;  %v4225_v58 = vrot.slane %v3809_v18, %v5604_v4  ;;  %2584 = vrcp.f32 %v1428_v33  ;;  %v5615_v63 = vld [vmem:[#allocation48_spill] sm:$0xff]  ;;  %v5618_v18 = vld [vmem:[#allocation82_spill] sm:$0xff] }
  0xb0   : > { %5607 = vst [vmem:[#allocation23_spill] sm:$0xff] %v4201_v31  ;;  %5608 = vst [vmem:[#allocation24_spill] sm:$0xff] %v4205_v50  ;;  %v1249_v46 = vadd.f32 %v1213_v2, %v1086_v19  ;;  %v1250_v25 = vadd.f32 %v1214_v34, %v1087_v26  ;;  %v1251_v24 = vadd.f32 %v1215_v51, %v1088_v41  ;;  %v5619_v19 = vld [vmem:[#allocation84_spill] sm:$0xff]  ;;  %v5621_v2 = vld [vmem:[#allocation87_spill] sm:$0xff] }
  0xb1   : > { %5609 = vst [vmem:[#allocation28_spill] sm:$0xff] %v4209_v40  ;;  %5610 = vst [vmem:[#allocation29_spill] sm:$0xff] %v4213_v36  ;;  %v1252_v60 = vadd.f32 %v1216_v49, %v1089_v48  ;;  %v1253_v6 = vadd.f32 %v1217_v47, %v1090_v23  ;;  %v1373_v45 = vmul.f32 %v5614_v62, %v4193_v12  ;;  %v5620_v48 = vld [vmem:[#allocation85_spill] sm:$0xff]  ;;  %v5622_v51 = vld [vmem:[#allocation88_spill] sm:$0xff] }
  0xb2   : > { %5611 = vst [vmem:[#allocation30_spill] sm:$0xff] %v4217_v44  ;;  %5612 = vst [vmem:[#allocation31_spill] sm:$0xff] %v4221_v56  ;;  %v1374_v37 = vmul.f32 %v5615_v63, %v4197_v8  ;;  %v1375_v11 = vmul.f32 %v5616_v9, %v4201_v31  ;;  %v1376_v53 = vmul.f32 %v5617_v16, %v4205_v50  ;;  %v5623_v47 = vld [vmem:[#allocation83_spill] sm:$0xff]  ;;  %v5624_v33 = vld [vmem:[#allocation58_spill] sm:$0xff] }
  0xb3   : > { %5613 = vst [vmem:[#allocation32_spill] sm:$0xff] %v4225_v58  ;;  %v1377_v4 = vmul.f32 %v5618_v18, %v4209_v40  ;;  %v1378_v26 = vmul.f32 %v5619_v19, %v4213_v36  ;;  %v1254_v41 = vadd.f32 %v1218_v43, %v1091_v42  ;;  %v1379_v23 = vmul.f32 %v5620_v48, %v4217_v44  ;;  %v5626_v63 = vld [vmem:[#allocation86_spill] sm:$0xff]  ;;  %v5627_v9 = vld [vmem:[#allocation59_spill] sm:$0xff]  ;;  %v5630_v42 = vld [vmem:[#allocation60_spill] sm:$0xff] }
  0xb4   : > { %v1380_v34 = vmul.f32 %v5621_v2, %v4221_v56  ;;  %v1381_v49 = vmul.f32 %v5622_v51, %v4225_v58  ;;  %v4247_v62 = vadd.f32 %v5624_v33, %v5623_v47  ;;  %v4251_v16 = vadd.f32 %v5627_v9, %v5626_v63  ;;  %v5629_v18 = vld [vmem:[#allocation55_spill] sm:$0xff]  ;;  %v5632_v19 = vld [vmem:[#allocation56_spill] sm:$0xff]  ;;  %v5633_v48 = vld [vmem:[#allocation61_spill] sm:$0xff] }
  0xb5   : > { %v4255_v43 = vadd.f32 %v5630_v42, %v5629_v18  ;;  %v4259_v2 = vadd.f32 %v5633_v48, %v5632_v19  ;;  %v5635_v56 = vld [vmem:[#allocation57_spill] sm:$0xff]  ;;  %v5636_v51 = vld [vmem:[#allocation62_spill] sm:$0xff]  ;;  %v4269_v63 = vadd.f32 %v1373_v45, %v1246_v17  ;;  %v4271_v9 = vadd.f32 %v1374_v37, %v1247_v13  ;;  %v2690_v13 = vld [vmem:[%s2819_s18 + $0x48] sm:$0xff] }
  0xb6   : > { %5625 = vst [vmem:[#allocation33_spill] sm:$0xff] %v4247_v62  ;;  %5628 = vst [vmem:[#allocation34_spill] sm:$0xff] %v4251_v16  ;;  %v4263_v58 = vadd.f32 %v5636_v51, %v5635_v56  ;;  %v5638_v47 = vld [vmem:[#allocation89_spill] sm:$0xff]  ;;  %v5639_v33 = vld [vmem:[#allocation90_spill] sm:$0xff]  ;;  %v4273_v18 = vadd.f32 %v1375_v11, %v1248_v15  ;;  %v4275_v42 = vadd.f32 %v1376_v53, %v1249_v46 }
  0xb7   : > { %5631 = vst [vmem:[#allocation25_spill] sm:$0xff] %v4255_v43  ;;  %5634 = vst [vmem:[#allocation36_spill] sm:$0xff] %v4259_v2  ;;  %v4267_v44 = vadd.f32 %v5639_v33, %v5638_v47  ;;  %v4277_v19 = vadd.f32 %v1377_v4, %v1250_v25  ;;  %v4279_v48 = vadd.f32 %v1378_v26, %v1251_v24  ;;  %v5650_v45 = vld [vmem:[#allocation3_spill] sm:$0xff]  ;;  %v2691_v37 = vld [vmem:[%s2819_s18 + $0x50] sm:$0xff] }
  0xb8   : > { %5637 = vst [vmem:[#allocation37_spill] sm:$0xff] %v4263_v58  ;;  %5641 = vst [vmem:[#allocation42_spill] sm:$0xff] %v4269_v63  ;;  %v4281_v56 = vadd.f32 %v1379_v23, %v1252_v60  ;;  %v4283_v51 = vadd.f32 %v1380_v34, %v1253_v6  ;;  %v4285_v17 = vadd.f32 %v1381_v49, %v1254_v41  ;;  %v5651_v46 = vld [vmem:[#allocation91_spill] sm:$0xff]  ;;  %v2692_v25 = vld [vmem:[%s2819_s18 + $0x58] sm:$0xff] }
  0xb9   : > { %5640 = vst [vmem:[#allocation26_spill] sm:$0xff] %v4267_v44  ;;  %5642 = vst [vmem:[#allocation43_spill] sm:$0xff] %v4271_v9  ;;  %v277_v15 = vmul.f32 %v2690_v13, %v5650_v45  ;;  %v278_v11 = vmul.f32 %v2691_v37, %v5651_v46  ;;  %v5652_v53 = vld [vmem:[#allocation95_spill] sm:$0xff]  ;;  %v2693_v4 = vld [vmem:[%s2819_s18 + $0x60] sm:$0xff] }
  0xba   : > { %5643 = vst [vmem:[#allocation44_spill] sm:$0xff] %v4273_v18  ;;  %5644 = vst [vmem:[#allocation45_spill] sm:$0xff] %v4275_v42  ;;  %v279_v24 = vmul.f32 %v2692_v25, %v5652_v53  ;;  %v5653_v60 = vld [vmem:[#allocation96_spill] sm:$0xff]  ;;  %v2694_v6 = vld [vmem:[%s2819_s18 + $0xd8] sm:$0xff] }
  0xbb   : > { %5645 = vst [vmem:[#allocation46_spill] sm:$0xff] %v4277_v19  ;;  %5646 = vst [vmem:[#allocation27_spill] sm:$0xff] %v4279_v48  ;;  %v280_v26 = vmul.f32 %v2693_v4, %v5653_v60  ;;  %v5654_v23 = vld [vmem:[#allocation63_spill] sm:$0xff]  ;;  %v5655_v49 = vld [vmem:[#allocation97_spill] sm:$0xff]  ;;  %v4305_v4 = vpop.eup %2584 }
  0xbc   : > { %5647 = vst [vmem:[#allocation47_spill] sm:$0xff] %v4281_v56  ;;  %5648 = vst [vmem:[#allocation48_spill] sm:$0xff] %v4283_v51  ;;  %v404_v41 = vmul.f32 %v2694_v6, %v5654_v23  ;;  %v2695_v34 = vld [vmem:[%s2819_s18 + $0x68] sm:$0xff]  ;;  %v2696_v33 = vld [vmem:[%s2819_s18 + $0x70] sm:$0xff] }
  0xbd   : > { %5649 = vst [vmem:[#allocation49_spill] sm:$0xff] %v4285_v17  ;;  %v281_v47 = vmul.f32 %v2695_v34, %v5655_v49  ;;  %v5656_v13 = vld [vmem:[#allocation98_spill] sm:$0xff]  ;;  %v2697_v37 = vld [vmem:[%s2819_s18 + $0x78] sm:$0xff]  ;;  %v5657_v46 = vld [vmem:[#allocation99_spill] sm:$0xff] }
  0xbe   : > { %v282_v45 = vmul.f32 %v2696_v33, %v5656_v13  ;;  %v283_v54 = vmul.f32 %v2697_v37, %v5657_v46  ;;  %v2698_v25 = vld [vmem:[%s2819_s18 + $0x80] sm:$0xff]  ;;  %v5658_v53 = vld [vmem:[#allocation100_spill] sm:$0xff]  ;;  %v5662_v37 = vld [vmem:[#allocation103_spill] sm:$0xff]  ;;  %v4329_v21 = vadd.f32 %v404_v41, %v277_v15 }
  0xbf   : > { %v284_v36 = vmul.f32 %v2698_v25, %v5658_v53  ;;  %v2699_v60 = vld [vmem:[%s2819_s18 + $0xe0] sm:$0xff]  ;;  %v5659_v6 = vld [vmem:[#allocation4_spill] sm:$0xff]  ;;  %v408_v46 = vmul.f32 %v2702_v1, %v5662_v37  ;;  %v5663_v50 = vld [vmem:[#allocation35_spill] sm:$0xff] }
  0xc0   : > { %v405_v23 = vmul.f32 %v2699_v60, %v5659_v6  ;;  %v5660_v34 = vld [vmem:[#allocation64_spill] sm:$0xff]  ;;  %v5661_v13 = vld [vmem:[#allocation102_spill] sm:$0xff]  ;;  %v1440_v25 = vmul.f32 %v4305_v4, %v5663_v50  ;;  %v2704_v60 = vld [vmem:[%s2819_s18 + $0x108] sm:$0xff] }
  0xc1   : > { %v406_v49 = vmul.f32 %v2700_v22, %v5660_v34  ;;  %v2701_v33 = vld [vmem:[%s2819_s18 + $0xf0] sm:$0xff]  ;;  %v5664_v53 = vld [vmem:[#allocation38_spill] sm:$0xff]  ;;  %v5666_v6 = vld [vmem:[#allocation105_spill] sm:$0xff] }
  0xc2   : > { %v407_v40 = vmul.f32 %v2701_v33, %v5661_v13  ;;  %v1441_v52 = vmul.f32 %v4305_v4, %v5664_v53  ;;  %v2703_v31 = vld [vmem:[%s2819_s18 + $0x100] sm:$0xff]  ;;  %v5665_v8 = vld [vmem:[#allocation104_spill] sm:$0xff]  ;;  %v410_v39 = vmul.f32 %v2704_v60, %v5666_v6  ;;  %v5667_v22 = vld [vmem:[#allocation101_spill] sm:$0xff]  ;;  %v4337_v6 = vadd.f32 %v405_v23, %v278_v11 }
  0xc3   : > { %v409_v12 = vmul.f32 %v2703_v31, %v5665_v8  ;;  %v285_v34 = vmul.f32 %v2705_v38, %v5667_v22  ;;  %v5668_v33 = vld [vmem:[#allocation106_spill] sm:$0xff]  ;;  %v5669_v1 = vld [vmem:[#allocation65_spill] sm:$0xff]  ;;  %v5670_v50 = vld [vmem:[#allocation39_spill] sm:$0xff]  ;;  %v1431_v8 = vmul.f32 %v4305_v4, %v5671_v61  ;;  %v4339_v38 = vadd.f32 %v406_v49, %v279_v24 }
  0xc4   : > { %v411_v13 = vmul.f32 %v2706_v20, %v5668_v33  ;;  %v412_v37 = vmul.f32 %v2707_v10, %v5669_v1  ;;  %v1442_v53 = vmul.f32 %v4305_v4, %v5670_v50  ;;  %v1477_v29 = vadd.f32 %v1441_v52, %v1440_v25  ;;  %v5672_v31 = vld [vmem:[#allocation93_spill] sm:$0xff]  ;;  %v5673_v10 = vld [vmem:[#allocation40_spill] sm:$0xff]  ;;  %v5674_v25 = vld [vmem:[#allocation94_spill] sm:$0xff] }
  0xc5   : > { %v1432_v60 = vmul.f32 %v4305_v4, %v5672_v31  ;;  %v4341_v20 = vadd.f32 %v407_v40, %v280_v26  ;;  %v4343_v22 = vadd.f32 %v408_v46, %v281_v47  ;;  %v1443_v15 = vmul.f32 %v4305_v4, %v5673_v10  ;;  %v5675_v24 = vld [vmem:[#allocation41_spill] sm:$0xff] }
  0xc6   : > { %v1478_v41 = vadd.f32 %v1477_v29, %v1442_v53  ;;  %v4347_v33 = vadd.f32 %v409_v12, %v282_v45  ;;  %v4349_v52 = vadd.f32 %v410_v39, %v283_v54  ;;  %v1433_v1 = vmul.f32 %v4305_v4, %v5674_v25  ;;  %v5676_v39 = vld [vmem:[#allocation50_spill] sm:$0xff]  ;;  %v5677_v12 = vld [vmem:[#allocation51_spill] sm:$0xff]  ;;  %v5678_v53 = vld [vmem:[#allocation52_spill] sm:$0xff] }
  0xc7   : > { %v1467_v50 = vadd.f32 %v1432_v60, %v1431_v8  ;;  %v1449_v11 = vmul.f32 %v4305_v4, %v4269_v63  ;;  %v1450_v40 = vmul.f32 %v4305_v4, %v4271_v9  ;;  %v1444_v26 = vmul.f32 %v4305_v4, %v5675_v24 }
  0xc8   : > { %v1479_v47 = vadd.f32 %v1478_v41, %v1443_v15  ;;  %v4359_v23 = vadd.f32 %v411_v13, %v284_v36  ;;  %v4361_v29 = vadd.f32 %v412_v37, %v285_v34  ;;  %v1445_v54 = vmul.f32 %v4305_v4, %v5676_v39  ;;  %v5679_v34 = vld [vmem:[#allocation53_spill] sm:$0xff] }
  0xc9   : > { %v1446_v45 = vmul.f32 %v4305_v4, %v5677_v12  ;;  %v1434_v49 = vmul.f32 %v4305_v4, %v4247_v62  ;;  %v1468_v46 = vadd.f32 %v1467_v50, %v1433_v1  ;;  %v1447_v8 = vmul.f32 %v4305_v4, %v5678_v53  ;;  %v5682_v53 = vld [vmem:[#allocation67_spill] sm:$0xff]  ;;  %v2713_v12 = vld [vmem:[%s2819_s18 + $0x190] sm:$0xff] }
  0xca   : > { %v1480_v60 = vadd.f32 %v1479_v47, %v1444_v26  ;;  %v1451_v36 = vmul.f32 %v4305_v4, %v4273_v18  ;;  %v1487_v13 = vadd.f32 %v1450_v40, %v1449_v11  ;;  %v1448_v37 = vmul.f32 %v4305_v4, %v5679_v34 }
  0xcb   : > { %v1435_v15 = vmul.f32 %v4305_v4, %v4251_v16  ;;  %v1436_v41 = vmul.f32 %v4305_v4, %v4255_v43  ;;  %v1469_v9 = vadd.f32 %v1468_v46, %v1434_v49  ;;  %v1437_v1 = vmul.f32 %v4305_v4, %v4259_v2 }
  0xcc   : > { %v1481_v50 = vadd.f32 %v1480_v60, %v1445_v54  ;;  %v1452_v26 = vmul.f32 %v4305_v4, %v4275_v42  ;;  %v1488_v11 = vadd.f32 %v1487_v13, %v1451_v36  ;;  %v1438_v40 = vmul.f32 %v4305_v4, %v4263_v58  ;;  %v2708_v42 = vld [vmem:[%s2819_s18 + $0x168] sm:$0xff]  ;;  %v5680_v36 = vld [vmem:[#allocation66_spill] sm:$0xff] }
  0xcd   : > { %v1439_v47 = vmul.f32 %v4305_v4, %v4267_v44  ;;  %v1470_v18 = vadd.f32 %v1469_v9, %v1435_v15  ;;  %v1453_v49 = vmul.f32 %v4305_v4, %v4277_v19  ;;  %v1454_v46 = vmul.f32 %v4305_v4, %v4279_v48  ;;  %v2709_v15 = vld [vmem:[%s2819_s18 + $0x170] sm:$0xff]  ;;  %v5681_v19 = vld [vmem:[#allocation70_spill] sm:$0xff]  ;;  %v2710_v48 = vld [vmem:[%s2819_s18 + $0x178] sm:$0xff] }
  0xce   : > { %v1482_v54 = vadd.f32 %v1481_v50, %v1446_v45  ;;  %v1489_v60 = vadd.f32 %v1488_v11, %v1452_v26  ;;  %v567_v13 = vmul.f32 %v2708_v42, %v5680_v36  ;;  %v1455_v34 = vmul.f32 %v4305_v4, %v4281_v56  ;;  %v5683_v36 = vld [vmem:[#allocation68_spill] sm:$0xff]  ;;  %v2712_v44 = vld [vmem:[%s2819_s18 + $0x188] sm:$0xff] }
  0xcf   : > { %v1471_v63 = vadd.f32 %v1470_v18, %v1436_v41  ;;  %v1456_v9 = vmul.f32 %v4305_v4, %v4283_v51  ;;  %v568_v45 = vmul.f32 %v2709_v15, %v5681_v19  ;;  %v1457_v26 = vmul.f32 %v4305_v4, %v4285_v17  ;;  %v2711_v41 = vld [vmem:[%s2819_s18 + $0x180] sm:$0xff]  ;;  %v5684_v51 = vld [vmem:[#allocation69_spill] sm:$0xff]  ;;  %v5685_v19 = vld [vmem:[#allocation71_spill] sm:$0xff] }
  0xd0   : > { %v1483_v50 = vadd.f32 %v1482_v54, %v1447_v8  ;;  %v1490_v11 = vadd.f32 %v1489_v60, %v1453_v49  ;;  %v569_v42 = vmul.f32 %v2710_v48, %v5682_v53  ;;  %v570_v56 = vmul.f32 %v2711_v41, %v5683_v36  ;;  %v2714_v49 = vld [vmem:[%s2819_s18 + $0x198] sm:$0xff]  ;;  %v5686_v60 = vld [vmem:[#allocation75_spill] sm:$0xff] }
  0xd1   : > { %v1472_v18 = vadd.f32 %v1471_v63, %v1437_v1  ;;  %v571_v58 = vmul.f32 %v2712_v44, %v5684_v51  ;;  %v572_v8 = vmul.f32 %v2713_v12, %v5685_v19  ;;  %v573_v17 = vmul.f32 %v2714_v49, %v5686_v60  ;;  %v2715_v1 = vld [vmem:[%s2819_s18 + $0x1f8] sm:$0xff]  ;;  %v2716_v44 = vld [vmem:[%s2819_s18 + $0x200] sm:$0xff]  ;;  %v2718_v36 = vld [vmem:[%s2819_s18 + $0x208] sm:$0xff] }
  0xd2   : > { %v1484_v54 = vadd.f32 %v1483_v50, %v1448_v37  ;;  %v1491_v15 = vadd.f32 %v1490_v11, %v1454_v46  ;;  %v603_v63 = vadd.f32 %v567_v13, %v4329_v21  ;;  %v604_v53 = vadd.f32 %v568_v45, %v4337_v6  ;;  %v2717_v37 = vld [vmem:[%s2819_s18 + $0x1a0] sm:$0xff]  ;;  %v2720_v19 = vld [vmem:[%s2819_s18 + $0x210] sm:$0xff]  ;;  %v2722_v49 = vld [vmem:[%s2819_s18 + $0x288] sm:$0xff] }
  0xd3   : > { %v1473_v48 = vadd.f32 %v1472_v18, %v1438_v40  ;;  %v730_v41 = vmul.f32 %v2715_v1, %v3977_v28  ;;  %v731_v51 = vmul.f32 %v2716_v44, %v3981_v3  ;;  %v5687_v46 = vld [vmem:[#allocation78_spill] sm:$0xff]  ;;  %v605_v11 = vadd.f32 %v569_v42, %v4339_v38  ;;  %v2719_v40 = vld [vmem:[%s2819_s18 + $0x1a8] sm:$0xff]  ;;  %v5688_v28 = vld [vmem:[#allocation72_spill] sm:$0xff] }
  0xd4   : > { %1485 = vadd.xlane.f32.xlu1 %v1484_v54  ;;  %v1492_v12 = vadd.f32 %v1491_v15, %v1455_v34  ;;  %v574_v50 = vmul.f32 %v2717_v37, %v5687_v46  ;;  %v732_v21 = vmul.f32 %v2718_v36, %v3985_v0  ;;  %v575_v13 = vmul.f32 %v2719_v40, %v5688_v28  ;;  %v2721_v42 = vld [vmem:[%s2819_s18 + $0x218] sm:$0xff]  ;;  %v2726_v1 = vld [vmem:[%s2819_s18 + $0x228] sm:$0xff] }
  0xd5   : > { %v1474_v6 = vadd.f32 %v1473_v48, %v1439_v47  ;;  %v606_v45 = vadd.f32 %v570_v56, %v4341_v20  ;;  %v607_v3 = vadd.f32 %v571_v58, %v4343_v22  ;;  %v608_v34 = vadd.f32 %v572_v8, %v4347_v33  ;;  %v5689_v54 = vld [vmem:[#allocation73_spill] sm:$0xff]  ;;  %v2723_v58 = vld [vmem:[%s2819_s18 + $0x290] sm:$0xff]  ;;  %v2725_v48 = vld [vmem:[%s2819_s18 + $0x220] sm:$0xff] }
  0xd6   : > { %v1493_v18 = vadd.f32 %v1492_v12, %v1456_v9  ;;  %v733_v38 = vmul.f32 %v2720_v19, %v3989_v59  ;;  %v734_v0 = vmul.f32 %v2721_v42, %v5689_v54  ;;  %v766_v47 = vadd.f32 %v730_v41, %v603_v63  ;;  %v2724_v9 = vld [vmem:[%s2819_s18 + $0x298] sm:$0xff]  ;;  %v5691_v41 = vld [vmem:[#allocation76_spill] sm:$0xff]  ;;  %v2730_v46 = vld [vmem:[%s2819_s18 + $0x2a8] sm:$0xff] }
  0xd7   : > { %1475 = vadd.xlane.f32.xlu0 %v1474_v6  ;;  %v767_v15 = vadd.f32 %v731_v51, %v604_v53  ;;  %v893_v56 = vmul.f32 %v2722_v49, %v4031_v30  ;;  %v894_v20 = vmul.f32 %v2723_v58, %v4035_v55  ;;  %v609_v33 = vadd.f32 %v573_v17, %v4349_v52  ;;  %v5690_v53 = vld [vmem:[#allocation74_spill] sm:$0xff]  ;;  %v2727_v17 = vld [vmem:[%s2819_s18 + $0x230] sm:$0xff]  ;;  %v5692_v52 = vld [vmem:[#allocation77_spill] sm:$0xff] }
  0xd8   : > { %v1494_v22 = vadd.f32 %v1493_v18, %v1457_v26  ;;  %v768_v59 = vadd.f32 %v732_v21, %v605_v11  ;;  %v895_v8 = vmul.f32 %v2724_v9, %v4039_v5  ;;  %v610_v60 = vadd.f32 %v574_v50, %v4359_v23  ;;  %v2728_v44 = vld [vmem:[%s2819_s18 + $0x238] sm:$0xff]  ;;  %v5693_v5 = vld [vmem:[#allocation79_spill] sm:$0xff]  ;;  %v2729_v23 = vld [vmem:[%s2819_s18 + $0x2a0] sm:$0xff] }
  0xd9   : > { %v611_v63 = vadd.f32 %v575_v13, %v4361_v29  ;;  %v735_v30 = vmul.f32 %v2725_v48, %v5690_v53  ;;  %v736_v55 = vmul.f32 %v2726_v1, %v5691_v41  ;;  %v737_v26 = vmul.f32 %v2727_v17, %v5692_v52  ;;  %v5694_v50 = vld [vmem:[#allocation80_spill] sm:$0xff]  ;;  %v2731_v40 = vld [vmem:[%s2819_s18 + $0x318] sm:$0xff]  ;;  %v2732_v13 = vld [vmem:[%s2819_s18 + $0x320] sm:$0xff] }
  0xda   : > { %1495 = vadd.xlane.f32.xlu1 %v1494_v22  ;;  %v738_v51 = vmul.f32 %v2728_v44, %v5693_v5  ;;  %v769_v12 = vadd.f32 %v733_v38, %v606_v45  ;;  %v896_v29 = vmul.f32 %v2729_v23, %v4043_v14  ;;  %v770_v37 = vadd.f32 %v734_v0, %v607_v3  ;;  %v2733_v18 = vld [vmem:[%s2819_s18 + $0x328] sm:$0xff]  ;;  %v2734_v38 = vld [vmem:[%s2819_s18 + $0x2b0] sm:$0xff]  ;;  %v5695_v42 = vld [vmem:[#allocation13_spill] sm:$0xff] }
  0xdb   : > { %v897_v11 = vmul.f32 %v2730_v46, %v5694_v50  ;;  %v929_v36 = vadd.f32 %v893_v56, %v766_v47  ;;  %v930_v21 = vadd.f32 %v894_v20, %v767_v15  ;;  %v931_v6 = vadd.f32 %v895_v8, %v768_v59  ;;  %v2735_v0 = vld [vmem:[%s2819_s18 + $0x2b8] sm:$0xff]  ;;  %v2736_v56 = vld [vmem:[%s2819_s18 + $0x2c0] sm:$0xff]  ;;  %v2740_v1 = vld [vmem:[%s2819_s18 + $0x3a8] sm:$0xff] }
  0xdc   : > { %v1056_v28 = vmul.f32 %v2731_v40, %v4085_v7  ;;  %v1057_v45 = vmul.f32 %v2732_v13, %v4089_v57  ;;  %v1058_v14 = vmul.f32 %v2733_v18, %v4093_v27  ;;  %v771_v3 = vadd.f32 %v735_v30, %v608_v34  ;;  %v5696_v47 = vld [vmem:[#allocation5_spill] sm:$0xff]  ;;  %v5697_v7 = vld [vmem:[#allocation6_spill] sm:$0xff]  ;;  %v2737_v57 = vld [vmem:[%s2819_s18 + $0x330] sm:$0xff] }
  0xdd   : > { %v772_v19 = vadd.f32 %v736_v55, %v609_v33  ;;  %v898_v54 = vmul.f32 %v2734_v38, %v5695_v42  ;;  %v899_v15 = vmul.f32 %v2735_v0, %v5696_v47  ;;  %v773_v49 = vadd.f32 %v737_v26, %v610_v60  ;;  %v2738_v34 = vld [vmem:[%s2819_s18 + $0x2c8] sm:$0xff]  ;;  %v5698_v33 = vld [vmem:[#allocation8_spill] sm:$0xff]  ;;  %v2739_v53 = vld [vmem:[%s2819_s18 + $0x338] sm:$0xff] }
  0xde   : > { %v900_v58 = vmul.f32 %v2736_v56, %v5697_v7  ;;  %v932_v20 = vadd.f32 %v896_v29, %v769_v12  ;;  %v1059_v22 = vmul.f32 %v2737_v57, %v4097_v32  ;;  %v774_v27 = vadd.f32 %v738_v51, %v611_v63  ;;  %v5699_v41 = vld [vmem:[#allocation12_spill] sm:$0xff]  ;;  %v5700_v52 = vld [vmem:[#allocation81_spill] sm:$0xff]  ;;  %v5701_v5 = vld [vmem:[#allocation22_spill] sm:$0xff] }
  0xdf   : > { %v901_v59 = vmul.f32 %v2738_v34, %v5698_v33  ;;  %v1092_v9 = vadd.f32 %v1056_v28, %v929_v36  ;;  %v1093_v8 = vadd.f32 %v1057_v45, %v930_v21  ;;  %v933_v48 = vadd.f32 %v897_v11, %v770_v37  ;;  %v2741_v63 = vld [vmem:[%s2819_s18 + $0x3b0] sm:$0xff]  ;;  %v2742_v44 = vld [vmem:[%s2819_s18 + $0x3b8] sm:$0xff]  ;;  %v2743_v23 = vld [vmem:[%s2819_s18 + $0x340] sm:$0xff] }
  0xe0   : > { %v1060_v60 = vmul.f32 %v2739_v53, %v4101_v35  ;;  %v1094_v30 = vadd.f32 %v1058_v14, %v931_v6  ;;  %v1219_v55 = vmul.f32 %v2740_v1, %v5699_v41  ;;  %v934_v17 = vadd.f32 %v898_v54, %v771_v3  ;;  %v5702_v29 = vld [vmem:[#allocation10_spill] sm:$0xff]  ;;  %v2745_v21 = vld [vmem:[%s2819_s18 + $0x348] sm:$0xff]  ;;  %v2746_v45 = vld [vmem:[%s2819_s18 + $0x350] sm:$0xff] }
  0xe1   : > { %v935_v32 = vadd.f32 %v899_v15, %v772_v19  ;;  %v1220_v26 = vmul.f32 %v2741_v63, %v5700_v52  ;;  %v1221_v51 = vmul.f32 %v2742_v44, %v5701_v5  ;;  %v936_v12 = vadd.f32 %v900_v58, %v773_v49  ;;  %v2744_v46 = vld [vmem:[%s2819_s18 + $0x3c0] sm:$0xff]  ;;  %v5704_v6 = vld [vmem:[#allocation7_spill] sm:$0xff]  ;;  %v5705_v18 = vld [vmem:[#allocation9_spill] sm:$0xff] }
  0xe2   : > { %v1061_v35 = vmul.f32 %v2743_v23, %v5702_v29  ;;  %v1095_v37 = vadd.f32 %v1059_v22, %v932_v20  ;;  %v5703_v50 = vld [vmem:[#allocation14_spill] sm:$0xff]  ;;  %v937_v36 = vadd.f32 %v901_v59, %v774_v27  ;;  %v1062_v40 = vmul.f32 %v2745_v21, %v5704_v6  ;;  %v2747_v19 = vld [vmem:[%s2819_s18 + $0x3c8] sm:$0xff]  ;;  %v2748_v0 = vld [vmem:[%s2819_s18 + $0x358] sm:$0xff] }
  0xe3   : > { %v1222_v11 = vmul.f32 %v2744_v46, %v5703_v50  ;;  %v1255_v28 = vadd.f32 %v1219_v55, %v1092_v9  ;;  %v1256_v13 = vadd.f32 %v1220_v26, %v1093_v8  ;;  %v1063_v14 = vmul.f32 %v2746_v45, %v5705_v18  ;;  %v5706_v38 = vld [vmem:[#allocation15_spill] sm:$0xff]  ;;  %v2749_v49 = vld [vmem:[%s2819_s18 + $0x438] sm:$0xff]  ;;  %v5708_v56 = vld [vmem:[#allocation20_spill] sm:$0xff] }
  0xe4   : > { %v1096_v3 = vadd.f32 %v1060_v60, %v933_v48  ;;  %v1223_v42 = vmul.f32 %v2747_v19, %v5706_v38  ;;  %v1257_v54 = vadd.f32 %v1221_v51, %v1094_v30  ;;  %v5707_v47 = vld [vmem:[#allocation11_spill] sm:$0xff]  ;;  %v1382_v7 = vmul.f32 %v2749_v49, %v5708_v56  ;;  %v2750_v58 = vld [vmem:[%s2819_s18 + $0x440] sm:$0xff]  ;;  %v5709_v20 = vld [vmem:[#allocation21_spill] sm:$0xff] }
  0xe5   : > { %v1064_v15 = vmul.f32 %v2748_v0, %v5707_v47  ;;  %v1383_v57 = vmul.f32 %v2750_v58, %v5709_v20  ;;  %v2751_v22 = vld [vmem:[%s2819_s18 + $0x448] sm:$0xff]  ;;  %v1097_v33 = vadd.f32 %v1061_v35, %v934_v17  ;;  %v2752_v59 = vld [vmem:[%s2819_s18 + $0x3d0] sm:$0xff]  ;;  %v1258_v48 = vadd.f32 %v1222_v11, %v1095_v37  ;;  %v2754_v41 = vld [vmem:[%s2819_s18 + $0x3d8] sm:$0xff] }
  0xe6   : > { %v5710_v27 = vld [vmem:[#allocation23_spill] sm:$0xff]  ;;  %v5711_v9 = vld [vmem:[#allocation16_spill] sm:$0xff]  ;;  %v1098_v1 = vadd.f32 %v1062_v40, %v935_v32  ;;  %v5713_v55 = vld [vmem:[#allocation17_spill] sm:$0xff]  ;;  %v4500_v52 = vadd.f32 %v1382_v7, %v1255_v28  ;;  %v1259_v44 = vadd.f32 %v1223_v42, %v1096_v3  ;;  %v1099_v29 = vadd.f32 %v1063_v14, %v936_v12 }
  0xe7   : > { %v1384_v34 = vmul.f32 %v2751_v22, %v5710_v27  ;;  %v1224_v8 = vmul.f32 %v2752_v59, %v5711_v9  ;;  %v2753_v53 = vld [vmem:[%s2819_s18 + $0x450] sm:$0xff]  ;;  %v1225_v63 = vmul.f32 %v2754_v41, %v5713_v55  ;;  %v4502_v26 = vadd.f32 %v1383_v57, %v1256_v13  ;;  %v2755_v17 = vld [vmem:[%s2819_s18 + $0x458] sm:$0xff]  ;;  %v2756_v35 = vld [vmem:[%s2819_s18 + $0x3e0] sm:$0xff] }
  0xe8   : > { %v5712_v60 = vld [vmem:[#allocation24_spill] sm:$0xff]  ;;  %5714 = vst [vmem:[#allocation54_spill] sm:$0xff] %v4500_v52  ;;  %v5718_v37 = vld [vmem:[#allocation18_spill] sm:$0xff]  ;;  %v1458_v32 = vmul.f32 %v4305_v4, %v4500_v52  ;;  %v5719_v21 = vld [vmem:[#allocation29_spill] sm:$0xff]  ;;  %v1100_v13 = vadd.f32 %v1064_v15, %v937_v36 }
  0xe9   : > { %v1385_v30 = vmul.f32 %v2753_v53, %v5712_v60  ;;  %5715 = vst [vmem:[#allocation82_spill] sm:$0xff] %v4502_v26  ;;  %v5716_v5 = vld [vmem:[#allocation28_spill] sm:$0xff]  ;;  %v4506_v23 = vadd.f32 %v1384_v34, %v1257_v54  ;;  %v1226_v46 = vmul.f32 %v2756_v35, %v5718_v37  ;;  %v1260_v50 = vadd.f32 %v1224_v8, %v1097_v33  ;;  %v2757_v11 = vld [vmem:[%s2819_s18 + $0x460] sm:$0xff]  ;;  %v2758_v45 = vld [vmem:[%s2819_s18 + $0x3e8] sm:$0xff] }
  0xea   : > { %v1386_v51 = vmul.f32 %v2755_v17, %v5716_v5  ;;  %v1387_v6 = vmul.f32 %v2757_v11, %v5719_v21  ;;  %v1459_v28 = vmul.f32 %v4305_v4, %v4502_v26  ;;  %v5721_v12 = vld [vmem:[#allocation19_spill] sm:$0xff]  ;;  %v1261_v14 = vadd.f32 %v1225_v63, %v1098_v1  ;;  %v5722_v19 = vld [vmem:[#allocation30_spill] sm:$0xff]  ;;  %v2760_v49 = vld [vmem:[%s2819_s18 + $0x470] sm:$0xff] }
  0xeb   : > { %5717 = vst [vmem:[#allocation84_spill] sm:$0xff] %v4506_v23  ;;  %v4514_v40 = vadd.f32 %v1385_v30, %v1258_v48  ;;  %v1227_v18 = vmul.f32 %v2758_v45, %v5721_v12  ;;  %v2759_v3 = vld [vmem:[%s2819_s18 + $0x468] sm:$0xff]  ;;  %v1460_v54 = vmul.f32 %v4305_v4, %v4506_v23  ;;  %v1262_v47 = vadd.f32 %v1226_v46, %v1099_v29  ;;  %v2761_v57 = vld [vmem:[%s2819_s18 + $0x478] sm:$0xff]  ;;  %v5726_v22 = vld [vmem:[#allocation32_spill] sm:$0xff]  ;;  %s2445_s18 = sshll.u32 %s5809_s10, 1 }
  0xec   : > { %v1388_v38 = vmul.f32 %v2759_v3, %v5722_v19  ;;  %v4522_v42 = vadd.f32 %v1386_v51, %v1259_v44  ;;  %v1497_v0 = vadd.f32 %v1459_v28, %v1458_v32  ;;  %v5724_v56 = vld [vmem:[#allocation31_spill] sm:$0xff]  ;;  %v4528_v58 = vadd.f32 %v1387_v6, %v1260_v50  ;;  %s141_s28 = scalar_lea.vmem %s5032_s2, %s2445_s18 }
  0xed   : > { %5720 = vst [vmem:[#allocation85_spill] sm:$0xff] %v4514_v40  ;;  %v1389_v7 = vmul.f32 %v2760_v49, %v5724_v56  ;;  %v1461_v36 = vmul.f32 %v4305_v4, %v4514_v40  ;;  %v1263_v20 = vadd.f32 %v1227_v18, %v1100_v13  ;;  %v1390_v27 = vmul.f32 %v2761_v57, %v5726_v22  ;;  %v5730_v57 = vld [vmem:[#allocation35_spill] sm:$0xff] }
  0xee   : > { %5723 = vst [vmem:[#allocation87_spill] sm:$0xff] %v4522_v42  ;;  %5725 = vst [vmem:[#allocation88_spill] sm:$0xff] %v4528_v58  ;;  %v1498_v15 = vadd.f32 %v1497_v0, %v1460_v54  ;;  %v4534_v34 = vadd.f32 %v1388_v38, %v1261_v14  ;;  %v1462_v33 = vmul.f32 %v4305_v4, %v4522_v42 }
  0xef   : > { %v4538_v9 = vadd.f32 %v1389_v7, %v1262_v47  ;;  %v1463_v8 = vmul.f32 %v4305_v4, %v4528_v58  ;;  %v4542_v53 = vadd.f32 %v1390_v27, %v1263_v20  ;;  %v5731_v27 = vld [vmem:[#allocation38_spill] sm:$0xff] }
  0xf0   : > { %5727 = vst [vmem:[#allocation83_spill] sm:$0xff] %v4534_v34  ;;  %v1499_v59 = vadd.f32 %v1498_v15, %v1461_v36  ;;  %v1464_v60 = vmul.f32 %v4305_v4, %v4534_v34 }
  0xf1   : > { %5728 = vst [vmem:[#allocation58_spill] sm:$0xff] %v4538_v9  ;;  %5729 = vst [vmem:[#allocation86_spill] sm:$0xff] %v4542_v53  ;;  %v1465_v1 = vmul.f32 %v4305_v4, %v4538_v9  ;;  %v1466_v55 = vmul.f32 %v4305_v4, %v4542_v53 }
  0xf2   : > { %v1500_v48 = vadd.f32 %v1499_v59, %v1462_v33  ;;  %v5732_v59 = vld [vmem:[#allocation39_spill] sm:$0xff] }
  0xf4   : > { %v1501_v30 = vadd.f32 %v1500_v48, %v1463_v8 }
  0xf6   : > { %v1502_v41 = vadd.f32 %v1501_v30, %v1464_v60 }
  0xf8   : > { %v1503_v63 = vadd.f32 %v1502_v41, %v1465_v1  ;;  %v5733_v41 = vld [vmem:[#allocation51_spill] sm:$0xff] }
  0xfa   : > { %v1504_v44 = vadd.f32 %v1503_v63, %v1466_v55 }
  0xfc   : > { %1505 = vadd.xlane.f32.xlu0 %v1504_v44 }
 0x161   : > { %v1486_v17 = vpop.xlane.xlu1 %1485 }
 0x162   : > { %v1508_v5 = vmul.f32 %v1486_v17, %v1486_v17 }
 0x164   : > { %v1476_v51 = vpop.xlane.xlu0 %1475 }
 0x165   : > { %v1507_v29 = vmul.f32 %v1476_v51, %v1476_v51 }
 0x167   : > { %v1511_v35 = vadd.f32 %v1508_v5, %v1507_v29  ;;  %v4550_v14 = vpop.xlane.xlu1 %1495 }
 0x168   : > { %v1509_v38 = vmul.f32 %v4550_v14, %v4550_v14 }
 0x169   : > { %v1512_v37 = vrot.slane %v1511_v35, 4 }
 0x16b   : > { %v1513_v46 = vadd.f32 %v1512_v37, %v1511_v35 }
 0x16d   : > { %v1514_v32 = vrot.slane %v1513_v46, 2 }
 0x16f   : > { %v1515_v50 = vadd.f32 %v1514_v32, %v1513_v46 }
 0x171   : > { %v1516_v11 = vrot.slane %v1515_v50, 1 }
 0x173   : > { %v1517_v21 = vadd.f32 %v1516_v11, %v1515_v50 }
 0x175   : > { %v1525_v6 = vadd.f32 1.0, %v1517_v21  ;;  %v1535_v28 = vadd.f32 1e-09, %v1517_v21 }
 0x177   : > { %2586 = vrcp.f32 %v1525_v6 }
 0x178   : > { %2588 = vrsqrt.f32 %v1535_v28 }
 0x181   : > { %v2587_v13 = vpop.eup %2586 }
 0x182   : > { %v1528_v4 = vmul.f32 %v2587_v13, %v1517_v21  ;;  %v2589_v18 = vpop.eup %2588 }
 0x184   : > { %v1531_v45 = vmul.f32 %v1528_v4, %v1476_v51  ;;  %v1532_v12 = vmul.f32 %v1528_v4, %v1486_v17 }
 0x186   : > { %v1539_v3 = vmul.f32 %v2589_v18, %v1531_v45  ;;  %v1540_v19 = vmul.f32 %v2589_v18, %v1532_v12 }
 0x188   : > { %v1543_v54 = vmul.f32 %v1539_v3, %v5671_v61  ;;  %v1544_v0 = vmul.f32 %v1539_v3, %v5672_v31  ;;  %v1545_v49 = vmul.f32 %v1539_v3, %v5674_v25  ;;  %v1546_v56 = vmul.f32 %v1539_v3, %v4247_v62 }
 0x189   : > { %v4556_v47 = vpop.xlane.xlu0 %1505  ;;  %v1547_v7 = vmul.f32 %v1539_v3, %v4251_v16  ;;  %v1548_v36 = vmul.f32 %v1539_v3, %v4255_v43  ;;  %v1549_v20 = vmul.f32 %v1539_v3, %v4259_v2  ;;  %v1552_v22 = vmul.f32 %v1540_v19, %v5730_v57 }
 0x18a   : > { %v1510_v15 = vmul.f32 %v4556_v47, %v4556_v47  ;;  %v1553_v33 = vmul.f32 %v1540_v19, %v5731_v27  ;;  %v1554_v8 = vmul.f32 %v1540_v19, %v5732_v59  ;;  %v1555_v48 = vmul.f32 %v1540_v19, %v5673_v10 }
 0x18b   : > { %v1556_v60 = vmul.f32 %v1540_v19, %v5675_v24  ;;  %v1557_v30 = vmul.f32 %v1540_v19, %v5676_v39  ;;  %v1558_v55 = vmul.f32 %v1540_v19, %v5733_v41  ;;  %v1579_v63 = vadd.f32 %v1552_v22, %v1543_v54  ;;  %v5734_v22 = vld [vmem:[#allocation37_spill] sm:$0xff] }
 0x18c   : > { %v1518_v1 = vadd.f32 %v1510_v15, %v1509_v38  ;;  %v1586_v44 = vadd.f32 %v1553_v33, %v1544_v0  ;;  %v1593_v17 = vadd.f32 %v1554_v8, %v1545_v49  ;;  %v1600_v5 = vadd.f32 %v1555_v48, %v1546_v56  ;;  %v5735_v8 = vld [vmem:[#allocation26_spill] sm:$0xff] }
 0x18d   : > { %v1607_v29 = vadd.f32 %v1556_v60, %v1547_v7  ;;  %v1614_v35 = vadd.f32 %v1557_v30, %v1548_v36  ;;  %v1621_v37 = vadd.f32 %v1558_v55, %v1549_v20  ;;  %v1580_v46 = vrot.slane %v1579_v63, 4 }
 0x18e   : > { %v1519_v51 = vrot.slane %v1518_v1, 4  ;;  %v1587_v32 = vrot.slane %v1586_v44, 4  ;;  %v1594_v50 = vrot.slane %v1593_v17, 4  ;;  %v1601_v11 = vrot.slane %v1600_v5, 4 }
 0x18f   : > { %v1608_v6 = vrot.slane %v1607_v29, 4  ;;  %v1615_v28 = vrot.slane %v1614_v35, 4  ;;  %v1622_v13 = vrot.slane %v1621_v37, 4  ;;  %v1581_v4 = vadd.f32 %v1580_v46, %v1579_v63 }
 0x190   : > { %v1520_v21 = vadd.f32 %v1519_v51, %v1518_v1  ;;  %v1588_v45 = vadd.f32 %v1587_v32, %v1586_v44  ;;  %v1595_v12 = vadd.f32 %v1594_v50, %v1593_v17  ;;  %v1602_v18 = vadd.f32 %v1601_v11, %v1600_v5  ;;  %v5736_v17 = vld [vmem:[#allocation52_spill] sm:$0xff]  ;;  %v5737_v51 = vld [vmem:[#allocation53_spill] sm:$0xff] }
 0x191   : > { %v1609_v54 = vadd.f32 %v1608_v6, %v1607_v29  ;;  %v1616_v0 = vadd.f32 %v1615_v28, %v1614_v35  ;;  %v1623_v49 = vadd.f32 %v1622_v13, %v1621_v37  ;;  %v1582_v56 = vrot.slane %v1581_v4, 2 }
 0x192   : > { %v1521_v38 = vrot.slane %v1520_v21, 2  ;;  %v1589_v7 = vrot.slane %v1588_v45, 2  ;;  %v1596_v36 = vrot.slane %v1595_v12, 2  ;;  %v1603_v15 = vrot.slane %v1602_v18, 2 }
 0x193   : > { %v1550_v33 = vmul.f32 %v1539_v3, %v5734_v22  ;;  %v1551_v48 = vmul.f32 %v1539_v3, %v5735_v8  ;;  %v1610_v60 = vrot.slane %v1609_v54, 2  ;;  %v1583_v30 = vadd.f32 %v1582_v56, %v1581_v4 }
 0x194   : > { %v1522_v20 = vadd.f32 %v1521_v38, %v1520_v21  ;;  %v1590_v1 = vadd.f32 %v1589_v7, %v1588_v45  ;;  %v1597_v55 = vadd.f32 %v1596_v36, %v1595_v12  ;;  %v1604_v63 = vadd.f32 %v1603_v15, %v1602_v18 }
 0x195   : > { %v1559_v5 = vmul.f32 %v1540_v19, %v5736_v17  ;;  %v1560_v29 = vmul.f32 %v1540_v19, %v5737_v51  ;;  %v1617_v35 = vrot.slane %v1616_v0, 2  ;;  %v1584_v37 = vrot.slane %v1583_v30, 1 }
 0x196   : > { %v1523_v44 = vrot.slane %v1522_v20, 1  ;;  %v1598_v46 = vrot.slane %v1597_v55, 1  ;;  %v1611_v32 = vadd.f32 %v1610_v60, %v1609_v54  ;;  %v1624_v50 = vrot.slane %v1623_v49, 2 }
 0x197   : > { %v1591_v21 = vrot.slane %v1590_v1, 1  ;;  %v4576_v6 = vadd.f32 %v1584_v37, %v1583_v30  ;;  %v1605_v28 = vrot.slane %v1604_v63, 1  ;;  %v1618_v4 = vadd.f32 %v1617_v35, %v1616_v0 }
 0x198   : > { %v1524_v11 = vadd.f32 %v1523_v44, %v1522_v20  ;;  %v4578_v3 = vadd.f32 %v1598_v46, %v1597_v55  ;;  %v1612_v45 = vrot.slane %v1611_v32, 1  ;;  %v1625_v12 = vadd.f32 %v1624_v50, %v1623_v49 }
 0x199   : > { %v1628_v18 = vadd.f32 %v1559_v5, %v1550_v33  ;;  %v1635_v38 = vadd.f32 %v1560_v29, %v1551_v48  ;;  %v4580_v56 = vadd.f32 %v1591_v21, %v1590_v1  ;;  %v4582_v7 = vadd.f32 %v1605_v28, %v1604_v63 }
 0x19a   : > { %v1526_v13 = vadd.f32 1.0, %v1524_v11  ;;  %v1536_v19 = vadd.f32 1e-09, %v1524_v11  ;;  %v1723_v15 = vmax.f32 %v4576_v6, %v4578_v3  ;;  %v1619_v20 = vrot.slane %v1618_v4, 1 }
 0x19b   : > { %v1629_v54 = vrot.slane %v1628_v18, 4  ;;  %v1636_v36 = vrot.slane %v1635_v38, 4  ;;  %v4586_v60 = vadd.f32 %v1612_v45, %v1611_v32  ;;  %v1626_v30 = vrot.slane %v1625_v12, 1 }
 0x19c   : > { %2590 = vrcp.f32 %v1526_v13  ;;  %v1724_v48 = vmax.f32 %v4580_v56, %v4582_v7  ;;  %v4591_v63 = vadd.f32 %v1619_v20, %v1618_v4 }
 0x19d   : > { %v1630_v0 = vadd.f32 %v1629_v54, %v1628_v18  ;;  %v1637_v55 = vadd.f32 %v1636_v36, %v1635_v38  ;;  %2592 = vrsqrt.f32 %v1536_v19  ;;  %v1725_v1 = vmax.f32 %v1723_v15, %v4586_v60  ;;  %v5738_v15 = vld [vmem:[#allocation42_spill] sm:$0xff] }
 0x19e   : > { %v4593_v44 = vadd.f32 %v1626_v30, %v1625_v12  ;;  %v1726_v46 = vmax.f32 %v1724_v48, %v4591_v63 }
 0x19f   : > { %v1631_v49 = vrot.slane %v1630_v0, 2  ;;  %v1638_v33 = vrot.slane %v1637_v55, 2 }
 0x1a0   : > { %v1727_v32 = vmax.f32 %v1725_v1, %v4593_v44 }
 0x1a1   : > { %v1632_v5 = vadd.f32 %v1631_v49, %v1630_v0  ;;  %v1639_v29 = vadd.f32 %v1638_v33, %v1637_v55  ;;  %v5740_v0 = vld [vmem:[#allocation44_spill] sm:$0xff]  ;;  %v5741_v49 = vld [vmem:[#allocation45_spill] sm:$0xff] }
 0x1a3   : > { %v1633_v35 = vrot.slane %v1632_v5, 1  ;;  %v1640_v37 = vrot.slane %v1639_v29, 1 }
 0x1a5   : > { %v4597_v28 = vadd.f32 %v1633_v35, %v1632_v5  ;;  %v4599_v13 = vadd.f32 %v1640_v37, %v1639_v29  ;;  %v5744_v5 = vld [vmem:[#allocation47_spill] sm:$0xff]  ;;  %v5745_v35 = vld [vmem:[#allocation48_spill] sm:$0xff] }
 0x1a6   : > { %v2591_v50 = vpop.eup %2590 }
 0x1a7   : > { %v1530_v21 = vmul.f32 %v2591_v50, %v1524_v11  ;;  %v1728_v12 = vmax.f32 %v1726_v46, %v4597_v28  ;;  %v1729_v18 = vmax.f32 %v1727_v32, %v4599_v13  ;;  %v2593_v38 = vpop.eup %2592  ;;  %v5739_v11 = vld [vmem:[#allocation43_spill] sm:$0xff] }
 0x1a9   : > { %v1533_v45 = vmul.f32 %v1530_v21, %v4550_v14  ;;  %v1534_v4 = vmul.f32 %v1530_v21, %v4556_v47  ;;  %v1730_v36 = vmax.f32 %v1729_v18, %v1728_v12  ;;  %v5742_v14 = vld [vmem:[#allocation46_spill] sm:$0xff]  ;;  %v5743_v47 = vld [vmem:[#allocation27_spill] sm:$0xff] }
 0x1ab   : > { %v1541_v19 = vmul.f32 %v2593_v38, %v1533_v45  ;;  %v1542_v54 = vmul.f32 %v2593_v38, %v1534_v4  ;;  %1731 = vmax.xlane.f32.xlu1 %v1730_v36 }
 0x1ad   : > { %v1561_v20 = vmul.f32 %v1541_v19, %v5738_v15  ;;  %v1562_v30 = vmul.f32 %v1541_v19, %v5739_v11  ;;  %v1563_v55 = vmul.f32 %v1541_v19, %v5740_v0  ;;  %v1564_v33 = vmul.f32 %v1541_v19, %v5741_v49 }
 0x1ae   : > { %v1565_v48 = vmul.f32 %v1541_v19, %v5742_v14  ;;  %v1566_v1 = vmul.f32 %v1541_v19, %v5743_v47  ;;  %v1567_v29 = vmul.f32 %v1541_v19, %v5744_v5  ;;  %v1568_v37 = vmul.f32 %v1541_v19, %v5745_v35 }
 0x1af   : > { %v1570_v46 = vmul.f32 %v1542_v54, %v4500_v52  ;;  %v1571_v32 = vmul.f32 %v1542_v54, %v4502_v26  ;;  %v1572_v50 = vmul.f32 %v1542_v54, %v4506_v23  ;;  %v1573_v21 = vmul.f32 %v1542_v54, %v4514_v40 }
 0x1b0   : > { %v1574_v45 = vmul.f32 %v1542_v54, %v4522_v42  ;;  %v1575_v4 = vmul.f32 %v1542_v54, %v4528_v58  ;;  %v1576_v12 = vmul.f32 %v1542_v54, %v4534_v34  ;;  %v1577_v18 = vmul.f32 %v1542_v54, %v4538_v9 }
 0x1b1   : > { %v1642_v38 = vadd.f32 %v1570_v46, %v1561_v20  ;;  %v1649_v36 = vadd.f32 %v1571_v32, %v1562_v30  ;;  %v1656_v5 = vadd.f32 %v1572_v50, %v1563_v55  ;;  %v1663_v35 = vadd.f32 %v1573_v21, %v1564_v33 }
 0x1b2   : > { %v1670_v47 = vadd.f32 %v1574_v45, %v1565_v48  ;;  %v1677_v14 = vadd.f32 %v1575_v4, %v1566_v1  ;;  %v1684_v11 = vadd.f32 %v1576_v12, %v1567_v29  ;;  %v1691_v15 = vadd.f32 %v1577_v18, %v1568_v37  ;;  %v5746_v29 = vld [vmem:[#allocation49_spill] sm:$0xff] }
 0x1b3   : > { %v1643_v49 = vrot.slane %v1642_v38, 4  ;;  %v1650_v0 = vrot.slane %v1649_v36, 4  ;;  %v1657_v23 = vrot.slane %v1656_v5, 4  ;;  %v1664_v40 = vrot.slane %v1663_v35, 4 }
 0x1b4   : > { %v1671_v26 = vrot.slane %v1670_v47, 4  ;;  %v1678_v42 = vrot.slane %v1677_v14, 4  ;;  %v1685_v51 = vrot.slane %v1684_v11, 4  ;;  %v1692_v20 = vrot.slane %v1691_v15, 4 }
 0x1b5   : > { %v1644_v52 = vadd.f32 %v1643_v49, %v1642_v38  ;;  %v1651_v58 = vadd.f32 %v1650_v0, %v1649_v36  ;;  %v1658_v34 = vadd.f32 %v1657_v23, %v1656_v5  ;;  %v1665_v17 = vadd.f32 %v1664_v40, %v1663_v35 }
 0x1b6   : > { %v1672_v9 = vadd.f32 %v1671_v26, %v1670_v47  ;;  %v1679_v33 = vadd.f32 %v1678_v42, %v1677_v14  ;;  %v1686_v48 = vadd.f32 %v1685_v51, %v1684_v11  ;;  %v1569_v37 = vmul.f32 %v1541_v19, %v5746_v29 }
 0x1b7   : > { %v1645_v30 = vrot.slane %v1644_v52, 2  ;;  %v1652_v55 = vrot.slane %v1651_v58, 2  ;;  %v1659_v1 = vrot.slane %v1658_v34, 2  ;;  %v1666_v46 = vrot.slane %v1665_v17, 2 }
 0x1b8   : > { %v1673_v32 = vrot.slane %v1672_v9, 2  ;;  %v1578_v45 = vmul.f32 %v1542_v54, %v4542_v53  ;;  %v1693_v4 = vadd.f32 %v1692_v20, %v1691_v15  ;;  %v1680_v26 = vrot.slane %v1679_v33, 2 }
 0x1b9   : > { %v1646_v50 = vadd.f32 %v1645_v30, %v1644_v52  ;;  %v1653_v21 = vadd.f32 %v1652_v55, %v1651_v58  ;;  %v1660_v49 = vadd.f32 %v1659_v1, %v1658_v34  ;;  %v1667_v0 = vadd.f32 %v1666_v46, %v1665_v17 }
 0x1ba   : > { %v1674_v40 = vadd.f32 %v1673_v32, %v1672_v9  ;;  %v1687_v47 = vrot.slane %v1686_v48, 2  ;;  %v1694_v14 = vrot.slane %v1693_v4, 2  ;;  %v1681_v52 = vadd.f32 %v1680_v26, %v1679_v33 }
 0x1bb   : > { %v1647_v23 = vrot.slane %v1646_v50, 1  ;;  %v1661_v5 = vrot.slane %v1660_v49, 1  ;;  %v1654_v42 = vrot.slane %v1653_v21, 1  ;;  %v1668_v51 = vrot.slane %v1667_v0, 1 }
 0x1bc   : > { %v1675_v19 = vrot.slane %v1674_v40, 1  ;;  %v1688_v58 = vadd.f32 %v1687_v47, %v1686_v48  ;;  %v1698_v12 = vadd.f32 %v1578_v45, %v1569_v37  ;;  %v1695_v15 = vadd.f32 %v1694_v14, %v1693_v4 }
 0x1bd   : > { %v4623_v35 = vadd.f32 %v1647_v23, %v1646_v50  ;;  %v4625_v11 = vadd.f32 %v1661_v5, %v1660_v49  ;;  %v4627_v54 = vadd.f32 %v1654_v42, %v1653_v21  ;;  %v4629_v34 = vadd.f32 %v1668_v51, %v1667_v0 }
 0x1be   : > { %v1699_v17 = vrot.slane %v1698_v12, 4  ;;  %v4633_v18 = vadd.f32 %v1675_v19, %v1674_v40  ;;  %v1682_v38 = vrot.slane %v1681_v52, 1  ;;  %v1689_v36 = vrot.slane %v1688_v58, 1 }
 0x1bf   : > { %5747 = vst [vmem:[#allocation59_spill] sm:$0xff] %v4623_v35  ;;  %5748 = vst [vmem:[#allocation55_spill] sm:$0xff] %v4625_v11  ;;  %v1733_v9 = vmax.f32 %v4623_v35, %v4625_v11  ;;  %v1734_v55 = vmax.f32 %v4627_v54, %v4629_v34  ;;  %v1696_v46 = vrot.slane %v1695_v15, 1 }
 0x1c0   : > { %5749 = vst [vmem:[#allocation60_spill] sm:$0xff] %v4627_v54  ;;  %5750 = vst [vmem:[#allocation56_spill] sm:$0xff] %v4629_v34  ;;  %v1700_v20 = vadd.f32 %v1699_v17, %v1698_v12  ;;  %v4638_v48 = vadd.f32 %v1682_v38, %v1681_v52  ;;  %v4640_v1 = vadd.f32 %v1689_v36, %v1688_v58 }
 0x1c1   : > { %5751 = vst [vmem:[#allocation61_spill] sm:$0xff] %v4633_v18  ;;  %v1735_v33 = vmax.f32 %v1733_v9, %v4633_v18  ;;  %v4644_v45 = vadd.f32 %v1696_v46, %v1695_v15 }
 0x1c2   : > { %v1701_v30 = vrot.slane %v1700_v20, 2  ;;  %5752 = vst [vmem:[#allocation57_spill] sm:$0xff] %v4638_v48  ;;  %5753 = vst [vmem:[#allocation62_spill] sm:$0xff] %v4640_v1  ;;  %v1736_v50 = vmax.f32 %v1734_v55, %v4638_v48 }
 0x1c3   : > { %v1737_v21 = vmax.f32 %v1735_v33, %v4640_v1  ;;  %5754 = vst [vmem:[#allocation89_spill] sm:$0xff] %v4644_v45 }
 0x1c4   : > { %v1702_v32 = vadd.f32 %v1701_v30, %v1700_v20  ;;  %v1738_v0 = vmax.f32 %v1736_v50, %v4644_v45 }
 0x1c6   : > { %v1703_v37 = vrot.slane %v1702_v32, 1 }
 0x1c8   : > { %v4646_v49 = vadd.f32 %v1703_v37, %v1702_v32 }
 0x1ca   : > { %5755 = vst [vmem:[#allocation90_spill] sm:$0xff] %v4646_v49  ;;  %v1739_v4 = vmax.f32 %v1737_v21, %v4646_v49 }
 0x1cc   : > { %v1740_v23 = vmax.f32 %v1739_v4, %v1738_v0 }
 0x1ce   : > { %1741 = vmax.xlane.f32.xlu0 %v1740_v23 }
 0x238   : > { %v1732_v40 = vpop.xlane.xlu1 %1731 }
 0x239   : > { %v1743_v26 = vsub.f32 %v4576_v6, %v1732_v40  ;;  %v1744_v47 = vsub.f32 %v4580_v56, %v1732_v40  ;;  %v1745_v5 = vsub.f32 %v4578_v3, %v1732_v40  ;;  %v1746_v42 = vsub.f32 %v4582_v7, %v1732_v40 }
 0x23a   : > { %v1747_v19 = vsub.f32 %v4586_v60, %v1732_v40  ;;  %v1748_v58 = vsub.f32 %v4591_v63, %v1732_v40  ;;  %v1749_v17 = vsub.f32 %v4593_v44, %v1732_v40  ;;  %v1750_v15 = vsub.f32 %v4597_v28, %v1732_v40 }
 0x23b   : > { %v1761_v51 = vmul.f32 1.442695, %v1743_v26  ;;  %v1763_v14 = vmul.f32 1.442695, %v1744_v47  ;;  %v1765_v52 = vmul.f32 1.442695, %v1745_v5  ;;  %v1751_v36 = vsub.f32 %v4599_v13, %v1732_v40 }
 0x23c   : > { %v1767_v12 = vmul.f32 1.442695, %v1746_v42  ;;  %v1769_v9 = vmul.f32 1.442695, %v1747_v19  ;;  %v1771_v38 = vmul.f32 1.442695, %v1748_v58 }
 0x23d   : > { %2594 = vpow2.f32 %v1761_v51  ;;  %v1773_v20 = vmul.f32 1.442695, %v1749_v17  ;;  %v1775_v30 = vmul.f32 1.442695, %v1750_v15  ;;  %v1777_v46 = vmul.f32 1.442695, %v1751_v36 }
 0x23e   : > { %2596 = vpow2.f32 %v1763_v14 }
 0x23f   : > { %2598 = vpow2.f32 %v1765_v52 }
 0x240   : > { %2600 = vpow2.f32 %v1767_v12 }
 0x241   : > { %2602 = vpow2.f32 %v1769_v9 }
 0x242   : > { %2604 = vpow2.f32 %v1771_v38 }
 0x243   : > { %2606 = vpow2.f32 %v1773_v20 }
 0x244   : > { %2608 = vpow2.f32 %v1775_v30 }
 0x245   : > { %2610 = vpow2.f32 %v1777_v46 }
 0x247   : > { %v4659_v55 = vpop.eup %2594 }
 0x248   : > { %v4661_v33 = vpop.eup %2596 }
 0x249   : > { %v1797_v32 = vadd.f32 %v4661_v33, %v4659_v55  ;;  %v4665_v37 = vpop.eup %2598 }
 0x24a   : > { %v4668_v21 = vpop.eup %2600 }
 0x24b   : > { %v1798_v50 = vadd.f32 %v4665_v37, %v1797_v32  ;;  %v4671_v4 = vpop.eup %2602 }
 0x24c   : > { %v4674_v40 = vpop.eup %2604 }
 0x24d   : > { %v1799_v0 = vadd.f32 %v4668_v21, %v1798_v50  ;;  %v4677_v47 = vpop.eup %2606 }
 0x24e   : > { %v4680_v42 = vpop.eup %2608 }
 0x24f   : > { %v1800_v23 = vadd.f32 %v4671_v4, %v1799_v0  ;;  %v4683_v14 = vpop.eup %2610 }
 0x251   : > { %v1801_v26 = vadd.f32 %v4674_v40, %v1800_v23 }
 0x253   : > { %v1802_v5 = vadd.f32 %v4677_v47, %v1801_v26 }
 0x255   : > { %v1803_v51 = vadd.f32 %v4680_v42, %v1802_v5 }
 0x257   : > { %v1804_v19 = vadd.f32 %v4683_v14, %v1803_v51 }
 0x259   : > { %1805 = vadd.xlane.f32.xlu1 %v1804_v19 }
 0x25b   : > { %v1742_v52 = vpop.xlane.xlu0 %1741 }
 0x25c   : > { %v1752_v58 = vsub.f32 %v4623_v35, %v1742_v52  ;;  %v1753_v12 = vsub.f32 %v4627_v54, %v1742_v52  ;;  %v1754_v17 = vsub.f32 %v4625_v11, %v1742_v52  ;;  %v1755_v9 = vsub.f32 %v4629_v34, %v1742_v52 }
 0x25d   : > { %v1756_v36 = vsub.f32 %v4633_v18, %v1742_v52  ;;  %v1757_v30 = vsub.f32 %v4638_v48, %v1742_v52  ;;  %v1758_v32 = vsub.f32 %v4640_v1, %v1742_v52  ;;  %v1759_v0 = vsub.f32 %v4644_v45, %v1742_v52 }
 0x25e   : > { %v1779_v15 = vmul.f32 1.442695, %v1752_v58  ;;  %v1781_v38 = vmul.f32 1.442695, %v1753_v12  ;;  %v1783_v20 = vmul.f32 1.442695, %v1754_v17  ;;  %v1760_v26 = vsub.f32 %v4646_v49, %v1742_v52 }
 0x25f   : > { %v1785_v46 = vmul.f32 1.442695, %v1755_v9  ;;  %v1787_v50 = vmul.f32 1.442695, %v1756_v36  ;;  %v1789_v23 = vmul.f32 1.442695, %v1757_v30 }
 0x260   : > { %2612 = vpow2.f32 %v1779_v15  ;;  %v1791_v5 = vmul.f32 1.442695, %v1758_v32  ;;  %v1793_v51 = vmul.f32 1.442695, %v1759_v0  ;;  %v1795_v12 = vmul.f32 1.442695, %v1760_v26 }
 0x261   : > { %2614 = vpow2.f32 %v1781_v38 }
 0x262   : > { %2616 = vpow2.f32 %v1783_v20 }
 0x263   : > { %2618 = vpow2.f32 %v1785_v46 }
 0x264   : > { %2620 = vpow2.f32 %v1787_v50 }
 0x265   : > { %2622 = vpow2.f32 %v1789_v23 }
 0x266   : > { %2624 = vpow2.f32 %v1791_v5 }
 0x267   : > { %2626 = vpow2.f32 %v1793_v51 }
 0x268   : > { %2628 = vpow2.f32 %v1795_v12 }
 0x26a   : > { %v4695_v19 = vpop.eup %2612 }
 0x26b   : > { %v4697_v58 = vpop.eup %2614 }
 0x26c   : > { %v1807_v17 = vadd.f32 %v4697_v58, %v4695_v19  ;;  %v4701_v9 = vpop.eup %2616 }
 0x26d   : > { %v4704_v38 = vpop.eup %2618 }
 0x26e   : > { %v1808_v15 = vadd.f32 %v4701_v9, %v1807_v17  ;;  %v4707_v36 = vpop.eup %2620 }
 0x26f   : > { %v4710_v30 = vpop.eup %2622 }
 0x270   : > { %v1809_v52 = vadd.f32 %v4704_v38, %v1808_v15  ;;  %v4713_v32 = vpop.eup %2624 }
 0x271   : > { %v4716_v0 = vpop.eup %2626 }
 0x272   : > { %v1810_v20 = vadd.f32 %v4707_v36, %v1809_v52  ;;  %v4719_v26 = vpop.eup %2628 }
 0x274   : > { %v1811_v46 = vadd.f32 %v4710_v30, %v1810_v20 }
 0x276   : > { %v1812_v50 = vadd.f32 %v4713_v32, %v1811_v46 }
 0x278   : > { %v1813_v23 = vadd.f32 %v4716_v0, %v1812_v50 }
 0x27a   : > { %v1814_v5 = vadd.f32 %v4719_v26, %v1813_v23 }
 0x27c   : > { %1815 = vadd.xlane.f32.xlu0 %v1814_v5 }
 0x2e6   : > { %v1806_v51 = vpop.xlane.xlu1 %1805 }
 0x2e7   : > { %2630 = vrcp.f32 %v1806_v51 }
 0x2f1   : > { %v2631_v12 = vpop.eup %2630 }
 0x2f2   : > { %v1818_v17 = vmul.f32 %v2631_v12, %v4659_v55  ;;  %v1819_v15 = vmul.f32 %v2631_v12, %v4661_v33  ;;  %v1820_v52 = vmul.f32 %v2631_v12, %v4665_v37  ;;  %v1821_v20 = vmul.f32 %v2631_v12, %v4668_v21 }
 0x2f3   : > { %v1822_v49 = vmul.f32 %v2631_v12, %v4671_v4  ;;  %v1823_v55 = vmul.f32 %v2631_v12, %v4674_v40  ;;  %v1824_v48 = vmul.f32 %v2631_v12, %v4677_v47 }
 0x2f4   : > { %v1837_v46 = vmul.f32 %v1818_v17, %v5671_v61  ;;  %v1838_v50 = vmul.f32 %v1819_v15, %v5672_v31  ;;  %v1839_v23 = vmul.f32 %v1820_v52, %v5674_v25  ;;  %v1846_v51 = vmul.f32 %v1818_v17, %v5730_v57 }
 0x2f5   : > { %v1847_v45 = vmul.f32 %v1819_v15, %v5731_v27  ;;  %v1840_v33 = vmul.f32 %v1821_v20, %v4247_v62  ;;  %v1848_v21 = vmul.f32 %v1820_v52, %v5732_v59  ;;  %v1841_v18 = vmul.f32 %v1822_v49, %v4251_v16 }
 0x2f6   : > { %v1873_v5 = vadd.f32 %v1838_v50, %v1837_v46  ;;  %v1849_v34 = vmul.f32 %v1821_v20, %v5673_v10  ;;  %v1825_v17 = vmul.f32 %v2631_v12, %v4680_v42  ;;  %v1842_v15 = vmul.f32 %v1823_v55, %v4255_v43 }
 0x2f7   : > { %v1883_v1 = vadd.f32 %v1847_v45, %v1846_v51  ;;  %v1850_v40 = vmul.f32 %v1822_v49, %v5675_v24  ;;  %v1843_v45 = vmul.f32 %v1824_v48, %v4259_v2  ;;  %v1851_v47 = vmul.f32 %v1823_v55, %v5676_v39 }
 0x2f8   : > { %v1874_v37 = vadd.f32 %v1873_v5, %v1839_v23  ;;  %v1826_v23 = vmul.f32 %v2631_v12, %v4683_v14  ;;  %v1844_v51 = vmul.f32 %v1825_v17, %v5734_v22  ;;  %v5757_v14 = vld [vmem:[#allocation53_spill] sm:$0xff] }
 0x2f9   : > { %v1884_v46 = vadd.f32 %v1883_v1, %v1848_v21  ;;  %v1852_v1 = vmul.f32 %v1824_v48, %v5733_v41 }
 0x2fa   : > { %v1875_v4 = vadd.f32 %v1874_v37, %v1840_v33  ;;  %v1845_v33 = vmul.f32 %v1826_v23, %v5735_v8  ;;  %v5756_v37 = vld [vmem:[#allocation52_spill] sm:$0xff]  ;;  %v1854_v12 = vmul.f32 %v1826_v23, %v5757_v14 }
 0x2fb   : > { %v1885_v54 = vadd.f32 %v1884_v46, %v1849_v34  ;;  %v1853_v49 = vmul.f32 %v1825_v17, %v5756_v37  ;;  %v5758_v17 = vld [vmem:[#allocation54_spill] sm:$0xff] }
 0x2fc   : > { %v1876_v50 = vadd.f32 %v1875_v4, %v1841_v18 }
 0x2fd   : > { %v1886_v5 = vadd.f32 %v1885_v54, %v1850_v40 }
 0x2fe   : > { %v1877_v52 = vadd.f32 %v1876_v50, %v1842_v15 }
 0x2ff   : > { %v1887_v42 = vadd.f32 %v1886_v5, %v1851_v47  ;;  %v5760_v5 = vld [vmem:[#allocation84_spill] sm:$0xff] }
 0x300   : > { %v1878_v20 = vadd.f32 %v1877_v52, %v1843_v45  ;;  %v5759_v52 = vld [vmem:[#allocation82_spill] sm:$0xff] }
 0x301   : > { %v1888_v34 = vadd.f32 %v1887_v42, %v1852_v1  ;;  %v5761_v1 = vld [vmem:[#allocation42_spill] sm:$0xff] }
 0x302   : > { %v1879_v18 = vadd.f32 %v1878_v20, %v1844_v51 }
 0x303   : > { %v1889_v4 = vadd.f32 %v1888_v34, %v1853_v49  ;;  %v5764_v34 = vld [vmem:[#allocation44_spill] sm:$0xff] }
 0x304   : > { %v1880_v21 = vadd.f32 %v1879_v18, %v1845_v33  ;;  %v5762_v33 = vld [vmem:[#allocation43_spill] sm:$0xff] }
 0x305   : > { %v1890_v46 = vadd.f32 %v1889_v4, %v1854_v12  ;;  %v5765_v4 = vld [vmem:[#allocation87_spill] sm:$0xff] }
 0x306   : > { %1881 = vadd.xlane.f32.xlu1 %v1880_v21 }
 0x307   : > { %1891 = vadd.xlane.f32.xlu0 %v1890_v46 }
 0x309   : > { %v1816_v54 = vpop.xlane.xlu0 %1815 }
 0x30a   : > { %2632 = vrcp.f32 %v1816_v54  ;;  %v5766_v54 = vld [vmem:[#allocation45_spill] sm:$0xff] }
 0x314   : > { %v2633_v55 = vpop.eup %2632 }
 0x315   : > { %v1828_v15 = vmul.f32 %v2633_v55, %v4695_v19  ;;  %v1829_v48 = vmul.f32 %v2633_v55, %v4697_v58  ;;  %v1830_v50 = vmul.f32 %v2633_v55, %v4701_v9  ;;  %v1831_v40 = vmul.f32 %v2633_v55, %v4704_v38  ;;  %v5763_v58 = vld [vmem:[#allocation85_spill] sm:$0xff] }
 0x316   : > { %v1832_v23 = vmul.f32 %v2633_v55, %v4707_v36  ;;  %v1833_v19 = vmul.f32 %v2633_v55, %v4710_v30  ;;  %v1834_v12 = vmul.f32 %v2633_v55, %v4713_v32  ;;  %v5768_v30 = vld [vmem:[#allocation46_spill] sm:$0xff]  ;;  %v5770_v32 = vld [vmem:[#allocation27_spill] sm:$0xff] }
 0x317   : > { %v1864_v45 = vmul.f32 %v1828_v15, %v5758_v17  ;;  %v1865_v47 = vmul.f32 %v1829_v48, %v5759_v52  ;;  %v1866_v51 = vmul.f32 %v1830_v50, %v5760_v5  ;;  %v1855_v42 = vmul.f32 %v1828_v15, %v5761_v1 }
 0x318   : > { %v1856_v18 = vmul.f32 %v1829_v48, %v5762_v33  ;;  %v1867_v49 = vmul.f32 %v1831_v40, %v5763_v58  ;;  %v1857_v38 = vmul.f32 %v1830_v50, %v5764_v34  ;;  %v1868_v46 = vmul.f32 %v1832_v23, %v5765_v4  ;;  %v5769_v50 = vld [vmem:[#allocation83_spill] sm:$0xff] }
 0x319   : > { %v1903_v20 = vadd.f32 %v1865_v47, %v1864_v45  ;;  %v1858_v11 = vmul.f32 %v1831_v40, %v5766_v54  ;;  %v1835_v15 = vmul.f32 %v2633_v55, %v4716_v0  ;;  %v5767_v47 = vld [vmem:[#allocation88_spill] sm:$0xff]  ;;  %v1859_v5 = vmul.f32 %v1832_v23, %v5768_v30 }
 0x31a   : > { %v1893_v21 = vadd.f32 %v1856_v18, %v1855_v42  ;;  %v1869_v48 = vmul.f32 %v1833_v19, %v5767_v47  ;;  %v1860_v18 = vmul.f32 %v1833_v19, %v5770_v32 }
 0x31b   : > { %v1904_v9 = vadd.f32 %v1903_v20, %v1866_v51  ;;  %v1836_v51 = vmul.f32 %v2633_v55, %v4719_v26  ;;  %v1870_v20 = vmul.f32 %v1834_v12, %v5769_v50 }
 0x31c   : > { %v1894_v45 = vadd.f32 %v1893_v21, %v1857_v38  ;;  %v5772_v38 = vld [vmem:[#allocation47_spill] sm:$0xff] }
 0x31d   : > { %v1905_v36 = vadd.f32 %v1904_v9, %v1867_v49  ;;  %v5771_v49 = vld [vmem:[#allocation58_spill] sm:$0xff]  ;;  %v1861_v21 = vmul.f32 %v1834_v12, %v5772_v38  ;;  %v1872_v47 = vmul.f32 %v1836_v51, %v4542_v53  ;;  %v1863_v26 = vmul.f32 %v1836_v51, %v5746_v29 }
 0x31e   : > { %v1895_v58 = vadd.f32 %v1894_v45, %v1858_v11  ;;  %v1871_v9 = vmul.f32 %v1835_v15, %v5771_v49 }
 0x31f   : > { %v1906_v35 = vadd.f32 %v1905_v36, %v1868_v46  ;;  %v5773_v36 = vld [vmem:[#allocation48_spill] sm:$0xff] }
 0x320   : > { %v1896_v4 = vadd.f32 %v1895_v58, %v1859_v5  ;;  %v1862_v23 = vmul.f32 %v1835_v15, %v5773_v36 }
 0x321   : > { %v1907_v42 = vadd.f32 %v1906_v35, %v1869_v48 }
 0x322   : > { %v1897_v0 = vadd.f32 %v1896_v4, %v1860_v18 }
 0x323   : > { %v1908_v40 = vadd.f32 %v1907_v42, %v1870_v20 }
 0x324   : > { %v1898_v11 = vadd.f32 %v1897_v0, %v1861_v21 }
 0x325   : > { %v1909_v46 = vadd.f32 %v1908_v40, %v1871_v9 }
 0x326   : > { %v1899_v55 = vadd.f32 %v1898_v11, %v1862_v23 }
 0x327   : > { %v1910_v45 = vadd.f32 %v1909_v46, %v1872_v47 }
 0x328   : > { %v1900_v35 = vadd.f32 %v1899_v55, %v1863_v26 }
 0x329   : > { %1911 = vadd.xlane.f32.xlu0 %v1910_v45 }
 0x32a   : > { %1901 = vadd.xlane.f32.xlu1 %v1900_v35 }
 0x393   : > { %v1882_v5 = vpop.xlane.xlu1 %1881 }
 0x394   : > { %v1913_v19 = vmul.f32 %v1882_v5, %v1882_v5  ;;  %v1892_v58 = vpop.xlane.xlu0 %1891 }
 0x395   : > { %v1914_v48 = vmul.f32 %v1892_v58, %v1892_v58 }
 0x397   : > { %v1917_v20 = vadd.f32 %v1914_v48, %v1913_v19 }
 0x399   : > { %v1918_v12 = vrot.slane %v1917_v20, 4 }
 0x39b   : > { %v1919_v4 = vadd.f32 %v1918_v12, %v1917_v20 }
 0x39d   : > { %v1920_v42 = vrot.slane %v1919_v4, 2 }
 0x39f   : > { %v1921_v18 = vadd.f32 %v1920_v42, %v1919_v4 }
 0x3a1   : > { %v1922_v9 = vrot.slane %v1921_v18, 1 }
 0x3a3   : > { %v1923_v40 = vadd.f32 %v1922_v9, %v1921_v18 }
 0x3a5   : > { %v1931_v15 = vadd.f32 1.0, %v1923_v40  ;;  %v1941_v47 = vadd.f32 1e-09, %v1923_v40 }
 0x3a7   : > { %2634 = vrcp.f32 %v1931_v15 }
 0x3a8   : > { %2636 = vrsqrt.f32 %v1941_v47 }
 0x3b1   : > { %v2635_v51 = vpop.eup %2634 }
 0x3b2   : > { %v1934_v21 = vmul.f32 %v2635_v51, %v1923_v40  ;;  %v2637_v23 = vpop.eup %2636 }
 0x3b4   : > { %v1937_v0 = vmul.f32 %v1934_v21, %v1882_v5  ;;  %v1938_v46 = vmul.f32 %v1934_v21, %v1892_v58 }
 0x3b6   : > { %v4776_v11 = vpop.xlane.xlu0 %1911  ;;  %v1945_v45 = vmul.f32 %v2637_v23, %v1937_v0  ;;  %v1946_v26 = vmul.f32 %v2637_v23, %v1938_v46 }
 0x3b7   : > { %v1916_v55 = vmul.f32 %v4776_v11, %v4776_v11  ;;  %v4780_v35 = vpop.xlane.xlu1 %1901 }
 0x3b8   : > { %v1949_v19 = vmul.f32 %v1945_v45, %v5671_v61  ;;  %v1950_v48 = vmul.f32 %v1945_v45, %v5672_v31  ;;  %v1915_v20 = vmul.f32 %v4780_v35, %v4780_v35  ;;  %v1951_v5 = vmul.f32 %v1945_v45, %v5674_v25 }
 0x3b9   : > { %v1952_v58 = vmul.f32 %v1945_v45, %v4247_v62  ;;  %v1953_v12 = vmul.f32 %v1945_v45, %v4251_v16  ;;  %v1954_v4 = vmul.f32 %v1945_v45, %v4255_v43  ;;  %v1955_v42 = vmul.f32 %v1945_v45, %v4259_v2 }
 0x3ba   : > { %v1958_v18 = vmul.f32 %v1946_v26, %v5730_v57  ;;  %v1959_v9 = vmul.f32 %v1946_v26, %v5731_v27  ;;  %v1924_v40 = vadd.f32 %v1916_v55, %v1915_v20  ;;  %v1960_v15 = vmul.f32 %v1946_v26, %v5732_v59 }
 0x3bb   : > { %v1961_v47 = vmul.f32 %v1946_v26, %v5673_v10  ;;  %v1962_v51 = vmul.f32 %v1946_v26, %v5675_v24  ;;  %v1956_v21 = vmul.f32 %v1945_v45, %v5734_v22  ;;  %v1957_v0 = vmul.f32 %v1945_v45, %v5735_v8 }
 0x3bc   : > { %v1963_v46 = vmul.f32 %v1946_v26, %v5676_v39  ;;  %v1964_v23 = vmul.f32 %v1946_v26, %v5733_v41  ;;  %v1925_v2 = vrot.slane %v1924_v40, 4  ;;  %v1985_v43 = vadd.f32 %v1958_v18, %v1949_v19 }
 0x3bd   : > { %v1992_v16 = vadd.f32 %v1959_v9, %v1950_v48  ;;  %v1999_v62 = vadd.f32 %v1960_v15, %v1951_v5  ;;  %v2006_v27 = vadd.f32 %v1961_v47, %v1952_v58  ;;  %v2013_v55 = vadd.f32 %v1962_v51, %v1953_v12 }
 0x3be   : > { %v2020_v20 = vadd.f32 %v1963_v46, %v1954_v4  ;;  %v2027_v59 = vadd.f32 %v1964_v23, %v1955_v42  ;;  %v1926_v57 = vadd.f32 %v1925_v2, %v1924_v40  ;;  %v1986_v10 = vrot.slane %v1985_v43, 4 }
 0x3bf   : > { %v1993_v25 = vrot.slane %v1992_v16, 4  ;;  %v2000_v24 = vrot.slane %v1999_v62, 4  ;;  %v2007_v31 = vrot.slane %v2006_v27, 4  ;;  %v2014_v22 = vrot.slane %v2013_v55, 4 }
 0x3c0   : > { %v2021_v61 = vrot.slane %v2020_v20, 4  ;;  %v2028_v45 = vrot.slane %v2027_v59, 4  ;;  %v1927_v8 = vrot.slane %v1926_v57, 2  ;;  %v1987_v39 = vadd.f32 %v1986_v10, %v1985_v43 }
 0x3c1   : > { %v1994_v53 = vadd.f32 %v1993_v25, %v1992_v16  ;;  %v2001_v41 = vadd.f32 %v2000_v24, %v1999_v62  ;;  %v2008_v29 = vadd.f32 %v2007_v31, %v2006_v27  ;;  %v2015_v19 = vadd.f32 %v2014_v22, %v2013_v55 }
 0x3c2   : > { %v2022_v48 = vadd.f32 %v2021_v61, %v2020_v20  ;;  %v2029_v5 = vadd.f32 %v2028_v45, %v2027_v59  ;;  %v1928_v58 = vadd.f32 %v1927_v8, %v1926_v57  ;;  %v1988_v12 = vrot.slane %v1987_v39, 2 }
 0x3c3   : > { %v1995_v4 = vrot.slane %v1994_v53, 2  ;;  %v2002_v42 = vrot.slane %v2001_v41, 2  ;;  %v2009_v2 = vrot.slane %v2008_v29, 2  ;;  %v2016_v18 = vrot.slane %v2015_v19, 2 }
 0x3c4   : > { %v2023_v9 = vrot.slane %v2022_v48, 2  ;;  %v2030_v40 = vrot.slane %v2029_v5, 2  ;;  %v1929_v15 = vrot.slane %v1928_v58, 1  ;;  %v1989_v47 = vadd.f32 %v1988_v12, %v1987_v39 }
 0x3c5   : > { %v1996_v51 = vadd.f32 %v1995_v4, %v1994_v53  ;;  %v2003_v46 = vadd.f32 %v2002_v42, %v2001_v41  ;;  %v1965_v43 = vmul.f32 %v1946_v26, %v5756_v37  ;;  %v1966_v62 = vmul.f32 %v1946_v26, %v5757_v14 }
 0x3c6   : > { %v2010_v16 = vadd.f32 %v2009_v2, %v2008_v29  ;;  %v2017_v31 = vadd.f32 %v2016_v18, %v2015_v19  ;;  %v1930_v61 = vadd.f32 %v1929_v15, %v1928_v58  ;;  %v1990_v10 = vrot.slane %v1989_v47, 1 }
 0x3c7   : > { %v1997_v25 = vrot.slane %v1996_v51, 1  ;;  %v2004_v24 = vrot.slane %v2003_v46, 1  ;;  %v2024_v27 = vadd.f32 %v2023_v9, %v2022_v48  ;;  %v2031_v23 = vadd.f32 %v2030_v40, %v2029_v5 }
 0x3c8   : > { %v2011_v57 = vrot.slane %v2010_v16, 1  ;;  %v1932_v59 = vadd.f32 1.0, %v1930_v61  ;;  %v1991_v22 = vadd.f32 %v1990_v10, %v1989_v47  ;;  %v2018_v8 = vrot.slane %v2017_v31, 1 }
 0x3c9   : > { %v1942_v55 = vadd.f32 1e-09, %v1930_v61  ;;  %v1998_v39 = vadd.f32 %v1997_v25, %v1996_v51  ;;  %v2005_v53 = vadd.f32 %v2004_v24, %v2003_v46  ;;  %v2034_v20 = vadd.f32 %v1965_v43, %v1956_v21 }
 0x3ca   : > { %2638 = vrcp.f32 %v1932_v59  ;;  %v2012_v41 = vadd.f32 %v2011_v57, %v2010_v16  ;;  %v2041_v45 = vadd.f32 %v1966_v62, %v1957_v0  ;;  %v2025_v26 = vrot.slane %v2024_v27, 1 }
 0x3cb   : > { %v4803_v29 = vadd.f32 %v1991_v22, %v4576_v6  ;;  %v4806_v19 = vadd.f32 %v2005_v53, %v4578_v3  ;;  %v2019_v58 = vadd.f32 %v2018_v8, %v2017_v31  ;;  %v2032_v48 = vrot.slane %v2031_v23, 1 }
 0x3cc   : > { %v2035_v12 = vrot.slane %v2034_v20, 4  ;;  %v2042_v4 = vrot.slane %v2041_v45, 4  ;;  %2640 = vrsqrt.f32 %v1942_v55  ;;  %v4809_v5 = vadd.f32 %v1998_v39, %v4580_v56 }
 0x3cd   : > { %v4812_v21 = vadd.f32 %v2012_v41, %v4582_v7  ;;  %v2129_v6 = vmax.f32 %v4803_v29, %v4806_v19  ;;  %v2026_v0 = vadd.f32 %v2025_v26, %v2024_v27  ;;  %v2033_v18 = vadd.f32 %v2032_v48, %v2031_v23 }
 0x3ce   : > { %v2036_v42 = vadd.f32 %v2035_v12, %v2034_v20  ;;  %v2043_v2 = vadd.f32 %v2042_v4, %v2041_v45  ;;  %v4817_v40 = vadd.f32 %v2019_v58, %v4586_v60  ;;  %v5774_v58 = vld [vmem:[#allocation84_spill] sm:$0xff]  ;;  %v5775_v12 = vld [vmem:[#allocation85_spill] sm:$0xff] }
 0x3cf   : > { %v2130_v56 = vmax.f32 %v4809_v5, %v4812_v21  ;;  %v4823_v62 = vadd.f32 %v2026_v0, %v4591_v63  ;;  %v4826_v16 = vadd.f32 %v2033_v18, %v4593_v44 }
 0x3d0   : > { %v2037_v3 = vrot.slane %v2036_v42, 2  ;;  %v2044_v9 = vrot.slane %v2043_v2, 2  ;;  %v2131_v51 = vmax.f32 %v2129_v6, %v4817_v40  ;;  %v5777_v6 = vld [vmem:[#allocation88_spill] sm:$0xff] }
 0x3d1   : > { %v2132_v25 = vmax.f32 %v2130_v56, %v4823_v62 }
 0x3d2   : > { %v2038_v15 = vadd.f32 %v2037_v3, %v2036_v42  ;;  %v2045_v47 = vadd.f32 %v2044_v9, %v2043_v2  ;;  %v2133_v24 = vmax.f32 %v2131_v51, %v4826_v16  ;;  %v5776_v42 = vld [vmem:[#allocation87_spill] sm:$0xff] }
 0x3d4   : > { %v2639_v46 = vpop.eup %2638  ;;  %v2039_v7 = vrot.slane %v2038_v15, 1  ;;  %v2046_v43 = vrot.slane %v2045_v47, 1 }
 0x3d5   : > { %v1936_v31 = vmul.f32 %v2639_v46, %v1930_v61 }
 0x3d6   : > { %v2040_v10 = vadd.f32 %v2039_v7, %v2038_v15  ;;  %v2047_v60 = vadd.f32 %v2046_v43, %v2045_v47  ;;  %v2641_v57 = vpop.eup %2640 }
 0x3d7   : > { %v1939_v27 = vmul.f32 %v1936_v31, %v4780_v35  ;;  %v1940_v59 = vmul.f32 %v1936_v31, %v4776_v11 }
 0x3d8   : > { %v4833_v22 = vadd.f32 %v2040_v10, %v4597_v28  ;;  %v4836_v63 = vadd.f32 %v2047_v60, %v4599_v13 }
 0x3d9   : > { %v1947_v44 = vmul.f32 %v2641_v57, %v1939_v27  ;;  %v1948_v8 = vmul.f32 %v2641_v57, %v1940_v59 }
 0x3da   : > { %v2134_v61 = vmax.f32 %v2132_v25, %v4833_v22  ;;  %v2135_v23 = vmax.f32 %v2133_v24, %v4836_v63 }
 0x3db   : > { %v1967_v55 = vmul.f32 %v1947_v44, %v5761_v1  ;;  %v1968_v39 = vmul.f32 %v1947_v44, %v5762_v33  ;;  %v1969_v35 = vmul.f32 %v1947_v44, %v5764_v34  ;;  %v1970_v11 = vmul.f32 %v1947_v44, %v5766_v54 }
 0x3dc   : > { %v2136_v53 = vmax.f32 %v2135_v23, %v2134_v61  ;;  %v1971_v28 = vmul.f32 %v1947_v44, %v5768_v30  ;;  %v1972_v13 = vmul.f32 %v1947_v44, %v5770_v32  ;;  %v1973_v41 = vmul.f32 %v1947_v44, %v5772_v38 }
 0x3dd   : > { %v1974_v20 = vmul.f32 %v1947_v44, %v5773_v36  ;;  %v1976_v45 = vmul.f32 %v1948_v8, %v5758_v17  ;;  %v1977_v26 = vmul.f32 %v1948_v8, %v5759_v52  ;;  %v1978_v48 = vmul.f32 %v1948_v8, %v5774_v58 }
 0x3de   : > { %2137 = vmax.xlane.f32.xlu1 %v2136_v53  ;;  %v1979_v4 = vmul.f32 %v1948_v8, %v5775_v12  ;;  %v1980_v2 = vmul.f32 %v1948_v8, %v5776_v42  ;;  %v1981_v0 = vmul.f32 %v1948_v8, %v5777_v6  ;;  %v1982_v18 = vmul.f32 %v1948_v8, %v5769_v50 }
 0x3df   : > { %v1983_v3 = vmul.f32 %v1948_v8, %v5771_v49  ;;  %v2048_v9 = vadd.f32 %v1976_v45, %v1967_v55  ;;  %v2055_v15 = vadd.f32 %v1977_v26, %v1968_v39  ;;  %v2062_v47 = vadd.f32 %v1978_v48, %v1969_v35 }
 0x3e0   : > { %v2069_v56 = vadd.f32 %v1979_v4, %v1970_v11  ;;  %v2076_v51 = vadd.f32 %v1980_v2, %v1971_v28  ;;  %v2083_v7 = vadd.f32 %v1981_v0, %v1972_v13  ;;  %v2090_v43 = vadd.f32 %v1982_v18, %v1973_v41 }
 0x3e1   : > { %v2049_v46 = vrot.slane %v2048_v9, 4  ;;  %v2097_v31 = vadd.f32 %v1983_v3, %v1974_v20  ;;  %v2056_v10 = vrot.slane %v2055_v15, 4  ;;  %v2063_v60 = vrot.slane %v2062_v47, 4 }
 0x3e2   : > { %v2070_v25 = vrot.slane %v2069_v56, 4  ;;  %v2077_v24 = vrot.slane %v2076_v51, 4  ;;  %v2084_v27 = vrot.slane %v2083_v7, 4  ;;  %v2091_v59 = vrot.slane %v2090_v43, 4 }
 0x3e3   : > { %v2050_v57 = vadd.f32 %v2049_v46, %v2048_v9  ;;  %v2098_v61 = vrot.slane %v2097_v31, 4  ;;  %v2057_v23 = vadd.f32 %v2056_v10, %v2055_v15  ;;  %v2064_v53 = vadd.f32 %v2063_v60, %v2062_v47  ;;  %v5778_v9 = vld [vmem:[#allocation49_spill] sm:$0xff]  ;;  %v5779_v47 = vld [vmem:[#allocation86_spill] sm:$0xff] }
 0x3e4   : > { %v2071_v36 = vadd.f32 %v2070_v25, %v2069_v56  ;;  %v2078_v55 = vadd.f32 %v2077_v24, %v2076_v51  ;;  %v2085_v35 = vadd.f32 %v2084_v27, %v2083_v7  ;;  %v2092_v11 = vadd.f32 %v2091_v59, %v2090_v43 }
 0x3e5   : > { %v2051_v39 = vrot.slane %v2050_v57, 2  ;;  %v2099_v28 = vadd.f32 %v2098_v61, %v2097_v31  ;;  %v2058_v45 = vrot.slane %v2057_v23, 2  ;;  %v2065_v13 = vrot.slane %v2064_v53, 2 }
 0x3e6   : > { %v2072_v41 = vrot.slane %v2071_v36, 2  ;;  %v2079_v20 = vrot.slane %v2078_v55, 2  ;;  %v2086_v48 = vrot.slane %v2085_v35, 2  ;;  %v2093_v4 = vrot.slane %v2092_v11, 2 }
 0x3e7   : > { %v2052_v26 = vadd.f32 %v2051_v39, %v2050_v57  ;;  %v2059_v2 = vadd.f32 %v2058_v45, %v2057_v23  ;;  %v2066_v0 = vadd.f32 %v2065_v13, %v2064_v53  ;;  %v1975_v15 = vmul.f32 %v1947_v44, %v5778_v9  ;;  %v5781_v44 = vld [vmem:[#allocation55_spill] sm:$0xff] }
 0x3e8   : > { %v2073_v18 = vadd.f32 %v2072_v41, %v2071_v36  ;;  %v2080_v3 = vadd.f32 %v2079_v20, %v2078_v55  ;;  %v1984_v56 = vmul.f32 %v1948_v8, %v5779_v47  ;;  %v2100_v31 = vrot.slane %v2099_v28, 2  ;;  %v5780_v36 = vld [vmem:[#allocation59_spill] sm:$0xff]  ;;  %v5782_v20 = vld [vmem:[#allocation60_spill] sm:$0xff] }
 0x3e9   : > { %v2053_v51 = vrot.slane %v2052_v26, 1  ;;  %v2060_v46 = vrot.slane %v2059_v2, 1  ;;  %v2067_v7 = vrot.slane %v2066_v0, 1  ;;  %v2087_v25 = vadd.f32 %v2086_v48, %v2085_v35  ;;  %v5783_v35 = vld [vmem:[#allocation56_spill] sm:$0xff] }
 0x3ea   : > { %v2074_v43 = vrot.slane %v2073_v18, 1  ;;  %v2081_v60 = vrot.slane %v2080_v3, 1  ;;  %v2094_v24 = vadd.f32 %v2093_v4, %v2092_v11  ;;  %v2104_v61 = vadd.f32 %v1984_v56, %v1975_v15 }
 0x3eb   : > { %v2054_v10 = vadd.f32 %v2053_v51, %v2052_v26  ;;  %v2068_v57 = vadd.f32 %v2067_v7, %v2066_v0  ;;  %v2061_v27 = vadd.f32 %v2060_v46, %v2059_v2  ;;  %v2101_v23 = vadd.f32 %v2100_v31, %v2099_v28 }
 0x3ec   : > { %v2075_v59 = vadd.f32 %v2074_v43, %v2073_v18  ;;  %v2082_v8 = vadd.f32 %v2081_v60, %v2080_v3  ;;  %v2088_v39 = vrot.slane %v2087_v25, 1  ;;  %v2095_v45 = vrot.slane %v2094_v24, 1  ;;  %v5784_v18 = vld [vmem:[#allocation61_spill] sm:$0xff] }
 0x3ed   : > { %v4859_v53 = vadd.f32 %v2054_v10, %v5780_v36  ;;  %v4862_v55 = vadd.f32 %v2068_v57, %v5781_v44  ;;  %v2105_v13 = vrot.slane %v2104_v61, 4  ;;  %v4865_v26 = vadd.f32 %v2061_v27, %v5782_v20  ;;  %v5785_v43 = vld [vmem:[#allocation57_spill] sm:$0xff]  ;;  %v5786_v10 = vld [vmem:[#allocation62_spill] sm:$0xff] }
 0x3ee   : > { %v4868_v11 = vadd.f32 %v2075_v59, %v5783_v35  ;;  %v2102_v48 = vrot.slane %v2101_v23, 1  ;;  %v2089_v4 = vadd.f32 %v2088_v39, %v2087_v25  ;;  %v2096_v2 = vadd.f32 %v2095_v45, %v2094_v24  ;;  %v5787_v27 = vld [vmem:[#allocation89_spill] sm:$0xff] }
 0x3ef   : > { %v2106_v41 = vadd.f32 %v2105_v13, %v2104_v61  ;;  %v2139_v28 = vmax.f32 %v4859_v53, %v4862_v55  ;;  %v4873_v15 = vadd.f32 %v2082_v8, %v5784_v18  ;;  %v5788_v61 = vld [vmem:[#allocation90_spill] sm:$0xff] }
 0x3f0   : > { %v2140_v56 = vmax.f32 %v4865_v26, %v4868_v11  ;;  %v2103_v46 = vadd.f32 %v2102_v48, %v2101_v23  ;;  %v4879_v31 = vadd.f32 %v2089_v4, %v5785_v43  ;;  %v4882_v60 = vadd.f32 %v2096_v2, %v5786_v10 }
 0x3f1   : > { %v2107_v0 = vrot.slane %v2106_v41, 2  ;;  %v2141_v51 = vmax.f32 %v2139_v28, %v4873_v15 }
 0x3f2   : > { %v2142_v24 = vmax.f32 %v2140_v56, %v4879_v31  ;;  %v4887_v59 = vadd.f32 %v2103_v46, %v5787_v27 }
 0x3f3   : > { %v2108_v3 = vadd.f32 %v2107_v0, %v2106_v41  ;;  %v2143_v57 = vmax.f32 %v2141_v51, %v4882_v60 }
 0x3f4   : > { %v2144_v23 = vmax.f32 %v2142_v24, %v4887_v59 }
 0x3f5   : > { %v2109_v7 = vrot.slane %v2108_v3, 1 }
 0x3f7   : > { %v2110_v25 = vadd.f32 %v2109_v7, %v2108_v3 }
 0x3f9   : > { %v4890_v36 = vadd.f32 %v2110_v25, %v5788_v61 }
 0x3fb   : > { %v2145_v44 = vmax.f32 %v2143_v57, %v4890_v36 }
 0x3fd   : > { %v2146_v8 = vmax.f32 %v2145_v44, %v2144_v23 }
 0x3ff   : > { %2147 = vmax.xlane.f32.xlu0 %v2146_v8 }
 0x46b   : > { %v2138_v39 = vpop.xlane.xlu1 %2137 }
 0x46c   : > { %v2149_v45 = vsub.f32 %v4803_v29, %v2138_v39  ;;  %v2150_v13 = vsub.f32 %v4809_v5, %v2138_v39  ;;  %v2151_v41 = vsub.f32 %v4806_v19, %v2138_v39  ;;  %v2152_v20 = vsub.f32 %v4812_v21, %v2138_v39 }
 0x46d   : > { %v2153_v48 = vsub.f32 %v4817_v40, %v2138_v39  ;;  %v2154_v2 = vsub.f32 %v4823_v62, %v2138_v39  ;;  %v2155_v18 = vsub.f32 %v4826_v16, %v2138_v39  ;;  %v2156_v5 = vsub.f32 %v4833_v22, %v2138_v39 }
 0x46e   : > { %v2167_v35 = vmul.f32 1.442695, %v2149_v45  ;;  %v2169_v28 = vmul.f32 1.442695, %v2150_v13  ;;  %v2171_v4 = vmul.f32 1.442695, %v2151_v41  ;;  %v2157_v21 = vsub.f32 %v4836_v63, %v2138_v39 }
 0x46f   : > { %v2173_v0 = vmul.f32 1.442695, %v2152_v20  ;;  %v2175_v29 = vmul.f32 1.442695, %v2153_v48  ;;  %v2177_v19 = vmul.f32 1.442695, %v2154_v2 }
 0x470   : > { %2642 = vpow2.f32 %v2167_v35  ;;  %v2179_v3 = vmul.f32 1.442695, %v2155_v18  ;;  %v2181_v40 = vmul.f32 1.442695, %v2156_v5  ;;  %v2183_v62 = vmul.f32 1.442695, %v2157_v21 }
 0x471   : > { %2644 = vpow2.f32 %v2169_v28 }
 0x472   : > { %2646 = vpow2.f32 %v2171_v4 }
 0x473   : > { %2648 = vpow2.f32 %v2173_v0 }
 0x474   : > { %2650 = vpow2.f32 %v2175_v29 }
 0x475   : > { %2652 = vpow2.f32 %v2177_v19 }
 0x476   : > { %2654 = vpow2.f32 %v2179_v3 }
 0x477   : > { %2656 = vpow2.f32 %v2181_v40 }
 0x478   : > { %2658 = vpow2.f32 %v2183_v62 }
 0x47a   : > { %v4903_v56 = vpop.eup %2642 }
 0x47b   : > { %v4905_v51 = vpop.eup %2644 }
 0x47c   : > { %v2203_v16 = vadd.f32 %v4905_v51, %v4903_v56  ;;  %v4909_v46 = vpop.eup %2646 }
 0x47d   : > { %v4912_v7 = vpop.eup %2648 }
 0x47e   : > { %v2204_v22 = vadd.f32 %v4909_v46, %v2203_v16  ;;  %v4915_v43 = vpop.eup %2650 }
 0x47f   : > { %v4918_v25 = vpop.eup %2652 }
 0x480   : > { %v2205_v63 = vadd.f32 %v4912_v7, %v2204_v22  ;;  %v4921_v57 = vpop.eup %2654 }
 0x481   : > { %v4924_v61 = vpop.eup %2656 }
 0x482   : > { %v2206_v10 = vadd.f32 %v4915_v43, %v2205_v63  ;;  %v4927_v44 = vpop.eup %2658 }
 0x484   : > { %v2207_v24 = vadd.f32 %v4918_v25, %v2206_v10 }
 0x486   : > { %v2208_v27 = vadd.f32 %v4921_v57, %v2207_v24 }
 0x488   : > { %v2209_v23 = vadd.f32 %v4924_v61, %v2208_v27 }
 0x48a   : > { %v2210_v8 = vadd.f32 %v4927_v44, %v2209_v23 }
 0x48c   : > { %2211 = vadd.xlane.f32.xlu1 %v2210_v8  ;;  %v2148_v39 = vpop.xlane.xlu0 %2147 }
 0x48d   : > { %v2158_v45 = vsub.f32 %v4859_v53, %v2148_v39  ;;  %v2159_v13 = vsub.f32 %v4865_v26, %v2148_v39  ;;  %v2160_v41 = vsub.f32 %v4862_v55, %v2148_v39  ;;  %v2161_v20 = vsub.f32 %v4868_v11, %v2148_v39 }
 0x48e   : > { %v2162_v48 = vsub.f32 %v4873_v15, %v2148_v39  ;;  %v2163_v2 = vsub.f32 %v4879_v31, %v2148_v39  ;;  %v2164_v18 = vsub.f32 %v4882_v60, %v2148_v39  ;;  %v2165_v26 = vsub.f32 %v4887_v59, %v2148_v39 }
 0x48f   : > { %v2185_v35 = vmul.f32 1.442695, %v2158_v45  ;;  %v2187_v28 = vmul.f32 1.442695, %v2159_v13  ;;  %v2189_v4 = vmul.f32 1.442695, %v2160_v41  ;;  %v2166_v11 = vsub.f32 %v4890_v36, %v2148_v39 }
 0x490   : > { %v2191_v0 = vmul.f32 1.442695, %v2161_v20  ;;  %v2193_v53 = vmul.f32 1.442695, %v2162_v48  ;;  %v2195_v55 = vmul.f32 1.442695, %v2163_v2 }
 0x491   : > { %2660 = vpow2.f32 %v2185_v35  ;;  %v2197_v29 = vmul.f32 1.442695, %v2164_v18  ;;  %v2199_v15 = vmul.f32 1.442695, %v2165_v26  ;;  %v2201_v31 = vmul.f32 1.442695, %v2166_v11 }
 0x492   : > { %2662 = vpow2.f32 %v2187_v28  ;;  %v5789_v28 = vld [vmem:[#allocation92_spill] sm:$0xff]  ;;  %v5791_v18 = vld [vmem:[#allocation94_spill] sm:$0xff] }
 0x493   : > { %2664 = vpow2.f32 %v2189_v4  ;;  %v5790_v4 = vld [vmem:[#allocation93_spill] sm:$0xff] }
 0x494   : > { %2666 = vpow2.f32 %v2191_v0 }
 0x495   : > { %2668 = vpow2.f32 %v2193_v53 }
 0x496   : > { %2670 = vpow2.f32 %v2195_v55  ;;  %v5792_v55 = vld [vmem:[#allocation35_spill] sm:$0xff] }
 0x497   : > { %2672 = vpow2.f32 %v2197_v29  ;;  %v5793_v29 = vld [vmem:[#allocation38_spill] sm:$0xff] }
 0x498   : > { %2674 = vpow2.f32 %v2199_v15 }
 0x499   : > { %2676 = vpow2.f32 %v2201_v31 }
 0x49b   : > { %v4939_v5 = vpop.eup %2660 }
 0x49c   : > { %v4941_v19 = vpop.eup %2662 }
 0x49d   : > { %v2213_v60 = vadd.f32 %v4941_v19, %v4939_v5  ;;  %v4945_v21 = vpop.eup %2664 }
 0x49e   : > { %v4948_v3 = vpop.eup %2666 }
 0x49f   : > { %v2214_v59 = vadd.f32 %v4945_v21, %v2213_v60  ;;  %v4951_v40 = vpop.eup %2668  ;;  %v5795_v60 = vld [vmem:[#allocation39_spill] sm:$0xff] }
 0x4a0   : > { %v4954_v16 = vpop.eup %2670 }
 0x4a1   : > { %v2215_v36 = vadd.f32 %v4948_v3, %v2214_v59  ;;  %v4957_v63 = vpop.eup %2672 }
 0x4a2   : > { %v4960_v24 = vpop.eup %2674 }
 0x4a3   : > { %v2216_v62 = vadd.f32 %v4951_v40, %v2215_v36  ;;  %v4963_v23 = vpop.eup %2676 }
 0x4a5   : > { %v2217_v22 = vadd.f32 %v4954_v16, %v2216_v62  ;;  %v5796_v62 = vld [vmem:[#allocation34_spill] sm:$0xff] }
 0x4a7   : > { %v2218_v10 = vadd.f32 %v4957_v63, %v2217_v22 }
 0x4a9   : > { %v2219_v27 = vadd.f32 %v4960_v24, %v2218_v10  ;;  %v5797_v10 = vld [vmem:[#allocation40_spill] sm:$0xff] }
 0x4ab   : > { %v2220_v8 = vadd.f32 %v4963_v23, %v2219_v27 }
 0x4ad   : > { %2221 = vadd.xlane.f32.xlu0 %v2220_v8 }
 0x519   : > { %v2212_v39 = vpop.xlane.xlu1 %2211 }
 0x51a   : > { %2678 = vrcp.f32 %v2212_v39 }
 0x524   : > { %v2679_v45 = vpop.eup %2678 }
 0x525   : > { %v2224_v13 = vmul.f32 %v2679_v45, %v4903_v56  ;;  %v2225_v41 = vmul.f32 %v2679_v45, %v4905_v51  ;;  %v2226_v20 = vmul.f32 %v2679_v45, %v4909_v46  ;;  %v2227_v35 = vmul.f32 %v2679_v45, %v4912_v7  ;;  %v5794_v51 = vld [vmem:[#allocation33_spill] sm:$0xff] }
 0x526   : > { %v2228_v0 = vmul.f32 %v2679_v45, %v4915_v43  ;;  %v2229_v56 = vmul.f32 %v2679_v45, %v4918_v25  ;;  %v2230_v36 = vmul.f32 %v2679_v45, %v4921_v57  ;;  %v2231_v39 = vmul.f32 %v2679_v45, %v4924_v61  ;;  %v5799_v25 = vld [vmem:[#allocation41_spill] sm:$0xff]  ;;  %v5801_v57 = vld [vmem:[#allocation50_spill] sm:$0xff] }
 0x527   : > { %v2243_v48 = vmul.f32 %v2224_v13, %v5789_v28  ;;  %v2244_v2 = vmul.f32 %v2225_v41, %v5790_v4  ;;  %v2245_v53 = vmul.f32 %v2226_v20, %v5791_v18  ;;  %v2252_v11 = vmul.f32 %v2224_v13, %v5792_v55  ;;  %v5798_v13 = vld [vmem:[#allocation25_spill] sm:$0xff] }
 0x528   : > { %v2253_v15 = vmul.f32 %v2225_v41, %v5793_v29  ;;  %v2246_v31 = vmul.f32 %v2227_v35, %v5794_v51  ;;  %v2254_v7 = vmul.f32 %v2226_v20, %v5795_v60  ;;  %v2247_v22 = vmul.f32 %v2228_v0, %v5796_v62  ;;  %v5800_v20 = vld [vmem:[#allocation36_spill] sm:$0xff] }
 0x529   : > { %v2279_v26 = vadd.f32 %v2244_v2, %v2243_v48  ;;  %v2255_v27 = vmul.f32 %v2227_v35, %v5797_v10  ;;  %v2248_v41 = vmul.f32 %v2229_v56, %v5798_v13  ;;  %v2256_v48 = vmul.f32 %v2228_v0, %v5799_v25 }
 0x52a   : > { %v2289_v59 = vadd.f32 %v2253_v15, %v2252_v11  ;;  %v2232_v2 = vmul.f32 %v2679_v45, %v4927_v44  ;;  %v2249_v18 = vmul.f32 %v2230_v36, %v5800_v20  ;;  %v5802_v11 = vld [vmem:[#allocation37_spill] sm:$0xff]  ;;  %v5803_v15 = vld [vmem:[#allocation51_spill] sm:$0xff]  ;;  %v2259_v0 = vmul.f32 %v2231_v39, %v5756_v37 }
 0x52b   : > { %v2280_v46 = vadd.f32 %v2279_v26, %v2245_v53  ;;  %v2257_v26 = vmul.f32 %v2229_v56, %v5801_v57  ;;  %v2250_v29 = vmul.f32 %v2231_v39, %v5802_v11  ;;  %v2258_v51 = vmul.f32 %v2230_v36, %v5803_v15 }
 0x52c   : > { %v2290_v8 = vadd.f32 %v2289_v59, %v2254_v7  ;;  %v2260_v44 = vmul.f32 %v2232_v2, %v5757_v14 }
 0x52d   : > { %v2281_v43 = vadd.f32 %v2280_v46, %v2246_v31  ;;  %v5804_v31 = vld [vmem:[#allocation26_spill] sm:$0xff] }
 0x52e   : > { %v2291_v4 = vadd.f32 %v2290_v8, %v2255_v27  ;;  %v2251_v46 = vmul.f32 %v2232_v2, %v5804_v31 }
 0x52f   : > { %v2282_v28 = vadd.f32 %v2281_v43, %v2247_v22 }
 0x530   : > { %v2292_v55 = vadd.f32 %v2291_v4, %v2256_v48 }
 0x531   : > { %v2283_v53 = vadd.f32 %v2282_v28, %v2248_v41 }
 0x532   : > { %v2293_v61 = vadd.f32 %v2292_v55, %v2257_v26  ;;  %v5805_v26 = vld [vmem:[#allocation48_spill] sm:$0xff] }
 0x533   : > { %v2284_v35 = vadd.f32 %v2283_v53, %v2249_v18 }
 0x534   : > { %v2294_v7 = vadd.f32 %v2293_v61, %v2258_v51 }
 0x535   : > { %v2285_v60 = vadd.f32 %v2284_v35, %v2250_v29 }
 0x536   : > { %v2295_v45 = vadd.f32 %v2294_v7, %v2259_v0 }
 0x537   : > { %v2286_v59 = vadd.f32 %v2285_v60, %v2251_v46 }
 0x538   : > { %v2296_v62 = vadd.f32 %v2295_v45, %v2260_v44 }
 0x539   : > { %2287 = vadd.xlane.f32.xlu1 %v2286_v59 }
 0x53a   : > { %v2222_v56 = vpop.xlane.xlu0 %2221  ;;  %2297 = vadd.xlane.f32.xlu0 %v2296_v62 }
 0x53b   : > { %2680 = vrcp.f32 %v2222_v56 }
 0x545   : > { %v2681_v22 = vpop.eup %2680 }
 0x546   : > { %v2234_v43 = vmul.f32 %v2681_v22, %v4939_v5  ;;  %v2235_v36 = vmul.f32 %v2681_v22, %v4941_v19  ;;  %v2236_v10 = vmul.f32 %v2681_v22, %v4945_v21  ;;  %v2237_v27 = vmul.f32 %v2681_v22, %v4948_v3 }
 0x547   : > { %v2238_v14 = vmul.f32 %v2681_v22, %v4951_v40  ;;  %v2239_v5 = vmul.f32 %v2681_v22, %v4954_v16  ;;  %v2242_v2 = vmul.f32 %v2681_v22, %v4963_v23 }
 0x548   : > { %v2270_v37 = vmul.f32 %v2234_v43, %v5758_v17  ;;  %v2271_v8 = vmul.f32 %v2235_v36, %v5759_v52  ;;  %v2272_v39 = vmul.f32 %v2236_v10, %v5774_v58  ;;  %v2261_v41 = vmul.f32 %v2234_v43, %v5761_v1 }
 0x549   : > { %v2262_v28 = vmul.f32 %v2235_v36, %v5762_v33  ;;  %v2273_v19 = vmul.f32 %v2237_v27, %v5775_v12  ;;  %v2263_v3 = vmul.f32 %v2236_v10, %v5764_v34  ;;  %v2240_v17 = vmul.f32 %v2681_v22, %v4957_v63 }
 0x54a   : > { %v2309_v13 = vadd.f32 %v2271_v8, %v2270_v37  ;;  %v2274_v52 = vmul.f32 %v2238_v14, %v5776_v42  ;;  %v2264_v58 = vmul.f32 %v2237_v27, %v5766_v54  ;;  %v2241_v1 = vmul.f32 %v2681_v22, %v4960_v24 }
 0x54b   : > { %v2299_v25 = vadd.f32 %v2262_v28, %v2261_v41  ;;  %v2275_v33 = vmul.f32 %v2239_v5, %v5777_v6  ;;  %v2265_v16 = vmul.f32 %v2238_v14, %v5768_v30  ;;  %v2276_v34 = vmul.f32 %v2240_v17, %v5769_v50 }
 0x54c   : > { %v2310_v21 = vadd.f32 %v2309_v13, %v2272_v39  ;;  %v2266_v63 = vmul.f32 %v2239_v5, %v5770_v32  ;;  %v2277_v18 = vmul.f32 %v2241_v1, %v5771_v49  ;;  %v2267_v53 = vmul.f32 %v2240_v17, %v5772_v38 }
 0x54d   : > { %v2300_v48 = vadd.f32 %v2299_v25, %v2263_v3  ;;  %v2278_v6 = vmul.f32 %v2242_v2, %v5779_v47  ;;  %v2268_v30 = vmul.f32 %v2241_v1, %v5805_v26  ;;  %v2269_v23 = vmul.f32 %v2242_v2, %v5778_v9  ;;  %v5807_v25 = vld [vmem:[#allocation2_spill] sm:$0xff] }
 0x54e   : > { %v2311_v40 = vadd.f32 %v2310_v21, %v2273_v19  ;;  %v5806_v39 = vlaneseq }
 0x54f   : > { %v2301_v12 = vadd.f32 %v2300_v48, %v2264_v58 }
 0x550   : > { %v2312_v4 = vadd.f32 %v2311_v40, %v2274_v52  ;;  %v2360_v13 = vand.u32 127, %v5806_v39 }
 0x551   : > { %v2302_v42 = vadd.f32 %v2301_v12, %v2265_v16 }
 0x552   : > { %v2313_v20 = vadd.f32 %v2312_v4, %v2275_v33  ;;  %v2365_v28 = vadd.s32 4294967288, %v2360_v13  ;;  %v2363_v17 = vsub.s32 %v2360_v13, %v5807_v25 }
 0x553   : > { %v2303_v24 = vadd.f32 %v2302_v42, %v2266_v63 }
 0x554   : > { %v2314_v54 = vadd.f32 %v2313_v20, %v2276_v34  ;;  %v2368_v52 = vsub.s32 %v2365_v28, %v5807_v25 }
 0x555   : > { %v2304_v55 = vadd.f32 %v2303_v24, %v2267_v53 }
 0x556   : > { %v2315_v57 = vadd.f32 %v2314_v54, %v2277_v18 }
 0x557   : > { %v2305_v50 = vadd.f32 %v2304_v55, %v2268_v30 }
 0x558   : > { %v2316_v11 = vadd.f32 %v2315_v57, %v2278_v6 }
 0x559   : > { %v2306_v29 = vadd.f32 %v2305_v50, %v2269_v23 }
 0x55a   : > { %2317 = vadd.xlane.f32.xlu0 %v2316_v11 }
 0x55b   : > { %2307 = vadd.xlane.f32.xlu1 %v2306_v29 }
 0x5c6   : > { %v2288_v32 = vpop.xlane.xlu1 %2287 }
 0x5c7   : > { %v2298_v35 = vpop.xlane.xlu0 %2297  ;;  %v2319_v49 = vmul.f32 %v2288_v32, %v2288_v32 }
 0x5c8   : > { %v2320_v15 = vmul.f32 %v2298_v35, %v2298_v35 }
 0x5ca   : > { %v2323_v51 = vadd.f32 %v2320_v15, %v2319_v49 }
 0x5cc   : > { %v2324_v38 = vrot.slane %v2323_v51, 4 }
 0x5ce   : > { %v2325_v61 = vadd.f32 %v2324_v38, %v2323_v51 }
 0x5d0   : > { %v2326_v31 = vrot.slane %v2325_v61, 2 }
 0x5d2   : > { %v2327_v47 = vadd.f32 %v2326_v31, %v2325_v61 }
 0x5d4   : > { %v2328_v46 = vrot.slane %v2327_v47, 1 }
 0x5d6   : > { %v2329_v59 = vadd.f32 %v2328_v46, %v2327_v47 }
 0x5d8   : > { %v2337_v45 = vadd.f32 1.0, %v2329_v59  ;;  %v2347_v10 = vadd.f32 1e-09, %v2329_v59 }
 0x5da   : > { %2682 = vrcp.f32 %v2337_v45 }
 0x5db   : > { %2684 = vrsqrt.f32 %v2347_v10 }
 0x5e4   : > { %v2683_v8 = vpop.eup %2682 }
 0x5e5   : > { %v2340_v41 = vmul.f32 %v2683_v8, %v2329_v59  ;;  %v2685_v21 = vpop.eup %2684 }
 0x5e7   : > { %v2318_v60 = vpop.xlane.xlu0 %2317  ;;  %v2343_v5 = vmul.f32 %v2340_v41, %v2288_v32  ;;  %v2344_v19 = vmul.f32 %v2340_v41, %v2298_v35 }
 0x5e8   : > { %v2322_v0 = vmul.f32 %v2318_v60, %v2318_v60  ;;  %v2308_v7 = vpop.xlane.xlu1 %2307 }
 0x5e9   : > { %v2321_v44 = vmul.f32 %v2308_v7, %v2308_v7  ;;  %v2351_v40 = vmul.f32 %v2685_v21, %v2343_v5  ;;  %v2352_v58 = vmul.f32 %v2685_v21, %v2344_v19 }
 0x5eb   : > { %v2330_v9 = vadd.f32 %v2322_v0, %v2321_v44  ;;  %v2364_v16 = vrot.slane %v2351_v40, %v2363_v17  ;;  %v2369_v12 = vrot.slane %v2352_v58, %v2368_v52 }
 0x5ed   : > { %v2331_v62 = vrot.slane %v2330_v9, 4  ;;  %v2371_v42 = vsel %vm2370_vm0, %v2369_v12, %v2364_v16 }
 0x5ef   : > { %v2332_v56 = vadd.f32 %v2331_v62, %v2330_v9 }
 0x5f1   : > { %v2333_v22 = vrot.slane %v2332_v56, 2 }
 0x5f3   : > { %v2334_v43 = vadd.f32 %v2333_v22, %v2332_v56 }
 0x5f5   : > { %v2335_v36 = vrot.slane %v2334_v43, 1 }
 0x5f7   : > { %v2336_v27 = vadd.f32 %v2335_v36, %v2334_v43 }
 0x5f9   : > { %v2338_v37 = vadd.f32 1.0, %v2336_v27  ;;  %v2348_v14 = vadd.f32 1e-09, %v2336_v27 }
 0x5fb   : > { %2686 = vrcp.f32 %v2338_v37 }
 0x5fc   : > { %2688 = vrsqrt.f32 %v2348_v14 }
 0x605   : > { %v2687_v3 = vpop.eup %2686 }
 0x606   : > { %v2342_v48 = vmul.f32 %v2687_v3, %v2336_v27  ;;  %v2689_v4 = vpop.eup %2688 }
 0x608   : > { %v2345_v1 = vmul.f32 %v2342_v48, %v2308_v7  ;;  %v2346_v33 = vmul.f32 %v2342_v48, %v2318_v60 }
 0x60a   : > { %v2353_v2 = vmul.f32 %v2689_v4, %v2345_v1  ;;  %v2354_v34 = vmul.f32 %v2689_v4, %v2346_v33 }
 0x60c   : > { %v2375_v20 = vrot.slane %v2353_v2, %v2363_v17  ;;  %v2379_v63 = vrot.slane %v2354_v34, %v2368_v52 }
 0x60e   : > { %v2380_v18 = vsel %vm2370_vm0, %v2379_v63, %v2375_v20 }
 0x60f   : > { %v2382_v54 = vsel %vm2381_vm1, %v2380_v18, %v2371_v42 }
 0x610   : > { %2385 = vst.msk [vmem:[%s141_s28] sm:$0x3] %vm2384_vm2, %v2382_v54 }
 0x611 PF: > { %s12_s9 = sadd.s32 1, %s2768_s9  }
 0x612   : > { %p9_p4 = scmp.ge.s32.totalorder %s12_s9, 12  }
 0x614   :  { %11 = sbr.rel (!%p9_p4) target bundleno = 1 (0x1), region = 65 }

// kernel: capsule_net_forward.9
= control target key start
LH: loop header
LB: loop body
LE: loop exit
PB: predicated region body
PF: predicated region fallthrough
CT: control target
= control target key end

     0   :  { %vm296_vm0 = vcmask 261120   ;;  %s9950_s1 = inlined_call_operand.vmem [shape: bf16[160,512], index: 1, kind: input, shape index: {}]   ;;  %s9951_s0 = inlined_call_operand.vmem [shape: bf16[8,160], index: 0, kind: input, shape index: {}]   ;;  %s9952_s3 = inlined_call_operand.vmem [shape: bf16[512,1024], index: 3, kind: input, shape index: {}]   ;;  %s9953_s2 = inlined_call_operand.vmem [shape: f32[1,512], index: 2, kind: input, shape index: {}]   ;;  %s9954_s5 = inlined_call_operand.vmem [shape: bf16[1024,896], index: 5, kind: input, shape index: {}]   ;;  %s9955_s4 = inlined_call_operand.vmem [shape: f32[1,1024], index: 4, kind: input, shape index: {}]   ;;  %s9956_s6 = inlined_call_operand.vmem [shape: f32[1,896], index: 6, kind: input, shape index: {}]   ;;  %s9957_s7 = inlined_call_operand.vmem [shape: f32[8,896], index: 7, kind: output, shape index: {}]  }
   0x1   :  { %v6777_v0 = vld [vmem:[%s9950_s1 + $0x4] ss:$16 sps:$4 sm:$0xff]   ;;  %v6779_v1 = vld [vmem:[%s9950_s1 + $0xc] ss:$16 sps:$4 sm:$0xff]   ;;  %v6781_v2 = vld [vmem:[%s9950_s1] ss:$16 sps:$4 sm:$0xff]  }
   0x2   :  { %300 = vmatprep.subr.bf16.mxu0 %v6777_v0  ;;  %v6782_v3 = vld [vmem:[%s9950_s1 + $0x8] ss:$16 sps:$4 sm:$0xff]   ;;  %341 = vmatprep.subr.bf16.mxu1 %v6779_v1  ;;  %v6783_v4 = vld [vmem:[%s9950_s1 + $0x24] ss:$16 sps:$4 sm:$0xff]   ;;  %v6785_v5 = vld [vmem:[%s9950_s1 + $0x2c] ss:$16 sps:$4 sm:$0xff]  }
   0x3   :  { %301 = vmatpush1.bf16.msra.mxu0 %v6781_v2  ;;  %342 = vmatpush1.bf16.msra.mxu1 %v6782_v3  ;;  %v6787_v6 = vld [vmem:[%s9950_s1 + $0x20] ss:$16 sps:$4 sm:$0xff]   ;;  %v6788_v7 = vld [vmem:[%s9950_s1 + $0x28] ss:$16 sps:$4 sm:$0xff]   ;;  %v6789_v8 = vld [vmem:[%s9950_s1 + $0x44] ss:$16 sps:$4 sm:$0xff]  }
   0x4   :  { %302 = vmatprep.subr.bf16.mxu0 %v6783_v4  ;;  %343 = vmatprep.subr.bf16.mxu1 %v6785_v5  ;;  %v6791_v9 = vld [vmem:[%s9950_s1 + $0x4c] ss:$16 sps:$4 sm:$0xff]   ;;  %v6793_v10 = vld [vmem:[%s9950_s1 + $0x40] ss:$16 sps:$4 sm:$0xff]   ;;  %v6794_v11 = vld [vmem:[%s9950_s1 + $0x48] ss:$16 sps:$4 sm:$0xff]  }
   0x5   :  { %v6795_v12 = vld [vmem:[%s9950_s1 + $0x64] ss:$16 sps:$4 sm:$0xff]   ;;  %v6797_v13 = vld [vmem:[%s9950_s1 + $0x6c] ss:$16 sps:$4 sm:$0xff]   ;;  %v6799_v14 = vld [vmem:[%s9950_s1 + $0x60] ss:$16 sps:$4 sm:$0xff]  }
   0x6   :  { %v6800_v15 = vld [vmem:[%s9950_s1 + $0x68] ss:$16 sps:$4 sm:$0xff]   ;;  %v6801_v16 = vld [vmem:[%s9950_s1 + $0x84] ss:$16 sps:$4 sm:$0xff]   ;;  %v6803_v17 = vld [vmem:[%s9950_s1 + $0x8c] ss:$16 sps:$4 sm:$0xff]  }
   0x7   :  { %303 = vmatpush1.bf16.msra.mxu0 %v6787_v6  ;;  %344 = vmatpush1.bf16.msra.mxu1 %v6788_v7  ;;  %v6805_v18 = vld [vmem:[%s9950_s1 + $0x80] ss:$16 sps:$4 sm:$0xff]   ;;  %v6806_v19 = vld [vmem:[%s9950_s1 + $0x88] ss:$16 sps:$4 sm:$0xff]   ;;  %v6807_v20 = vld [vmem:[%s9950_s1 + $0xa4] ss:$16 sps:$4 sm:$0xff]  }
   0x8   :  { %304 = vmatprep.subr.bf16.mxu0 %v6789_v8  ;;  %345 = vmatprep.subr.bf16.mxu1 %v6791_v9  ;;  %v6809_v21 = vld [vmem:[%s9950_s1 + $0xac] ss:$16 sps:$4 sm:$0xff]   ;;  %v6811_v22 = vld [vmem:[%s9950_s1 + $0xa0] ss:$16 sps:$4 sm:$0xff]   ;;  %v6812_v23 = vld [vmem:[%s9950_s1 + $0xa8] ss:$16 sps:$4 sm:$0xff]  }
   0x9   :  { %v6813_v24 = vld [vmem:[%s9950_s1 + $0xc4] ss:$16 sps:$4 sm:$0xff]   ;;  %v6815_v25 = vld [vmem:[%s9950_s1 + $0xcc] ss:$16 sps:$4 sm:$0xff]   ;;  %v6817_v26 = vld [vmem:[%s9950_s1 + $0xc0] ss:$16 sps:$4 sm:$0xff]  }
   0xa   :  { %v6818_v27 = vld [vmem:[%s9950_s1 + $0xc8] ss:$16 sps:$4 sm:$0xff]   ;;  %v6819_v28 = vld [vmem:[%s9950_s1 + $0xe4] ss:$16 sps:$4 sm:$0xff]   ;;  %v6821_v29 = vld [vmem:[%s9950_s1 + $0xec] ss:$16 sps:$4 sm:$0xff]  }
   0xb   :  { %305 = vmatpush1.bf16.msra.mxu0 %v6793_v10  ;;  %346 = vmatpush1.bf16.msra.mxu1 %v6794_v11  ;;  %v27_v30 = vld [vmem:[%s9951_s0] sm:$0xff]  ;;  %v6824_v33 = vld [vmem:[%s9950_s1 + $0xe8] ss:$16 sps:$4 sm:$0xff]   ;;  %v6827_v35 = vld [vmem:[%s9950_s1 + $0x10c] ss:$16 sps:$4 sm:$0xff]  }
   0xc   :  { %306 = vmatprep.subr.bf16.mxu0 %v6795_v12  ;;  %347 = vmatprep.subr.bf16.mxu1 %v6797_v13  ;;  %v5871_v31 = vcombine.high %v27_v30, %v27_v30  ;;  %v6823_v32 = vld [vmem:[%s9950_s1 + $0xe0] ss:$16 sps:$4 sm:$0xff]   ;;  %v6825_v34 = vld [vmem:[%s9950_s1 + $0x104] ss:$16 sps:$4 sm:$0xff]   ;;  %v6830_v37 = vld [vmem:[%s9950_s1 + $0x108] ss:$16 sps:$4 sm:$0xff]   ;;  %v5870_v52 = vcombine.low %v27_v30, %v27_v30 }
   0xd   :  { %v6829_v36 = vld [vmem:[%s9950_s1 + $0x100] ss:$16 sps:$4 sm:$0xff]   ;;  %v6831_v38 = vld [vmem:[%s9950_s1 + $0x124] ss:$16 sps:$4 sm:$0xff]   ;;  %v6833_v39 = vld [vmem:[%s9950_s1 + $0x12c] ss:$16 sps:$4 sm:$0xff]  }
   0xe   :  { %5912 = vmatprep.mubr.msk.bf16.mxu0 %vm296_vm0, %v5871_v31  ;;  %5913 = vmatprep.mubr.msk.bf16.mxu1 %vm296_vm0, %v5871_v31  ;;  %v390_v40 = vld [vmem:[%s9952_s3] sm:$0xff]  ;;  %v6836_v45 = vld [vmem:[%s9950_s1 + $0x128] ss:$16 sps:$4 sm:$0xff]  }
   0xf   :  { %307 = vmatpush1.bf16.msra.mxu0 %v6799_v14  ;;  %348 = vmatpush1.bf16.msra.mxu1 %v6800_v15  ;;  %v394_v41 = vld [vmem:[%s9952_s3 + $0x20] sm:$0xff] }
  0x10   :  { %308 = vmatprep.subr.bf16.mxu0 %v6801_v16  ;;  %349 = vmatprep.subr.bf16.mxu1 %v6803_v17  ;;  %v518_v42 = vld [vmem:[%s9952_s3 + $0x400] sm:$0xff]  ;;  %v5915_v46 = vcombine.high %v390_v40, %v394_v41  ;;  %v5914_v53 = vcombine.low %v390_v40, %v394_v41 }
  0x11   :  { %v522_v43 = vld [vmem:[%s9952_s3 + $0x420] sm:$0xff] }
  0x12   :  { %v6835_v44 = vld [vmem:[%s9950_s1 + $0x120] ss:$16 sps:$4 sm:$0xff]   ;;  %v6043_v47 = vcombine.high %v518_v42, %v522_v43  ;;  %v6042_v54 = vcombine.low %v518_v42, %v522_v43 }
  0x13   :  { %309 = vmatpush1.bf16.msra.mxu0 %v6805_v18  ;;  %350 = vmatpush1.bf16.msra.mxu1 %v6806_v19  ;;  %v398_v48 = vld [vmem:[%s9952_s3 + $0x40] sm:$0xff] }
  0x14   :  { %310 = vmatprep.subr.bf16.mxu0 %v6807_v20  ;;  %351 = vmatprep.subr.bf16.mxu1 %v6809_v21  ;;  %v402_v49 = vld [vmem:[%s9952_s3 + $0x60] sm:$0xff] }
  0x15   :  { %v526_v50 = vld [vmem:[%s9952_s3 + $0x440] sm:$0xff]  ;;  %v5923_v55 = vcombine.high %v398_v48, %v402_v49  ;;  %v5922_v61 = vcombine.low %v398_v48, %v402_v49 }
  0x16   :  { %v530_v51 = vld [vmem:[%s9952_s3 + $0x460] sm:$0xff] }
  0x17   :  { %311 = vmatpush1.bf16.msra.mxu0 %v6811_v22  ;;  %352 = vmatpush1.bf16.msra.mxu1 %v6812_v23  ;;  %v6051_v56 = vcombine.high %v526_v50, %v530_v51  ;;  %v406_v57 = vld [vmem:[%s9952_s3 + $0x80] sm:$0xff]  ;;  %v6050_v62 = vcombine.low %v526_v50, %v530_v51 }
  0x18   :  { %312 = vmatprep.subr.bf16.mxu0 %v6813_v24  ;;  %353 = vmatprep.subr.bf16.mxu1 %v6815_v25  ;;  %v410_v58 = vld [vmem:[%s9952_s3 + $0xa0] sm:$0xff] }
  0x19   :  { %v534_v59 = vld [vmem:[%s9952_s3 + $0x480] sm:$0xff]  ;;  %v5931_v63 = vcombine.high %v406_v57, %v410_v58  ;;  %v5930_v5 = vcombine.low %v406_v57, %v410_v58 }
  0x1a   :  { %v538_v60 = vld [vmem:[%s9952_s3 + $0x4a0] sm:$0xff] }
  0x1b   :  { %313 = vmatpush1.bf16.msra.mxu0 %v6817_v26  ;;  %354 = vmatpush1.bf16.msra.mxu1 %v6818_v27  ;;  %v6059_v0 = vcombine.high %v534_v59, %v538_v60  ;;  %v414_v1 = vld [vmem:[%s9952_s3 + $0xc0] sm:$0xff]  ;;  %v6058_v6 = vcombine.low %v534_v59, %v538_v60 }
  0x1c   :  { %314 = vmatprep.subr.bf16.mxu0 %v6819_v28  ;;  %355 = vmatprep.subr.bf16.mxu1 %v6821_v29  ;;  %v418_v2 = vld [vmem:[%s9952_s3 + $0xe0] sm:$0xff] }
  0x1d   :  { %v542_v3 = vld [vmem:[%s9952_s3 + $0x4c0] sm:$0xff]  ;;  %v5939_v7 = vcombine.high %v414_v1, %v418_v2  ;;  %v5938_v13 = vcombine.low %v414_v1, %v418_v2 }
  0x1e   :  { %v546_v4 = vld [vmem:[%s9952_s3 + $0x4e0] sm:$0xff] }
  0x1f   :  { %315 = vmatpush1.bf16.msra.mxu0 %v6823_v32  ;;  %356 = vmatpush1.bf16.msra.mxu1 %v6824_v33  ;;  %v6067_v8 = vcombine.high %v542_v3, %v546_v4  ;;  %v422_v9 = vld [vmem:[%s9952_s3 + $0x100] sm:$0xff]  ;;  %v6066_v14 = vcombine.low %v542_v3, %v546_v4 }
  0x20   :  { %316 = vmatprep.subr.bf16.mxu0 %v6825_v34  ;;  %357 = vmatprep.subr.bf16.mxu1 %v6827_v35  ;;  %v426_v10 = vld [vmem:[%s9952_s3 + $0x120] sm:$0xff] }
  0x21   :  { %v550_v11 = vld [vmem:[%s9952_s3 + $0x500] sm:$0xff]  ;;  %v5947_v15 = vcombine.high %v422_v9, %v426_v10  ;;  %v5946_v21 = vcombine.low %v422_v9, %v426_v10 }
  0x22   :  { %v554_v12 = vld [vmem:[%s9952_s3 + $0x520] sm:$0xff] }
  0x23   :  { %317 = vmatpush1.bf16.msra.mxu0 %v6829_v36  ;;  %358 = vmatpush1.bf16.msra.mxu1 %v6830_v37  ;;  %v6075_v16 = vcombine.high %v550_v11, %v554_v12  ;;  %v430_v17 = vld [vmem:[%s9952_s3 + $0x140] sm:$0xff]  ;;  %v6074_v22 = vcombine.low %v550_v11, %v554_v12 }
  0x24   :  { %318 = vmatprep.subr.bf16.mxu0 %v6831_v38  ;;  %359 = vmatprep.subr.bf16.mxu1 %v6833_v39  ;;  %v434_v18 = vld [vmem:[%s9952_s3 + $0x160] sm:$0xff] }
  0x25   :  { %v558_v19 = vld [vmem:[%s9952_s3 + $0x540] sm:$0xff]  ;;  %v5955_v23 = vcombine.high %v430_v17, %v434_v18  ;;  %v5954_v29 = vcombine.low %v430_v17, %v434_v18 }
  0x26   :  { %v562_v20 = vld [vmem:[%s9952_s3 + $0x560] sm:$0xff] }
  0x27   :  { %319 = vmatpush1.bf16.msra.mxu0 %v6835_v44  ;;  %360 = vmatpush1.bf16.msra.mxu1 %v6836_v45  ;;  %v6083_v24 = vcombine.high %v558_v19, %v562_v20  ;;  %v438_v25 = vld [vmem:[%s9952_s3 + $0x180] sm:$0xff]  ;;  %v6082_v30 = vcombine.low %v558_v19, %v562_v20 }
  0x28   :  { %1968 = vmatprep.subr.bf16.mxu1 %v5915_v46  ;;  %2009 = vmatprep.subr.bf16.mxu0 %v6043_v47  ;;  %v442_v26 = vld [vmem:[%s9952_s3 + $0x1a0] sm:$0xff] }
  0x29   :  { %v566_v27 = vld [vmem:[%s9952_s3 + $0x580] sm:$0xff]  ;;  %v5963_v31 = vcombine.high %v438_v25, %v442_v26  ;;  %v5962_v37 = vcombine.low %v438_v25, %v442_v26 }
  0x2a   :  { %333 = vmatmul.mubr.bf16.vlgmr.msra.gmra.mrb[0].mxu0 %v5870_v52  ;;  %374 = vmatmul.mubr.bf16.vlgmr.msra.gmra.mrb[0].mxu1 %v5870_v52  ;;  %v570_v28 = vld [vmem:[%s9952_s3 + $0x5a0] sm:$0xff] }
  0x2b   :  { %1969 = vmatpush1.bf16.msra.mxu1 %v5914_v53  ;;  %2010 = vmatpush1.bf16.msra.mxu0 %v6042_v54  ;;  %v6091_v32 = vcombine.high %v566_v27, %v570_v28  ;;  %v446_v33 = vld [vmem:[%s9952_s3 + $0x1c0] sm:$0xff]  ;;  %v6090_v38 = vcombine.low %v566_v27, %v570_v28 }
  0x2c   :  { %1970 = vmatprep.subr.bf16.mxu1 %v5923_v55  ;;  %2011 = vmatprep.subr.bf16.mxu0 %v6051_v56  ;;  %v450_v34 = vld [vmem:[%s9952_s3 + $0x1e0] sm:$0xff] }
  0x2d   :  { %v574_v35 = vld [vmem:[%s9952_s3 + $0x5c0] sm:$0xff]  ;;  %v5971_v39 = vcombine.high %v446_v33, %v450_v34  ;;  %v5970_v45 = vcombine.low %v446_v33, %v450_v34 }
  0x2e   :  { %v578_v36 = vld [vmem:[%s9952_s3 + $0x5e0] sm:$0xff] }
  0x2f   :  { %1971 = vmatpush1.bf16.msra.mxu1 %v5922_v61  ;;  %2012 = vmatpush1.bf16.msra.mxu0 %v6050_v62  ;;  %v6099_v40 = vcombine.high %v574_v35, %v578_v36  ;;  %v454_v41 = vld [vmem:[%s9952_s3 + $0x200] sm:$0xff]  ;;  %v6098_v46 = vcombine.low %v574_v35, %v578_v36 }
  0x30   :  { %1972 = vmatprep.subr.bf16.mxu1 %v5931_v63  ;;  %2013 = vmatprep.subr.bf16.mxu0 %v6059_v0  ;;  %v458_v42 = vld [vmem:[%s9952_s3 + $0x220] sm:$0xff] }
  0x31   :  { %v582_v43 = vld [vmem:[%s9952_s3 + $0x600] sm:$0xff]  ;;  %v5979_v47 = vcombine.high %v454_v41, %v458_v42  ;;  %v5978_v53 = vcombine.low %v454_v41, %v458_v42 }
  0x32   :  { %v586_v44 = vld [vmem:[%s9952_s3 + $0x620] sm:$0xff] }
  0x33   :  { %1973 = vmatpush1.bf16.msra.mxu1 %v5930_v5  ;;  %2014 = vmatpush1.bf16.msra.mxu0 %v6058_v6  ;;  %v6107_v48 = vcombine.high %v582_v43, %v586_v44  ;;  %v462_v49 = vld [vmem:[%s9952_s3 + $0x240] sm:$0xff]  ;;  %v6106_v54 = vcombine.low %v582_v43, %v586_v44  ;;  %v391_v43 = vld [vmem:[%s9952_s3 + $0x8] sm:$0xff] }
  0x34   :  { %1974 = vmatprep.subr.bf16.mxu1 %v5939_v7  ;;  %2015 = vmatprep.subr.bf16.mxu0 %v6067_v8  ;;  %v466_v50 = vld [vmem:[%s9952_s3 + $0x260] sm:$0xff]  ;;  %v395_v44 = vld [vmem:[%s9952_s3 + $0x28] sm:$0xff] }
  0x35   :  { %v590_v51 = vld [vmem:[%s9952_s3 + $0x640] sm:$0xff]  ;;  %v5987_v55 = vcombine.high %v462_v49, %v466_v50  ;;  %v5986_v61 = vcombine.low %v462_v49, %v466_v50 }
  0x36   :  { %v594_v52 = vld [vmem:[%s9952_s3 + $0x660] sm:$0xff] }
  0x37   :  { %1975 = vmatpush1.bf16.msra.mxu1 %v5938_v13  ;;  %2016 = vmatpush1.bf16.msra.mxu0 %v6066_v14  ;;  %v6115_v56 = vcombine.high %v590_v51, %v594_v52  ;;  %v470_v57 = vld [vmem:[%s9952_s3 + $0x280] sm:$0xff]  ;;  %v6114_v62 = vcombine.low %v590_v51, %v594_v52  ;;  %v70_v51 = vlaneseq }
  0x38   :  { %1976 = vmatprep.subr.bf16.mxu1 %v5947_v15  ;;  %2017 = vmatprep.subr.bf16.mxu0 %v6075_v16  ;;  %v474_v58 = vld [vmem:[%s9952_s3 + $0x2a0] sm:$0xff] }
  0x39   :  { %v598_v59 = vld [vmem:[%s9952_s3 + $0x680] sm:$0xff]  ;;  %v5995_v63 = vcombine.high %v470_v57, %v474_v58  ;;  %v5994_v5 = vcombine.low %v470_v57, %v474_v58  ;;  %v7875_v52 = vshrl.u32 %v70_v51, 7  ;;  %v436_v51 = vld [vmem:[%s9952_s3 + $0x170] sm:$0xff] }
  0x3a   :  { %v602_v60 = vld [vmem:[%s9952_s3 + $0x6a0] sm:$0xff] }
  0x3b   :  { %1977 = vmatpush1.bf16.msra.mxu1 %v5946_v21  ;;  %2018 = vmatpush1.bf16.msra.mxu0 %v6074_v22  ;;  %v6123_v0 = vcombine.high %v598_v59, %v602_v60  ;;  %v478_v1 = vld [vmem:[%s9952_s3 + $0x2c0] sm:$0xff]  ;;  %v6122_v6 = vcombine.low %v598_v59, %v602_v60  ;;  %v7890_v57 = vsub.s32 3, %v7875_v52 }
  0x3c   :  { %1978 = vmatprep.subr.bf16.mxu1 %v5955_v23  ;;  %2019 = vmatprep.subr.bf16.mxu0 %v6083_v24  ;;  %v482_v2 = vld [vmem:[%s9952_s3 + $0x2e0] sm:$0xff] }
  0x3d   :  { %v606_v3 = vld [vmem:[%s9952_s3 + $0x6c0] sm:$0xff]  ;;  %v6003_v7 = vcombine.high %v478_v1, %v482_v2  ;;  %v6002_v13 = vcombine.low %v478_v1, %v482_v2 }
  0x3e   :  { %v610_v4 = vld [vmem:[%s9952_s3 + $0x6e0] sm:$0xff] }
  0x3f   :  { %1979 = vmatpush1.bf16.msra.mxu1 %v5954_v29  ;;  %2020 = vmatpush1.bf16.msra.mxu0 %v6082_v30  ;;  %v6131_v8 = vcombine.high %v606_v3, %v610_v4  ;;  %v486_v9 = vld [vmem:[%s9952_s3 + $0x300] sm:$0xff]  ;;  %v6130_v14 = vcombine.low %v606_v3, %v610_v4 }
  0x40   :  { %1980 = vmatprep.subr.bf16.mxu1 %v5963_v31  ;;  %2021 = vmatprep.subr.bf16.mxu0 %v6091_v32  ;;  %v490_v10 = vld [vmem:[%s9952_s3 + $0x320] sm:$0xff] }
  0x41   :  { %v614_v11 = vld [vmem:[%s9952_s3 + $0x700] sm:$0xff]  ;;  %v6011_v15 = vcombine.high %v486_v9, %v490_v10  ;;  %v6010_v21 = vcombine.low %v486_v9, %v490_v10 }
  0x42   :  { %v618_v12 = vld [vmem:[%s9952_s3 + $0x720] sm:$0xff] }
  0x43   :  { %1981 = vmatpush1.bf16.msra.mxu1 %v5962_v37  ;;  %2022 = vmatpush1.bf16.msra.mxu0 %v6090_v38  ;;  %v6139_v16 = vcombine.high %v614_v11, %v618_v12  ;;  %v494_v17 = vld [vmem:[%s9952_s3 + $0x340] sm:$0xff]  ;;  %v6138_v22 = vcombine.low %v614_v11, %v618_v12 }
  0x44   :  { %1982 = vmatprep.subr.bf16.mxu1 %v5971_v39  ;;  %2023 = vmatprep.subr.bf16.mxu0 %v6099_v40  ;;  %v498_v18 = vld [vmem:[%s9952_s3 + $0x360] sm:$0xff] }
  0x45   :  { %v622_v19 = vld [vmem:[%s9952_s3 + $0x740] sm:$0xff]  ;;  %v6019_v23 = vcombine.high %v494_v17, %v498_v18  ;;  %v6018_v25 = vcombine.low %v494_v17, %v498_v18  ;;  %v400_v17 = vld [vmem:[%s9952_s3 + $0x50] sm:$0xff] }
  0x46   :  { %v626_v20 = vld [vmem:[%s9952_s3 + $0x760] sm:$0xff]  ;;  %v404_v18 = vld [vmem:[%s9952_s3 + $0x70] sm:$0xff] }
  0x47   :  { %1983 = vmatpush1.bf16.msra.mxu1 %v5970_v45  ;;  %2024 = vmatpush1.bf16.msra.mxu0 %v6098_v46  ;;  %v6147_v24 = vcombine.high %v622_v19, %v626_v20  ;;  %v6146_v26 = vcombine.low %v622_v19, %v626_v20  ;;  %v502_v27 = vld [vmem:[%s9952_s3 + $0x380] sm:$0xff]  ;;  %v392_v45 = vld [vmem:[%s9952_s3 + $0x10] sm:$0xff]  ;;  %v5917_v46 = vcombine.high %v391_v43, %v395_v44 }
  0x48   :  { %1984 = vmatprep.subr.bf16.mxu1 %v5979_v47  ;;  %2025 = vmatprep.subr.bf16.mxu0 %v6107_v48  ;;  %v506_v28 = vld [vmem:[%s9952_s3 + $0x3a0] sm:$0xff]  ;;  %v396_v47 = vld [vmem:[%s9952_s3 + $0x30] sm:$0xff]  ;;  %v5916_v48 = vcombine.low %v391_v43, %v395_v44 }
  0x49   :  { %v630_v29 = vld [vmem:[%s9952_s3 + $0x780] sm:$0xff]  ;;  %v6027_v30 = vcombine.high %v502_v27, %v506_v28  ;;  %v6026_v32 = vcombine.low %v502_v27, %v506_v28  ;;  %v5918_v49 = vcombine.low %v392_v45, %v396_v47  ;;  %v5919_v50 = vcombine.high %v392_v45, %v396_v47  ;;  %v412_v27 = vld [vmem:[%s9952_s3 + $0xb0] sm:$0xff] }
  0x4a   :  { %v634_v31 = vld [vmem:[%s9952_s3 + $0x7a0] sm:$0xff]  ;;  %v428_v43 = vld [vmem:[%s9952_s3 + $0x130] sm:$0xff] }
  0x4b   :  { %1985 = vmatpush1.bf16.msra.mxu1 %v5978_v53  ;;  %2026 = vmatpush1.bf16.msra.mxu0 %v6106_v54  ;;  %v6154_v33 = vcombine.low %v630_v29, %v634_v31  ;;  %v6155_v34 = vcombine.high %v630_v29, %v634_v31  ;;  %v510_v35 = vld [vmem:[%s9952_s3 + $0x3c0] sm:$0xff]  ;;  %v7878_v53 = vsub.s32 0, %v7875_v52  ;;  %v7881_v54 = vsub.s32 2, %v7875_v52 }
  0x4c   :  { %1986 = vmatprep.subr.bf16.mxu1 %v5987_v55  ;;  %2027 = vmatprep.subr.bf16.mxu0 %v6115_v56  ;;  %v514_v36 = vld [vmem:[%s9952_s3 + $0x3e0] sm:$0xff]  ;;  %v7887_v56 = vsub.s32 1, %v7875_v52  ;;  %v5926_v29 = vcombine.low %v400_v17, %v404_v18 }
  0x4d   :  { %v638_v37 = vld [vmem:[%s9952_s3 + $0x7c0] sm:$0xff]  ;;  %v6035_v38 = vcombine.high %v510_v35, %v514_v36  ;;  %v6034_v40 = vcombine.low %v510_v35, %v514_v36  ;;  %v420_v35 = vld [vmem:[%s9952_s3 + $0xf0] sm:$0xff] }
  0x4e   :  { %v642_v39 = vld [vmem:[%s9952_s3 + $0x7e0] sm:$0xff] }
  0x4f   :  { %1987 = vmatpush1.bf16.msra.mxu1 %v5986_v61  ;;  %2028 = vmatpush1.bf16.msra.mxu0 %v6114_v62  ;;  %v6162_v41 = vcombine.low %v638_v37, %v642_v39  ;;  %v6163_v42 = vcombine.high %v638_v37, %v642_v39  ;;  %v68_v55 = vld [vmem:[%s9953_s2] sm:$0xf] }
  0x50   :  { %1988 = vmatprep.subr.bf16.mxu1 %v5995_v63  ;;  %2029 = vmatprep.subr.bf16.mxu0 %v6123_v0  ;;  %v73_v58 = vrot.slane %v68_v55, %v7878_v53  ;;  %v81_v59 = vrot.slane %v68_v55, %v7881_v54  ;;  %v77_v60 = vrot.slane %v68_v55, %v7887_v56 }
  0x51   :  { %v85_v61 = vrot.slane %v68_v55, %v7890_v57 }
  0x53   :  { %1989 = vmatpush1.bf16.msra.mxu1 %v5994_v5  ;;  %2030 = vmatpush1.bf16.msra.mxu0 %v6122_v6 }
  0x54   :  { %1990 = vmatprep.subr.bf16.mxu1 %v6003_v7  ;;  %2031 = vmatprep.subr.bf16.mxu0 %v6131_v8 }
  0x57   :  { %1991 = vmatpush1.bf16.msra.mxu1 %v6002_v13  ;;  %2032 = vmatpush1.bf16.msra.mxu0 %v6130_v14  ;;  %v399_v14 = vld [vmem:[%s9952_s3 + $0x48] sm:$0xff] }
  0x58   :  { %1992 = vmatprep.subr.bf16.mxu1 %v6011_v15  ;;  %2033 = vmatprep.subr.bf16.mxu0 %v6139_v16  ;;  %v403_v16 = vld [vmem:[%s9952_s3 + $0x68] sm:$0xff] }
  0x59   :  { %v5924_v28 = vcombine.low %v399_v14, %v403_v16 }
  0x5b   :  { %1993 = vmatpush1.bf16.msra.mxu1 %v6010_v21  ;;  %2034 = vmatpush1.bf16.msra.mxu0 %v6138_v22  ;;  %v407_v22 = vld [vmem:[%s9952_s3 + $0x88] sm:$0xff] }
  0x5c   :  { %1994 = vmatprep.subr.bf16.mxu1 %v6019_v23  ;;  %2035 = vmatprep.subr.bf16.mxu0 %v6147_v24  ;;  %v5925_v23 = vcombine.high %v399_v14, %v403_v16  ;;  %v5927_v24 = vcombine.high %v400_v17, %v404_v18  ;;  %v459_v14 = vld [vmem:[%s9952_s3 + $0x228] sm:$0xff]  ;;  %v456_v16 = vld [vmem:[%s9952_s3 + $0x210] sm:$0xff] }
  0x5d   :  { %v460_v17 = vld [vmem:[%s9952_s3 + $0x230] sm:$0xff] }
  0x5f   :  { %1995 = vmatpush1.bf16.msra.mxu1 %v6018_v25  ;;  %2036 = vmatpush1.bf16.msra.mxu0 %v6146_v26  ;;  %v411_v25 = vld [vmem:[%s9952_s3 + $0xa8] sm:$0xff]  ;;  %v408_v26 = vld [vmem:[%s9952_s3 + $0x90] sm:$0xff] }
  0x60   :  { %1996 = vmatprep.subr.bf16.mxu1 %v6027_v30  ;;  %2037 = vmatprep.subr.bf16.mxu0 %v6155_v34  ;;  %v5933_v30 = vcombine.high %v407_v22, %v411_v25  ;;  %v5935_v31 = vcombine.high %v408_v26, %v412_v27  ;;  %v416_v34 = vld [vmem:[%s9952_s3 + $0xd0] sm:$0xff]  ;;  %v5932_v36 = vcombine.low %v407_v22, %v411_v25  ;;  %v463_v25 = vld [vmem:[%s9952_s3 + $0x248] sm:$0xff] }
  0x61   :  { %v5934_v37 = vcombine.low %v408_v26, %v412_v27  ;;  %v5943_v39 = vcombine.high %v416_v34, %v420_v35  ;;  %v5942_v45 = vcombine.low %v416_v34, %v420_v35  ;;  %v467_v26 = vld [vmem:[%s9952_s3 + $0x268] sm:$0xff]  ;;  %v464_v27 = vld [vmem:[%s9952_s3 + $0x250] sm:$0xff] }
  0x62   :  { %v472_v35 = vld [vmem:[%s9952_s3 + $0x290] sm:$0xff] }
  0x63   :  { %1997 = vmatpush1.bf16.msra.mxu1 %v6026_v32  ;;  %2038 = vmatpush1.bf16.msra.mxu0 %v6154_v33  ;;  %v415_v32 = vld [vmem:[%s9952_s3 + $0xc8] sm:$0xff] }
  0x64   :  { %1998 = vmatprep.subr.bf16.mxu1 %v6035_v38  ;;  %2039 = vmatprep.subr.bf16.mxu0 %v6163_v42  ;;  %v419_v33 = vld [vmem:[%s9952_s3 + $0xe8] sm:$0xff]  ;;  %v424_v42 = vld [vmem:[%s9952_s3 + $0x110] sm:$0xff] }
  0x65   :  { %v5941_v38 = vcombine.high %v415_v32, %v419_v33  ;;  %v5940_v44 = vcombine.low %v415_v32, %v419_v33  ;;  %v5951_v47 = vcombine.high %v424_v42, %v428_v43  ;;  %v475_v32 = vld [vmem:[%s9952_s3 + $0x2a8] sm:$0xff]  ;;  %v5989_v33 = vcombine.high %v463_v25, %v467_v26 }
  0x67   :  { %1999 = vmatpush1.bf16.msra.mxu1 %v6034_v40  ;;  %2040 = vmatpush1.bf16.msra.mxu0 %v6162_v41  ;;  %v423_v40 = vld [vmem:[%s9952_s3 + $0x108] sm:$0xff] }
  0x68   :  { %2050 = vmatprep.subr.bf16.mxu1 %v5917_v46  ;;  %2132 = vmatprep.subr.bf16.mxu0 %v5919_v50  ;;  %v427_v41 = vld [vmem:[%s9952_s3 + $0x128] sm:$0xff]  ;;  %v432_v50 = vld [vmem:[%s9952_s3 + $0x150] sm:$0xff] }
  0x69   :  { %v5949_v46 = vcombine.high %v423_v40, %v427_v41  ;;  %v5948_v55 = vcombine.low %v423_v40, %v427_v41  ;;  %v483_v40 = vld [vmem:[%s9952_s3 + $0x2e8] sm:$0xff]  ;;  %v480_v41 = vld [vmem:[%s9952_s3 + $0x2d0] sm:$0xff] }
  0xfd   :  { %v334_v62 = vpop.f32.mrb[0].mxu0  ;;  %v375_v63 = vpop.f32.mrb[0].mxu1 }
  0xfe   :  { %v335_v0 = vadd.f32 %v334_v62, %v73_v58  ;;  %v376_v1 = vadd.f32 %v375_v63, %v81_v59  ;;  %v336_v2 = vpop.f32.mrb[1].mxu0  ;;  %v377_v3 = vpop.f32.mrb[1].mxu1  ;;  %v5950_v58 = vcombine.low %v424_v42, %v428_v43  ;;  %v443_v62 = vld [vmem:[%s9952_s3 + $0x1a8] sm:$0xff]  ;;  %v440_v63 = vld [vmem:[%s9952_s3 + $0x190] sm:$0xff] }
  0xff   :  { %v337_v4 = vadd.f32 %v336_v2, %v77_v60  ;;  %v378_v5 = vadd.f32 %v377_v3, %v85_v61  ;;  %v338_v6 = vpop.f32.mrb[2].mxu0  ;;  %v379_v7 = vpop.f32.mrb[2].mxu1  ;;  %v5959_v60 = vcombine.high %v432_v50, %v436_v51  ;;  %v439_v61 = vld [vmem:[%s9952_s3 + $0x188] sm:$0xff]  ;;  %v5958_v2 = vcombine.low %v432_v50, %v436_v51 }
 0x100   :  { %v382_v8 = vmax.f32 %v335_v0, 0.0  ;;  %v384_v9 = vmax.f32 %v376_v1, 0.0  ;;  %v339_v10 = vpop.f32.mrb[3].mxu0  ;;  %v380_v11 = vpop.f32.mrb[3].mxu1  ;;  %v444_v0 = vld [vmem:[%s9952_s3 + $0x1b0] sm:$0xff]  ;;  %v5965_v3 = vcombine.high %v439_v61, %v443_v62  ;;  %v451_v6 = vld [vmem:[%s9952_s3 + $0x1e8] sm:$0xff] }
 0x101   :  { %v383_v12 = vmax.f32 %v337_v4, 0.0  ;;  %v385_v13 = vmax.f32 %v378_v5, 0.0  ;;  %v5967_v4 = vcombine.high %v440_v63, %v444_v0  ;;  %v447_v5 = vld [vmem:[%s9952_s3 + $0x1c8] sm:$0xff]  ;;  %v448_v7 = vld [vmem:[%s9952_s3 + $0x1d0] sm:$0xff]  ;;  %v5966_v10 = vcombine.low %v440_v63, %v444_v0 }
 0x102   :  { %v7899_v15 = vpack.c.bf16 %v384_v9, %v384_v9  ;;  %v7914_v21 = vpack.c.bf16 %v382_v8, %v382_v8  ;;  %v452_v8 = vld [vmem:[%s9952_s3 + $0x1f0] sm:$0xff]  ;;  %v5964_v9 = vcombine.low %v439_v61, %v443_v62  ;;  %v5973_v11 = vcombine.high %v447_v5, %v451_v6  ;;  %v499_v61 = vld [vmem:[%s9952_s3 + $0x368] sm:$0xff] }
 0x103   :  { %v7910_v19 = vpack.c.bf16 %v383_v12, %v383_v12  ;;  %v7912_v20 = vpack.c.bf16 %v385_v13, %v385_v13  ;;  %v5975_v12 = vcombine.high %v448_v7, %v452_v8  ;;  %v455_v13 = vld [vmem:[%s9952_s3 + $0x208] sm:$0xff]  ;;  %v5972_v18 = vcombine.low %v447_v5, %v451_v6  ;;  %v496_v62 = vld [vmem:[%s9952_s3 + $0x350] sm:$0xff] }
 0x104   :  { %v5974_v22 = vcombine.low %v448_v7, %v452_v8  ;;  %v507_v5 = vld [vmem:[%s9952_s3 + $0x3a8] sm:$0xff]  ;;  %v504_v6 = vld [vmem:[%s9952_s3 + $0x390] sm:$0xff] }
 0x105   :  { %2000 = vmatprep.mubr.bf16.mxu1 %v7910_v19  ;;  %2041 = vmatprep.mubr.bf16.mxu0 %v7912_v20 }
 0x106   :  { %2001 = vmatmul.mubr.bf16.vlgmr.msra.gmra.mrb[4].mxu1 %v7914_v21  ;;  %2042 = vmatmul.mubr.bf16.vlgmr.msra.gmra.mrb[4].mxu0 %v7899_v15 }
 0x107   :  { %2051 = vmatpush1.bf16.msra.mxu1 %v5916_v48  ;;  %2133 = vmatpush1.bf16.msra.mxu0 %v5918_v49  ;;  %v431_v48 = vld [vmem:[%s9952_s3 + $0x148] sm:$0xff] }
 0x108   :  { %2082 = vmatprep.mubr.bf16.mxu1 %v7910_v19  ;;  %2164 = vmatprep.mubr.bf16.mxu0 %v7910_v19  ;;  %v435_v49 = vld [vmem:[%s9952_s3 + $0x168] sm:$0xff] }
 0x109   :  { %2052 = vmatprep.subr.bf16.mxu1 %v5925_v23  ;;  %2134 = vmatprep.subr.bf16.mxu0 %v5927_v24  ;;  %v5957_v59 = vcombine.high %v431_v48, %v435_v49  ;;  %v5956_v1 = vcombine.low %v431_v48, %v435_v49  ;;  %v5981_v23 = vcombine.high %v455_v13, %v459_v14  ;;  %v491_v48 = vld [vmem:[%s9952_s3 + $0x328] sm:$0xff]  ;;  %v488_v49 = vld [vmem:[%s9952_s3 + $0x310] sm:$0xff] }
 0x10a   :  { %v5983_v24 = vcombine.high %v456_v16, %v460_v17 }
 0x10b   :  { %2053 = vmatpush1.bf16.msra.mxu1 %v5924_v28  ;;  %2135 = vmatpush1.bf16.msra.mxu0 %v5926_v29  ;;  %v468_v28 = vld [vmem:[%s9952_s3 + $0x270] sm:$0xff]  ;;  %v5980_v29 = vcombine.low %v455_v13, %v459_v14  ;;  %v515_v13 = vld [vmem:[%s9952_s3 + $0x3e8] sm:$0xff] }
 0x10c   :  { %2054 = vmatprep.subr.bf16.mxu1 %v5933_v30  ;;  %2136 = vmatprep.subr.bf16.mxu0 %v5935_v31  ;;  %v5982_v30 = vcombine.low %v456_v16, %v460_v17  ;;  %v471_v31 = vld [vmem:[%s9952_s3 + $0x288] sm:$0xff]  ;;  %v5991_v34 = vcombine.high %v464_v27, %v468_v28  ;;  %v512_v14 = vld [vmem:[%s9952_s3 + $0x3d0] sm:$0xff] }
 0x10d   :  { %v5997_v42 = vcombine.high %v471_v31, %v475_v32 }
 0x10f   :  { %2055 = vmatpush1.bf16.msra.mxu1 %v5932_v36  ;;  %2137 = vmatpush1.bf16.msra.mxu0 %v5934_v37  ;;  %v476_v36 = vld [vmem:[%s9952_s3 + $0x2b0] sm:$0xff]  ;;  %v5988_v37 = vcombine.low %v463_v25, %v467_v26  ;;  %v523_v25 = vld [vmem:[%s9952_s3 + $0x428] sm:$0xff] }
 0x110   :  { %2056 = vmatprep.subr.bf16.mxu1 %v5941_v38  ;;  %2138 = vmatprep.subr.bf16.mxu0 %v5943_v39  ;;  %v5990_v38 = vcombine.low %v464_v27, %v468_v28  ;;  %v479_v39 = vld [vmem:[%s9952_s3 + $0x2c8] sm:$0xff]  ;;  %v5999_v43 = vcombine.high %v472_v35, %v476_v36  ;;  %v520_v26 = vld [vmem:[%s9952_s3 + $0x410] sm:$0xff] }
 0x111   :  { %v6005_v50 = vcombine.high %v479_v39, %v483_v40 }
 0x113   :  { %2057 = vmatpush1.bf16.msra.mxu1 %v5940_v44  ;;  %2139 = vmatpush1.bf16.msra.mxu0 %v5942_v45  ;;  %v484_v44 = vld [vmem:[%s9952_s3 + $0x2f0] sm:$0xff]  ;;  %v5996_v45 = vcombine.low %v471_v31, %v475_v32 }
 0x114   :  { %2058 = vmatprep.subr.bf16.mxu1 %v5949_v46  ;;  %2140 = vmatprep.subr.bf16.mxu0 %v5951_v47  ;;  %v5998_v46 = vcombine.low %v472_v35, %v476_v36  ;;  %v487_v47 = vld [vmem:[%s9952_s3 + $0x308] sm:$0xff]  ;;  %v6007_v51 = vcombine.high %v480_v41, %v484_v44  ;;  %v528_v36 = vld [vmem:[%s9952_s3 + $0x450] sm:$0xff] }
 0x115   :  { %v6013_v63 = vcombine.high %v487_v47, %v491_v48  ;;  %v531_v35 = vld [vmem:[%s9952_s3 + $0x468] sm:$0xff] }
 0x117   :  { %2059 = vmatpush1.bf16.msra.mxu1 %v5948_v55  ;;  %2141 = vmatpush1.bf16.msra.mxu0 %v5950_v58  ;;  %v492_v55 = vld [vmem:[%s9952_s3 + $0x330] sm:$0xff]  ;;  %v6004_v58 = vcombine.low %v479_v39, %v483_v40  ;;  %v535_v39 = vld [vmem:[%s9952_s3 + $0x488] sm:$0xff] }
 0x118   :  { %2060 = vmatprep.subr.bf16.mxu1 %v5957_v59  ;;  %2142 = vmatprep.subr.bf16.mxu0 %v5959_v60  ;;  %v6006_v59 = vcombine.low %v480_v41, %v484_v44  ;;  %v495_v60 = vld [vmem:[%s9952_s3 + $0x348] sm:$0xff]  ;;  %v6015_v0 = vcombine.high %v488_v49, %v492_v55 }
 0x119   :  { %v6021_v7 = vcombine.high %v495_v60, %v499_v61  ;;  %v539_v40 = vld [vmem:[%s9952_s3 + $0x4a8] sm:$0xff] }
 0x11b   :  { %2061 = vmatpush1.bf16.msra.mxu1 %v5956_v1  ;;  %2143 = vmatpush1.bf16.msra.mxu0 %v5958_v2  ;;  %v500_v1 = vld [vmem:[%s9952_s3 + $0x370] sm:$0xff]  ;;  %v6012_v2 = vcombine.low %v487_v47, %v491_v48  ;;  %v543_v47 = vld [vmem:[%s9952_s3 + $0x4c8] sm:$0xff] }
 0x11c   :  { %2062 = vmatprep.subr.bf16.mxu1 %v5965_v3  ;;  %2144 = vmatprep.subr.bf16.mxu0 %v5967_v4  ;;  %v6014_v3 = vcombine.low %v488_v49, %v492_v55  ;;  %v503_v4 = vld [vmem:[%s9952_s3 + $0x388] sm:$0xff]  ;;  %v6023_v8 = vcombine.high %v496_v62, %v500_v1  ;;  %v548_v55 = vld [vmem:[%s9952_s3 + $0x4f0] sm:$0xff] }
 0x11d   :  { %v6029_v16 = vcombine.high %v503_v4, %v507_v5  ;;  %v547_v48 = vld [vmem:[%s9952_s3 + $0x4e8] sm:$0xff] }
 0x11f   :  { %2063 = vmatpush1.bf16.msra.mxu1 %v5964_v9  ;;  %2145 = vmatpush1.bf16.msra.mxu0 %v5966_v10  ;;  %v508_v9 = vld [vmem:[%s9952_s3 + $0x3b0] sm:$0xff]  ;;  %v6020_v10 = vcombine.low %v495_v60, %v499_v61  ;;  %v551_v60 = vld [vmem:[%s9952_s3 + $0x508] sm:$0xff] }
 0x120   :  { %2064 = vmatprep.subr.bf16.mxu1 %v5973_v11  ;;  %2146 = vmatprep.subr.bf16.mxu0 %v5975_v12  ;;  %v6022_v11 = vcombine.low %v496_v62, %v500_v1  ;;  %v511_v12 = vld [vmem:[%s9952_s3 + $0x3c8] sm:$0xff]  ;;  %v6031_v17 = vcombine.high %v504_v6, %v508_v9  ;;  %v556_v1 = vld [vmem:[%s9952_s3 + $0x530] sm:$0xff] }
 0x121   :  { %v6037_v27 = vcombine.high %v511_v12, %v515_v13  ;;  %v555_v61 = vld [vmem:[%s9952_s3 + $0x528] sm:$0xff] }
 0x123   :  { %2065 = vmatpush1.bf16.msra.mxu1 %v5972_v18  ;;  %2147 = vmatpush1.bf16.msra.mxu0 %v5974_v22  ;;  %v516_v18 = vld [vmem:[%s9952_s3 + $0x3f0] sm:$0xff]  ;;  %v6028_v22 = vcombine.low %v503_v4, %v507_v5  ;;  %v559_v4 = vld [vmem:[%s9952_s3 + $0x548] sm:$0xff] }
 0x124   :  { %2066 = vmatprep.subr.bf16.mxu1 %v5981_v23  ;;  %2148 = vmatprep.subr.bf16.mxu0 %v5983_v24  ;;  %v6030_v23 = vcombine.low %v504_v6, %v508_v9  ;;  %v519_v24 = vld [vmem:[%s9952_s3 + $0x408] sm:$0xff]  ;;  %v6039_v28 = vcombine.high %v512_v14, %v516_v18  ;;  %v6038_v31 = vcombine.low %v512_v14, %v516_v18  ;;  %v564_v9 = vld [vmem:[%s9952_s3 + $0x570] sm:$0xff] }
 0x125   :  { %v6045_v32 = vcombine.high %v519_v24, %v523_v25  ;;  %v563_v5 = vld [vmem:[%s9952_s3 + $0x568] sm:$0xff]  ;;  %v572_v18 = vld [vmem:[%s9952_s3 + $0x5b0] sm:$0xff] }
 0x127   :  { %2067 = vmatpush1.bf16.msra.mxu1 %v5980_v29  ;;  %2149 = vmatpush1.bf16.msra.mxu0 %v5982_v30  ;;  %v524_v29 = vld [vmem:[%s9952_s3 + $0x430] sm:$0xff]  ;;  %v6036_v30 = vcombine.low %v511_v12, %v515_v13  ;;  %v567_v12 = vld [vmem:[%s9952_s3 + $0x588] sm:$0xff] }
 0x128   :  { %2068 = vmatprep.subr.bf16.mxu1 %v5989_v33  ;;  %2150 = vmatprep.subr.bf16.mxu0 %v5991_v34  ;;  %v6047_v33 = vcombine.high %v520_v26, %v524_v29  ;;  %v527_v34 = vld [vmem:[%s9952_s3 + $0x448] sm:$0xff]  ;;  %v6046_v41 = vcombine.low %v520_v26, %v524_v29  ;;  %v580_v29 = vld [vmem:[%s9952_s3 + $0x5f0] sm:$0xff] }
 0x129   :  { %v6053_v44 = vcombine.high %v527_v34, %v531_v35  ;;  %v571_v13 = vld [vmem:[%s9952_s3 + $0x5a8] sm:$0xff] }
 0x12a   :  { %v6093_v26 = vcombine.high %v567_v12, %v571_v13 }
 0x12b   :  { %2069 = vmatpush1.bf16.msra.mxu1 %v5988_v37  ;;  %2151 = vmatpush1.bf16.msra.mxu0 %v5990_v38  ;;  %v532_v37 = vld [vmem:[%s9952_s3 + $0x470] sm:$0xff]  ;;  %v6044_v38 = vcombine.low %v519_v24, %v523_v25  ;;  %v575_v24 = vld [vmem:[%s9952_s3 + $0x5c8] sm:$0xff] }
 0x12c   :  { %2070 = vmatprep.subr.bf16.mxu1 %v5997_v42  ;;  %2152 = vmatprep.subr.bf16.mxu0 %v5999_v43  ;;  %v536_v42 = vld [vmem:[%s9952_s3 + $0x490] sm:$0xff]  ;;  %v6054_v49 = vcombine.low %v528_v36, %v532_v37 }
 0x12d   :  { %v540_v43 = vld [vmem:[%s9952_s3 + $0x4b0] sm:$0xff] }
 0x12e   :  { %v6062_v62 = vcombine.low %v536_v42, %v540_v43 }
 0x12f   :  { %2071 = vmatpush1.bf16.msra.mxu1 %v5996_v45  ;;  %2153 = vmatpush1.bf16.msra.mxu0 %v5998_v46  ;;  %v6055_v45 = vcombine.high %v528_v36, %v532_v37  ;;  %v6052_v46 = vcombine.low %v527_v34, %v531_v35  ;;  %v583_v34 = vld [vmem:[%s9952_s3 + $0x608] sm:$0xff]  ;;  %v584_v36 = vld [vmem:[%s9952_s3 + $0x610] sm:$0xff] }
 0x130   :  { %2072 = vmatprep.subr.bf16.mxu1 %v6005_v50  ;;  %2154 = vmatprep.subr.bf16.mxu0 %v6007_v51  ;;  %v6061_v50 = vcombine.high %v535_v39, %v539_v40  ;;  %v544_v51 = vld [vmem:[%s9952_s3 + $0x4d0] sm:$0xff]  ;;  %v587_v35 = vld [vmem:[%s9952_s3 + $0x628] sm:$0xff] }
 0x131   :  { %v6070_v6 = vcombine.low %v544_v51, %v548_v55 }
 0x133   :  { %2073 = vmatpush1.bf16.msra.mxu1 %v6004_v58  ;;  %2155 = vmatpush1.bf16.msra.mxu0 %v6006_v59  ;;  %v6063_v58 = vcombine.high %v536_v42, %v540_v43  ;;  %v6060_v59 = vcombine.low %v535_v39, %v539_v40  ;;  %v591_v42 = vld [vmem:[%s9952_s3 + $0x648] sm:$0xff] }
 0x134   :  { %2074 = vmatprep.subr.bf16.mxu1 %v6013_v63  ;;  %2156 = vmatprep.subr.bf16.mxu0 %v6015_v0  ;;  %v6069_v63 = vcombine.high %v543_v47, %v547_v48  ;;  %v552_v0 = vld [vmem:[%s9952_s3 + $0x510] sm:$0xff]  ;;  %v595_v43 = vld [vmem:[%s9952_s3 + $0x668] sm:$0xff] }
 0x135   :  { %v6078_v14 = vcombine.low %v552_v0, %v556_v1 }
 0x137   :  { %2075 = vmatpush1.bf16.msra.mxu1 %v6012_v2  ;;  %2157 = vmatpush1.bf16.msra.mxu0 %v6014_v3  ;;  %v6071_v2 = vcombine.high %v544_v51, %v548_v55  ;;  %v6068_v3 = vcombine.low %v543_v47, %v547_v48  ;;  %v6108_v47 = vcombine.low %v583_v34, %v587_v35  ;;  %v599_v48 = vld [vmem:[%s9952_s3 + $0x688] sm:$0xff]  ;;  %v600_v55 = vld [vmem:[%s9952_s3 + $0x690] sm:$0xff] }
 0x138   :  { %2076 = vmatprep.subr.bf16.mxu1 %v6021_v7  ;;  %2158 = vmatprep.subr.bf16.mxu0 %v6023_v8  ;;  %v6077_v7 = vcombine.high %v551_v60, %v555_v61  ;;  %v560_v8 = vld [vmem:[%s9952_s3 + $0x550] sm:$0xff]  ;;  %v6117_v51 = vcombine.high %v591_v42, %v595_v43 }
 0x139   :  { %v6086_v25 = vcombine.low %v560_v8, %v564_v9 }
 0x13b   :  { %2077 = vmatpush1.bf16.msra.mxu1 %v6020_v10  ;;  %2159 = vmatpush1.bf16.msra.mxu0 %v6022_v11  ;;  %v6079_v10 = vcombine.high %v552_v0, %v556_v1  ;;  %v6076_v11 = vcombine.low %v551_v60, %v555_v61  ;;  %v6116_v60 = vcombine.low %v591_v42, %v595_v43  ;;  %v607_v61 = vld [vmem:[%s9952_s3 + $0x6c8] sm:$0xff]  ;;  %v608_v1 = vld [vmem:[%s9952_s3 + $0x6d0] sm:$0xff]  ;;  %v397_v42 = vld [vmem:[%s9952_s3 + $0x38] sm:$0xff] }
 0x13c   :  { %2078 = vmatprep.subr.bf16.mxu1 %v6029_v16  ;;  %2160 = vmatprep.subr.bf16.mxu0 %v6031_v17  ;;  %v6085_v16 = vcombine.high %v559_v4, %v563_v5  ;;  %v568_v17 = vld [vmem:[%s9952_s3 + $0x590] sm:$0xff] }
 0x13f   :  { %2079 = vmatpush1.bf16.msra.mxu1 %v6028_v22  ;;  %2161 = vmatpush1.bf16.msra.mxu0 %v6030_v23  ;;  %v6087_v22 = vcombine.high %v560_v8, %v564_v9  ;;  %v6084_v23 = vcombine.low %v559_v4, %v563_v5  ;;  %v615_v5 = vld [vmem:[%s9952_s3 + $0x708] sm:$0xff]  ;;  %v616_v9 = vld [vmem:[%s9952_s3 + $0x710] sm:$0xff] }
 0x140   :  { %2080 = vmatprep.subr.bf16.mxu1 %v6037_v27  ;;  %2162 = vmatprep.subr.bf16.mxu0 %v6039_v28  ;;  %v579_v27 = vld [vmem:[%s9952_s3 + $0x5e8] sm:$0xff]  ;;  %v576_v28 = vld [vmem:[%s9952_s3 + $0x5d0] sm:$0xff] }
 0x141   :  { %v6103_v37 = vcombine.high %v576_v28, %v580_v29  ;;  %v6100_v39 = vcombine.low %v575_v24, %v579_v27  ;;  %v6102_v40 = vcombine.low %v576_v28, %v580_v29  ;;  %v632_v29 = vld [vmem:[%s9952_s3 + $0x790] sm:$0xff] }
 0x143   :  { %2081 = vmatpush1.bf16.msra.mxu1 %v6036_v30  ;;  %2163 = vmatpush1.bf16.msra.mxu0 %v6038_v31  ;;  %v6095_v30 = vcombine.high %v568_v17, %v572_v18  ;;  %v6092_v31 = vcombine.low %v567_v12, %v571_v13  ;;  %v623_v13 = vld [vmem:[%s9952_s3 + $0x748] sm:$0xff] }
 0x144   :  { %2091 = vmatprep.subr.bf16.mxu1 %v6045_v32  ;;  %2173 = vmatprep.subr.bf16.mxu0 %v6047_v33  ;;  %v6094_v32 = vcombine.low %v568_v17, %v572_v18  ;;  %v6101_v33 = vcombine.high %v575_v24, %v579_v27  ;;  %v624_v18 = vld [vmem:[%s9952_s3 + $0x750] sm:$0xff] }
 0x146   :  { %2083 = vmatmul.mubr.bf16.vlgmr.msra.gmra.mrb[8].mxu1 %v7914_v21  ;;  %2165 = vmatmul.mubr.bf16.vlgmr.msra.gmra.mrb[8].mxu0 %v7914_v21 }
 0x147   :  { %2092 = vmatpush1.bf16.msra.mxu1 %v6044_v38  ;;  %2123 = vmatprep.mubr.bf16.mxu1 %v7912_v20  ;;  %v588_v38 = vld [vmem:[%s9952_s3 + $0x630] sm:$0xff] }
 0x148   :  { %2174 = vmatpush1.bf16.msra.mxu0 %v6046_v41  ;;  %2205 = vmatprep.mubr.bf16.mxu0 %v7912_v20  ;;  %v6109_v41 = vcombine.high %v583_v34, %v587_v35  ;;  %v643_v34 = vld [vmem:[%s9952_s3 + $0x7e8] sm:$0xff] }
 0x149   :  { %2093 = vmatprep.subr.bf16.mxu1 %v6053_v44  ;;  %2175 = vmatprep.subr.bf16.mxu0 %v6055_v45  ;;  %v592_v44 = vld [vmem:[%s9952_s3 + $0x650] sm:$0xff]  ;;  %v6111_v45 = vcombine.high %v584_v36, %v588_v38 }
 0x14b   :  { %2094 = vmatpush1.bf16.msra.mxu1 %v6052_v46  ;;  %v596_v46 = vld [vmem:[%s9952_s3 + $0x670] sm:$0xff] }
 0x14c   :  { %2176 = vmatpush1.bf16.msra.mxu0 %v6054_v49  ;;  %2095 = vmatprep.subr.bf16.mxu1 %v6061_v50  ;;  %v603_v49 = vld [vmem:[%s9952_s3 + $0x6a8] sm:$0xff]  ;;  %v6110_v50 = vcombine.low %v584_v36, %v588_v38  ;;  %v644_v38 = vld [vmem:[%s9952_s3 + $0x7f0] sm:$0xff] }
 0x14d   :  { %2177 = vmatprep.subr.bf16.mxu0 %v6063_v58  ;;  %v604_v58 = vld [vmem:[%s9952_s3 + $0x6b0] sm:$0xff]  ;;  %v6125_v0 = vcombine.high %v599_v48, %v603_v49  ;;  %v6124_v4 = vcombine.low %v599_v48, %v603_v49  ;;  %v405_v48 = vld [vmem:[%s9952_s3 + $0x78] sm:$0xff]  ;;  %v6841_v49 = vld [vmem:[%s9954_s5 + $0x4] ss:$28 sps:$4 sm:$0xff]  }
 0x14f   :  { %2096 = vmatpush1.bf16.msra.mxu1 %v6060_v59  ;;  %v6119_v59 = vcombine.high %v592_v44, %v596_v46 }
 0x150   :  { %2178 = vmatpush1.bf16.msra.mxu0 %v6062_v62  ;;  %2097 = vmatprep.subr.bf16.mxu1 %v6069_v63  ;;  %v611_v62 = vld [vmem:[%s9952_s3 + $0x6e8] sm:$0xff]  ;;  %v6118_v63 = vcombine.low %v592_v44, %v596_v46 }
 0x151   :  { %2179 = vmatprep.subr.bf16.mxu0 %v6071_v2  ;;  %v612_v2 = vld [vmem:[%s9952_s3 + $0x6f0] sm:$0xff]  ;;  %v6133_v8 = vcombine.high %v607_v61, %v611_v62  ;;  %v6132_v12 = vcombine.low %v607_v61, %v611_v62  ;;  %v6839_v61 = vld [vmem:[%s9954_s5] ss:$28 sps:$4 sm:$0xff]  }
 0x152   :  { %v6844_v62 = vld [vmem:[%s9954_s5 + $0x3c] ss:$28 sps:$4 sm:$0xff]  }
 0x153   :  { %2098 = vmatpush1.bf16.msra.mxu1 %v6068_v3  ;;  %v6127_v3 = vcombine.high %v600_v55, %v604_v58 }
 0x154   :  { %2180 = vmatpush1.bf16.msra.mxu0 %v6070_v6  ;;  %2099 = vmatprep.subr.bf16.mxu1 %v6077_v7  ;;  %v619_v6 = vld [vmem:[%s9952_s3 + $0x728] sm:$0xff]  ;;  %v6126_v7 = vcombine.low %v600_v55, %v604_v58  ;;  %v409_v58 = vld [vmem:[%s9952_s3 + $0x98] sm:$0xff] }
 0x155   :  { %2181 = vmatprep.subr.bf16.mxu0 %v6079_v10  ;;  %v620_v10 = vld [vmem:[%s9952_s3 + $0x730] sm:$0xff]  ;;  %v6141_v17 = vcombine.high %v615_v5, %v619_v6  ;;  %v6140_v24 = vcombine.low %v615_v5, %v619_v6  ;;  %v425_v6 = vld [vmem:[%s9952_s3 + $0x118] sm:$0xff] }
 0x156   :  { %v6142_v27 = vcombine.low %v616_v9, %v620_v10 }
 0x157   :  { %2100 = vmatpush1.bf16.msra.mxu1 %v6076_v11  ;;  %v6135_v11 = vcombine.high %v608_v1, %v612_v2 }
 0x158   :  { %2182 = vmatpush1.bf16.msra.mxu0 %v6078_v14  ;;  %2101 = vmatprep.subr.bf16.mxu1 %v6085_v16  ;;  %v627_v14 = vld [vmem:[%s9952_s3 + $0x768] sm:$0xff]  ;;  %v6134_v16 = vcombine.low %v608_v1, %v612_v2  ;;  %v421_v1 = vld [vmem:[%s9952_s3 + $0xf8] sm:$0xff] }
 0x159   :  { %2183 = vmatprep.subr.bf16.mxu0 %v6087_v22  ;;  %v628_v22 = vld [vmem:[%s9952_s3 + $0x770] sm:$0xff]  ;;  %v6149_v28 = vcombine.high %v623_v13, %v627_v14 }
 0x15a   :  { %v6150_v35 = vcombine.low %v624_v18, %v628_v22  ;;  %v6842_v2 = vld [vmem:[%s9954_s5 + $0x38] ss:$28 sps:$4 sm:$0xff]  }
 0x15b   :  { %2102 = vmatpush1.bf16.msra.mxu1 %v6084_v23  ;;  %v6143_v23 = vcombine.high %v616_v9, %v620_v10  ;;  %v6850_v9 = vld [vmem:[%s9954_s5 + $0xac] ss:$28 sps:$4 sm:$0xff]  }
 0x15c   :  { %2184 = vmatpush1.bf16.msra.mxu0 %v6086_v25  ;;  %2103 = vmatprep.subr.bf16.mxu1 %v6093_v26  ;;  %v631_v25 = vld [vmem:[%s9952_s3 + $0x788] sm:$0xff] }
 0x15d   :  { %2185 = vmatprep.subr.bf16.mxu0 %v6095_v30  ;;  %v635_v26 = vld [vmem:[%s9952_s3 + $0x7a8] sm:$0xff]  ;;  %v636_v30 = vld [vmem:[%s9952_s3 + $0x7b0] sm:$0xff] }
 0x15e   :  { %v6157_v36 = vcombine.high %v631_v25, %v635_v26  ;;  %v6158_v43 = vcombine.low %v632_v29, %v636_v30 }
 0x15f   :  { %2104 = vmatpush1.bf16.msra.mxu1 %v6092_v31  ;;  %v6151_v31 = vcombine.high %v624_v18, %v628_v22  ;;  %v441_v18 = vld [vmem:[%s9952_s3 + $0x198] sm:$0xff] }
 0x160   :  { %2186 = vmatpush1.bf16.msra.mxu0 %v6094_v32  ;;  %2105 = vmatprep.subr.bf16.mxu1 %v6101_v33  ;;  %v6148_v32 = vcombine.low %v623_v13, %v627_v14  ;;  %v639_v33 = vld [vmem:[%s9952_s3 + $0x7c8] sm:$0xff]  ;;  %v445_v22 = vld [vmem:[%s9952_s3 + $0x1b8] sm:$0xff] }
 0x161   :  { %2187 = vmatprep.subr.bf16.mxu0 %v6103_v37  ;;  %v640_v37 = vld [vmem:[%s9952_s3 + $0x7d0] sm:$0xff]  ;;  %v6165_v44 = vcombine.high %v639_v33, %v643_v34  ;;  %v6164_v46 = vcombine.low %v639_v33, %v643_v34  ;;  %v6848_v13 = vld [vmem:[%s9954_s5 + $0xa8] ss:$28 sps:$4 sm:$0xff]   ;;  %v457_v33 = vld [vmem:[%s9952_s3 + $0x218] sm:$0xff] }
 0x162   :  { %v461_v34 = vld [vmem:[%s9952_s3 + $0x238] sm:$0xff] }
 0x163   :  { %2106 = vmatpush1.bf16.msra.mxu1 %v6100_v39  ;;  %v6159_v39 = vcombine.high %v632_v29, %v636_v30  ;;  %v6854_v29 = vld [vmem:[%s9954_s5 + $0x118] ss:$28 sps:$4 sm:$0xff]   ;;  %v5969_v30 = vcombine.high %v441_v18, %v445_v22 }
 0x164   :  { %2188 = vmatpush1.bf16.msra.mxu0 %v6102_v40  ;;  %2107 = vmatprep.subr.bf16.mxu1 %v6109_v41  ;;  %v6156_v40 = vcombine.low %v631_v25, %v635_v26  ;;  %v393_v41 = vld [vmem:[%s9952_s3 + $0x18] sm:$0xff] }
 0x165   :  { %2189 = vmatprep.subr.bf16.mxu0 %v6111_v45  ;;  %v6167_v45 = vcombine.high %v640_v37, %v644_v38  ;;  %v5920_v55 = vcombine.low %v393_v41, %v397_v42  ;;  %v6856_v25 = vld [vmem:[%s9954_s5 + $0x11c] ss:$28 sps:$4 sm:$0xff]  }
 0x167   :  { %2108 = vmatpush1.bf16.msra.mxu1 %v6108_v47  ;;  %v401_v47 = vld [vmem:[%s9952_s3 + $0x58] sm:$0xff] }
 0x168   :  { %2190 = vmatpush1.bf16.msra.mxu0 %v6110_v50  ;;  %2109 = vmatprep.subr.bf16.mxu1 %v6117_v51  ;;  %v6166_v50 = vcombine.low %v640_v37, %v644_v38  ;;  %v5921_v51 = vcombine.high %v393_v41, %v397_v42  ;;  %v6862_v37 = vld [vmem:[%s9954_s5 + $0x18c] ss:$28 sps:$4 sm:$0xff]   ;;  %v5985_v42 = vcombine.high %v457_v33, %v461_v34 }
 0x169   :  { %2191 = vmatprep.subr.bf16.mxu0 %v6119_v59  ;;  %v413_v59 = vld [vmem:[%s9952_s3 + $0xb8] sm:$0xff]  ;;  %v6860_v41 = vld [vmem:[%s9954_s5 + $0x188] ss:$28 sps:$4 sm:$0xff]  }
 0x16a   :  { %v5936_v5 = vcombine.low %v409_v58, %v413_v59 }
 0x16b   :  { %2110 = vmatpush1.bf16.msra.mxu1 %v6116_v60  ;;  %v5929_v60 = vcombine.high %v401_v47, %v405_v48 }
 0x16c   :  { %2192 = vmatpush1.bf16.msra.mxu0 %v6118_v63  ;;  %2111 = vmatprep.subr.bf16.mxu1 %v6125_v0  ;;  %v5928_v63 = vcombine.low %v401_v47, %v405_v48  ;;  %v417_v0 = vld [vmem:[%s9952_s3 + $0xd8] sm:$0xff] }
 0x16d   :  { %2193 = vmatprep.subr.bf16.mxu0 %v6127_v3  ;;  %v5937_v3 = vcombine.high %v409_v58, %v413_v59  ;;  %v5944_v10 = vcombine.low %v417_v0, %v421_v1  ;;  %v6863_v47 = vld [vmem:[%s9954_s5 + $0x1c0] ss:$28 sps:$4 sm:$0xff]   ;;  %v6866_v58 = vld [vmem:[%s9954_s5 + $0x1f8] ss:$28 sps:$4 sm:$0xff]  }
 0x16f   :  { %2112 = vmatpush1.bf16.msra.mxu1 %v6124_v4  ;;  %v6847_v4 = vld [vmem:[%s9954_s5 + $0x74] ss:$28 sps:$4 sm:$0xff]  }
 0x170   :  { %2194 = vmatpush1.bf16.msra.mxu0 %v6126_v7  ;;  %2113 = vmatprep.subr.bf16.mxu1 %v6133_v8  ;;  %v429_v7 = vld [vmem:[%s9952_s3 + $0x138] sm:$0xff]  ;;  %v5945_v8 = vcombine.high %v417_v0, %v421_v1  ;;  %v6869_v0 = vld [vmem:[%s9954_s5 + $0x230] ss:$28 sps:$4 sm:$0xff]  }
 0x171   :  { %2195 = vmatprep.subr.bf16.mxu0 %v6135_v11  ;;  %v433_v11 = vld [vmem:[%s9952_s3 + $0x158] sm:$0xff]  ;;  %v5953_v14 = vcombine.high %v425_v6, %v429_v7 }
 0x173   :  { %2114 = vmatpush1.bf16.msra.mxu1 %v6132_v12  ;;  %v437_v12 = vld [vmem:[%s9952_s3 + $0x178] sm:$0xff] }
 0x174   :  { %2196 = vmatpush1.bf16.msra.mxu0 %v6134_v16  ;;  %2115 = vmatprep.subr.bf16.mxu1 %v6141_v17  ;;  %v6853_v16 = vld [vmem:[%s9954_s5 + $0xe4] ss:$28 sps:$4 sm:$0xff]   ;;  %v5952_v17 = vcombine.low %v425_v6, %v429_v7  ;;  %v5960_v26 = vcombine.low %v433_v11, %v437_v12 }
 0x175   :  { %2197 = vmatprep.subr.bf16.mxu0 %v6143_v23  ;;  %v6851_v23 = vld [vmem:[%s9954_s5 + $0xe0] ss:$28 sps:$4 sm:$0xff]   ;;  %v6872_v6 = vld [vmem:[%s9954_s5 + $0x268] ss:$28 sps:$4 sm:$0xff]  }
 0x177   :  { %2116 = vmatpush1.bf16.msra.mxu1 %v6140_v24  ;;  %v5961_v24 = vcombine.high %v433_v11, %v437_v12  ;;  %v6875_v11 = vld [vmem:[%s9954_s5 + $0x2a0] ss:$28 sps:$4 sm:$0xff]  }
 0x178   :  { %2198 = vmatpush1.bf16.msra.mxu0 %v6142_v27  ;;  %2117 = vmatprep.subr.bf16.mxu1 %v6149_v28  ;;  %v449_v27 = vld [vmem:[%s9952_s3 + $0x1d8] sm:$0xff] }
 0x179   :  { %2199 = vmatprep.subr.bf16.mxu0 %v6151_v31  ;;  %v453_v28 = vld [vmem:[%s9952_s3 + $0x1f8] sm:$0xff]  ;;  %v6859_v31 = vld [vmem:[%s9954_s5 + $0x154] ss:$28 sps:$4 sm:$0xff]  }
 0x17a   :  { %v5976_v38 = vcombine.low %v449_v27, %v453_v28 }
 0x17b   :  { %2118 = vmatpush1.bf16.msra.mxu1 %v6148_v32  ;;  %v5968_v32 = vcombine.low %v441_v18, %v445_v22  ;;  %v6878_v18 = vld [vmem:[%s9954_s5 + $0x2d8] ss:$28 sps:$4 sm:$0xff]  }
 0x17c   :  { %2200 = vmatpush1.bf16.msra.mxu0 %v6150_v35  ;;  %2119 = vmatprep.subr.bf16.mxu1 %v6157_v36  ;;  %v6857_v35 = vld [vmem:[%s9954_s5 + $0x150] ss:$28 sps:$4 sm:$0xff]   ;;  %v5977_v36 = vcombine.high %v449_v27, %v453_v28 }
 0x17d   :  { %2201 = vmatprep.subr.bf16.mxu0 %v6159_v39  ;;  %v465_v39 = vld [vmem:[%s9952_s3 + $0x258] sm:$0xff]  ;;  %v6881_v27 = vld [vmem:[%s9954_s5 + $0x310] ss:$28 sps:$4 sm:$0xff]  }
 0x17f   :  { %2120 = vmatpush1.bf16.msra.mxu1 %v6156_v40  ;;  %v469_v40 = vld [vmem:[%s9952_s3 + $0x278] sm:$0xff] }
 0x180   :  { %2202 = vmatpush1.bf16.msra.mxu0 %v6158_v43  ;;  %2121 = vmatprep.subr.bf16.mxu1 %v6165_v44  ;;  %v6865_v43 = vld [vmem:[%s9954_s5 + $0x1c4] ss:$28 sps:$4 sm:$0xff]   ;;  %v5984_v44 = vcombine.low %v457_v33, %v461_v34  ;;  %v5993_v48 = vcombine.high %v465_v39, %v469_v40 }
 0x181   :  { %2203 = vmatprep.subr.bf16.mxu0 %v6167_v45  ;;  %v473_v45 = vld [vmem:[%s9952_s3 + $0x298] sm:$0xff]  ;;  %v6884_v33 = vld [vmem:[%s9954_s5 + $0x348] ss:$28 sps:$4 sm:$0xff]  }
 0x183   :  { %2122 = vmatpush1.bf16.msra.mxu1 %v6164_v46  ;;  %v477_v46 = vld [vmem:[%s9952_s3 + $0x2b8] sm:$0xff] }
 0x184   :  { %2204 = vmatpush1.bf16.msra.mxu0 %v6166_v50  ;;  %2214 = vmatprep.subr.bf16.mxu1 %v5921_v51  ;;  %v5992_v50 = vcombine.low %v465_v39, %v469_v40  ;;  %v481_v51 = vld [vmem:[%s9952_s3 + $0x2d8] sm:$0xff]  ;;  %v6001_v59 = vcombine.high %v473_v45, %v477_v46 }
 0x185   :  { %5165 = vmatprep.subr.bf16.mxu0 %v6841_v49  ;;  %v6868_v49 = vld [vmem:[%s9954_s5 + $0x1fc] ss:$28 sps:$4 sm:$0xff]  }
 0x186   :  { %2124 = vmatmul.mubr.bf16.vlgmr.msra.gmra.mrb[8].mxu1 %v7899_v15  ;;  %v541_v39 = vld [vmem:[%s9952_s3 + $0x4b8] sm:$0xff] }
 0x187   :  { %2206 = vmatmul.mubr.bf16.vlgmr.msra.gmra.mrb[8].mxu0 %v7899_v15  ;;  %2215 = vmatpush1.bf16.msra.mxu1 %v5920_v55  ;;  %v485_v55 = vld [vmem:[%s9952_s3 + $0x2f8] sm:$0xff] }
 0x188   :  { %2246 = vmatprep.mubr.bf16.mxu1 %v7910_v19  ;;  %2216 = vmatprep.subr.bf16.mxu1 %v5929_v60  ;;  %v6845_v19 = vld [vmem:[%s9954_s5 + $0x70] ss:$28 sps:$4 sm:$0xff]   ;;  %v6009_v1 = vcombine.high %v481_v51, %v485_v55 }
 0x189   :  { %5166 = vmatpush1.bf16.msra.mxu0 %v6839_v61  ;;  %v6871_v60 = vld [vmem:[%s9954_s5 + $0x234] ss:$28 sps:$4 sm:$0xff]   ;;  %v6000_v61 = vcombine.low %v473_v45, %v477_v46 }
 0x18a   :  { %5167 = vmatprep.subr.bf16.mxu0 %v6844_v62  ;;  %v489_v62 = vld [vmem:[%s9952_s3 + $0x318] sm:$0xff] }
 0x18b   :  { %2217 = vmatpush1.bf16.msra.mxu1 %v5928_v63  ;;  %v493_v63 = vld [vmem:[%s9952_s3 + $0x338] sm:$0xff] }
 0x18c   :  { %2218 = vmatprep.subr.bf16.mxu1 %v5937_v3  ;;  %v6008_v3 = vcombine.low %v481_v51, %v485_v55  ;;  %v6017_v7 = vcombine.high %v489_v62, %v493_v63  ;;  %v8525_v51 = vld [vmem:[%s9955_s4] sm:$0xff]  ;;  %v569_v55 = vld [vmem:[%s9952_s3 + $0x598] sm:$0xff] }
 0x18d   :  { %5168 = vmatpush1.bf16.msra.mxu0 %v6842_v2  ;;  %v6874_v2 = vld [vmem:[%s9954_s5 + $0x26c] ss:$28 sps:$4 sm:$0xff]  }
 0x18e   :  { %5169 = vmatprep.subr.bf16.mxu0 %v6847_v4  ;;  %v497_v4 = vld [vmem:[%s9952_s3 + $0x358] sm:$0xff] }
 0x18f   :  { %2219 = vmatpush1.bf16.msra.mxu1 %v5936_v5  ;;  %v501_v5 = vld [vmem:[%s9952_s3 + $0x378] sm:$0xff] }
 0x190   :  { %2220 = vmatprep.subr.bf16.mxu1 %v5945_v8  ;;  %v6016_v8 = vcombine.low %v489_v62, %v493_v63  ;;  %v6025_v12 = vcombine.high %v497_v4, %v501_v5  ;;  %v655_v62 = vrot.slane %v8525_v51, %v7887_v56 }
 0x191   :  { %5170 = vmatpush1.bf16.msra.mxu0 %v6845_v19  ;;  %v6877_v19 = vld [vmem:[%s9954_s5 + $0x2a4] ss:$28 sps:$4 sm:$0xff]  }
 0x192   :  { %5171 = vmatprep.subr.bf16.mxu0 %v6850_v9  ;;  %v505_v9 = vld [vmem:[%s9952_s3 + $0x398] sm:$0xff] }
 0x193   :  { %2221 = vmatpush1.bf16.msra.mxu1 %v5944_v10  ;;  %v509_v10 = vld [vmem:[%s9952_s3 + $0x3b8] sm:$0xff] }
 0x194   :  { %2222 = vmatprep.subr.bf16.mxu1 %v5953_v14  ;;  %v6024_v14 = vcombine.low %v497_v4, %v501_v5  ;;  %v6033_v22 = vcombine.high %v505_v9, %v509_v10 }
 0x195   :  { %5172 = vmatpush1.bf16.msra.mxu0 %v6848_v13  ;;  %v6880_v13 = vld [vmem:[%s9954_s5 + $0x2dc] ss:$28 sps:$4 sm:$0xff]  }
 0x196   :  { %5173 = vmatprep.subr.bf16.mxu0 %v6853_v16  ;;  %v513_v16 = vld [vmem:[%s9952_s3 + $0x3d8] sm:$0xff] }
 0x197   :  { %2223 = vmatpush1.bf16.msra.mxu1 %v5952_v17  ;;  %v517_v17 = vld [vmem:[%s9952_s3 + $0x3f8] sm:$0xff] }
 0x198   :  { %2224 = vmatprep.subr.bf16.mxu1 %v5961_v24  ;;  %v6032_v24 = vcombine.low %v505_v9, %v509_v10  ;;  %v6041_v28 = vcombine.high %v513_v16, %v517_v17 }
 0x199   :  { %5174 = vmatpush1.bf16.msra.mxu0 %v6851_v23  ;;  %v6883_v23 = vld [vmem:[%s9954_s5 + $0x314] ss:$28 sps:$4 sm:$0xff]  }
 0x19a   :  { %5175 = vmatprep.subr.bf16.mxu0 %v6856_v25  ;;  %v521_v25 = vld [vmem:[%s9952_s3 + $0x418] sm:$0xff] }
 0x19b   :  { %2225 = vmatpush1.bf16.msra.mxu1 %v5960_v26  ;;  %v525_v26 = vld [vmem:[%s9952_s3 + $0x438] sm:$0xff] }
 0x19c   :  { %2226 = vmatprep.subr.bf16.mxu1 %v5969_v30  ;;  %v6040_v30 = vcombine.low %v513_v16, %v517_v17  ;;  %v6049_v34 = vcombine.high %v521_v25, %v525_v26  ;;  %v585_v16 = vld [vmem:[%s9952_s3 + $0x618] sm:$0xff] }
 0x19d   :  { %5176 = vmatpush1.bf16.msra.mxu0 %v6854_v29  ;;  %v6886_v29 = vld [vmem:[%s9954_s5 + $0x34c] ss:$28 sps:$4 sm:$0xff]   ;;  %v589_v17 = vld [vmem:[%s9952_s3 + $0x638] sm:$0xff] }
 0x19e   :  { %5177 = vmatprep.subr.bf16.mxu0 %v6859_v31  ;;  %v529_v31 = vld [vmem:[%s9952_s3 + $0x458] sm:$0xff] }
 0x19f   :  { %2227 = vmatpush1.bf16.msra.mxu1 %v5968_v32  ;;  %v533_v32 = vld [vmem:[%s9952_s3 + $0x478] sm:$0xff] }
 0x1a0   :  { %2228 = vmatprep.subr.bf16.mxu1 %v5977_v36  ;;  %v6048_v36 = vcombine.low %v521_v25, %v525_v26  ;;  %v6056_v40 = vcombine.low %v529_v31, %v533_v32  ;;  %v593_v25 = vld [vmem:[%s9952_s3 + $0x658] sm:$0xff] }
 0x1a1   :  { %5178 = vmatpush1.bf16.msra.mxu0 %v6857_v35  ;;  %v6910_v35 = vld [vmem:[%s9954_s5 + $0x384] ss:$28 sps:$4 sm:$0xff]  }
 0x1a2   :  { %5179 = vmatprep.subr.bf16.mxu0 %v6862_v37  ;;  %v537_v37 = vld [vmem:[%s9952_s3 + $0x498] sm:$0xff] }
 0x1a3   :  { %2229 = vmatpush1.bf16.msra.mxu1 %v5976_v38  ;;  %v6057_v38 = vcombine.high %v529_v31, %v533_v32  ;;  %v6112_v31 = vcombine.low %v585_v16, %v589_v17 }
 0x1a4   :  { %2230 = vmatprep.subr.bf16.mxu1 %v5985_v42  ;;  %v6065_v42 = vcombine.high %v537_v37, %v541_v39 }
 0x1a5   :  { %5180 = vmatpush1.bf16.msra.mxu0 %v6860_v41  ;;  %v545_v41 = vld [vmem:[%s9952_s3 + $0x4d8] sm:$0xff] }
 0x1a6   :  { %5181 = vmatprep.subr.bf16.mxu0 %v6865_v43  ;;  %v549_v43 = vld [vmem:[%s9952_s3 + $0x4f8] sm:$0xff] }
 0x1a7   :  { %2231 = vmatpush1.bf16.msra.mxu1 %v5984_v44  ;;  %v6064_v44 = vcombine.low %v537_v37, %v541_v39  ;;  %v6073_v45 = vcombine.high %v545_v41, %v549_v43  ;;  %v6072_v46 = vcombine.low %v545_v41, %v549_v43  ;;  %v609_v39 = vld [vmem:[%s9952_s3 + $0x6d8] sm:$0xff]  ;;  %v6920_v41 = vld [vmem:[%s9954_s5 + $0x3f0] ss:$28 sps:$4 sm:$0xff]  }
 0x1a8   :  { %2232 = vmatprep.subr.bf16.mxu1 %v5993_v48 }
 0x1a9   :  { %5182 = vmatpush1.bf16.msra.mxu0 %v6863_v47  ;;  %v561_v47 = vld [vmem:[%s9952_s3 + $0x558] sm:$0xff] }
 0x1aa   :  { %5183 = vmatprep.subr.bf16.mxu0 %v6868_v49  ;;  %v565_v49 = vld [vmem:[%s9952_s3 + $0x578] sm:$0xff] }
 0x1ab   :  { %2233 = vmatpush1.bf16.msra.mxu1 %v5992_v50 }
 0x1ac   :  { %2234 = vmatprep.subr.bf16.mxu1 %v6001_v59  ;;  %v573_v59 = vld [vmem:[%s9952_s3 + $0x5b8] sm:$0xff] }
 0x1ad   :  { %5184 = vmatpush1.bf16.msra.mxu0 %v6866_v58  ;;  %v6089_v58 = vcombine.high %v561_v47, %v565_v49  ;;  %v6097_v63 = vcombine.high %v569_v55, %v573_v59 }
 0x1ae   :  { %5185 = vmatprep.subr.bf16.mxu0 %v6871_v60  ;;  %v651_v60 = vrot.slane %v8525_v51, %v7878_v53 }
 0x1af   :  { %2235 = vmatpush1.bf16.msra.mxu1 %v6000_v61  ;;  %v6088_v61 = vcombine.low %v561_v47, %v565_v49  ;;  %v625_v49 = vld [vmem:[%s9952_s3 + $0x758] sm:$0xff] }
 0x1b0   :  { %2236 = vmatprep.subr.bf16.mxu1 %v6009_v1 }
 0x1b1   :  { %5186 = vmatpush1.bf16.msra.mxu0 %v6869_v0 }
 0x1b2   :  { %5187 = vmatprep.subr.bf16.mxu0 %v6874_v2  ;;  %v577_v2 = vld [vmem:[%s9952_s3 + $0x5d8] sm:$0xff] }
 0x1b3   :  { %2237 = vmatpush1.bf16.msra.mxu1 %v6008_v3  ;;  %v581_v3 = vld [vmem:[%s9952_s3 + $0x5f8] sm:$0xff] }
 0x1b4   :  { %2238 = vmatprep.subr.bf16.mxu1 %v6017_v7 }
 0x1b5   :  { %5188 = vmatpush1.bf16.msra.mxu0 %v6872_v6 }
 0x1b6   :  { %5189 = vmatprep.subr.bf16.mxu0 %v6877_v19 }
 0x1b7   :  { %2239 = vmatpush1.bf16.msra.mxu1 %v6016_v8  ;;  %v6096_v8 = vcombine.low %v569_v55, %v573_v59  ;;  %v6932_v55 = vld [vmem:[%s9954_s5 + $0x460] ss:$28 sps:$4 sm:$0xff]  }
 0x1b8   :  { %2240 = vmatprep.subr.bf16.mxu1 %v6025_v12  ;;  %v6105_v12 = vcombine.high %v577_v2, %v581_v3 }
 0x1b9   :  { %5190 = vmatpush1.bf16.msra.mxu0 %v6875_v11 }
 0x1ba   :  { %5191 = vmatprep.subr.bf16.mxu0 %v6880_v13 }
 0x1bb   :  { %2241 = vmatpush1.bf16.msra.mxu1 %v6024_v14 }
 0x1bc   :  { %2242 = vmatprep.subr.bf16.mxu1 %v6033_v22 }
 0x1bd   :  { %5192 = vmatpush1.bf16.msra.mxu0 %v6878_v18 }
 0x1be   :  { %5193 = vmatprep.subr.bf16.mxu0 %v6883_v23  ;;  %v6104_v23 = vcombine.low %v577_v2, %v581_v3  ;;  %v641_v3 = vld [vmem:[%s9952_s3 + $0x7d8] sm:$0xff] }
 0x1bf   :  { %2243 = vmatpush1.bf16.msra.mxu1 %v6032_v24  ;;  %v6113_v24 = vcombine.high %v585_v16, %v589_v17  ;;  %v6892_v16 = vld [vmem:[%s9954_s5 + $0x44] ss:$28 sps:$4 sm:$0xff]  }
 0x1c0   :  { %2244 = vmatprep.subr.bf16.mxu1 %v6041_v28  ;;  %v6908_v28 = vld [vmem:[%s9954_s5 + $0x380] ss:$28 sps:$4 sm:$0xff]  }
 0x1c1   :  { %5194 = vmatpush1.bf16.msra.mxu0 %v6881_v27  ;;  %v597_v27 = vld [vmem:[%s9952_s3 + $0x678] sm:$0xff] }
 0x1c2   :  { %5195 = vmatprep.subr.bf16.mxu0 %v6886_v29  ;;  %v6121_v32 = vcombine.high %v593_v25, %v597_v27  ;;  %v6120_v37 = vcombine.low %v593_v25, %v597_v27  ;;  %v6890_v17 = vld [vmem:[%s9954_s5 + $0x40] ss:$28 sps:$4 sm:$0xff]   ;;  %v6976_v25 = vld [vmem:[%s9954_s5 + $0x5ec] ss:$28 sps:$4 sm:$0xff]   ;;  %v6898_v27 = vld [vmem:[%s9954_s5 + $0xb4] ss:$28 sps:$4 sm:$0xff]  }
 0x1c3   :  { %2245 = vmatpush1.bf16.msra.mxu1 %v6040_v30  ;;  %v6916_v30 = vld [vmem:[%s9954_s5 + $0x3bc] ss:$28 sps:$4 sm:$0xff]  }
 0x1c4   :  { %2255 = vmatprep.subr.bf16.mxu1 %v6049_v34  ;;  %v605_v34 = vld [vmem:[%s9952_s3 + $0x6b8] sm:$0xff] }
 0x1c5   :  { %5196 = vmatpush1.bf16.msra.mxu0 %v6884_v33  ;;  %v601_v33 = vld [vmem:[%s9952_s3 + $0x698] sm:$0xff] }
 0x1c6   :  { %2247 = vmatmul.mubr.bf16.vlgmr.msra.gmra.mrb[12].mxu1 %v7914_v21  ;;  %5206 = vmatprep.subr.bf16.mxu0 %v6910_v35  ;;  %v553_v21 = vld [vmem:[%s9952_s3 + $0x518] sm:$0xff]  ;;  %v6128_v43 = vcombine.low %v601_v33, %v605_v34 }
 0x1c7   :  { %2256 = vmatpush1.bf16.msra.mxu1 %v6048_v36  ;;  %2287 = vmatprep.mubr.bf16.mxu1 %v7912_v20  ;;  %v557_v20 = vld [vmem:[%s9952_s3 + $0x538] sm:$0xff]  ;;  %v6922_v36 = vld [vmem:[%s9954_s5 + $0x3f4] ss:$28 sps:$4 sm:$0xff]  }
 0x1c8   :  { %2257 = vmatprep.subr.bf16.mxu1 %v6057_v38  ;;  %v6081_v48 = vcombine.high %v553_v21, %v557_v20  ;;  %v6080_v50 = vcombine.low %v553_v21, %v557_v20  ;;  %v6914_v35 = vld [vmem:[%s9954_s5 + $0x3b8] ss:$28 sps:$4 sm:$0xff]   ;;  %v6129_v38 = vcombine.high %v601_v33, %v605_v34  ;;  %v6926_v20 = vld [vmem:[%s9954_s5 + $0x428] ss:$28 sps:$4 sm:$0xff]   ;;  %v6980_v34 = vld [vmem:[%s9954_s5 + $0x620] ss:$28 sps:$4 sm:$0xff]  }
 0x1c9   :  { %v617_v21 = vld [vmem:[%s9952_s3 + $0x718] sm:$0xff]  ;;  %v6899_v33 = vld [vmem:[%s9954_s5 + $0xe8] ss:$28 sps:$4 sm:$0xff]  }
 0x1cb   :  { %2258 = vmatpush1.bf16.msra.mxu1 %v6056_v40  ;;  %v613_v40 = vld [vmem:[%s9952_s3 + $0x6f8] sm:$0xff] }
 0x1cc   :  { %2259 = vmatprep.subr.bf16.mxu1 %v6065_v42  ;;  %v6928_v42 = vld [vmem:[%s9954_s5 + $0x42c] ss:$28 sps:$4 sm:$0xff]   ;;  %v6136_v47 = vcombine.low %v609_v39, %v613_v40 }
 0x1cf   :  { %2260 = vmatpush1.bf16.msra.mxu1 %v6064_v44  ;;  %v6137_v44 = vcombine.high %v609_v39, %v613_v40  ;;  %v6902_v39 = vld [vmem:[%s9954_s5 + $0x120] ss:$28 sps:$4 sm:$0xff]  }
 0x1d0   :  { %2261 = vmatprep.subr.bf16.mxu1 %v6073_v45  ;;  %v621_v45 = vld [vmem:[%s9952_s3 + $0x738] sm:$0xff] }
 0x1d1   :  { %v6144_v59 = vcombine.low %v617_v21, %v621_v45  ;;  %v6907_v40 = vld [vmem:[%s9954_s5 + $0x15c] ss:$28 sps:$4 sm:$0xff]  }
 0x1d3   :  { %2262 = vmatpush1.bf16.msra.mxu1 %v6072_v46  ;;  %v6934_v46 = vld [vmem:[%s9954_s5 + $0x464] ss:$28 sps:$4 sm:$0xff]  }
 0x1d4   :  { %2263 = vmatprep.subr.bf16.mxu1 %v6081_v48  ;;  %v6145_v48 = vcombine.high %v617_v21, %v621_v45  ;;  %v6998_v21 = vld [vmem:[%s9954_s5 + $0x6c8] ss:$28 sps:$4 sm:$0xff]  }
 0x1d5   :  { %v7006_v45 = vld [vmem:[%s9954_s5 + $0x704] ss:$28 sps:$4 sm:$0xff]  }
 0x1d7   :  { %2264 = vmatpush1.bf16.msra.mxu1 %v6080_v50  ;;  %v629_v50 = vld [vmem:[%s9952_s3 + $0x778] sm:$0xff] }
 0x1d8   :  { %2265 = vmatprep.subr.bf16.mxu1 %v6089_v58  ;;  %v6940_v58 = vld [vmem:[%s9954_s5 + $0x49c] ss:$28 sps:$4 sm:$0xff]  }
 0x1d9   :  { %v2002_v0 = vpop.f32.mrb[4].mxu1  ;;  %v2043_v1 = vpop.f32.mrb[4].mxu0 }
 0x1da   :  { %v2003_v4 = vadd.f32 %v2002_v0, %v651_v60  ;;  %v2004_v5 = vpop.f32.mrb[5].mxu1  ;;  %v2045_v6 = vpop.f32.mrb[5].mxu0  ;;  %v6153_v60 = vcombine.high %v625_v49, %v629_v50  ;;  %v6946_v0 = vld [vmem:[%s9954_s5 + $0x4d4] ss:$28 sps:$4 sm:$0xff]  }
 0x1db   :  { %v2005_v7 = vadd.f32 %v2004_v5, %v655_v62  ;;  %2266 = vmatpush1.bf16.msra.mxu1 %v6088_v61  ;;  %v2006_v19 = vpop.f32.mrb[6].mxu1  ;;  %v2047_v9 = vpop.f32.mrb[6].mxu0  ;;  %v633_v61 = vld [vmem:[%s9952_s3 + $0x798] sm:$0xff]  ;;  %v6944_v5 = vld [vmem:[%s9954_s5 + $0x4d0] ss:$28 sps:$4 sm:$0xff]  }
 0x1dc   :  { %v2044_v10 = vadd.f32 %v2043_v1, %v2003_v4  ;;  %v2007_v11 = vpop.f32.mrb[7].mxu1  ;;  %2267 = vmatprep.subr.bf16.mxu1 %v6097_v63  ;;  %v2048_v13 = vpop.f32.mrb[7].mxu0  ;;  %v637_v62 = vld [vmem:[%s9952_s3 + $0x7b8] sm:$0xff]  ;;  %v6152_v1 = vcombine.low %v625_v49, %v629_v50  ;;  %v6958_v9 = vld [vmem:[%s9954_s5 + $0x544] ss:$28 sps:$4 sm:$0xff]  }
 0x1dd   :  { %v2046_v14 = vadd.f32 %v2045_v6, %v2005_v7  ;;  %v6938_v63 = vld [vmem:[%s9954_s5 + $0x498] ss:$28 sps:$4 sm:$0xff]   ;;  %v6161_v2 = vcombine.high %v633_v61, %v637_v62  ;;  %v6952_v6 = vld [vmem:[%s9954_s5 + $0x50c] ss:$28 sps:$4 sm:$0xff]   ;;  %v6160_v7 = vcombine.low %v633_v61, %v637_v62  ;;  %v6956_v13 = vld [vmem:[%s9954_s5 + $0x540] ss:$28 sps:$4 sm:$0xff]  }
 0x1de   :  { %v2296_v18 = vmax.f32 %v2044_v10, 0.0  ;;  %v645_v4 = vld [vmem:[%s9952_s3 + $0x7f8] sm:$0xff]  ;;  %v6889_v11 = vld [vmem:[%s9954_s5 + $0xc] ss:$28 sps:$4 sm:$0xff]   ;;  %v6949_v62 = vld [vmem:[%s9954_s5 + $0x2e4] ss:$28 sps:$4 sm:$0xff]  }
 0x1df   :  { %v2297_v22 = vmax.f32 %v2046_v14, 0.0  ;;  %2268 = vmatpush1.bf16.msra.mxu1 %v6096_v8  ;;  %v6169_v19 = vcombine.high %v641_v3, %v645_v4  ;;  %v6950_v8 = vld [vmem:[%s9954_s5 + $0x508] ss:$28 sps:$4 sm:$0xff]   ;;  %v6168_v10 = vcombine.low %v641_v3, %v645_v4  ;;  %v6964_v14 = vld [vmem:[%s9954_s5 + $0x57c] ss:$28 sps:$4 sm:$0xff]  }
 0x1e0   :  { %2269 = vmatprep.subr.bf16.mxu1 %v6105_v12  ;;  %v8560_v29 = vpack.c.bf16 %v2296_v18, %v2296_v18  ;;  %v6887_v12 = vld [vmem:[%s9954_s5 + $0x8] ss:$28 sps:$4 sm:$0xff]   ;;  %v6962_v18 = vld [vmem:[%s9954_s5 + $0x578] ss:$28 sps:$4 sm:$0xff]   ;;  %v6923_v49 = vld [vmem:[%s9954_s5 + $0x200] ss:$28 sps:$4 sm:$0xff]  }
 0x1e1   :  { %v8552_v26 = vpack.c.bf16 %v2297_v22, %v2297_v22  ;;  %v6970_v22 = vld [vmem:[%s9954_s5 + $0x5b4] ss:$28 sps:$4 sm:$0xff]   ;;  %v6931_v50 = vld [vmem:[%s9954_s5 + $0x23c] ss:$28 sps:$4 sm:$0xff]   ;;  %v6941_v61 = vld [vmem:[%s9954_s5 + $0x2a8] ss:$28 sps:$4 sm:$0xff]  }
 0x1e2   :  { %v6959_v3 = vld [vmem:[%s9954_s5 + $0x350] ss:$28 sps:$4 sm:$0xff]  }
 0x1e3   :  { %2270 = vmatpush1.bf16.msra.mxu1 %v6104_v23  ;;  %5197 = vmatprep.mubr.bf16.mxu0 %v8552_v26  ;;  %v6895_v23 = vld [vmem:[%s9954_s5 + $0x7c] ss:$28 sps:$4 sm:$0xff]   ;;  %v6967_v4 = vld [vmem:[%s9954_s5 + $0x38c] ss:$28 sps:$4 sm:$0xff]  }
 0x1e4   :  { %5198 = vmatmul.mubr.bf16.vlgmr.msra.gmra.mrb[12].mxu0 %v8560_v29  ;;  %2271 = vmatprep.subr.bf16.mxu1 %v6113_v24  ;;  %v6893_v24 = vld [vmem:[%s9954_s5 + $0x78] ss:$28 sps:$4 sm:$0xff]  }
 0x1e5   :  { %5207 = vmatpush1.bf16.msra.mxu0 %v6908_v28  ;;  %v6896_v28 = vld [vmem:[%s9954_s5 + $0xb0] ss:$28 sps:$4 sm:$0xff]  }
 0x1e6   :  { %5208 = vmatprep.subr.bf16.mxu0 %v6916_v30  ;;  %v6974_v30 = vld [vmem:[%s9954_s5 + $0x5e8] ss:$28 sps:$4 sm:$0xff]  }
 0x1e7   :  { %2272 = vmatpush1.bf16.msra.mxu1 %v6112_v31  ;;  %v6982_v31 = vld [vmem:[%s9954_s5 + $0x624] ss:$28 sps:$4 sm:$0xff]  }
 0x1e8   :  { %2273 = vmatprep.subr.bf16.mxu1 %v6121_v32  ;;  %v6901_v32 = vld [vmem:[%s9954_s5 + $0xec] ss:$28 sps:$4 sm:$0xff]  }
 0x1e9   :  { %5209 = vmatpush1.bf16.msra.mxu0 %v6914_v35  ;;  %v6988_v35 = vld [vmem:[%s9954_s5 + $0x65c] ss:$28 sps:$4 sm:$0xff]  }
 0x1ea   :  { %5210 = vmatprep.subr.bf16.mxu0 %v6922_v36  ;;  %v6904_v36 = vld [vmem:[%s9954_s5 + $0x124] ss:$28 sps:$4 sm:$0xff]  }
 0x1eb   :  { %2274 = vmatpush1.bf16.msra.mxu1 %v6120_v37  ;;  %v6986_v37 = vld [vmem:[%s9954_s5 + $0x658] ss:$28 sps:$4 sm:$0xff]  }
 0x1ec   :  { %2275 = vmatprep.subr.bf16.mxu1 %v6129_v38  ;;  %v6994_v38 = vld [vmem:[%s9954_s5 + $0x694] ss:$28 sps:$4 sm:$0xff]  }
 0x1ed   :  { %5211 = vmatpush1.bf16.msra.mxu0 %v6920_v41  ;;  %v6992_v41 = vld [vmem:[%s9954_s5 + $0x690] ss:$28 sps:$4 sm:$0xff]  }
 0x1ee   :  { %5212 = vmatprep.subr.bf16.mxu0 %v6928_v42  ;;  %v7000_v42 = vld [vmem:[%s9954_s5 + $0x6cc] ss:$28 sps:$4 sm:$0xff]  }
 0x1ef   :  { %2276 = vmatpush1.bf16.msra.mxu1 %v6128_v43  ;;  %v6905_v43 = vld [vmem:[%s9954_s5 + $0x158] ss:$28 sps:$4 sm:$0xff]  }
 0x1f0   :  { %2277 = vmatprep.subr.bf16.mxu1 %v6137_v44  ;;  %v6913_v44 = vld [vmem:[%s9954_s5 + $0x194] ss:$28 sps:$4 sm:$0xff]  }
 0x1f1   :  { %5213 = vmatpush1.bf16.msra.mxu0 %v6926_v20  ;;  %v6911_v20 = vld [vmem:[%s9954_s5 + $0x190] ss:$28 sps:$4 sm:$0xff]  }
 0x1f2   :  { %5214 = vmatprep.subr.bf16.mxu0 %v6934_v46  ;;  %v6919_v46 = vld [vmem:[%s9954_s5 + $0x1cc] ss:$28 sps:$4 sm:$0xff]  }
 0x1f3   :  { %2278 = vmatpush1.bf16.msra.mxu1 %v6136_v47  ;;  %v6917_v47 = vld [vmem:[%s9954_s5 + $0x1c8] ss:$28 sps:$4 sm:$0xff]  }
 0x1f4   :  { %2279 = vmatprep.subr.bf16.mxu1 %v6145_v48  ;;  %v6925_v48 = vld [vmem:[%s9954_s5 + $0x204] ss:$28 sps:$4 sm:$0xff]  }
 0x1f5   :  { %5215 = vmatpush1.bf16.msra.mxu0 %v6932_v55  ;;  %v6929_v55 = vld [vmem:[%s9954_s5 + $0x238] ss:$28 sps:$4 sm:$0xff]  }
 0x1f6   :  { %5216 = vmatprep.subr.bf16.mxu0 %v6940_v58  ;;  %v6937_v58 = vld [vmem:[%s9954_s5 + $0x274] ss:$28 sps:$4 sm:$0xff]  }
 0x1f7   :  { %2280 = vmatpush1.bf16.msra.mxu1 %v6144_v59  ;;  %v6935_v59 = vld [vmem:[%s9954_s5 + $0x270] ss:$28 sps:$4 sm:$0xff]  }
 0x1f8   :  { %2281 = vmatprep.subr.bf16.mxu1 %v6153_v60  ;;  %v6943_v60 = vld [vmem:[%s9954_s5 + $0x2ac] ss:$28 sps:$4 sm:$0xff]  }
 0x1f9   :  { %5217 = vmatpush1.bf16.msra.mxu0 %v6938_v63  ;;  %v6947_v63 = vld [vmem:[%s9954_s5 + $0x2e0] ss:$28 sps:$4 sm:$0xff]  }
 0x1fa   :  { %5218 = vmatprep.subr.bf16.mxu0 %v6946_v0  ;;  %v6955_v0 = vld [vmem:[%s9954_s5 + $0x31c] ss:$28 sps:$4 sm:$0xff]  }
 0x1fb   :  { %2282 = vmatpush1.bf16.msra.mxu1 %v6152_v1  ;;  %v6953_v1 = vld [vmem:[%s9954_s5 + $0x318] ss:$28 sps:$4 sm:$0xff]  }
 0x1fc   :  { %2283 = vmatprep.subr.bf16.mxu1 %v6161_v2  ;;  %v6961_v2 = vld [vmem:[%s9954_s5 + $0x354] ss:$28 sps:$4 sm:$0xff]  }
 0x1fd   :  { %5219 = vmatpush1.bf16.msra.mxu0 %v6944_v5  ;;  %v6965_v5 = vld [vmem:[%s9954_s5 + $0x388] ss:$28 sps:$4 sm:$0xff]  }
 0x1fe   :  { %5220 = vmatprep.subr.bf16.mxu0 %v6952_v6  ;;  %v6973_v6 = vld [vmem:[%s9954_s5 + $0x3c4] ss:$28 sps:$4 sm:$0xff]  }
 0x1ff   :  { %2284 = vmatpush1.bf16.msra.mxu1 %v6160_v7  ;;  %v6971_v7 = vld [vmem:[%s9954_s5 + $0x3c0] ss:$28 sps:$4 sm:$0xff]  }
 0x200   :  { %2285 = vmatprep.subr.bf16.mxu1 %v6169_v19  ;;  %v6979_v19 = vld [vmem:[%s9954_s5 + $0x3fc] ss:$28 sps:$4 sm:$0xff]  }
 0x201   :  { %5221 = vmatpush1.bf16.msra.mxu0 %v6950_v8  ;;  %v6977_v8 = vld [vmem:[%s9954_s5 + $0x3f8] ss:$28 sps:$4 sm:$0xff]  }
 0x202   :  { %5222 = vmatprep.subr.bf16.mxu0 %v6958_v9  ;;  %v6985_v9 = vld [vmem:[%s9954_s5 + $0x434] ss:$28 sps:$4 sm:$0xff]  }
 0x203   :  { %2286 = vmatpush1.bf16.msra.mxu1 %v6168_v10  ;;  %v6983_v10 = vld [vmem:[%s9954_s5 + $0x430] ss:$28 sps:$4 sm:$0xff]  }
 0x204   :  { %5329 = vmatprep.subr.bf16.mxu1 %v6889_v11  ;;  %v6991_v11 = vld [vmem:[%s9954_s5 + $0x46c] ss:$28 sps:$4 sm:$0xff]  }
 0x205   :  { %5223 = vmatpush1.bf16.msra.mxu0 %v6956_v13  ;;  %v670_v13 = vsub.s32 5, %v7875_v52 }
 0x206   :  { %2288 = vmatmul.mubr.bf16.vlgmr.msra.gmra.mrb[12].mxu1 %v7899_v15  ;;  %5224 = vmatprep.subr.bf16.mxu0 %v6964_v14  ;;  %v6968_v15 = vld [vmem:[%s9954_s5 + $0x5b0] ss:$28 sps:$4 sm:$0xff]   ;;  %v6997_v14 = vld [vmem:[%s9954_s5 + $0x4a4] ss:$28 sps:$4 sm:$0xff]  }
 0x207   :  { %5330 = vmatpush1.bf16.msra.mxu1 %v6887_v12  ;;  %5361 = vmatprep.mubr.bf16.mxu1 %v8552_v26  ;;  %v6989_v12 = vld [vmem:[%s9954_s5 + $0x468] ss:$28 sps:$4 sm:$0xff]  }
 0x208   :  { %5331 = vmatprep.subr.bf16.mxu1 %v6892_v16  ;;  %v659_v16 = vrot.slane %v8525_v51, %v7881_v54 }
 0x209   :  { %5225 = vmatpush1.bf16.msra.mxu0 %v6962_v18  ;;  %v6995_v18 = vld [vmem:[%s9954_s5 + $0x4a0] ss:$28 sps:$4 sm:$0xff]  }
 0x20a   :  { %5226 = vmatprep.subr.bf16.mxu0 %v6970_v22  ;;  %v671_v22 = vrot.slane %v8525_v51, %v670_v13 }
 0x20b   :  { %5332 = vmatpush1.bf16.msra.mxu1 %v6890_v17  ;;  %v663_v17 = vrot.slane %v8525_v51, %v7890_v57 }
 0x20c   :  { %5333 = vmatprep.subr.bf16.mxu1 %v6895_v23  ;;  %v7003_v23 = vld [vmem:[%s9954_s5 + $0x4dc] ss:$28 sps:$4 sm:$0xff]  }
 0x20d   :  { %5227 = vmatpush1.bf16.msra.mxu0 %v6968_v15 }
 0x20e   :  { %5228 = vmatprep.subr.bf16.mxu0 %v6976_v25 }
 0x20f   :  { %5334 = vmatpush1.bf16.msra.mxu1 %v6893_v24 }
 0x210   :  { %5335 = vmatprep.subr.bf16.mxu1 %v6898_v27 }
 0x211   :  { %5229 = vmatpush1.bf16.msra.mxu0 %v6974_v30 }
 0x212   :  { %5230 = vmatprep.subr.bf16.mxu0 %v6982_v31 }
 0x213   :  { %5336 = vmatpush1.bf16.msra.mxu1 %v6896_v28 }
 0x214   :  { %5337 = vmatprep.subr.bf16.mxu1 %v6901_v32  ;;  %v7001_v32 = vld [vmem:[%s9954_s5 + $0x4d8] ss:$28 sps:$4 sm:$0xff]  }
 0x215   :  { %5231 = vmatpush1.bf16.msra.mxu0 %v6980_v34 }
 0x216   :  { %5232 = vmatprep.subr.bf16.mxu0 %v6988_v35 }
 0x217   :  { %5338 = vmatpush1.bf16.msra.mxu1 %v6899_v33 }
 0x218   :  { %5339 = vmatprep.subr.bf16.mxu1 %v6904_v36 }
 0x219   :  { %5233 = vmatpush1.bf16.msra.mxu0 %v6986_v37  ;;  %v7009_v37 = vld [vmem:[%s9954_s5 + $0x514] ss:$28 sps:$4 sm:$0xff]  }
 0x21a   :  { %5234 = vmatprep.subr.bf16.mxu0 %v6994_v38 }
 0x21b   :  { %5340 = vmatpush1.bf16.msra.mxu1 %v6902_v39 }
 0x21c   :  { %5341 = vmatprep.subr.bf16.mxu1 %v6907_v40 }
 0x21d   :  { %5235 = vmatpush1.bf16.msra.mxu0 %v6992_v41 }
 0x21e   :  { %5236 = vmatprep.subr.bf16.mxu0 %v7000_v42  ;;  %v7004_v42 = vld [vmem:[%s9954_s5 + $0x700] ss:$28 sps:$4 sm:$0xff]  }
 0x21f   :  { %5342 = vmatpush1.bf16.msra.mxu1 %v6905_v43 }
 0x220   :  { %5343 = vmatprep.subr.bf16.mxu1 %v6913_v44  ;;  %v7007_v44 = vld [vmem:[%s9954_s5 + $0x510] ss:$28 sps:$4 sm:$0xff]  }
 0x221   :  { %5237 = vmatpush1.bf16.msra.mxu0 %v6998_v21  ;;  %v7012_v21 = vld [vmem:[%s9954_s5 + $0x73c] ss:$28 sps:$4 sm:$0xff]  }
 0x222   :  { %5247 = vmatprep.subr.bf16.mxu0 %v7006_v45 }
 0x223   :  { %5344 = vmatpush1.bf16.msra.mxu1 %v6911_v20  ;;  %v7015_v20 = vld [vmem:[%s9954_s5 + $0x54c] ss:$28 sps:$4 sm:$0xff]  }
 0x224   :  { %5345 = vmatprep.subr.bf16.mxu1 %v6919_v46  ;;  %v7010_v46 = vld [vmem:[%s9954_s5 + $0x738] ss:$28 sps:$4 sm:$0xff]  }
 0x227   :  { %5346 = vmatpush1.bf16.msra.mxu1 %v6917_v47  ;;  %v7013_v47 = vld [vmem:[%s9954_s5 + $0x548] ss:$28 sps:$4 sm:$0xff]  }
 0x228   :  { %5347 = vmatprep.subr.bf16.mxu1 %v6925_v48  ;;  %v7018_v48 = vld [vmem:[%s9954_s5 + $0x774] ss:$28 sps:$4 sm:$0xff]  }
 0x22b   :  { %5348 = vmatpush1.bf16.msra.mxu1 %v6923_v49  ;;  %v7021_v49 = vld [vmem:[%s9954_s5 + $0x584] ss:$28 sps:$4 sm:$0xff]  }
 0x22c   :  { %5349 = vmatprep.subr.bf16.mxu1 %v6931_v50  ;;  %v7016_v50 = vld [vmem:[%s9954_s5 + $0x770] ss:$28 sps:$4 sm:$0xff]  }
 0x22f   :  { %5350 = vmatpush1.bf16.msra.mxu1 %v6929_v55  ;;  %v7019_v55 = vld [vmem:[%s9954_s5 + $0x580] ss:$28 sps:$4 sm:$0xff]  }
 0x230   :  { %5351 = vmatprep.subr.bf16.mxu1 %v6937_v58  ;;  %v7024_v58 = vld [vmem:[%s9954_s5 + $0x7ac] ss:$28 sps:$4 sm:$0xff]  }
 0x233   :  { %5352 = vmatpush1.bf16.msra.mxu1 %v6935_v59  ;;  %v7027_v59 = vld [vmem:[%s9954_s5 + $0x5bc] ss:$28 sps:$4 sm:$0xff]  }
 0x234   :  { %5353 = vmatprep.subr.bf16.mxu1 %v6943_v60  ;;  %v7022_v60 = vld [vmem:[%s9954_s5 + $0x7a8] ss:$28 sps:$4 sm:$0xff]  }
 0x237   :  { %5354 = vmatpush1.bf16.msra.mxu1 %v6941_v61  ;;  %v7025_v61 = vld [vmem:[%s9954_s5 + $0x5b8] ss:$28 sps:$4 sm:$0xff]  }
 0x238   :  { %5355 = vmatprep.subr.bf16.mxu1 %v6949_v62  ;;  %v7030_v62 = vld [vmem:[%s9954_s5 + $0x7e4] ss:$28 sps:$4 sm:$0xff]  }
 0x23b   :  { %5356 = vmatpush1.bf16.msra.mxu1 %v6947_v63  ;;  %v7033_v63 = vld [vmem:[%s9954_s5 + $0x5f4] ss:$28 sps:$4 sm:$0xff]  }
 0x23c   :  { %5357 = vmatprep.subr.bf16.mxu1 %v6955_v0  ;;  %v7028_v0 = vld [vmem:[%s9954_s5 + $0x7e0] ss:$28 sps:$4 sm:$0xff]  }
 0x23f   :  { %5358 = vmatpush1.bf16.msra.mxu1 %v6953_v1  ;;  %v7031_v1 = vld [vmem:[%s9954_s5 + $0x5f0] ss:$28 sps:$4 sm:$0xff]  }
 0x240   :  { %5359 = vmatprep.subr.bf16.mxu1 %v6961_v2  ;;  %v7036_v2 = vld [vmem:[%s9954_s5 + $0x81c] ss:$28 sps:$4 sm:$0xff]  }
 0x243   :  { %5360 = vmatpush1.bf16.msra.mxu1 %v6959_v3  ;;  %v7039_v3 = vld [vmem:[%s9954_s5 + $0x62c] ss:$28 sps:$4 sm:$0xff]  }
 0x244   :  { %5370 = vmatprep.subr.bf16.mxu1 %v6967_v4  ;;  %v7034_v4 = vld [vmem:[%s9954_s5 + $0x818] ss:$28 sps:$4 sm:$0xff]  }
 0x246   :  { %5362 = vmatmul.mubr.bf16.vlgmr.msra.gmra.mrb[16].mxu1 %v8560_v29 }
 0x247   :  { %5371 = vmatpush1.bf16.msra.mxu1 %v6965_v5  ;;  %v7037_v5 = vld [vmem:[%s9954_s5 + $0x628] ss:$28 sps:$4 sm:$0xff]  }
 0x248   :  { %5372 = vmatprep.subr.bf16.mxu1 %v6973_v6  ;;  %v7042_v6 = vld [vmem:[%s9954_s5 + $0x854] ss:$28 sps:$4 sm:$0xff]  }
 0x24b   :  { %5373 = vmatpush1.bf16.msra.mxu1 %v6971_v7  ;;  %v7045_v7 = vld [vmem:[%s9954_s5 + $0x664] ss:$28 sps:$4 sm:$0xff]  }
 0x24c   :  { %5374 = vmatprep.subr.bf16.mxu1 %v6979_v19  ;;  %v7040_v19 = vld [vmem:[%s9954_s5 + $0x850] ss:$28 sps:$4 sm:$0xff]  }
 0x24f   :  { %5375 = vmatpush1.bf16.msra.mxu1 %v6977_v8  ;;  %v7043_v8 = vld [vmem:[%s9954_s5 + $0x660] ss:$28 sps:$4 sm:$0xff]  }
 0x250   :  { %5376 = vmatprep.subr.bf16.mxu1 %v6985_v9  ;;  %v7048_v9 = vld [vmem:[%s9954_s5 + $0x88c] ss:$28 sps:$4 sm:$0xff]  }
 0x253   :  { %5377 = vmatpush1.bf16.msra.mxu1 %v6983_v10  ;;  %v7051_v10 = vld [vmem:[%s9954_s5 + $0x69c] ss:$28 sps:$4 sm:$0xff]  }
 0x254   :  { %5378 = vmatprep.subr.bf16.mxu1 %v6991_v11  ;;  %v7046_v11 = vld [vmem:[%s9954_s5 + $0x888] ss:$28 sps:$4 sm:$0xff]  }
 0x257   :  { %5379 = vmatpush1.bf16.msra.mxu1 %v6989_v12  ;;  %v7049_v12 = vld [vmem:[%s9954_s5 + $0x698] ss:$28 sps:$4 sm:$0xff]  }
 0x258   :  { %5380 = vmatprep.subr.bf16.mxu1 %v6997_v14  ;;  %v7054_v14 = vld [vmem:[%s9954_s5 + $0x8c4] ss:$28 sps:$4 sm:$0xff]  }
 0x259   :  { %v2125_v24 = vpop.f32.mrb[8].mxu1 }
 0x25a   :  { %v6717_v15 = vadd.f32 %v2125_v24, %v659_v16  ;;  %v8839_v25 = vpop.f32.mrb[8].mxu0  ;;  %v2127_v27 = vpop.f32.mrb[9].mxu1  ;;  %v7057_v16 = vld [vmem:[%s9954_s5 + $0x6d4] ss:$28 sps:$4 sm:$0xff]  }
 0x25b   :  { %v6718_v28 = vadd.f32 %v2127_v27, %v663_v17  ;;  %v2209_v30 = vpop.f32.mrb[9].mxu0  ;;  %v2129_v31 = vpop.f32.mrb[10].mxu1  ;;  %5381 = vmatpush1.bf16.msra.mxu1 %v6995_v18  ;;  %v7052_v17 = vld [vmem:[%s9954_s5 + $0x8c0] ss:$28 sps:$4 sm:$0xff]   ;;  %v7055_v18 = vld [vmem:[%s9954_s5 + $0x6d0] ss:$28 sps:$4 sm:$0xff]  }
 0x25c   :  { %v2298_v33 = vmax.f32 %v6717_v15, 0.0  ;;  %v6720_v34 = vadd.f32 %v2209_v30, %v671_v22  ;;  %v2211_v35 = vpop.f32.mrb[10].mxu0  ;;  %v2130_v36 = vpop.f32.mrb[11].mxu1  ;;  %5382 = vmatprep.subr.bf16.mxu1 %v7003_v23  ;;  %v7060_v22 = vld [vmem:[%s9954_s5 + $0x8fc] ss:$28 sps:$4 sm:$0xff]  }
 0x25d   :  { %v2299_v38 = vmax.f32 %v6718_v28, 0.0  ;;  %v2212_v39 = vpop.f32.mrb[11].mxu0  ;;  %v7063_v23 = vld [vmem:[%s9954_s5 + $0x70c] ss:$28 sps:$4 sm:$0xff]   ;;  %v7058_v24 = vld [vmem:[%s9954_s5 + $0x8f8] ss:$28 sps:$4 sm:$0xff]  }
 0x25e   :  { %v2301_v40 = vmax.f32 %v6720_v34, 0.0  ;;  %v8852_v43 = vpack.c.bf16 %v2298_v33, %v2298_v33  ;;  %v7061_v15 = vld [vmem:[%s9954_s5 + $0x708] ss:$28 sps:$4 sm:$0xff]   ;;  %v7066_v27 = vld [vmem:[%s9954_s5 + $0x934] ss:$28 sps:$4 sm:$0xff]   ;;  %v666_v39 = vsub.s32 4, %v7875_v52 }
 0x25f   :  { %v8847_v41 = vpack.c.bf16 %v2299_v38, %v2299_v38  ;;  %5383 = vmatpush1.bf16.msra.mxu1 %v7001_v32  ;;  %v7069_v28 = vld [vmem:[%s9954_s5 + $0x744] ss:$28 sps:$4 sm:$0xff]   ;;  %v7064_v30 = vld [vmem:[%s9954_s5 + $0x930] ss:$28 sps:$4 sm:$0xff]   ;;  %v7075_v33 = vld [vmem:[%s9954_s5 + $0x77c] ss:$28 sps:$4 sm:$0xff]  }
 0x260   :  { %5384 = vmatprep.subr.bf16.mxu1 %v7009_v37  ;;  %v8860_v45 = vpack.c.bf16 %v2301_v40, %v2301_v40  ;;  %v7067_v31 = vld [vmem:[%s9954_s5 + $0x740] ss:$28 sps:$4 sm:$0xff]   ;;  %v7072_v32 = vld [vmem:[%s9954_s5 + $0x96c] ss:$28 sps:$4 sm:$0xff]   ;;  %v7073_v35 = vld [vmem:[%s9954_s5 + $0x778] ss:$28 sps:$4 sm:$0xff]  }
 0x261   :  { %5238 = vmatprep.mubr.bf16.mxu0 %v8847_v41  ;;  %5402 = vmatprep.mubr.bf16.mxu1 %v8847_v41  ;;  %v7070_v34 = vld [vmem:[%s9954_s5 + $0x968] ss:$28 sps:$4 sm:$0xff]   ;;  %v7081_v37 = vld [vmem:[%s9954_s5 + $0x7b4] ss:$28 sps:$4 sm:$0xff]   ;;  %v7076_v38 = vld [vmem:[%s9954_s5 + $0x9a0] ss:$28 sps:$4 sm:$0xff]  }
 0x262   :  { %5239 = vmatmul.mubr.bf16.vlgmr.msra.gmra.mrb[12].mxu0 %v8852_v43  ;;  %v7078_v36 = vld [vmem:[%s9954_s5 + $0x9a4] ss:$28 sps:$4 sm:$0xff]   ;;  %v7079_v40 = vld [vmem:[%s9954_s5 + $0x7b0] ss:$28 sps:$4 sm:$0xff]  }
 0x263   :  { %5248 = vmatpush1.bf16.msra.mxu0 %v7004_v42  ;;  %5279 = vmatprep.mubr.bf16.mxu0 %v8860_v45  ;;  %v7084_v42 = vld [vmem:[%s9954_s5 + $0x9dc] ss:$28 sps:$4 sm:$0xff]  }
 0x264   :  { %5385 = vmatpush1.bf16.msra.mxu1 %v7007_v44  ;;  %5249 = vmatprep.subr.bf16.mxu0 %v7012_v21  ;;  %v7087_v44 = vld [vmem:[%s9954_s5 + $0x7ec] ss:$28 sps:$4 sm:$0xff]   ;;  %v7082_v21 = vld [vmem:[%s9954_s5 + $0x9d8] ss:$28 sps:$4 sm:$0xff]  }
 0x265   :  { %5386 = vmatprep.subr.bf16.mxu1 %v7015_v20  ;;  %v667_v20 = vrot.slane %v8525_v51, %v666_v39  ;;  %v7088_v51 = vld [vmem:[%s9954_s5 + $0xa10] ss:$28 sps:$4 sm:$0xff]  }
 0x267   :  { %5250 = vmatpush1.bf16.msra.mxu0 %v7010_v46  ;;  %v7085_v46 = vld [vmem:[%s9954_s5 + $0x7e8] ss:$28 sps:$4 sm:$0xff]  }
 0x268   :  { %5387 = vmatpush1.bf16.msra.mxu1 %v7013_v47  ;;  %5251 = vmatprep.subr.bf16.mxu0 %v7018_v48  ;;  %v7090_v47 = vld [vmem:[%s9954_s5 + $0xa14] ss:$28 sps:$4 sm:$0xff]   ;;  %v7093_v48 = vld [vmem:[%s9954_s5 + $0x824] ss:$28 sps:$4 sm:$0xff]  }
 0x269   :  { %5388 = vmatprep.subr.bf16.mxu1 %v7021_v49  ;;  %v6719_v49 = vadd.f32 %v8839_v25, %v667_v20  ;;  %v7094_v25 = vld [vmem:[%s9954_s5 + $0xa48] ss:$28 sps:$4 sm:$0xff]  }
 0x26a   :  { %v7157_v20 = vld [vmem:[%s9954_s5 + $0xa88] ss:$28 sps:$4 sm:$0xff]  }
 0x26b   :  { %5252 = vmatpush1.bf16.msra.mxu0 %v7016_v50  ;;  %v7091_v50 = vld [vmem:[%s9954_s5 + $0x820] ss:$28 sps:$4 sm:$0xff]  }
 0x26c   :  { %5389 = vmatpush1.bf16.msra.mxu1 %v7019_v55  ;;  %5253 = vmatprep.subr.bf16.mxu0 %v7024_v58  ;;  %v7096_v55 = vld [vmem:[%s9954_s5 + $0xa4c] ss:$28 sps:$4 sm:$0xff]   ;;  %v7099_v58 = vld [vmem:[%s9954_s5 + $0x85c] ss:$28 sps:$4 sm:$0xff]  }
 0x26d   :  { %5390 = vmatprep.subr.bf16.mxu1 %v7027_v59  ;;  %v2300_v59 = vmax.f32 %v6719_v49, 0.0  ;;  %v7168_v49 = vld [vmem:[%s9954_s5 + $0xcec] ss:$28 sps:$4 sm:$0xff]  }
 0x26f   :  { %5254 = vmatpush1.bf16.msra.mxu0 %v7022_v60  ;;  %v7097_v60 = vld [vmem:[%s9954_s5 + $0x858] ss:$28 sps:$4 sm:$0xff]  }
 0x270   :  { %5391 = vmatpush1.bf16.msra.mxu1 %v7025_v61  ;;  %5255 = vmatprep.subr.bf16.mxu0 %v7030_v62  ;;  %v7102_v61 = vld [vmem:[%s9954_s5 + $0xa84] ss:$28 sps:$4 sm:$0xff]   ;;  %v7105_v62 = vld [vmem:[%s9954_s5 + $0x894] ss:$28 sps:$4 sm:$0xff]  }
 0x271   :  { %5392 = vmatprep.subr.bf16.mxu1 %v7033_v63  ;;  %v7100_v63 = vld [vmem:[%s9954_s5 + $0xa80] ss:$28 sps:$4 sm:$0xff]  }
 0x273   :  { %5256 = vmatpush1.bf16.msra.mxu0 %v7028_v0  ;;  %v9059_v0 = vpack.c.bf16 %v2300_v59, %v2300_v59  ;;  %v7177_v59 = vld [vmem:[%s9954_s5 + $0xb34] ss:$28 sps:$4 sm:$0xff]  }
 0x274   :  { %5393 = vmatpush1.bf16.msra.mxu1 %v7031_v1  ;;  %5257 = vmatprep.subr.bf16.mxu0 %v7036_v2  ;;  %v7103_v1 = vld [vmem:[%s9954_s5 + $0x890] ss:$28 sps:$4 sm:$0xff]   ;;  %v7108_v2 = vld [vmem:[%s9954_s5 + $0xabc] ss:$28 sps:$4 sm:$0xff]  }
 0x275   :  { %5394 = vmatprep.subr.bf16.mxu1 %v7039_v3  ;;  %v7111_v3 = vld [vmem:[%s9954_s5 + $0x8cc] ss:$28 sps:$4 sm:$0xff]  }
 0x277   :  { %5258 = vmatpush1.bf16.msra.mxu0 %v7034_v4  ;;  %v7106_v4 = vld [vmem:[%s9954_s5 + $0xab8] ss:$28 sps:$4 sm:$0xff]  }
 0x278   :  { %5395 = vmatpush1.bf16.msra.mxu1 %v7037_v5  ;;  %5259 = vmatprep.subr.bf16.mxu0 %v7042_v6  ;;  %v7109_v5 = vld [vmem:[%s9954_s5 + $0x8c8] ss:$28 sps:$4 sm:$0xff]   ;;  %v7114_v6 = vld [vmem:[%s9954_s5 + $0xaf4] ss:$28 sps:$4 sm:$0xff]  }
 0x279   :  { %5396 = vmatprep.subr.bf16.mxu1 %v7045_v7  ;;  %v7117_v7 = vld [vmem:[%s9954_s5 + $0x904] ss:$28 sps:$4 sm:$0xff]  }
 0x27b   :  { %5260 = vmatpush1.bf16.msra.mxu0 %v7040_v19  ;;  %v7112_v19 = vld [vmem:[%s9954_s5 + $0xaf0] ss:$28 sps:$4 sm:$0xff]  }
 0x27c   :  { %5397 = vmatpush1.bf16.msra.mxu1 %v7043_v8  ;;  %5261 = vmatprep.subr.bf16.mxu0 %v7048_v9  ;;  %v7115_v8 = vld [vmem:[%s9954_s5 + $0x900] ss:$28 sps:$4 sm:$0xff]   ;;  %v7120_v9 = vld [vmem:[%s9954_s5 + $0xb2c] ss:$28 sps:$4 sm:$0xff]  }
 0x27d   :  { %5398 = vmatprep.subr.bf16.mxu1 %v7051_v10  ;;  %v7123_v10 = vld [vmem:[%s9954_s5 + $0x93c] ss:$28 sps:$4 sm:$0xff]  }
 0x27f   :  { %5262 = vmatpush1.bf16.msra.mxu0 %v7046_v11  ;;  %v7118_v11 = vld [vmem:[%s9954_s5 + $0xb28] ss:$28 sps:$4 sm:$0xff]  }
 0x280   :  { %5399 = vmatpush1.bf16.msra.mxu1 %v7049_v12  ;;  %5263 = vmatprep.subr.bf16.mxu0 %v7054_v14  ;;  %v7121_v12 = vld [vmem:[%s9954_s5 + $0x938] ss:$28 sps:$4 sm:$0xff]   ;;  %v7126_v14 = vld [vmem:[%s9954_s5 + $0xb64] ss:$28 sps:$4 sm:$0xff]  }
 0x281   :  { %5400 = vmatprep.subr.bf16.mxu1 %v7057_v16  ;;  %v7129_v16 = vld [vmem:[%s9954_s5 + $0x974] ss:$28 sps:$4 sm:$0xff]  }
 0x283   :  { %5264 = vmatpush1.bf16.msra.mxu0 %v7052_v17  ;;  %v7124_v17 = vld [vmem:[%s9954_s5 + $0xb60] ss:$28 sps:$4 sm:$0xff]  }
 0x284   :  { %5401 = vmatpush1.bf16.msra.mxu1 %v7055_v18  ;;  %5265 = vmatprep.subr.bf16.mxu0 %v7060_v22  ;;  %v7127_v18 = vld [vmem:[%s9954_s5 + $0x970] ss:$28 sps:$4 sm:$0xff]   ;;  %v7132_v22 = vld [vmem:[%s9954_s5 + $0xb9c] ss:$28 sps:$4 sm:$0xff]  }
 0x285   :  { %5411 = vmatprep.subr.bf16.mxu1 %v7063_v23  ;;  %v7135_v23 = vld [vmem:[%s9954_s5 + $0x9ac] ss:$28 sps:$4 sm:$0xff]  }
 0x287   :  { %5266 = vmatpush1.bf16.msra.mxu0 %v7058_v24  ;;  %5403 = vmatmul.mubr.bf16.vlgmr.msra.gmra.mrb[16].mxu1 %v8852_v43  ;;  %v7130_v24 = vld [vmem:[%s9954_s5 + $0xb98] ss:$28 sps:$4 sm:$0xff]  }
 0x288   :  { %5412 = vmatpush1.bf16.msra.mxu1 %v7061_v15  ;;  %5443 = vmatprep.mubr.bf16.mxu1 %v8860_v45  ;;  %v7133_v15 = vld [vmem:[%s9954_s5 + $0x9a8] ss:$28 sps:$4 sm:$0xff]  }
 0x289   :  { %5267 = vmatprep.subr.bf16.mxu0 %v7066_v27  ;;  %5413 = vmatprep.subr.bf16.mxu1 %v7069_v28  ;;  %v7138_v27 = vld [vmem:[%s9954_s5 + $0xbd4] ss:$28 sps:$4 sm:$0xff]   ;;  %v7141_v28 = vld [vmem:[%s9954_s5 + $0x9e4] ss:$28 sps:$4 sm:$0xff]  }
 0x28b   :  { %5268 = vmatpush1.bf16.msra.mxu0 %v7064_v30  ;;  %v7136_v30 = vld [vmem:[%s9954_s5 + $0xbd0] ss:$28 sps:$4 sm:$0xff]  }
 0x28c   :  { %5414 = vmatpush1.bf16.msra.mxu1 %v7067_v31  ;;  %5269 = vmatprep.subr.bf16.mxu0 %v7072_v32  ;;  %v7139_v31 = vld [vmem:[%s9954_s5 + $0x9e0] ss:$28 sps:$4 sm:$0xff]   ;;  %v7144_v32 = vld [vmem:[%s9954_s5 + $0xc0c] ss:$28 sps:$4 sm:$0xff]  }
 0x28d   :  { %5415 = vmatprep.subr.bf16.mxu1 %v7075_v33  ;;  %v7147_v33 = vld [vmem:[%s9954_s5 + $0xa1c] ss:$28 sps:$4 sm:$0xff]  }
 0x28f   :  { %5270 = vmatpush1.bf16.msra.mxu0 %v7070_v34  ;;  %v7142_v34 = vld [vmem:[%s9954_s5 + $0xc08] ss:$28 sps:$4 sm:$0xff]  }
 0x290   :  { %5416 = vmatpush1.bf16.msra.mxu1 %v7073_v35  ;;  %5271 = vmatprep.subr.bf16.mxu0 %v7078_v36  ;;  %v7145_v35 = vld [vmem:[%s9954_s5 + $0xa18] ss:$28 sps:$4 sm:$0xff]   ;;  %v7150_v36 = vld [vmem:[%s9954_s5 + $0xc44] ss:$28 sps:$4 sm:$0xff]  }
 0x291   :  { %5417 = vmatprep.subr.bf16.mxu1 %v7081_v37  ;;  %v7153_v37 = vld [vmem:[%s9954_s5 + $0xa54] ss:$28 sps:$4 sm:$0xff]  }
 0x293   :  { %5272 = vmatpush1.bf16.msra.mxu0 %v7076_v38  ;;  %v7148_v38 = vld [vmem:[%s9954_s5 + $0xc40] ss:$28 sps:$4 sm:$0xff]  }
 0x294   :  { %5418 = vmatpush1.bf16.msra.mxu1 %v7079_v40  ;;  %5273 = vmatprep.subr.bf16.mxu0 %v7084_v42  ;;  %v7151_v40 = vld [vmem:[%s9954_s5 + $0xa50] ss:$28 sps:$4 sm:$0xff]   ;;  %v7156_v42 = vld [vmem:[%s9954_s5 + $0xc7c] ss:$28 sps:$4 sm:$0xff]  }
 0x295   :  { %5419 = vmatprep.subr.bf16.mxu1 %v7087_v44  ;;  %v7159_v44 = vld [vmem:[%s9954_s5 + $0xa8c] ss:$28 sps:$4 sm:$0xff]  }
 0x297   :  { %5274 = vmatpush1.bf16.msra.mxu0 %v7082_v21  ;;  %v7154_v21 = vld [vmem:[%s9954_s5 + $0xc78] ss:$28 sps:$4 sm:$0xff]  }
 0x298   :  { %5420 = vmatpush1.bf16.msra.mxu1 %v7085_v46  ;;  %5275 = vmatprep.subr.bf16.mxu0 %v7090_v47  ;;  %v7162_v46 = vld [vmem:[%s9954_s5 + $0xcb4] ss:$28 sps:$4 sm:$0xff]   ;;  %v7165_v47 = vld [vmem:[%s9954_s5 + $0xac4] ss:$28 sps:$4 sm:$0xff]  }
 0x299   :  { %5421 = vmatprep.subr.bf16.mxu1 %v7093_v48  ;;  %v7160_v48 = vld [vmem:[%s9954_s5 + $0xcb0] ss:$28 sps:$4 sm:$0xff]  }
 0x29b   :  { %5276 = vmatpush1.bf16.msra.mxu0 %v7088_v51  ;;  %v7163_v51 = vld [vmem:[%s9954_s5 + $0xac0] ss:$28 sps:$4 sm:$0xff]  }
 0x29c   :  { %5422 = vmatpush1.bf16.msra.mxu1 %v7091_v50  ;;  %5277 = vmatprep.subr.bf16.mxu0 %v7096_v55  ;;  %v7171_v50 = vld [vmem:[%s9954_s5 + $0xafc] ss:$28 sps:$4 sm:$0xff]   ;;  %v7166_v55 = vld [vmem:[%s9954_s5 + $0xce8] ss:$28 sps:$4 sm:$0xff]  }
 0x29d   :  { %5423 = vmatprep.subr.bf16.mxu1 %v7099_v58  ;;  %v7169_v58 = vld [vmem:[%s9954_s5 + $0xaf8] ss:$28 sps:$4 sm:$0xff]  }
 0x29f   :  { %5278 = vmatpush1.bf16.msra.mxu0 %v7094_v25  ;;  %v7174_v25 = vld [vmem:[%s9954_s5 + $0xd24] ss:$28 sps:$4 sm:$0xff]  }
 0x2a0   :  { %5424 = vmatpush1.bf16.msra.mxu1 %v7097_v60  ;;  %5288 = vmatprep.subr.bf16.mxu0 %v7102_v61  ;;  %v7172_v60 = vld [vmem:[%s9954_s5 + $0xd20] ss:$28 sps:$4 sm:$0xff]   ;;  %v7175_v61 = vld [vmem:[%s9954_s5 + $0xb30] ss:$28 sps:$4 sm:$0xff]  }
 0x2a1   :  { %5425 = vmatprep.subr.bf16.mxu1 %v7105_v62  ;;  %v7180_v62 = vld [vmem:[%s9954_s5 + $0xd5c] ss:$28 sps:$4 sm:$0xff]  }
 0x2a2   :  { %5280 = vmatmul.mubr.bf16.vlgmr.msra.gmra.mrb[12].mxu0 %v9059_v0 }
 0x2a3   :  { %5289 = vmatpush1.bf16.msra.mxu0 %v7100_v63  ;;  %v7183_v63 = vld [vmem:[%s9954_s5 + $0xb6c] ss:$28 sps:$4 sm:$0xff]  }
 0x2a4   :  { %5426 = vmatpush1.bf16.msra.mxu1 %v7103_v1  ;;  %5290 = vmatprep.subr.bf16.mxu0 %v7108_v2  ;;  %v674_v1 = vsub.s32 6, %v7875_v52  ;;  %v7178_v2 = vld [vmem:[%s9954_s5 + $0xd58] ss:$28 sps:$4 sm:$0xff]  }
 0x2a5   :  { %5427 = vmatprep.subr.bf16.mxu1 %v7111_v3  ;;  %v678_v3 = vsub.s32 7, %v7875_v52 }
 0x2a7   :  { %5291 = vmatpush1.bf16.msra.mxu0 %v7106_v4  ;;  %v7181_v4 = vld [vmem:[%s9954_s5 + $0xb68] ss:$28 sps:$4 sm:$0xff]  }
 0x2a8   :  { %5428 = vmatpush1.bf16.msra.mxu1 %v7109_v5  ;;  %5292 = vmatprep.subr.bf16.mxu0 %v7114_v6  ;;  %v7186_v5 = vld [vmem:[%s9954_s5 + $0xd94] ss:$28 sps:$4 sm:$0xff]   ;;  %v7189_v6 = vld [vmem:[%s9954_s5 + $0xba4] ss:$28 sps:$4 sm:$0xff]  }
 0x2a9   :  { %5429 = vmatprep.subr.bf16.mxu1 %v7117_v7  ;;  %v7507_v7 = vld [vmem:[%s9955_s4] sm:$0xff] }
 0x2ab   :  { %5293 = vmatpush1.bf16.msra.mxu0 %v7112_v19  ;;  %v675_v19 = vrot.slane %v7507_v7, %v674_v1 }
 0x2ac   :  { %5430 = vmatpush1.bf16.msra.mxu1 %v7115_v8  ;;  %5294 = vmatprep.subr.bf16.mxu0 %v7120_v9  ;;  %v7184_v8 = vld [vmem:[%s9954_s5 + $0xd90] ss:$28 sps:$4 sm:$0xff]   ;;  %v679_v9 = vrot.slane %v7507_v7, %v678_v3  ;;  %v7235_v3 = vld [vmem:[%s9954_s5 + $0xd60] ss:$28 sps:$4 sm:$0xff]   ;;  %v7241_v7 = vld [vmem:[%s9954_s5 + $0xd98] ss:$28 sps:$4 sm:$0xff]  }
 0x2ad   :  { %5431 = vmatprep.subr.bf16.mxu1 %v7123_v10  ;;  %v7187_v10 = vld [vmem:[%s9954_s5 + $0xba0] ss:$28 sps:$4 sm:$0xff]  }
 0x2af   :  { %5295 = vmatpush1.bf16.msra.mxu0 %v7118_v11  ;;  %v7192_v11 = vld [vmem:[%s9954_s5 + $0xdcc] ss:$28 sps:$4 sm:$0xff]  }
 0x2b0   :  { %5432 = vmatpush1.bf16.msra.mxu1 %v7121_v12  ;;  %5296 = vmatprep.subr.bf16.mxu0 %v7126_v14  ;;  %v7195_v14 = vld [vmem:[%s9954_s5 + $0xbdc] ss:$28 sps:$4 sm:$0xff]  }
 0x2b1   :  { %5433 = vmatprep.subr.bf16.mxu1 %v7129_v16 }
 0x2b3   :  { %5297 = vmatpush1.bf16.msra.mxu0 %v7124_v17 }
 0x2b4   :  { %5434 = vmatpush1.bf16.msra.mxu1 %v7127_v18  ;;  %5298 = vmatprep.subr.bf16.mxu0 %v7132_v22 }
 0x2b5   :  { %5435 = vmatprep.subr.bf16.mxu1 %v7135_v23  ;;  %v7190_v23 = vld [vmem:[%s9954_s5 + $0xdc8] ss:$28 sps:$4 sm:$0xff]  }
 0x2b7   :  { %5299 = vmatpush1.bf16.msra.mxu0 %v7130_v24 }
 0x2b8   :  { %5436 = vmatpush1.bf16.msra.mxu1 %v7133_v15  ;;  %5300 = vmatprep.subr.bf16.mxu0 %v7138_v27  ;;  %v7193_v27 = vld [vmem:[%s9954_s5 + $0xbd8] ss:$28 sps:$4 sm:$0xff]  }
 0x2b9   :  { %5437 = vmatprep.subr.bf16.mxu1 %v7141_v28  ;;  %v7198_v28 = vld [vmem:[%s9954_s5 + $0x14] ss:$28 sps:$4 sm:$0xff]  }
 0x2bb   :  { %5301 = vmatpush1.bf16.msra.mxu0 %v7136_v30 }
 0x2bc   :  { %5438 = vmatpush1.bf16.msra.mxu1 %v7139_v31  ;;  %5302 = vmatprep.subr.bf16.mxu0 %v7144_v32  ;;  %v7201_v31 = vld [vmem:[%s9954_s5 + $0xc14] ss:$28 sps:$4 sm:$0xff]  }
 0x2bd   :  { %5439 = vmatprep.subr.bf16.mxu1 %v7147_v33  ;;  %v7196_v33 = vld [vmem:[%s9954_s5 + $0x10] ss:$28 sps:$4 sm:$0xff]  }
 0x2bf   :  { %5303 = vmatpush1.bf16.msra.mxu0 %v7142_v34 }
 0x2c0   :  { %5440 = vmatpush1.bf16.msra.mxu1 %v7145_v35  ;;  %5304 = vmatprep.subr.bf16.mxu0 %v7150_v36  ;;  %v7199_v35 = vld [vmem:[%s9954_s5 + $0xc10] ss:$28 sps:$4 sm:$0xff]  }
 0x2c1   :  { %5441 = vmatprep.subr.bf16.mxu1 %v7153_v37  ;;  %v7204_v36 = vld [vmem:[%s9954_s5 + $0x4c] ss:$28 sps:$4 sm:$0xff]  }
 0x2c2   :  { %v7207_v37 = vld [vmem:[%s9954_s5 + $0xc4c] ss:$28 sps:$4 sm:$0xff]  }
 0x2c3   :  { %5305 = vmatpush1.bf16.msra.mxu0 %v7148_v38  ;;  %v7202_v38 = vld [vmem:[%s9954_s5 + $0x48] ss:$28 sps:$4 sm:$0xff]  }
 0x2c4   :  { %5442 = vmatpush1.bf16.msra.mxu1 %v7151_v40  ;;  %5306 = vmatprep.subr.bf16.mxu0 %v7156_v42  ;;  %v7205_v40 = vld [vmem:[%s9954_s5 + $0xc48] ss:$28 sps:$4 sm:$0xff]  }
 0x2c5   :  { %5452 = vmatprep.subr.bf16.mxu1 %v7159_v44  ;;  %v7210_v42 = vld [vmem:[%s9954_s5 + $0x84] ss:$28 sps:$4 sm:$0xff]  }
 0x2c6   :  { %v7213_v44 = vld [vmem:[%s9954_s5 + $0xc84] ss:$28 sps:$4 sm:$0xff]  }
 0x2c7   :  { %5307 = vmatpush1.bf16.msra.mxu0 %v7154_v21  ;;  %5444 = vmatmul.mubr.bf16.vlgmr.msra.gmra.mrb[16].mxu1 %v9059_v0  ;;  %v7208_v21 = vld [vmem:[%s9954_s5 + $0x80] ss:$28 sps:$4 sm:$0xff]  }
 0x2c8   :  { %5453 = vmatpush1.bf16.msra.mxu1 %v7157_v20  ;;  %5308 = vmatprep.subr.bf16.mxu0 %v7162_v46  ;;  %v7211_v20 = vld [vmem:[%s9954_s5 + $0xc80] ss:$28 sps:$4 sm:$0xff]  }
 0x2c9   :  { %5454 = vmatprep.subr.bf16.mxu1 %v7165_v47  ;;  %v7216_v46 = vld [vmem:[%s9954_s5 + $0xbc] ss:$28 sps:$4 sm:$0xff]  }
 0x2ca   :  { %v7219_v47 = vld [vmem:[%s9954_s5 + $0xcbc] ss:$28 sps:$4 sm:$0xff]  }
 0x2cb   :  { %5309 = vmatpush1.bf16.msra.mxu0 %v7160_v48  ;;  %v7214_v48 = vld [vmem:[%s9954_s5 + $0xb8] ss:$28 sps:$4 sm:$0xff]  }
 0x2cc   :  { %5455 = vmatpush1.bf16.msra.mxu1 %v7163_v51  ;;  %5310 = vmatprep.subr.bf16.mxu0 %v7168_v49  ;;  %v7217_v51 = vld [vmem:[%s9954_s5 + $0xcb8] ss:$28 sps:$4 sm:$0xff]  }
 0x2cd   :  { %5456 = vmatprep.subr.bf16.mxu1 %v7171_v50  ;;  %v7222_v49 = vld [vmem:[%s9954_s5 + $0xf4] ss:$28 sps:$4 sm:$0xff]  }
 0x2ce   :  { %v7225_v50 = vld [vmem:[%s9954_s5 + $0xcf4] ss:$28 sps:$4 sm:$0xff]  }
 0x2cf   :  { %5311 = vmatpush1.bf16.msra.mxu0 %v7166_v55  ;;  %v7220_v55 = vld [vmem:[%s9954_s5 + $0xf0] ss:$28 sps:$4 sm:$0xff]  }
 0x2d0   :  { %5457 = vmatpush1.bf16.msra.mxu1 %v7169_v58  ;;  %5312 = vmatprep.subr.bf16.mxu0 %v7174_v25  ;;  %v7223_v58 = vld [vmem:[%s9954_s5 + $0xcf0] ss:$28 sps:$4 sm:$0xff]  }
 0x2d1   :  { %5458 = vmatprep.subr.bf16.mxu1 %v7177_v59  ;;  %v7228_v25 = vld [vmem:[%s9954_s5 + $0x12c] ss:$28 sps:$4 sm:$0xff]  }
 0x2d2   :  { %v7231_v59 = vld [vmem:[%s9954_s5 + $0xd2c] ss:$28 sps:$4 sm:$0xff]  }
 0x2d3   :  { %5313 = vmatpush1.bf16.msra.mxu0 %v7172_v60  ;;  %v7226_v60 = vld [vmem:[%s9954_s5 + $0x128] ss:$28 sps:$4 sm:$0xff]  }
 0x2d4   :  { %5459 = vmatpush1.bf16.msra.mxu1 %v7175_v61  ;;  %5314 = vmatprep.subr.bf16.mxu0 %v7180_v62  ;;  %v7229_v61 = vld [vmem:[%s9954_s5 + $0xd28] ss:$28 sps:$4 sm:$0xff]  }
 0x2d5   :  { %5460 = vmatprep.subr.bf16.mxu1 %v7183_v63  ;;  %v7234_v62 = vld [vmem:[%s9954_s5 + $0x164] ss:$28 sps:$4 sm:$0xff]  }
 0x2d6   :  { %v7237_v63 = vld [vmem:[%s9954_s5 + $0xd64] ss:$28 sps:$4 sm:$0xff]  }
 0x2d7   :  { %5315 = vmatpush1.bf16.msra.mxu0 %v7178_v2  ;;  %v7232_v2 = vld [vmem:[%s9954_s5 + $0x160] ss:$28 sps:$4 sm:$0xff]  }
 0x2d8   :  { %5461 = vmatpush1.bf16.msra.mxu1 %v7181_v4  ;;  %5316 = vmatprep.subr.bf16.mxu0 %v7186_v5  ;;  %v7240_v4 = vld [vmem:[%s9954_s5 + $0x19c] ss:$28 sps:$4 sm:$0xff]  }
 0x2d9   :  { %v2289_v12 = vpop.f32.mrb[12].mxu1  ;;  %5462 = vmatprep.subr.bf16.mxu1 %v7189_v6  ;;  %v7243_v5 = vld [vmem:[%s9954_s5 + $0xd9c] ss:$28 sps:$4 sm:$0xff]  }
 0x2da   :  { %v6721_v16 = vadd.f32 %v2289_v12, %v675_v19  ;;  %v2291_v17 = vpop.f32.mrb[13].mxu1  ;;  %v7238_v6 = vld [vmem:[%s9954_s5 + $0x198] ss:$28 sps:$4 sm:$0xff]  }
 0x2db   :  { %v6722_v18 = vadd.f32 %v2291_v17, %v679_v9  ;;  %5317 = vmatpush1.bf16.msra.mxu0 %v7184_v8  ;;  %v2293_v22 = vpop.f32.mrb[14].mxu1  ;;  %v7246_v19 = vld [vmem:[%s9954_s5 + $0x1d4] ss:$28 sps:$4 sm:$0xff]   ;;  %v7257_v17 = vld [vmem:[%s9954_s5 + $0x244] ss:$28 sps:$4 sm:$0xff]  }
 0x2dc   :  { %v2302_v24 = vmax.f32 %v6721_v16, 0.0  ;;  %5463 = vmatpush1.bf16.msra.mxu1 %v7187_v10  ;;  %v2294_v15 = vpop.f32.mrb[15].mxu1  ;;  %5318 = vmatprep.subr.bf16.mxu0 %v7192_v11  ;;  %v7249_v8 = vld [vmem:[%s9954_s5 + $0xdd4] ss:$28 sps:$4 sm:$0xff]   ;;  %v7252_v11 = vld [vmem:[%s9954_s5 + $0x20c] ss:$28 sps:$4 sm:$0xff]  }
 0x2dd   :  { %v2303_v30 = vmax.f32 %v6722_v18, 0.0  ;;  %5464 = vmatprep.subr.bf16.mxu1 %v7195_v14  ;;  %v7244_v9 = vld [vmem:[%s9954_s5 + $0x1d0] ss:$28 sps:$4 sm:$0xff]   ;;  %v7253_v12 = vld [vmem:[%s9954_s5 + $0x1d8] ss:$28 sps:$4 sm:$0xff]  }
 0x2de   :  { %v9264_v34 = vpack.c.bf16 %v2302_v24, %v2302_v24  ;;  %v7247_v10 = vld [vmem:[%s9954_s5 + $0xdd0] ss:$28 sps:$4 sm:$0xff]   ;;  %v7250_v14 = vld [vmem:[%s9954_s5 + $0x208] ss:$28 sps:$4 sm:$0xff]   ;;  %v7254_v16 = vld [vmem:[%s9954_s5 + $0x18] ss:$28 sps:$4 sm:$0xff]  }
 0x2df   :  { %v9259_v32 = vpack.c.bf16 %v2303_v30, %v2303_v30  ;;  %5319 = vmatpush1.bf16.msra.mxu0 %v7190_v23  ;;  %v7258_v18 = vld [vmem:[%s9954_s5 + $0x210] ss:$28 sps:$4 sm:$0xff]   ;;  %v7255_v22 = vld [vmem:[%s9954_s5 + $0x240] ss:$28 sps:$4 sm:$0xff]   ;;  %v7263_v15 = vld [vmem:[%s9954_s5 + $0x248] ss:$28 sps:$4 sm:$0xff]  }
 0x2e0   :  { %5465 = vmatpush1.bf16.msra.mxu1 %v7193_v27  ;;  %5493 = vmatprep.subr.bf16.mxu0 %v7198_v28  ;;  %v7259_v23 = vld [vmem:[%s9954_s5 + $0x50] ss:$28 sps:$4 sm:$0xff]   ;;  %v7262_v24 = vld [vmem:[%s9954_s5 + $0x27c] ss:$28 sps:$4 sm:$0xff]  }
 0x2e1   :  { %5320 = vmatprep.mubr.bf16.mxu0 %v9259_v32  ;;  %5484 = vmatprep.mubr.bf16.mxu1 %v9259_v32  ;;  %v7260_v27 = vld [vmem:[%s9954_s5 + $0x278] ss:$28 sps:$4 sm:$0xff]   ;;  %v7268_v30 = vld [vmem:[%s9954_s5 + $0x280] ss:$28 sps:$4 sm:$0xff]  }
 0x2e2   :  { %5321 = vmatmul.mubr.bf16.vlgmr.msra.gmra.mrb[12].mxu0 %v9264_v34  ;;  %5466 = vmatprep.subr.bf16.mxu1 %v7201_v31  ;;  %v7267_v28 = vld [vmem:[%s9954_s5 + $0x2b4] ss:$28 sps:$4 sm:$0xff]  }
 0x2e3   :  { %5494 = vmatpush1.bf16.msra.mxu0 %v7196_v33  ;;  %5525 = vmatprep.mubr.bf16.mxu0 %v8552_v26  ;;  %v7265_v31 = vld [vmem:[%s9954_s5 + $0x2b0] ss:$28 sps:$4 sm:$0xff]   ;;  %v7269_v33 = vld [vmem:[%s9954_s5 + $0xc0] ss:$28 sps:$4 sm:$0xff]  }
 0x2e4   :  { %5467 = vmatpush1.bf16.msra.mxu1 %v7199_v35  ;;  %5495 = vmatprep.subr.bf16.mxu0 %v7204_v36  ;;  %v7272_v35 = vld [vmem:[%s9954_s5 + $0x2ec] ss:$28 sps:$4 sm:$0xff]   ;;  %v7273_v36 = vld [vmem:[%s9954_s5 + $0x2b8] ss:$28 sps:$4 sm:$0xff]  }
 0x2e5   :  { %5468 = vmatprep.subr.bf16.mxu1 %v7207_v37  ;;  %v7270_v37 = vld [vmem:[%s9954_s5 + $0x2e8] ss:$28 sps:$4 sm:$0xff]  }
 0x2e7   :  { %5496 = vmatpush1.bf16.msra.mxu0 %v7202_v38  ;;  %v7274_v38 = vld [vmem:[%s9954_s5 + $0xf8] ss:$28 sps:$4 sm:$0xff]  }
 0x2e8   :  { %5469 = vmatpush1.bf16.msra.mxu1 %v7205_v40  ;;  %5497 = vmatprep.subr.bf16.mxu0 %v7210_v42  ;;  %v7277_v40 = vld [vmem:[%s9954_s5 + $0x324] ss:$28 sps:$4 sm:$0xff]   ;;  %v7278_v42 = vld [vmem:[%s9954_s5 + $0x2f0] ss:$28 sps:$4 sm:$0xff]  }
 0x2e9   :  { %5470 = vmatprep.subr.bf16.mxu1 %v7213_v44  ;;  %v7275_v44 = vld [vmem:[%s9954_s5 + $0x320] ss:$28 sps:$4 sm:$0xff]  }
 0x2eb   :  { %5498 = vmatpush1.bf16.msra.mxu0 %v7208_v21  ;;  %v7279_v21 = vld [vmem:[%s9954_s5 + $0x130] ss:$28 sps:$4 sm:$0xff]  }
 0x2ec   :  { %5471 = vmatpush1.bf16.msra.mxu1 %v7211_v20  ;;  %5499 = vmatprep.subr.bf16.mxu0 %v7216_v46  ;;  %v7282_v20 = vld [vmem:[%s9954_s5 + $0x35c] ss:$28 sps:$4 sm:$0xff]   ;;  %v7283_v46 = vld [vmem:[%s9954_s5 + $0x328] ss:$28 sps:$4 sm:$0xff]  }
 0x2ed   :  { %5472 = vmatprep.subr.bf16.mxu1 %v7219_v47  ;;  %v7280_v47 = vld [vmem:[%s9954_s5 + $0x358] ss:$28 sps:$4 sm:$0xff]  }
 0x2ef   :  { %5500 = vmatpush1.bf16.msra.mxu0 %v7214_v48  ;;  %v7284_v48 = vld [vmem:[%s9954_s5 + $0x168] ss:$28 sps:$4 sm:$0xff]  }
 0x2f0   :  { %5473 = vmatpush1.bf16.msra.mxu1 %v7217_v51  ;;  %5501 = vmatprep.subr.bf16.mxu0 %v7222_v49  ;;  %v7287_v51 = vld [vmem:[%s9954_s5 + $0x394] ss:$28 sps:$4 sm:$0xff]   ;;  %v7288_v49 = vld [vmem:[%s9954_s5 + $0x360] ss:$28 sps:$4 sm:$0xff]  }
 0x2f1   :  { %5474 = vmatprep.subr.bf16.mxu1 %v7225_v50  ;;  %v7285_v50 = vld [vmem:[%s9954_s5 + $0x390] ss:$28 sps:$4 sm:$0xff]  }
 0x2f3   :  { %5502 = vmatpush1.bf16.msra.mxu0 %v7220_v55  ;;  %v7289_v55 = vld [vmem:[%s9954_s5 + $0x1a0] ss:$28 sps:$4 sm:$0xff]  }
 0x2f4   :  { %5475 = vmatpush1.bf16.msra.mxu1 %v7223_v58  ;;  %5503 = vmatprep.subr.bf16.mxu0 %v7228_v25  ;;  %v7292_v58 = vld [vmem:[%s9954_s5 + $0x3cc] ss:$28 sps:$4 sm:$0xff]   ;;  %v7293_v25 = vld [vmem:[%s9954_s5 + $0x558] ss:$28 sps:$4 sm:$0xff]  }
 0x2f5   :  { %5476 = vmatprep.subr.bf16.mxu1 %v7231_v59  ;;  %v7290_v59 = vld [vmem:[%s9954_s5 + $0x3c8] ss:$28 sps:$4 sm:$0xff]  }
 0x2f7   :  { %5504 = vmatpush1.bf16.msra.mxu0 %v7226_v60  ;;  %v7294_v60 = vld [vmem:[%s9954_s5 + $0x398] ss:$28 sps:$4 sm:$0xff]  }
 0x2f8   :  { %5477 = vmatpush1.bf16.msra.mxu1 %v7229_v61  ;;  %5505 = vmatprep.subr.bf16.mxu0 %v7234_v62  ;;  %v7297_v61 = vld [vmem:[%s9954_s5 + $0x404] ss:$28 sps:$4 sm:$0xff]   ;;  %v7298_v62 = vld [vmem:[%s9954_s5 + $0x590] ss:$28 sps:$4 sm:$0xff]  }
 0x2f9   :  { %5478 = vmatprep.subr.bf16.mxu1 %v7237_v63  ;;  %v7295_v63 = vld [vmem:[%s9954_s5 + $0x400] ss:$28 sps:$4 sm:$0xff]  }
 0x2fb   :  { %5506 = vmatpush1.bf16.msra.mxu0 %v7232_v2  ;;  %v7299_v2 = vld [vmem:[%s9954_s5 + $0x3d0] ss:$28 sps:$4 sm:$0xff]  }
 0x2fc   :  { %5479 = vmatpush1.bf16.msra.mxu1 %v7235_v3  ;;  %5507 = vmatprep.subr.bf16.mxu0 %v7240_v4  ;;  %v7302_v3 = vld [vmem:[%s9954_s5 + $0x43c] ss:$28 sps:$4 sm:$0xff]  }
 0x2fd   :  { %5480 = vmatprep.subr.bf16.mxu1 %v7243_v5  ;;  %v7300_v4 = vld [vmem:[%s9954_s5 + $0x438] ss:$28 sps:$4 sm:$0xff]  }
 0x2fe   :  { %v7307_v5 = vld [vmem:[%s9954_s5 + $0x474] ss:$28 sps:$4 sm:$0xff]  }
 0x2ff   :  { %5508 = vmatpush1.bf16.msra.mxu0 %v7238_v6  ;;  %v7308_v6 = vld [vmem:[%s9954_s5 + $0x600] ss:$28 sps:$4 sm:$0xff]  }
 0x300   :  { %5481 = vmatpush1.bf16.msra.mxu1 %v7241_v7  ;;  %5509 = vmatprep.subr.bf16.mxu0 %v7246_v19  ;;  %v7305_v7 = vld [vmem:[%s9954_s5 + $0x470] ss:$28 sps:$4 sm:$0xff]   ;;  %v7309_v19 = vld [vmem:[%s9954_s5 + $0x440] ss:$28 sps:$4 sm:$0xff]  }
 0x301   :  { %5482 = vmatprep.subr.bf16.mxu1 %v7249_v8  ;;  %v7312_v8 = vld [vmem:[%s9954_s5 + $0x4ac] ss:$28 sps:$4 sm:$0xff]  }
 0x303   :  { %5510 = vmatpush1.bf16.msra.mxu0 %v7244_v9  ;;  %v7313_v9 = vld [vmem:[%s9954_s5 + $0x638] ss:$28 sps:$4 sm:$0xff]  }
 0x304   :  { %5483 = vmatpush1.bf16.msra.mxu1 %v7247_v10  ;;  %5511 = vmatprep.subr.bf16.mxu0 %v7252_v11  ;;  %v7310_v10 = vld [vmem:[%s9954_s5 + $0x4a8] ss:$28 sps:$4 sm:$0xff]   ;;  %v7314_v11 = vld [vmem:[%s9954_s5 + $0x478] ss:$28 sps:$4 sm:$0xff]  }
 0x305   :  { %6625 = vmatprep.subr.bf16.mxu1 %v7253_v12  ;;  %v7317_v12 = vld [vmem:[%s9954_s5 + $0x4e4] ss:$28 sps:$4 sm:$0xff]  }
 0x307   :  { %5485 = vmatmul.mubr.bf16.vlgmr.msra.gmra.mrb[16].mxu1 %v9264_v34  ;;  %5512 = vmatpush1.bf16.msra.mxu0 %v7250_v14  ;;  %v7318_v14 = vld [vmem:[%s9954_s5 + $0x670] ss:$28 sps:$4 sm:$0xff]  }
 0x308   :  { %6626 = vmatpush3.bf16.msra.mxu1 %v7254_v16  ;;  %5689 = vmatprep.mubr.bf16.mxu1 %v8552_v26  ;;  %v7264_v26 = vld [vmem:[%s9954_s5 + $0x88] ss:$28 sps:$4 sm:$0xff]   ;;  %v7315_v16 = vld [vmem:[%s9954_s5 + $0x4e0] ss:$28 sps:$4 sm:$0xff]  }
 0x309   :  { %5513 = vmatprep.subr.bf16.mxu0 %v7257_v17  ;;  %6627 = vmatprep.subr.bf16.mxu1 %v7258_v18  ;;  %v7319_v17 = vld [vmem:[%s9954_s5 + $0x4b0] ss:$28 sps:$4 sm:$0xff]   ;;  %v7322_v18 = vld [vmem:[%s9954_s5 + $0x51c] ss:$28 sps:$4 sm:$0xff]  }
 0x30b   :  { %5514 = vmatpush1.bf16.msra.mxu0 %v7255_v22  ;;  %v7323_v22 = vld [vmem:[%s9954_s5 + $0x6a8] ss:$28 sps:$4 sm:$0xff]  }
 0x30c   :  { %6628 = vmatpush3.bf16.msra.mxu1 %v7259_v23  ;;  %5515 = vmatprep.subr.bf16.mxu0 %v7262_v24  ;;  %v7320_v23 = vld [vmem:[%s9954_s5 + $0x518] ss:$28 sps:$4 sm:$0xff]   ;;  %v7324_v24 = vld [vmem:[%s9954_s5 + $0x4e8] ss:$28 sps:$4 sm:$0xff]  }
 0x30d   :  { %6629 = vmatprep.subr.bf16.mxu1 %v7263_v15  ;;  %v7327_v15 = vld [vmem:[%s9954_s5 + $0x554] ss:$28 sps:$4 sm:$0xff]  }
 0x30f   :  { %5516 = vmatpush1.bf16.msra.mxu0 %v7260_v27  ;;  %v7328_v27 = vld [vmem:[%s9954_s5 + $0x6e0] ss:$28 sps:$4 sm:$0xff]  }
 0x310   :  { %6630 = vmatpush3.bf16.msra.mxu1 %v7264_v26  ;;  %5517 = vmatprep.subr.bf16.mxu0 %v7267_v28  ;;  %v7325_v26 = vld [vmem:[%s9954_s5 + $0x550] ss:$28 sps:$4 sm:$0xff]   ;;  %v7329_v28 = vld [vmem:[%s9954_s5 + $0x520] ss:$28 sps:$4 sm:$0xff]  }
 0x311   :  { %6631 = vmatprep.subr.bf16.mxu1 %v7268_v30  ;;  %v7332_v30 = vld [vmem:[%s9954_s5 + $0x58c] ss:$28 sps:$4 sm:$0xff]  }
 0x313   :  { %5518 = vmatpush1.bf16.msra.mxu0 %v7265_v31  ;;  %v7333_v31 = vld [vmem:[%s9954_s5 + $0x8d8] ss:$28 sps:$4 sm:$0xff]  }
 0x314   :  { %6632 = vmatpush3.bf16.msra.mxu1 %v7269_v33  ;;  %5519 = vmatprep.subr.bf16.mxu0 %v7272_v35  ;;  %v7330_v33 = vld [vmem:[%s9954_s5 + $0x588] ss:$28 sps:$4 sm:$0xff]   ;;  %v7334_v35 = vld [vmem:[%s9954_s5 + $0x718] ss:$28 sps:$4 sm:$0xff]  }
 0x315   :  { %6633 = vmatprep.subr.bf16.mxu1 %v7273_v36  ;;  %v7337_v36 = vld [vmem:[%s9954_s5 + $0x5c4] ss:$28 sps:$4 sm:$0xff]  }
 0x317   :  { %5520 = vmatpush1.bf16.msra.mxu0 %v7270_v37  ;;  %v7338_v37 = vld [vmem:[%s9954_s5 + $0x910] ss:$28 sps:$4 sm:$0xff]  }
 0x318   :  { %6634 = vmatpush3.bf16.msra.mxu1 %v7274_v38  ;;  %5521 = vmatprep.subr.bf16.mxu0 %v7277_v40  ;;  %v7335_v38 = vld [vmem:[%s9954_s5 + $0x5c0] ss:$28 sps:$4 sm:$0xff]   ;;  %v7339_v40 = vld [vmem:[%s9954_s5 + $0x750] ss:$28 sps:$4 sm:$0xff]  }
 0x319   :  { %6635 = vmatprep.subr.bf16.mxu1 %v7278_v42  ;;  %v7342_v42 = vld [vmem:[%s9954_s5 + $0x5fc] ss:$28 sps:$4 sm:$0xff]  }
 0x31b   :  { %5522 = vmatpush1.bf16.msra.mxu0 %v7275_v44  ;;  %v7343_v44 = vld [vmem:[%s9954_s5 + $0x948] ss:$28 sps:$4 sm:$0xff]  }
 0x31c   :  { %6636 = vmatpush3.bf16.msra.mxu1 %v7279_v21  ;;  %5523 = vmatprep.subr.bf16.mxu0 %v7282_v20  ;;  %v7340_v21 = vld [vmem:[%s9954_s5 + $0x5f8] ss:$28 sps:$4 sm:$0xff]   ;;  %v7344_v20 = vld [vmem:[%s9954_s5 + $0x788] ss:$28 sps:$4 sm:$0xff]  }
 0x31d   :  { %6637 = vmatprep.subr.bf16.mxu1 %v7283_v46  ;;  %v7347_v46 = vld [vmem:[%s9954_s5 + $0x634] ss:$28 sps:$4 sm:$0xff]  }
 0x31f   :  { %5524 = vmatpush1.bf16.msra.mxu0 %v7280_v47  ;;  %v7348_v47 = vld [vmem:[%s9954_s5 + $0x980] ss:$28 sps:$4 sm:$0xff]  }
 0x320   :  { %6638 = vmatpush3.bf16.msra.mxu1 %v7284_v48  ;;  %5534 = vmatprep.subr.bf16.mxu0 %v7287_v51  ;;  %v7345_v48 = vld [vmem:[%s9954_s5 + $0x630] ss:$28 sps:$4 sm:$0xff]   ;;  %v7349_v51 = vld [vmem:[%s9954_s5 + $0x7c0] ss:$28 sps:$4 sm:$0xff]  }
 0x321   :  { %6639 = vmatprep.subr.bf16.mxu1 %v7288_v49  ;;  %v7352_v49 = vld [vmem:[%s9954_s5 + $0x66c] ss:$28 sps:$4 sm:$0xff]  }
 0x322   :  { %5526 = vmatmul.mubr.bf16.vlgmr.msra.gmra.mrb[16].mxu0 %v8560_v29 }
 0x323   :  { %5535 = vmatpush1.bf16.msra.mxu0 %v7285_v50  ;;  %5566 = vmatprep.mubr.bf16.mxu0 %v8847_v41  ;;  %v7353_v50 = vld [vmem:[%s9954_s5 + $0x9b8] ss:$28 sps:$4 sm:$0xff]  }
 0x324   :  { %6640 = vmatpush3.bf16.msra.mxu1 %v7289_v55  ;;  %5536 = vmatprep.subr.bf16.mxu0 %v7292_v58  ;;  %v7350_v55 = vld [vmem:[%s9954_s5 + $0x668] ss:$28 sps:$4 sm:$0xff]   ;;  %v7354_v58 = vld [vmem:[%s9954_s5 + $0x7f8] ss:$28 sps:$4 sm:$0xff]  }
 0x325   :  { %6647 = vmatprep.subr.bf16.mxu1 %v7293_v25  ;;  %v7357_v25 = vld [vmem:[%s9954_s5 + $0x6a4] ss:$28 sps:$4 sm:$0xff]  }
 0x327   :  { %5537 = vmatpush1.bf16.msra.mxu0 %v7290_v59  ;;  %5690 = vmatmul.mubr.bf16.vlgmr.msra.gmra.mrb[20].mxu1 %v8560_v29  ;;  %v7303_v29 = vld [vmem:[%s9954_s5 + $0x5c8] ss:$28 sps:$4 sm:$0xff]   ;;  %v7358_v59 = vld [vmem:[%s9954_s5 + $0x9f0] ss:$28 sps:$4 sm:$0xff]  }
 0x328   :  { %6648 = vmatpush3.bf16.msra.mxu1 %v7294_v60  ;;  %5729 = vmatprep.mubr.bf16.mxu1 %v8847_v41  ;;  %v7304_v41 = vld [vmem:[%s9954_s5 + $0x408] ss:$28 sps:$4 sm:$0xff]   ;;  %v7355_v60 = vld [vmem:[%s9954_s5 + $0x6a0] ss:$28 sps:$4 sm:$0xff]  }
 0x329   :  { %5538 = vmatprep.subr.bf16.mxu0 %v7297_v61  ;;  %6649 = vmatprep.subr.bf16.mxu1 %v7298_v62  ;;  %v7359_v61 = vld [vmem:[%s9954_s5 + $0x830] ss:$28 sps:$4 sm:$0xff]   ;;  %v7362_v62 = vld [vmem:[%s9954_s5 + $0x6dc] ss:$28 sps:$4 sm:$0xff]  }
 0x32b   :  { %5539 = vmatpush1.bf16.msra.mxu0 %v7295_v63  ;;  %v7363_v63 = vld [vmem:[%s9954_s5 + $0xa28] ss:$28 sps:$4 sm:$0xff]  }
 0x32c   :  { %6650 = vmatpush3.bf16.msra.mxu1 %v7299_v2  ;;  %5540 = vmatprep.subr.bf16.mxu0 %v7302_v3  ;;  %v7360_v2 = vld [vmem:[%s9954_s5 + $0x6d8] ss:$28 sps:$4 sm:$0xff]   ;;  %v7364_v3 = vld [vmem:[%s9954_s5 + $0x868] ss:$28 sps:$4 sm:$0xff]  }
 0x32d   :  { %6651 = vmatprep.subr.bf16.mxu1 %v7303_v29  ;;  %v7367_v29 = vld [vmem:[%s9954_s5 + $0x714] ss:$28 sps:$4 sm:$0xff]  }
 0x32f   :  { %5541 = vmatpush1.bf16.msra.mxu0 %v7300_v4  ;;  %v7368_v4 = vld [vmem:[%s9954_s5 + $0xa60] ss:$28 sps:$4 sm:$0xff]  }
 0x330   :  { %6652 = vmatpush3.bf16.msra.mxu1 %v7304_v41  ;;  %5542 = vmatprep.subr.bf16.mxu0 %v7307_v5  ;;  %v7365_v41 = vld [vmem:[%s9954_s5 + $0x710] ss:$28 sps:$4 sm:$0xff]   ;;  %v7369_v5 = vld [vmem:[%s9954_s5 + $0x8a0] ss:$28 sps:$4 sm:$0xff]  }
 0x331   :  { %6653 = vmatprep.subr.bf16.mxu1 %v7308_v6  ;;  %v7372_v6 = vld [vmem:[%s9954_s5 + $0x74c] ss:$28 sps:$4 sm:$0xff]  }
 0x333   :  { %5543 = vmatpush1.bf16.msra.mxu0 %v7305_v7  ;;  %v7373_v7 = vld [vmem:[%s9954_s5 + $0xc58] ss:$28 sps:$4 sm:$0xff]  }
 0x334   :  { %6654 = vmatpush3.bf16.msra.mxu1 %v7309_v19  ;;  %5544 = vmatprep.subr.bf16.mxu0 %v7312_v8  ;;  %v7370_v19 = vld [vmem:[%s9954_s5 + $0x748] ss:$28 sps:$4 sm:$0xff]   ;;  %v7374_v8 = vld [vmem:[%s9954_s5 + $0xa98] ss:$28 sps:$4 sm:$0xff]  }
 0x335   :  { %6655 = vmatprep.subr.bf16.mxu1 %v7313_v9  ;;  %v7377_v9 = vld [vmem:[%s9954_s5 + $0x784] ss:$28 sps:$4 sm:$0xff]  }
 0x337   :  { %5545 = vmatpush1.bf16.msra.mxu0 %v7310_v10  ;;  %v7379_v10 = vld [vmem:[%s9954_s5 + $0xad0] ss:$28 sps:$4 sm:$0xff]  }
 0x338   :  { %6656 = vmatpush3.bf16.msra.mxu1 %v7314_v11  ;;  %5546 = vmatprep.subr.bf16.mxu0 %v7317_v12  ;;  %v7382_v11 = vld [vmem:[%s9954_s5 + $0x7bc] ss:$28 sps:$4 sm:$0xff]   ;;  %v7383_v12 = vld [vmem:[%s9954_s5 + $0xcc8] ss:$28 sps:$4 sm:$0xff]  }
 0x339   :  { %6657 = vmatprep.subr.bf16.mxu1 %v7318_v14  ;;  %v7380_v14 = vld [vmem:[%s9954_s5 + $0x7b8] ss:$28 sps:$4 sm:$0xff]  }
 0x33b   :  { %5547 = vmatpush1.bf16.msra.mxu0 %v7315_v16  ;;  %v7384_v16 = vld [vmem:[%s9954_s5 + $0xb08] ss:$28 sps:$4 sm:$0xff]  }
 0x33c   :  { %6658 = vmatpush3.bf16.msra.mxu1 %v7319_v17  ;;  %5548 = vmatprep.subr.bf16.mxu0 %v7322_v18  ;;  %v7387_v17 = vld [vmem:[%s9954_s5 + $0x7f4] ss:$28 sps:$4 sm:$0xff]   ;;  %v7388_v18 = vld [vmem:[%s9954_s5 + $0xd00] ss:$28 sps:$4 sm:$0xff]  }
 0x33d   :  { %6659 = vmatprep.subr.bf16.mxu1 %v7323_v22  ;;  %v7385_v22 = vld [vmem:[%s9954_s5 + $0x7f0] ss:$28 sps:$4 sm:$0xff]  }
 0x33f   :  { %5549 = vmatpush1.bf16.msra.mxu0 %v7320_v23  ;;  %v7389_v23 = vld [vmem:[%s9954_s5 + $0xb40] ss:$28 sps:$4 sm:$0xff]  }
 0x340   :  { %6660 = vmatpush3.bf16.msra.mxu1 %v7324_v24  ;;  %5550 = vmatprep.subr.bf16.mxu0 %v7327_v15  ;;  %v7392_v24 = vld [vmem:[%s9954_s5 + $0x82c] ss:$28 sps:$4 sm:$0xff]   ;;  %v7393_v15 = vld [vmem:[%s9954_s5 + $0xd38] ss:$28 sps:$4 sm:$0xff]  }
 0x341   :  { %6661 = vmatprep.subr.bf16.mxu1 %v7328_v27  ;;  %v7390_v27 = vld [vmem:[%s9954_s5 + $0x828] ss:$28 sps:$4 sm:$0xff]  }
 0x343   :  { %5551 = vmatpush1.bf16.msra.mxu0 %v7325_v26  ;;  %v7394_v26 = vld [vmem:[%s9954_s5 + $0xb78] ss:$28 sps:$4 sm:$0xff]  }
 0x344   :  { %6662 = vmatpush3.bf16.msra.mxu1 %v7329_v28  ;;  %5552 = vmatprep.subr.bf16.mxu0 %v7332_v30  ;;  %v7397_v28 = vld [vmem:[%s9954_s5 + $0x864] ss:$28 sps:$4 sm:$0xff]   ;;  %v7398_v30 = vld [vmem:[%s9954_s5 + $0xd70] ss:$28 sps:$4 sm:$0xff]  }
 0x345   :  { %6669 = vmatprep.subr.bf16.mxu1 %v7333_v31  ;;  %v7395_v31 = vld [vmem:[%s9954_s5 + $0x860] ss:$28 sps:$4 sm:$0xff]  }
 0x347   :  { %5553 = vmatpush1.bf16.msra.mxu0 %v7330_v33  ;;  %5730 = vmatmul.mubr.bf16.vlgmr.msra.gmra.mrb[24].mxu1 %v8852_v43  ;;  %v7399_v33 = vld [vmem:[%s9954_s5 + $0xbb0] ss:$28 sps:$4 sm:$0xff]  }
 0x348   :  { %6670 = vmatpush3.bf16.msra.mxu1 %v7334_v35  ;;  %5769 = vmatprep.mubr.bf16.mxu1 %v8860_v45  ;;  %v7402_v35 = vld [vmem:[%s9954_s5 + $0x89c] ss:$28 sps:$4 sm:$0xff]  }
 0x349   :  { %5554 = vmatprep.subr.bf16.mxu0 %v7337_v36  ;;  %6671 = vmatprep.subr.bf16.mxu1 %v7338_v37  ;;  %v7403_v36 = vld [vmem:[%s9954_s5 + $0xda8] ss:$28 sps:$4 sm:$0xff]   ;;  %v7400_v37 = vld [vmem:[%s9954_s5 + $0x898] ss:$28 sps:$4 sm:$0xff]  }
 0x34b   :  { %5555 = vmatpush1.bf16.msra.mxu0 %v7335_v38  ;;  %v7404_v38 = vld [vmem:[%s9954_s5 + $0xbe8] ss:$28 sps:$4 sm:$0xff]  }
 0x34c   :  { %6672 = vmatpush3.bf16.msra.mxu1 %v7339_v40  ;;  %5556 = vmatprep.subr.bf16.mxu0 %v7342_v42  ;;  %v7407_v40 = vld [vmem:[%s9954_s5 + $0x8d4] ss:$28 sps:$4 sm:$0xff]   ;;  %v7408_v42 = vld [vmem:[%s9954_s5 + $0xde0] ss:$28 sps:$4 sm:$0xff]  }
 0x34d   :  { %6673 = vmatprep.subr.bf16.mxu1 %v7343_v44  ;;  %v7405_v44 = vld [vmem:[%s9954_s5 + $0x8d0] ss:$28 sps:$4 sm:$0xff]  }
 0x34f   :  { %5557 = vmatpush1.bf16.msra.mxu0 %v7340_v21  ;;  %v7409_v21 = vld [vmem:[%s9954_s5 + $0xc20] ss:$28 sps:$4 sm:$0xff]  }
 0x350   :  { %6674 = vmatpush3.bf16.msra.mxu1 %v7344_v20  ;;  %5558 = vmatprep.subr.bf16.mxu0 %v7347_v46  ;;  %v7412_v20 = vld [vmem:[%s9954_s5 + $0x90c] ss:$28 sps:$4 sm:$0xff]  }
 0x351   :  { %6675 = vmatprep.subr.bf16.mxu1 %v7348_v47  ;;  %v7410_v46 = vld [vmem:[%s9954_s5 + $0x908] ss:$28 sps:$4 sm:$0xff]  }
 0x352   :  { %v7415_v47 = vld [vmem:[%s9954_s5 + $0x944] ss:$28 sps:$4 sm:$0xff]  }
 0x353   :  { %5559 = vmatpush1.bf16.msra.mxu0 %v7345_v48  ;;  %v7413_v48 = vld [vmem:[%s9954_s5 + $0x940] ss:$28 sps:$4 sm:$0xff]  }
 0x354   :  { %6676 = vmatpush3.bf16.msra.mxu1 %v7349_v51  ;;  %5560 = vmatprep.subr.bf16.mxu0 %v7352_v49  ;;  %v7418_v51 = vld [vmem:[%s9954_s5 + $0x97c] ss:$28 sps:$4 sm:$0xff]  }
 0x355   :  { %6677 = vmatprep.subr.bf16.mxu1 %v7353_v50  ;;  %v7416_v49 = vld [vmem:[%s9954_s5 + $0x978] ss:$28 sps:$4 sm:$0xff]  }
 0x356   :  { %v7421_v50 = vld [vmem:[%s9954_s5 + $0x9b4] ss:$28 sps:$4 sm:$0xff]  }
 0x357   :  { %5561 = vmatpush1.bf16.msra.mxu0 %v7350_v55  ;;  %v7419_v55 = vld [vmem:[%s9954_s5 + $0x9b0] ss:$28 sps:$4 sm:$0xff]  }
 0x358   :  { %6678 = vmatpush3.bf16.msra.mxu1 %v7354_v58  ;;  %5562 = vmatprep.subr.bf16.mxu0 %v7357_v25  ;;  %v7424_v58 = vld [vmem:[%s9954_s5 + $0x9ec] ss:$28 sps:$4 sm:$0xff]  }
 0x359   :  { %6679 = vmatprep.subr.bf16.mxu1 %v7358_v59  ;;  %v7422_v25 = vld [vmem:[%s9954_s5 + $0x9e8] ss:$28 sps:$4 sm:$0xff]  }
 0x35a   :  { %v7427_v59 = vld [vmem:[%s9954_s5 + $0xa24] ss:$28 sps:$4 sm:$0xff]  }
 0x35b   :  { %5563 = vmatpush1.bf16.msra.mxu0 %v7355_v60  ;;  %v7425_v60 = vld [vmem:[%s9954_s5 + $0xa20] ss:$28 sps:$4 sm:$0xff]  }
 0x35c   :  { %6680 = vmatpush3.bf16.msra.mxu1 %v7359_v61  ;;  %5564 = vmatprep.subr.bf16.mxu0 %v7362_v62  ;;  %v7430_v61 = vld [vmem:[%s9954_s5 + $0xa5c] ss:$28 sps:$4 sm:$0xff]  }
 0x35d   :  { %6681 = vmatprep.subr.bf16.mxu1 %v7363_v63  ;;  %v7428_v62 = vld [vmem:[%s9954_s5 + $0xa58] ss:$28 sps:$4 sm:$0xff]  }
 0x35e   :  { %v7433_v63 = vld [vmem:[%s9954_s5 + $0xa94] ss:$28 sps:$4 sm:$0xff]  }
 0x35f   :  { %5565 = vmatpush1.bf16.msra.mxu0 %v7360_v2  ;;  %v7431_v2 = vld [vmem:[%s9954_s5 + $0xa90] ss:$28 sps:$4 sm:$0xff]  }
 0x360   :  { %6682 = vmatpush3.bf16.msra.mxu1 %v7364_v3  ;;  %5575 = vmatprep.subr.bf16.mxu0 %v7367_v29  ;;  %v7436_v3 = vld [vmem:[%s9954_s5 + $0xacc] ss:$28 sps:$4 sm:$0xff]  }
 0x361   :  { %6683 = vmatprep.subr.bf16.mxu1 %v7368_v4  ;;  %v7434_v29 = vld [vmem:[%s9954_s5 + $0xac8] ss:$28 sps:$4 sm:$0xff]  }
 0x362   :  { %5567 = vmatmul.mubr.bf16.vlgmr.msra.gmra.mrb[16].mxu0 %v8852_v43  ;;  %v7378_v43 = vld [vmem:[%s9954_s5 + $0xc90] ss:$28 sps:$4 sm:$0xff]   ;;  %v7439_v4 = vld [vmem:[%s9954_s5 + $0xb04] ss:$28 sps:$4 sm:$0xff]  }
 0x363   :  { %5576 = vmatpush1.bf16.msra.mxu0 %v7365_v41  ;;  %5607 = vmatprep.mubr.bf16.mxu0 %v8860_v45  ;;  %v7375_v45 = vld [vmem:[%s9954_s5 + $0x780] ss:$28 sps:$4 sm:$0xff]  }
 0x364   :  { %6684 = vmatpush3.bf16.msra.mxu1 %v7369_v5  ;;  %5577 = vmatprep.subr.bf16.mxu0 %v7372_v6  ;;  %v7437_v41 = vld [vmem:[%s9954_s5 + $0xb00] ss:$28 sps:$4 sm:$0xff]   ;;  %v7445_v5 = vld [vmem:[%s9954_s5 + $0xb74] ss:$28 sps:$4 sm:$0xff]  }
 0x365   :  { %6691 = vmatprep.subr.bf16.mxu1 %v7373_v7  ;;  %v7443_v6 = vld [vmem:[%s9954_s5 + $0xb70] ss:$28 sps:$4 sm:$0xff]   ;;  %v9843_v7 = vld [vmem:[%s9956_s6] sm:$0xff] }
 0x367   :  { %5578 = vmatpush1.bf16.msra.mxu0 %v7370_v19  ;;  %5770 = vmatmul.mubr.bf16.vlgmr.msra.gmra.mrb[28].mxu1 %v9059_v0  ;;  %v7448_v19 = vld [vmem:[%s9954_s5 + $0xbac] ss:$28 sps:$4 sm:$0xff]  }
 0x368   :  { %6692 = vmatpush3.bf16.msra.mxu1 %v7374_v8  ;;  %5809 = vmatprep.mubr.bf16.mxu1 %v9259_v32  ;;  %v2829_v8 = vrot.slane %v9843_v7, %v7878_v53  ;;  %v7449_v53 = vld [vmem:[%s9954_s5 + $0xbe0] ss:$28 sps:$4 sm:$0xff]  }
 0x369   :  { %5579 = vmatprep.subr.bf16.mxu0 %v7377_v9  ;;  %6693 = vmatprep.subr.bf16.mxu1 %v7378_v43  ;;  %v7446_v9 = vld [vmem:[%s9954_s5 + $0xba8] ss:$28 sps:$4 sm:$0xff]   ;;  %v2833_v43 = vrot.slane %v9843_v7, %v7887_v56  ;;  %v7454_v56 = vld [vmem:[%s9954_s5 + $0xc1c] ss:$28 sps:$4 sm:$0xff]  }
 0x36b   :  { %5580 = vmatpush1.bf16.msra.mxu0 %v7375_v45  ;;  %v7451_v45 = vld [vmem:[%s9954_s5 + $0xbe4] ss:$28 sps:$4 sm:$0xff]  }
 0x36c   :  { %6694 = vmatpush3.bf16.msra.mxu1 %v7379_v10  ;;  %5581 = vmatprep.subr.bf16.mxu0 %v7382_v11 }
 0x36d   :  { %6695 = vmatprep.subr.bf16.mxu1 %v7383_v12 }
 0x36f   :  { %5582 = vmatpush1.bf16.msra.mxu0 %v7380_v14 }
 0x370   :  { %6696 = vmatpush3.bf16.msra.mxu1 %v7384_v16  ;;  %5583 = vmatprep.subr.bf16.mxu0 %v7387_v17 }
 0x371   :  { %6697 = vmatprep.subr.bf16.mxu1 %v7388_v18 }
 0x373   :  { %5584 = vmatpush1.bf16.msra.mxu0 %v7385_v22 }
 0x374   :  { %6698 = vmatpush3.bf16.msra.mxu1 %v7389_v23  ;;  %5585 = vmatprep.subr.bf16.mxu0 %v7392_v24  ;;  %v7452_v23 = vld [vmem:[%s9954_s5 + $0xc18] ss:$28 sps:$4 sm:$0xff]  }
 0x375   :  { %6699 = vmatprep.subr.bf16.mxu1 %v7393_v15  ;;  %v7457_v24 = vld [vmem:[%s9954_s5 + $0xc54] ss:$28 sps:$4 sm:$0xff]  }
 0x376   :  { %v7455_v15 = vld [vmem:[%s9954_s5 + $0xc50] ss:$28 sps:$4 sm:$0xff]  }
 0x377   :  { %5586 = vmatpush1.bf16.msra.mxu0 %v7390_v27  ;;  %v7460_v27 = vld [vmem:[%s9954_s5 + $0xc8c] ss:$28 sps:$4 sm:$0xff]  }
 0x378   :  { %6700 = vmatpush3.bf16.msra.mxu1 %v7394_v26  ;;  %5587 = vmatprep.subr.bf16.mxu0 %v7397_v28  ;;  %v7458_v26 = vld [vmem:[%s9954_s5 + $0xc88] ss:$28 sps:$4 sm:$0xff]  }
 0x379   :  { %6701 = vmatprep.subr.bf16.mxu1 %v7398_v30  ;;  %v7463_v30 = vld [vmem:[%s9954_s5 + $0xcc4] ss:$28 sps:$4 sm:$0xff]  }
 0x37b   :  { %5588 = vmatpush1.bf16.msra.mxu0 %v7395_v31 }
 0x37c   :  { %6702 = vmatpush3.bf16.msra.mxu1 %v7399_v33  ;;  %5589 = vmatprep.subr.bf16.mxu0 %v7402_v35 }
 0x37d   :  { %6703 = vmatprep.subr.bf16.mxu1 %v7403_v36  ;;  %v7461_v36 = vld [vmem:[%s9954_s5 + $0xcc0] ss:$28 sps:$4 sm:$0xff]  }
 0x37f   :  { %5590 = vmatpush1.bf16.msra.mxu0 %v7400_v37  ;;  %v7466_v37 = vld [vmem:[%s9954_s5 + $0xcfc] ss:$28 sps:$4 sm:$0xff]  }
 0x380   :  { %6704 = vmatpush3.bf16.msra.mxu1 %v7404_v38  ;;  %5591 = vmatprep.subr.bf16.mxu0 %v7407_v40  ;;  %v7464_v38 = vld [vmem:[%s9954_s5 + $0xcf8] ss:$28 sps:$4 sm:$0xff]  }
 0x381   :  { %6705 = vmatprep.subr.bf16.mxu1 %v7408_v42  ;;  %v7469_v40 = vld [vmem:[%s9954_s5 + $0xd34] ss:$28 sps:$4 sm:$0xff]  }
 0x382   :  { %v7467_v42 = vld [vmem:[%s9954_s5 + $0xd30] ss:$28 sps:$4 sm:$0xff]  }
 0x383   :  { %5592 = vmatpush1.bf16.msra.mxu0 %v7405_v44  ;;  %v7472_v44 = vld [vmem:[%s9954_s5 + $0xd6c] ss:$28 sps:$4 sm:$0xff]  }
 0x384   :  { %6706 = vmatpush3.bf16.msra.mxu1 %v7409_v21  ;;  %5593 = vmatprep.subr.bf16.mxu0 %v7412_v20 }
 0x387   :  { %5594 = vmatpush1.bf16.msra.mxu0 %v7410_v46  ;;  %5810 = vmatmul.mubr.bf16.vlgmr.msra.gmra.mrb[32].mxu1 %v9264_v34  ;;  %v7470_v46 = vld [vmem:[%s9954_s5 + $0xd68] ss:$28 sps:$4 sm:$0xff]  }
 0x388   :  { %5595 = vmatprep.subr.bf16.mxu0 %v7415_v47  ;;  %v7475_v47 = vld [vmem:[%s9954_s5 + $0xda4] ss:$28 sps:$4 sm:$0xff]  }
 0x38b   :  { %5596 = vmatpush1.bf16.msra.mxu0 %v7413_v48  ;;  %v2837_v48 = vrot.slane %v9843_v7, %v7881_v54  ;;  %v7476_v54 = vld [vmem:[%s9954_s5 + $0xdd8] ss:$28 sps:$4 sm:$0xff]  }
 0x38c   :  { %5597 = vmatprep.subr.bf16.mxu0 %v7418_v51  ;;  %v7473_v51 = vld [vmem:[%s9954_s5 + $0xda0] ss:$28 sps:$4 sm:$0xff]  }
 0x38f   :  { %5598 = vmatpush1.bf16.msra.mxu0 %v7416_v49  ;;  %v2841_v49 = vrot.slane %v9843_v7, %v7890_v57 }
 0x390   :  { %5599 = vmatprep.subr.bf16.mxu0 %v7421_v50  ;;  %v7478_v50 = vld [vmem:[%s9954_s5 + $0xddc] ss:$28 sps:$4 sm:$0xff]  }
 0x393   :  { %5600 = vmatpush1.bf16.msra.mxu0 %v7419_v55 }
 0x394   :  { %5601 = vmatprep.subr.bf16.mxu0 %v7424_v58 }
 0x397   :  { %5602 = vmatpush1.bf16.msra.mxu0 %v7422_v25 }
 0x398   :  { %5603 = vmatprep.subr.bf16.mxu0 %v7427_v59 }
 0x39b   :  { %5604 = vmatpush1.bf16.msra.mxu0 %v7425_v60 }
 0x39c   :  { %5605 = vmatprep.subr.bf16.mxu0 %v7430_v61 }
 0x39f   :  { %5606 = vmatpush1.bf16.msra.mxu0 %v7428_v62 }
 0x3a0   :  { %5616 = vmatprep.subr.bf16.mxu0 %v7433_v63 }
 0x3a2   :  { %5608 = vmatmul.mubr.bf16.vlgmr.msra.gmra.mrb[16].mxu0 %v9059_v0  ;;  %v7442_v0 = vld [vmem:[%s9954_s5 + $0xb3c] ss:$28 sps:$4 sm:$0xff]  }
 0x3a3   :  { %5617 = vmatpush1.bf16.msra.mxu0 %v7431_v2  ;;  %5648 = vmatprep.mubr.bf16.mxu0 %v9259_v32  ;;  %v7440_v32 = vld [vmem:[%s9954_s5 + $0xb38] ss:$28 sps:$4 sm:$0xff]  }
 0x3a4   :  { %5618 = vmatprep.subr.bf16.mxu0 %v7436_v3 }
 0x3a7   :  { %5619 = vmatpush1.bf16.msra.mxu0 %v7434_v29 }
 0x3a8   :  { %5620 = vmatprep.subr.bf16.mxu0 %v7439_v4 }
 0x3ab   :  { %5621 = vmatpush1.bf16.msra.mxu0 %v7437_v41 }
 0x3ac   :  { %5622 = vmatprep.subr.bf16.mxu0 %v7442_v0 }
 0x3af   :  { %5623 = vmatpush1.bf16.msra.mxu0 %v7440_v32 }
 0x3b0   :  { %5624 = vmatprep.subr.bf16.mxu0 %v7445_v5 }
 0x3b3   :  { %5625 = vmatpush1.bf16.msra.mxu0 %v7443_v6 }
 0x3b4   :  { %5626 = vmatprep.subr.bf16.mxu0 %v7448_v19  ;;  %v2853_v19 = vrot.slane %v9843_v7, %v674_v1 }
 0x3b5   :  { %v5322_v10 = vpop.f32.mrb[12].mxu0 }
 0x3b6   :  { %v6723_v11 = vadd.f32 %v5322_v10, %v2829_v8  ;;  %v5324_v12 = vpop.f32.mrb[13].mxu0 }
 0x3b7   :  { %v6724_v14 = vadd.f32 %v5324_v12, %v2833_v43  ;;  %5627 = vmatpush1.bf16.msra.mxu0 %v7446_v9  ;;  %v5326_v16 = vpop.f32.mrb[14].mxu0 }
 0x3b8   :  { %v6618_v17 = vmul.f32 -1.442695, %v6723_v11  ;;  %v5327_v18 = vpop.f32.mrb[15].mxu0  ;;  %5628 = vmatprep.subr.bf16.mxu0 %v7451_v45 }
 0x3b9   :  { %v6619_v22 = vmul.f32 -1.442695, %v6724_v14 }
 0x3ba   :  { %7479 = vpow2.f32 %v6618_v17 }
 0x3bb   :  { %7481 = vpow2.f32 %v6619_v22  ;;  %5629 = vmatpush1.bf16.msra.mxu0 %v7449_v53 }
 0x3bc   :  { %5630 = vmatprep.subr.bf16.mxu0 %v7454_v56 }
 0x3bf   :  { %5631 = vmatpush1.bf16.msra.mxu0 %v7452_v23 }
 0x3c0   :  { %5632 = vmatprep.subr.bf16.mxu0 %v7457_v24 }
 0x3c3   :  { %5633 = vmatpush1.bf16.msra.mxu0 %v7455_v15 }
 0x3c4   :  { %v7480_v28 = vpop.eup %7479  ;;  %5634 = vmatprep.subr.bf16.mxu0 %v7460_v27 }
 0x3c5   :  { %v7482_v31 = vpop.eup %7481  ;;  %v5838_v33 = vadd.f32 1.0, %v7480_v28 }
 0x3c6   :  { %v5839_v35 = vadd.f32 1.0, %v7482_v31 }
 0x3c7   :  { %7483 = vrcp.f32 %v5838_v33  ;;  %5635 = vmatpush1.bf16.msra.mxu0 %v7458_v26  ;;  %v2845_v33 = vrot.slane %v9843_v7, %v666_v39 }
 0x3c8   :  { %7485 = vrcp.f32 %v5839_v35  ;;  %5636 = vmatprep.subr.bf16.mxu0 %v7463_v30  ;;  %v2849_v35 = vrot.slane %v9843_v7, %v670_v13 }
 0x3cb   :  { %5637 = vmatpush1.bf16.msra.mxu0 %v7461_v36 }
 0x3cc   :  { %5638 = vmatprep.subr.bf16.mxu0 %v7466_v37 }
 0x3cf   :  { %5639 = vmatpush1.bf16.msra.mxu0 %v7464_v38 }
 0x3d0   :  { %5640 = vmatprep.subr.bf16.mxu0 %v7469_v40 }
 0x3d1   :  { %v7484_v21 = vpop.eup %7483 }
 0x3d2   :  { %v7486_v20 = vpop.eup %7485  ;;  %5859 = vst [vmem:[%s9957_s7] sm:$0xff] %v7484_v21 }
 0x3d3   :  { %5860 = vst [vmem:[%s9957_s7 + $0x8] sm:$0xff] %v7486_v20  ;;  %5641 = vmatpush1.bf16.msra.mxu0 %v7467_v42 }
 0x3d4   :  { %5642 = vmatprep.subr.bf16.mxu0 %v7472_v44 }
 0x3d7   :  { %5643 = vmatpush1.bf16.msra.mxu0 %v7470_v46 }
 0x3d8   :  { %5644 = vmatprep.subr.bf16.mxu0 %v7475_v47 }
 0x3da   :  { %v5486_v55 = vpop.f32.mrb[16].mxu1 }
 0x3db   :  { %v6725_v58 = vadd.f32 %v5486_v55, %v2837_v48  ;;  %v5488_v25 = vpop.f32.mrb[17].mxu1  ;;  %5645 = vmatpush1.bf16.msra.mxu0 %v7473_v51 }
 0x3dc   :  { %v6726_v59 = vadd.f32 %v5488_v25, %v2841_v49  ;;  %v5490_v60 = vpop.f32.mrb[18].mxu1  ;;  %5646 = vmatprep.subr.bf16.mxu0 %v7478_v50 }
 0x3dd   :  { %v6620_v61 = vmul.f32 -1.442695, %v6725_v58  ;;  %v5491_v62 = vpop.f32.mrb[19].mxu1 }
 0x3de   :  { %v6621_v63 = vmul.f32 -1.442695, %v6726_v59 }
 0x3df   :  { %7487 = vpow2.f32 %v6620_v61  ;;  %5647 = vmatpush1.bf16.msra.mxu0 %v7476_v54 }
 0x3e0   :  { %7489 = vpow2.f32 %v6621_v63 }
 0x3e2   :  { %5649 = vmatmul.mubr.bf16.vlgmr.msra.gmra.mrb[16].mxu0 %v9264_v34 }
 0x3e9   :  { %v7488_v57 = vpop.eup %7487 }
 0x3ea   :  { %v7490_v2 = vpop.eup %7489  ;;  %v5840_v3 = vadd.f32 1.0, %v7488_v57 }
 0x3eb   :  { %v5841_v29 = vadd.f32 1.0, %v7490_v2 }
 0x3ec   :  { %7491 = vrcp.f32 %v5840_v3 }
 0x3ed   :  { %7493 = vrcp.f32 %v5841_v29 }
 0x3f6   :  { %v7492_v4 = vpop.eup %7491 }
 0x3f7   :  { %v7494_v41 = vpop.eup %7493  ;;  %5861 = vst [vmem:[%s9957_s7 + $0x10] sm:$0xff] %v7492_v4 }
 0x3f8   :  { %5862 = vst [vmem:[%s9957_s7 + $0x18] sm:$0xff] %v7494_v41 }
 0x3fa   :  { %v6641_v0 = vpop.f32.mrb[20].mxu1 }
 0x3fb   :  { %v6642_v32 = vpop.f32.mrb[21].mxu1 }
 0x3fc   :  { %v6643_v5 = vadd.f32 %v6642_v32, %v6641_v0  ;;  %v6644_v34 = vpop.f32.mrb[22].mxu1 }
 0x3fd   :  { %v6645_v6 = vpop.f32.mrb[23].mxu1 }
 0x3fe   :  { %v5692_v43 = vadd.f32 %v6643_v5, %v2853_v19 }
 0x41a   :  { %v6663_v8 = vpop.f32.mrb[24].mxu1 }
 0x41b   :  { %v6664_v9 = vpop.f32.mrb[25].mxu1 }
 0x41c   :  { %v6665_v45 = vadd.f32 %v6664_v9, %v6663_v8  ;;  %v6666_v10 = vpop.f32.mrb[26].mxu1 }
 0x41d   :  { %v6667_v11 = vpop.f32.mrb[27].mxu1 }
 0x41e   :  { %v5732_v12 = vadd.f32 %v6665_v45, %v5692_v43 }
 0x43a   :  { %v6685_v14 = vpop.f32.mrb[28].mxu1 }
 0x43b   :  { %v6686_v16 = vpop.f32.mrb[29].mxu1 }
 0x43c   :  { %v6687_v53 = vadd.f32 %v6686_v16, %v6685_v14  ;;  %v6688_v17 = vpop.f32.mrb[30].mxu1 }
 0x43d   :  { %v6689_v18 = vpop.f32.mrb[31].mxu1 }
 0x43e   :  { %v5772_v56 = vadd.f32 %v6687_v53, %v5732_v12 }
 0x45a   :  { %v6707_v22 = vpop.f32.mrb[32].mxu1 }
 0x45b   :  { %v6708_v23 = vpop.f32.mrb[33].mxu1 }
 0x45c   :  { %v6709_v24 = vadd.f32 %v6708_v23, %v6707_v22  ;;  %v6710_v15 = vpop.f32.mrb[34].mxu1 }
 0x45d   :  { %v6711_v27 = vpop.f32.mrb[35].mxu1 }
 0x45e   :  { %v5812_v26 = vadd.f32 %v6709_v24, %v5772_v56 }
 0x460   :  { %v6624_v1 = vmul.f32 -1.442695, %v5812_v26 }
 0x462   :  { %7495 = vpow2.f32 %v6624_v1 }
 0x46c   :  { %v7496_v28 = vpop.eup %7495 }
 0x46d   :  { %v5844_v30 = vadd.f32 1.0, %v7496_v28 }
 0x46f   :  { %7497 = vrcp.f32 %v5844_v30 }
 0x479   :  { %v7498_v31 = vpop.eup %7497 }
 0x47a   :  { %5865 = vst [vmem:[%s9957_s7 + $0x30] sm:$0xff] %v7498_v31 }
 0x4b5   :  { %v5650_v36 = vpop.f32.mrb[16].mxu0 }
 0x4b6   :  { %v6727_v37 = vadd.f32 %v5650_v36, %v2845_v33  ;;  %v5652_v38 = vpop.f32.mrb[17].mxu0 }
 0x4b7   :  { %v6728_v40 = vadd.f32 %v5652_v38, %v2849_v35  ;;  %v5654_v42 = vpop.f32.mrb[18].mxu0 }
 0x4b8   :  { %v6622_v44 = vmul.f32 -1.442695, %v6727_v37  ;;  %v5655_v21 = vpop.f32.mrb[19].mxu0 }
 0x4b9   :  { %v6623_v20 = vmul.f32 -1.442695, %v6728_v40 }
 0x4ba   :  { %7499 = vpow2.f32 %v6622_v44 }
 0x4bb   :  { %7501 = vpow2.f32 %v6623_v20 }
 0x4c4   :  { %v7500_v46 = vpop.eup %7499 }
 0x4c5   :  { %v7502_v47 = vpop.eup %7501  ;;  %v5842_v48 = vadd.f32 1.0, %v7500_v46 }
 0x4c6   :  { %v5843_v51 = vadd.f32 1.0, %v7502_v47 }
 0x4c7   :  { %7503 = vrcp.f32 %v5842_v48 }
 0x4c8   :  { %7505 = vrcp.f32 %v5843_v51 }
 0x4d1   :  { %v7504_v39 = vpop.eup %7503 }
 0x4d2   :  { %v7506_v52 = vpop.eup %7505  ;;  %5863 = vst [vmem:[%s9957_s7 + $0x20] sm:$0xff] %v7504_v39 }
 0x4d3   :  { %5864 = vst [vmem:[%s9957_s7 + $0x28] sm:$0xff] %v7506_v52 }

</bundles_post_ra>
